<compile_context>
chip_gen: v5e
topology: v5e:2x2
jax: 0.10.0
libtpu: 0.0.40
codegen_flags: <defaults>
</compile_context>

<pallas_src>
import jax
import jax.numpy as jnp
from jax.experimental import pallas as pl
from jax.experimental.pallas import tpu as pltpu

LANE = 128            # TPU lane width (last-dim tiling unit)
DEFAULT_TILE_B = 512  # batch tile: amortizes the ~0.35 us per-grid-step cost


def _linear_relu_f32(h_bf16, w_ref, b_ref):
    """bf16 x bf16 -> f32 accumulate on the MXU, add f32 bias, ReLU (f32 out)."""
    y = jnp.dot(h_bf16, w_ref[...], preferred_element_type=jnp.float32)
    y = y + b_ref[...]                      # f32 (1, out) broadcasts over batch
    return jnp.maximum(y, 0.0)


def _mlp_kernel(x_ref,
                w1_ref, b1_ref,
                w2_ref, b2_ref,
                w3_ref, b3_ref,
                w4_ref, b4_ref,
                w5_ref, b5_ref,
                o_ref):
    """Fused 5x (Linear + ReLU) on one batch tile. Weights are VMEM-resident."""
    h = x_ref[...].astype(jnp.bfloat16)     # f32 tile -> bf16 (VPU cast, hidden under MXU)
    h = _linear_relu_f32(h, w1_ref, b1_ref).astype(jnp.bfloat16)
    h = _linear_relu_f32(h, w2_ref, b2_ref).astype(jnp.bfloat16)
    h = _linear_relu_f32(h, w3_ref, b3_ref).astype(jnp.bfloat16)
    h = _linear_relu_f32(h, w4_ref, b4_ref).astype(jnp.bfloat16)
    h = _linear_relu_f32(h, w5_ref, b5_ref)                 # f32, ReLU'd logits
    o_ref[...] = h.astype(o_ref.dtype)                      # bf16 lane-dense store


def _pick_tile_b(B, desired=DEFAULT_TILE_B):
    """Batch tile: big for amortization, but keep >=2 grid steps (v7x has 2 TCs)."""
    if B <= LANE:
        return B                                    # single full-extent block
    tb = max(LANE, (min(desired, B) // LANE) * LANE)
    if B >= 2 * LANE:
        half = max(LANE, ((B // 2) // LANE) * LANE)  # cap so grid >= 2 steps
        tb = min(tb, half)
    return tb


def simple_neural_network_forward(x_nchw, params, *, tile_b=None):
    """x_nchw: (B, 3, 32, 32). params: list of (W[in,out], b[out]) f32 arrays."""
    B = x_nchw.shape[0]
    num_classes = params[-1][0].shape[1]

    # nn.Flatten on contiguous NCHW == row-major reshape (free bitcast).
    x = x_nchw.reshape(B, -1)                       # keep f32; cast in-kernel
    in_dim = x.shape[1]

    if tile_b is None:
        tile_b = _pick_tile_b(B)
    grid = (pl.cdiv(B, tile_b),)                    # partial last block is masked

    # bf16 weights (halves weight HBM bytes); f32 biases; pad the final layer
    # to a lane-dense (.., 128) output slab so stores are unmasked full-lane.
    nc_pad = max(LANE, pl.cdiv(num_classes, LANE) * LANE)
    n_layers = len(params)
    kparams = []
    for li, (w, b) in enumerate(params):
        w = w.astype(jnp.bfloat16)
        b = b.astype(jnp.float32)
        if li == n_layers - 1 and w.shape[1] != nc_pad:
            w = jnp.pad(w, ((0, 0), (0, nc_pad - w.shape[1])))
            b = jnp.pad(b, ((0, nc_pad - b.shape[0]),))
        kparams.append((w, b.reshape(1, -1)))

    flat_args = [x]
    in_specs = [pl.BlockSpec((tile_b, in_dim), lambda i: (i, 0))]
    for w, b2d in kparams:
        flat_args += [w, b2d]
        # Constant block index -> weights/biases stay resident in VMEM.
        in_specs += [pl.BlockSpec(w.shape, lambda i: (0, 0)),
                     pl.BlockSpec(b2d.shape, lambda i: (0, 0))]

    out_shape = jax.ShapeDtypeStruct((B, nc_pad), jnp.bfloat16)
    out_spec = pl.BlockSpec((tile_b, nc_pad), lambda i: (i, 0))

    # Advisory cost so XLA can schedule/overlap this call with surrounding ops.
    flops = 2 * B * sum(w.shape[0] * w.shape[1] for w, _ in kparams)
    bytes_accessed = (x.size * 4                                   # f32 input
                      + sum(w.size * 2 + b.size * 4 for w, b in kparams)
                      + B * nc_pad * 2)                            # bf16 output
    cost = pl.CostEstimate(flops=int(flops), transcendentals=0,
                           bytes_accessed=int(bytes_accessed))

    fn = pl.pallas_call(
        _mlp_kernel,
        out_shape=out_shape,
        grid=grid,
        in_specs=in_specs,
        out_specs=out_spec,
        compiler_params=pltpu.CompilerParams(
            dimension_semantics=("parallel",),
            vmem_limit_bytes=48 << 20),
        cost_estimate=cost,
    )
    out = fn(*flat_args)
    # Tiny (B, num_classes) slice + upcast; fused by XLA into the consumer.
    return out[:B, :num_classes].astype(jnp.float32)


def init_params(key, num_classes):
    """Deterministic init matching the module's layer shapes (PyTorch-style U)."""
    sizes = [3 * 32 * 32, 256, 512, 1024, 512, num_classes]
    params = []
    for i in range(len(sizes) - 1):
        fan_in, fan_out = sizes[i], sizes[i + 1]
        key, kw, kb = jax.random.split(key, 3)
        bound = 1.0 / (fan_in ** 0.5)
        w = jax.random.uniform(kw, (fan_in, fan_out), jnp.float32, -bound, bound)
        b = jax.random.uniform(kb, (fan_out,), jnp.float32, -bound, bound)
        params.append((w, b))
    return params


def _reference_forward(x_nchw, params):
    """Pure-JAX reference with the same bf16 weights/activations, f32 biases."""
    h = x_nchw.reshape(x_nchw.shape[0], -1).astype(jnp.bfloat16)
    n = len(params)
    for li, (w, b) in enumerate(params):
        y = jnp.dot(h, w.astype(jnp.bfloat16), preferred_element_type=jnp.float32)
        y = y + b.astype(jnp.float32)
        y = jnp.maximum(y, 0.0)
        h = y.astype(jnp.bfloat16) if li < n - 1 else y
    return h


if __name__ == "__main__":
    num_classes = 10
    key = jax.random.PRNGKey(0)
    key, kx = jax.random.split(key)

    # Input implied by in_features = 3*32*32: NCHW (B, 3, 32, 32)
    x = jax.random.normal(kx, (2, 3, 32, 32), jnp.float32)
    params = init_params(key, num_classes)

    out = simple_neural_network_forward(x, params)
    out = jax.block_until_ready(out)

    ref = _reference_forward(x, params)
    assert out.shape == (2, num_classes)
    assert jnp.allclose(out, ref, atol=2e-2, rtol=2e-2), (
        "max abs err = %f" % float(jnp.max(jnp.abs(out - ref))))
    print("KERNEL_OK")
</pallas_src>

<mosaic_0001>
module attributes {stable_mosaic.version = 11 : i64} {
  func.func @_mlp_kernel(%arg0: i32, %arg1: memref<2x3072xf32, #tpu.memory_space<vmem>>, %arg2: memref<3072x256xbf16, #tpu.memory_space<vmem>>, %arg3: memref<1x256xf32, #tpu.memory_space<vmem>>, %arg4: memref<256x512xbf16, #tpu.memory_space<vmem>>, %arg5: memref<1x512xf32, #tpu.memory_space<vmem>>, %arg6: memref<512x1024xbf16, #tpu.memory_space<vmem>>, %arg7: memref<1x1024xf32, #tpu.memory_space<vmem>>, %arg8: memref<1024x512xbf16, #tpu.memory_space<vmem>>, %arg9: memref<1x512xf32, #tpu.memory_space<vmem>>, %arg10: memref<512x128xbf16, #tpu.memory_space<vmem>>, %arg11: memref<1x128xf32, #tpu.memory_space<vmem>>, %arg12: memref<2x128xbf16, #tpu.memory_space<vmem>>) attributes {dimension_semantics = [#tpu.dimension_semantics<parallel>], iteration_bounds = array<i64: 1>, scalar_prefetch = 0 : i64, scratch_operands = 0 : i64, tpu.core_type = #tpu.core_type<tc>, window_params = [{transform_indices = @transform_0, window_bounds = array<i64: 2, 3072>}, {pipeline_mode = #tpu.pipeline_mode<synchronous>, transform_indices = @transform_1, window_bounds = array<i64: 3072, 256>}, {pipeline_mode = #tpu.pipeline_mode<synchronous>, transform_indices = @transform_2, window_bounds = array<i64: 1, 256>}, {pipeline_mode = #tpu.pipeline_mode<synchronous>, transform_indices = @transform_3, window_bounds = array<i64: 256, 512>}, {pipeline_mode = #tpu.pipeline_mode<synchronous>, transform_indices = @transform_4, window_bounds = array<i64: 1, 512>}, {pipeline_mode = #tpu.pipeline_mode<synchronous>, transform_indices = @transform_5, window_bounds = array<i64: 512, 1024>}, {pipeline_mode = #tpu.pipeline_mode<synchronous>, transform_indices = @transform_6, window_bounds = array<i64: 1, 1024>}, {pipeline_mode = #tpu.pipeline_mode<synchronous>, transform_indices = @transform_7, window_bounds = array<i64: 1024, 512>}, {pipeline_mode = #tpu.pipeline_mode<synchronous>, transform_indices = @transform_8, window_bounds = array<i64: 1, 512>}, {pipeline_mode = #tpu.pipeline_mode<synchronous>, transform_indices = @transform_9, window_bounds = array<i64: 512, 128>}, {pipeline_mode = #tpu.pipeline_mode<synchronous>, transform_indices = @transform_10, window_bounds = array<i64: 1, 128>}, {transform_indices = @transform_11, window_bounds = array<i64: 2, 128>}]} {
    %c0 = arith.constant 0 : index
    %c0_0 = arith.constant 0 : index
    %0 = vector.load %arg1[%c0, %c0_0] : memref<2x3072xf32, #tpu.memory_space<vmem>>, vector<2x3072xf32>
    %1 = arith.truncf %0 : vector<2x3072xf32> to vector<2x3072xbf16>
    %c0_1 = arith.constant 0 : index
    %c0_2 = arith.constant 0 : index
    %2 = vector.load %arg2[%c0_1, %c0_2] : memref<3072x256xbf16, #tpu.memory_space<vmem>>, vector<3072x256xbf16>
    %cst = arith.constant dense<0.000000e+00> : vector<2x256xf32>
    %3 = tpu.matmul %1, %2, %cst {dimension_numbers = #tpu.dot_dimension_numbers<[1], [0], [0], [1], [0, 0, 1, 1], [], []>} : vector<2x3072xbf16>, vector<3072x256xbf16>, vector<2x256xf32> -> vector<2x256xf32>
    %c0_3 = arith.constant 0 : index
    %c0_4 = arith.constant 0 : index
    %4 = vector.load %arg3[%c0_3, %c0_4] : memref<1x256xf32, #tpu.memory_space<vmem>>, vector<1x256xf32>
    %5 = vector.broadcast %4 : vector<1x256xf32> to vector<2x256xf32>
    %6 = arith.addf %3, %5 : vector<2x256xf32>
    %cst_5 = arith.constant 0.000000e+00 : f32
    %7 = vector.broadcast %cst_5 : f32 to vector<2x256xf32>
    %8 = arith.maximumf %6, %7 : vector<2x256xf32>
    %9 = arith.truncf %8 : vector<2x256xf32> to vector<2x256xbf16>
    %c0_6 = arith.constant 0 : index
    %c0_7 = arith.constant 0 : index
    %10 = vector.load %arg4[%c0_6, %c0_7] : memref<256x512xbf16, #tpu.memory_space<vmem>>, vector<256x512xbf16>
    %cst_8 = arith.constant dense<0.000000e+00> : vector<2x512xf32>
    %11 = tpu.matmul %9, %10, %cst_8 {dimension_numbers = #tpu.dot_dimension_numbers<[1], [0], [0], [1], [0, 0, 1, 1], [], []>} : vector<2x256xbf16>, vector<256x512xbf16>, vector<2x512xf32> -> vector<2x512xf32>
    %c0_9 = arith.constant 0 : index
    %c0_10 = arith.constant 0 : index
    %12 = vector.load %arg5[%c0_9, %c0_10] : memref<1x512xf32, #tpu.memory_space<vmem>>, vector<1x512xf32>
    %13 = vector.broadcast %12 : vector<1x512xf32> to vector<2x512xf32>
    %14 = arith.addf %11, %13 : vector<2x512xf32>
    %cst_11 = arith.constant 0.000000e+00 : f32
    %15 = vector.broadcast %cst_11 : f32 to vector<2x512xf32>
    %16 = arith.maximumf %14, %15 : vector<2x512xf32>
    %17 = arith.truncf %16 : vector<2x512xf32> to vector<2x512xbf16>
    %c0_12 = arith.constant 0 : index
    %c0_13 = arith.constant 0 : index
    %18 = vector.load %arg6[%c0_12, %c0_13] : memref<512x1024xbf16, #tpu.memory_space<vmem>>, vector<512x1024xbf16>
    %cst_14 = arith.constant dense<0.000000e+00> : vector<2x1024xf32>
    %19 = tpu.matmul %17, %18, %cst_14 {dimension_numbers = #tpu.dot_dimension_numbers<[1], [0], [0], [1], [0, 0, 1, 1], [], []>} : vector<2x512xbf16>, vector<512x1024xbf16>, vector<2x1024xf32> -> vector<2x1024xf32>
    %c0_15 = arith.constant 0 : index
    %c0_16 = arith.constant 0 : index
    %20 = vector.load %arg7[%c0_15, %c0_16] : memref<1x1024xf32, #tpu.memory_space<vmem>>, vector<1x1024xf32>
    %21 = vector.broadcast %20 : vector<1x1024xf32> to vector<2x1024xf32>
    %22 = arith.addf %19, %21 : vector<2x1024xf32>
    %cst_17 = arith.constant 0.000000e+00 : f32
    %23 = vector.broadcast %cst_17 : f32 to vector<2x1024xf32>
    %24 = arith.maximumf %22, %23 : vector<2x1024xf32>
    %25 = arith.truncf %24 : vector<2x1024xf32> to vector<2x1024xbf16>
    %c0_18 = arith.constant 0 : index
    %c0_19 = arith.constant 0 : index
    %26 = vector.load %arg8[%c0_18, %c0_19] : memref<1024x512xbf16, #tpu.memory_space<vmem>>, vector<1024x512xbf16>
    %cst_20 = arith.constant dense<0.000000e+00> : vector<2x512xf32>
    %27 = tpu.matmul %25, %26, %cst_20 {dimension_numbers = #tpu.dot_dimension_numbers<[1], [0], [0], [1], [0, 0, 1, 1], [], []>} : vector<2x1024xbf16>, vector<1024x512xbf16>, vector<2x512xf32> -> vector<2x512xf32>
    %c0_21 = arith.constant 0 : index
    %c0_22 = arith.constant 0 : index
    %28 = vector.load %arg9[%c0_21, %c0_22] : memref<1x512xf32, #tpu.memory_space<vmem>>, vector<1x512xf32>
    %29 = vector.broadcast %28 : vector<1x512xf32> to vector<2x512xf32>
    %30 = arith.addf %27, %29 : vector<2x512xf32>
    %cst_23 = arith.constant 0.000000e+00 : f32
    %31 = vector.broadcast %cst_23 : f32 to vector<2x512xf32>
    %32 = arith.maximumf %30, %31 : vector<2x512xf32>
    %33 = arith.truncf %32 : vector<2x512xf32> to vector<2x512xbf16>
    %c0_24 = arith.constant 0 : index
    %c0_25 = arith.constant 0 : index
    %34 = vector.load %arg10[%c0_24, %c0_25] : memref<512x128xbf16, #tpu.memory_space<vmem>>, vector<512x128xbf16>
    %cst_26 = arith.constant dense<0.000000e+00> : vector<2x128xf32>
    %35 = tpu.matmul %33, %34, %cst_26 {dimension_numbers = #tpu.dot_dimension_numbers<[1], [0], [0], [1], [0, 0, 1, 1], [], []>} : vector<2x512xbf16>, vector<512x128xbf16>, vector<2x128xf32> -> vector<2x128xf32>
    %c0_27 = arith.constant 0 : index
    %c0_28 = arith.constant 0 : index
    %36 = vector.load %arg11[%c0_27, %c0_28] : memref<1x128xf32, #tpu.memory_space<vmem>>, vector<1x128xf32>
    %37 = vector.broadcast %36 : vector<1x128xf32> to vector<2x128xf32>
    %38 = arith.addf %35, %37 : vector<2x128xf32>
    %cst_29 = arith.constant 0.000000e+00 : f32
    %39 = vector.broadcast %cst_29 : f32 to vector<2x128xf32>
    %40 = arith.maximumf %38, %39 : vector<2x128xf32>
    %41 = arith.truncf %40 : vector<2x128xf32> to vector<2x128xbf16>
    %c0_30 = arith.constant 0 : index
    %c0_31 = arith.constant 0 : index
    %42 = vector.load %arg12[%c0_30, %c0_31] : memref<2x128xbf16, #tpu.memory_space<vmem>>, vector<2x128xbf16>
    tpu.vector_store %arg12[%c0_30, %c0_31], %41 {strides = array<i32>} : memref<2x128xbf16, #tpu.memory_space<vmem>>, vector<2x128xbf16>,
    return
  }
  func.func @transform_0(%arg0: i32) -> (i32, i32) {
    %c0_i32 = arith.constant 0 : i32
    %c0_i32_0 = arith.constant 0 : i32
    return %arg0, %c0_i32 : i32, i32
  }
  func.func @transform_1(%arg0: i32) -> (i32, i32) {
    %c0_i32 = arith.constant 0 : i32
    %c0_i32_0 = arith.constant 0 : i32
    %c0_i32_1 = arith.constant 0 : i32
    return %c0_i32, %c0_i32_0 : i32, i32
  }
  func.func @transform_2(%arg0: i32) -> (i32, i32) {
    %c0_i32 = arith.constant 0 : i32
    %c0_i32_0 = arith.constant 0 : i32
    %c0_i32_1 = arith.constant 0 : i32
    return %c0_i32, %c0_i32_0 : i32, i32
  }
  func.func @transform_3(%arg0: i32) -> (i32, i32) {
    %c0_i32 = arith.constant 0 : i32
    %c0_i32_0 = arith.constant 0 : i32
    %c0_i32_1 = arith.constant 0 : i32
    return %c0_i32, %c0_i32_0 : i32, i32
  }
  func.func @transform_4(%arg0: i32) -> (i32, i32) {
    %c0_i32 = arith.constant 0 : i32
    %c0_i32_0 = arith.constant 0 : i32
    %c0_i32_1 = arith.constant 0 : i32
    return %c0_i32, %c0_i32_0 : i32, i32
  }
  func.func @transform_5(%arg0: i32) -> (i32, i32) {
    %c0_i32 = arith.constant 0 : i32
    %c0_i32_0 = arith.constant 0 : i32
    %c0_i32_1 = arith.constant 0 : i32
    return %c0_i32, %c0_i32_0 : i32, i32
  }
  func.func @transform_6(%arg0: i32) -> (i32, i32) {
    %c0_i32 = arith.constant 0 : i32
    %c0_i32_0 = arith.constant 0 : i32
    %c0_i32_1 = arith.constant 0 : i32
    return %c0_i32, %c0_i32_0 : i32, i32
  }
  func.func @transform_7(%arg0: i32) -> (i32, i32) {
    %c0_i32 = arith.constant 0 : i32
    %c0_i32_0 = arith.constant 0 : i32
    %c0_i32_1 = arith.constant 0 : i32
    return %c0_i32, %c0_i32_0 : i32, i32
  }
  func.func @transform_8(%arg0: i32) -> (i32, i32) {
    %c0_i32 = arith.constant 0 : i32
    %c0_i32_0 = arith.constant 0 : i32
    %c0_i32_1 = arith.constant 0 : i32
    return %c0_i32, %c0_i32_0 : i32, i32
  }
  func.func @transform_9(%arg0: i32) -> (i32, i32) {
    %c0_i32 = arith.constant 0 : i32
    %c0_i32_0 = arith.constant 0 : i32
    %c0_i32_1 = arith.constant 0 : i32
    return %c0_i32, %c0_i32_0 : i32, i32
  }
  func.func @transform_10(%arg0: i32) -> (i32, i32) {
    %c0_i32 = arith.constant 0 : i32
    %c0_i32_0 = arith.constant 0 : i32
    %c0_i32_1 = arith.constant 0 : i32
    return %c0_i32, %c0_i32_0 : i32, i32
  }
  func.func @transform_11(%arg0: i32) -> (i32, i32) {
    %c0_i32 = arith.constant 0 : i32
    %c0_i32_0 = arith.constant 0 : i32
    return %arg0, %c0_i32 : i32, i32
  }
}

</mosaic_0001>

<bundles_post_ra>
// kernel: tpu_custom_call.1
= control target key start
LH: loop header
LB: loop body
LE: loop exit
PB: predicated region body
PF: predicated region fallthrough
CT: control target
= control target key end

     0   :  { %16 = vsyncpa [#allocation3], 0  ;;  %s13814_s0 = inlined_call_operand.hbm [shape: f32[2,3072], index: 0, kind: input, shape index: {}]   ;;  %s13815_s1 = inlined_call_operand.hbm [shape: bf16[3072,256], index: 1, kind: input, shape index: {}]   ;;  %s13816_s2 = inlined_call_operand.hbm [shape: f32[1,256], index: 2, kind: input, shape index: {}]   ;;  %s13817_s3 = inlined_call_operand.hbm [shape: bf16[256,512], index: 3, kind: input, shape index: {}]   ;;  %s13818_s4 = inlined_call_operand.hbm [shape: f32[1,512], index: 4, kind: input, shape index: {}]   ;;  %s13819_s5 = inlined_call_operand.hbm [shape: bf16[512,1024], index: 5, kind: input, shape index: {}]   ;;  %s13820_s6 = inlined_call_operand.hbm [shape: f32[1,1024], index: 6, kind: input, shape index: {}]   ;;  %s13821_s7 = inlined_call_operand.hbm [shape: bf16[1024,512], index: 7, kind: input, shape index: {}]   ;;  %s13822_s8 = inlined_call_operand.hbm [shape: f32[1,512], index: 8, kind: input, shape index: {}]   ;;  %s13823_s9 = inlined_call_operand.hbm [shape: bf16[512,128], index: 9, kind: input, shape index: {}]   ;;  %s13824_s10 = inlined_call_operand.hbm [shape: f32[1,128], index: 10, kind: input, shape index: {}]   ;;  %s13825_s11 = inlined_call_operand.hbm [shape: bf16[2,128], index: 11, kind: output, shape index: {}]  }
   0x1   :  { %17 = vsyncpa [#allocation6], 0 }
   0x2   :  { %18 = vsyncpa [#allocation9], 0 }
   0x3   :  { %19 = vsyncpa [#allocation12], 0 }
   0x4   :  { %20 = vsyncpa [#allocation15], 0 }
   0x5   :  { %21 = vsyncpa [#allocation18], 0  ;;  %s38_s19 = sshll.u32 %s13815_s1, 4  ;;  %s39_s19 = int_to_ptr.hbm [resolvable:$true] %s38_s19 }
   0x6   :  { %22 = vsyncpa [#allocation4], 0  ;;  %s13312_s20 = smov [#allocation5]   ;;  %s62_s24 = sshll.u32 %s13817_s3, 4  ;;  %s63_s24 = int_to_ptr.hbm [resolvable:$true] %s62_s24 }
   0x7   :  { %s40_s21 = sshll.u32 %s13312_s20, 4  ;;  %s13313_s25 = smov 128   ;;  %s41_s21 = int_to_ptr.vmem [resolvable:$true] %s40_s21 }
   0x8   :  { %s13314_s26 = smov 8   ;;  %s13315_s27 = smov [#allocation8]  }
   0x9   :  { %46 = dma.hbm_to_vmem [thread:$0]  %s39_s19, 49152, %s41_s21, [#allocation6], %s13313_s25, %s13313_s25, %s13314_s26  }
   0xa   :  { %s64_s28 = sshll.u32 %s13315_s27, 4  ;;  %s13316_s29 = smov 256   ;;  %s65_s28 = int_to_ptr.vmem [resolvable:$true] %s64_s28 }
   0xb   :  { %s13317_s30 = smov 16   ;;  %s86_s13 = sshll.u32 %s13819_s5, 4  ;;  %s87_s13 = int_to_ptr.hbm [resolvable:$true] %s86_s13 }
   0xc   :  { %70 = dma.hbm_to_vmem [thread:$0]  %s63_s24, 8192, %s65_s28, [#allocation9], %s13316_s29, %s13316_s29, %s13317_s30  }
   0xd   :  { %s13318_s14 = smov [#allocation11]   ;;  %s110_s17 = sshll.u32 %s13821_s7, 4  ;;  %s111_s17 = int_to_ptr.hbm [resolvable:$true] %s110_s17 }
   0xe   :  { %s88_s15 = sshll.u32 %s13318_s14, 4  ;;  %s13319_s18 = smov 512   ;;  %s89_s15 = int_to_ptr.vmem [resolvable:$true] %s88_s15 }
   0xf   :  { %s13320_s19 = smov 32   ;;  %s13321_s20 = smov [#allocation14]  }
  0x10   :  { %94 = dma.hbm_to_vmem [thread:$0]  %s87_s13, 32768, %s89_s15, [#allocation12], %s13319_s18, %s13319_s18, %s13320_s19  }
  0x11   :  { %s112_s21 = sshll.u32 %s13321_s20, 4  ;;  %s134_s24 = sshll.u32 %s13823_s9, 4  ;;  %s113_s21 = int_to_ptr.vmem [resolvable:$true] %s112_s21  ;;  %s135_s24 = int_to_ptr.hbm [resolvable:$true] %s134_s24 }
  0x12   :  { %118 = dma.hbm_to_vmem [thread:$0]  %s111_s17, 32768, %s113_s21, [#allocation15], %s13316_s29, %s13316_s29, %s13317_s30  }
  0x13   :  { %s13322_s5 = smov [#allocation17]   ;;  %s28_s7 = sshll.u32 %s13814_s0, 4  ;;  %s29_s7 = int_to_ptr.hbm [resolvable:$true] %s28_s7 }
  0x14   :  { %s136_s25 = sshll.u32 %s13322_s5, 4  ;;  %s13323_s28 = smov 64   ;;  %s137_s25 = int_to_ptr.vmem [resolvable:$true] %s136_s25 }
  0x15   :  { %s13324_s1 = smov 4   ;;  %s13325_s12 = smov [#allocation2]  }
  0x16   :  { %142 = dma.hbm_to_vmem [thread:$0]  %s135_s24, 4096, %s137_s25, [#allocation18], %s13323_s28, %s13323_s28, %s13324_s1  }
  0x17   :  { %s30_s13 = sshll.u32 %s13325_s12, 4  ;;  %s52_s9 = sshll.u32 %s13816_s2, 4  ;;  %s31_s13 = int_to_ptr.vmem [resolvable:$true] %s30_s13  ;;  %s53_s9 = int_to_ptr.hbm [resolvable:$true] %s52_s9 }
  0x18   :  { %33 = dma.hbm_to_vmem [thread:$0]  %s29_s7, 768, %s31_s13, [#allocation3]  }
  0x19   :  { %s76_s16 = sshll.u32 %s13818_s4, 4  ;;  %s13326_s3 = smov [#allocation7]   ;;  %s77_s16 = int_to_ptr.hbm [resolvable:$true] %s76_s16 }
  0x1a   :  { %s54_s17 = sshll.u32 %s13326_s3, 4  ;;  %s13327_s0 = smov [#allocation10]   ;;  %s55_s17 = int_to_ptr.vmem [resolvable:$true] %s54_s17 }
  0x1b   :  { %57 = dma.hbm_to_vmem [thread:$0]  %s53_s9, 32, %s55_s17, [#allocation6]  }
  0x1c   :  { %s78_s18 = sshll.u32 %s13327_s0, 4  ;;  %s100_s21 = sshll.u32 %s13820_s6, 4  ;;  %s79_s18 = int_to_ptr.vmem [resolvable:$true] %s78_s18  ;;  %s101_s21 = int_to_ptr.hbm [resolvable:$true] %s100_s21 }
  0x1d   :  { %81 = dma.hbm_to_vmem [thread:$0]  %s77_s16, 64, %s79_s18, [#allocation9]  }
  0x1e   :  { %s124_s23 = sshll.u32 %s13822_s8, 4  ;;  %s13328_s24 = smov [#allocation13]   ;;  %s125_s23 = int_to_ptr.hbm [resolvable:$true] %s124_s23 }
  0x1f   :  { %s102_s4 = sshll.u32 %s13328_s24, 4  ;;  %s13329_s5 = smov [#allocation16]   ;;  %s103_s4 = int_to_ptr.vmem [resolvable:$true] %s102_s4 }
  0x20   :  { %105 = dma.hbm_to_vmem [thread:$0]  %s101_s21, 128, %s103_s4, [#allocation12]  }
  0x21   :  { %s126_s25 = sshll.u32 %s13329_s5, 4  ;;  %s148_s7 = sshll.u32 %s13824_s10, 4  ;;  %s127_s25 = int_to_ptr.vmem [resolvable:$true] %s126_s25  ;;  %s149_s7 = int_to_ptr.hbm [resolvable:$true] %s148_s7 }
  0x22   :  { %129 = dma.hbm_to_vmem [thread:$0]  %s125_s23, 64, %s127_s25, [#allocation15]  }
  0x23   :  { %s13330_s6 = smov [#allocation19]  }
  0x24   :  { %s150_s28 = sshll.u32 %s13330_s6, 4  ;;  %s151_s28 = int_to_ptr.vmem [resolvable:$true] %s150_s28 }
  0x25   :  { %153 = dma.hbm_to_vmem [thread:$0]  %s149_s7, 16, %s151_s28, [#allocation18]  }
  0x26   :  { %13298 = dma.done.wait [#allocation3], 768  }
  0x27   :  { %13299 = vsyncadd [#allocation3], 4294966528 }
  0x28   :  { %13300 = dma.done.wait [#allocation6], 49184  }
  0x29   :  { %13301 = vsyncadd [#allocation6], 4294918112 }
  0x2a   :  { %13302 = dma.done.wait [#allocation9], 8256  }
  0x2b   :  { %13303 = vsyncadd [#allocation9], 4294959040 }
  0x2c   :  { %13304 = dma.done.wait [#allocation12], 32896  }
  0x2d   :  { %13305 = vsyncadd [#allocation12], 4294934400 }
  0x2e   :  { %13306 = dma.done.wait [#allocation15], 32832  }
  0x2f   :  { %13307 = vsyncadd [#allocation15], 4294934464 }
  0x30   :  { %13308 = dma.done.wait [#allocation18], 4112  }
  0x31   :  { %13309 = vsyncadd [#allocation18], 4294963184  ;;  %v8084_v0 = vld [vmem:[#allocation5 + $0x70] sm:$0xf]  ;;  %v12009_v1 = vld [vmem:[#allocation5 + $0x74] sm:$0xf0] }
  0x32   :  { %v8148_v2 = vld [vmem:[#allocation5 + $0xf0] sm:$0xf]  ;;  %v8085_v3 = vor.u32 %v12009_v1, %v8084_v0  ;;  %v12025_v4 = vld [vmem:[#allocation5 + $0xf4] sm:$0xf0]  ;;  %v8076_v11 = vld [vmem:[#allocation5 + $0x60] sm:$0xf] }
  0x33   :  { %v8212_v5 = vld [vmem:[#allocation5 + $0x170] sm:$0xf]  ;;  %v12041_v6 = vld [vmem:[#allocation5 + $0x174] sm:$0xf0]  ;;  %v8149_v7 = vor.u32 %v12025_v4, %v8148_v2  ;;  %v12007_v13 = vld [vmem:[#allocation5 + $0x64] sm:$0xf0] }
  0x34   :  { %v8213_v8 = vor.u32 %v12041_v6, %v8212_v5  ;;  %v8276_v9 = vld [vmem:[#allocation5 + $0x1f0] sm:$0xf]  ;;  %v12057_v10 = vld [vmem:[#allocation5 + $0x1f4] sm:$0xf0]  ;;  %2599 = vmatpush.bf16.msra.mxu0 %v8085_v3  ;;  %v8140_v14 = vld [vmem:[#allocation5 + $0xe0] sm:$0xf]  ;;  %v8077_v16 = vor.u32 %v12007_v13, %v8076_v11 }
  0x35   :  { %v8277_v12 = vor.u32 %v12057_v10, %v8276_v9  ;;  %v12023_v15 = vld [vmem:[#allocation5 + $0xe4] sm:$0xf0]  ;;  %2612 = vmatpush.bf16.msra.mxu1 %v8149_v7  ;;  %v8204_v18 = vld [vmem:[#allocation5 + $0x160] sm:$0xf]  ;;  %v8068_v23 = vld [vmem:[#allocation5 + $0x50] sm:$0xf] }
  0x36   :  { %2625 = vmatpush.bf16.msra.mxu2 %v8213_v8  ;;  %v8141_v17 = vor.u32 %v12023_v15, %v8140_v14  ;;  %v12039_v19 = vld [vmem:[#allocation5 + $0x164] sm:$0xf0]  ;;  %v8268_v20 = vld [vmem:[#allocation5 + $0x1e0] sm:$0xf]  ;;  %v12005_v24 = vld [vmem:[#allocation5 + $0x54] sm:$0xf0] }
  0x37   :  { %2638 = vmatpush.bf16.msra.mxu3 %v8277_v12  ;;  %v8205_v21 = vor.u32 %v12039_v19, %v8204_v18  ;;  %v12055_v22 = vld [vmem:[#allocation5 + $0x1e4] sm:$0xf0]  ;;  %v8132_v26 = vld [vmem:[#allocation5 + $0xd0] sm:$0xf]  ;;  %v12021_v27 = vld [vmem:[#allocation5 + $0xd4] sm:$0xf0]  ;;  %v8069_v29 = vor.u32 %v12005_v24, %v8068_v23 }
  0x38   :  { %v8269_v25 = vor.u32 %v12055_v22, %v8268_v20  ;;  %v8196_v28 = vld [vmem:[#allocation5 + $0x150] sm:$0xf]  ;;  %2600 = vmatpush.bf16.msra.mxu0 %v8077_v16  ;;  %v12037_v30 = vld [vmem:[#allocation5 + $0x154] sm:$0xf0]  ;;  %v8133_v33 = vor.u32 %v12021_v27, %v8132_v26  ;;  %v8060_v35 = vld [vmem:[#allocation5 + $0x40] sm:$0xf] }
  0x39   :  { %v8260_v31 = vld [vmem:[#allocation5 + $0x1d0] sm:$0xf]  ;;  %v12053_v32 = vld [vmem:[#allocation5 + $0x1d4] sm:$0xf0]  ;;  %2613 = vmatpush.bf16.msra.mxu1 %v8141_v17  ;;  %v8197_v34 = vor.u32 %v12037_v30, %v8196_v28  ;;  %v12003_v36 = vld [vmem:[#allocation5 + $0x44] sm:$0xf0] }
  0x3a   :  { %2626 = vmatpush.bf16.msra.mxu2 %v8205_v21  ;;  %v8124_v37 = vld [vmem:[#allocation5 + $0xc0] sm:$0xf]  ;;  %v8261_v38 = vor.u32 %v12053_v32, %v8260_v31  ;;  %v12019_v39 = vld [vmem:[#allocation5 + $0xc4] sm:$0xf0]  ;;  %v8061_v44 = vor.u32 %v12003_v36, %v8060_v35  ;;  %v8052_v47 = vld [vmem:[#allocation5 + $0x30] sm:$0xf] }
  0x3b   :  { %2639 = vmatpush.bf16.msra.mxu3 %v8269_v25  ;;  %v8188_v40 = vld [vmem:[#allocation5 + $0x140] sm:$0xf]  ;;  %v12035_v41 = vld [vmem:[#allocation5 + $0x144] sm:$0xf0]  ;;  %v8125_v45 = vor.u32 %v12019_v39, %v8124_v37  ;;  %v12001_v48 = vld [vmem:[#allocation5 + $0x34] sm:$0xf0] }
  0x3c   :  { %v8252_v42 = vld [vmem:[#allocation5 + $0x1c0] sm:$0xf]  ;;  %v12051_v43 = vld [vmem:[#allocation5 + $0x1c4] sm:$0xf0]  ;;  %2601 = vmatpush.bf16.msra.mxu0 %v8069_v29  ;;  %v8189_v46 = vor.u32 %v12035_v41, %v8188_v40  ;;  %v8116_v49 = vld [vmem:[#allocation5 + $0xb0] sm:$0xf]  ;;  %v8053_v56 = vor.u32 %v12001_v48, %v8052_v47 }
  0x3d   :  { %2614 = vmatpush.bf16.msra.mxu1 %v8133_v33  ;;  %v8253_v50 = vor.u32 %v12051_v43, %v8252_v42  ;;  %v12017_v51 = vld [vmem:[#allocation5 + $0xb4] sm:$0xf0]  ;;  %v8180_v52 = vld [vmem:[#allocation5 + $0x130] sm:$0xf]  ;;  %v8044_v59 = vld [vmem:[#allocation5 + $0x20] sm:$0xf] }
  0x3e   :  { %2627 = vmatpush.bf16.msra.mxu2 %v8197_v34  ;;  %v12033_v53 = vld [vmem:[#allocation5 + $0x134] sm:$0xf0]  ;;  %v8244_v54 = vld [vmem:[#allocation5 + $0x1b0] sm:$0xf]  ;;  %v8117_v57 = vor.u32 %v12017_v51, %v8116_v49  ;;  %v11999_v60 = vld [vmem:[#allocation5 + $0x24] sm:$0xf0] }
  0x3f   :  { %2640 = vmatpush.bf16.msra.mxu3 %v8261_v38  ;;  %v12049_v55 = vld [vmem:[#allocation5 + $0x1b4] sm:$0xf0]  ;;  %v8181_v58 = vor.u32 %v12033_v53, %v8180_v52  ;;  %v8108_v61 = vld [vmem:[#allocation5 + $0xa0] sm:$0xf]  ;;  %v12015_v63 = vld [vmem:[#allocation5 + $0xa4] sm:$0xf0]  ;;  %v8045_v4 = vor.u32 %v11999_v60, %v8044_v59 }
  0x40   :  { %2602 = vmatpush.bf16.msra.mxu0 %v8061_v44  ;;  %v8245_v62 = vor.u32 %v12049_v55, %v8244_v54  ;;  %v8172_v0 = vld [vmem:[#allocation5 + $0x120] sm:$0xf]  ;;  %v12031_v1 = vld [vmem:[#allocation5 + $0x124] sm:$0xf0]  ;;  %v8109_v5 = vor.u32 %v12015_v63, %v8108_v61  ;;  %v8036_v7 = vld [vmem:[#allocation5 + $0x10] sm:$0xf] }
  0x41   :  { %2615 = vmatpush.bf16.msra.mxu1 %v8125_v45  ;;  %v8236_v2 = vld [vmem:[#allocation5 + $0x1a0] sm:$0xf]  ;;  %v12047_v3 = vld [vmem:[#allocation5 + $0x1a4] sm:$0xf0]  ;;  %v8173_v6 = vor.u32 %v12031_v1, %v8172_v0  ;;  %v11997_v8 = vld [vmem:[#allocation5 + $0x14] sm:$0xf0] }
  0x42   :  { %2628 = vmatpush.bf16.msra.mxu2 %v8189_v46  ;;  %v8100_v9 = vld [vmem:[#allocation5 + $0x90] sm:$0xf]  ;;  %v8237_v10 = vor.u32 %v12047_v3, %v8236_v2  ;;  %v12013_v11 = vld [vmem:[#allocation5 + $0x94] sm:$0xf0]  ;;  %v8037_v16 = vor.u32 %v11997_v8, %v8036_v7  ;;  %v8028_v17 = vld [vmem:[#allocation5] sm:$0xf] }
  0x43   :  { %2641 = vmatpush.bf16.msra.mxu3 %v8253_v50  ;;  %v8164_v12 = vld [vmem:[#allocation5 + $0x110] sm:$0xf]  ;;  %v12029_v13 = vld [vmem:[#allocation5 + $0x114] sm:$0xf0]  ;;  %v11995_v18 = vld [vmem:[#allocation5 + $0x4] sm:$0xf0]  ;;  %v8101_v19 = vor.u32 %v12013_v11, %v8100_v9 }
  0x44   :  { %2603 = vmatpush.bf16.msra.mxu0 %v8053_v56  ;;  %v8228_v14 = vld [vmem:[#allocation5 + $0x190] sm:$0xf]  ;;  %v12045_v15 = vld [vmem:[#allocation5 + $0x194] sm:$0xf0]  ;;  %v8165_v20 = vor.u32 %v12029_v13, %v8164_v12  ;;  %v8092_v21 = vld [vmem:[#allocation5 + $0x80] sm:$0xf]  ;;  %v8029_v31 = vor.u32 %v11995_v18, %v8028_v17 }
  0x45   :  { %2616 = vmatpush.bf16.msra.mxu1 %v8117_v57  ;;  %v12011_v22 = vld [vmem:[#allocation5 + $0x84] sm:$0xf0]  ;;  %v8156_v23 = vld [vmem:[#allocation5 + $0x100] sm:$0xf]  ;;  %v8229_v24 = vor.u32 %v12045_v15, %v8228_v14  ;;  %v8340_v28 = vld [vmem:[#allocation5 + $0x270] sm:$0xf] }
  0x46   :  { %2629 = vmatpush.bf16.msra.mxu2 %v8181_v58  ;;  %v12027_v25 = vld [vmem:[#allocation5 + $0x104] sm:$0xf0]  ;;  %v8220_v26 = vld [vmem:[#allocation5 + $0x180] sm:$0xf]  ;;  %v12073_v29 = vld [vmem:[#allocation5 + $0x274] sm:$0xf0]  ;;  %v8093_v35 = vor.u32 %v12011_v22, %v8092_v21 }
  0x47   :  { %2642 = vmatpush.bf16.msra.mxu3 %v8245_v62  ;;  %v12043_v27 = vld [vmem:[#allocation5 + $0x184] sm:$0xf0]  ;;  %v8404_v30 = vld [vmem:[#allocation5 + $0x2f0] sm:$0xf]  ;;  %v12089_v32 = vld [vmem:[#allocation5 + $0x2f4] sm:$0xf0]  ;;  %v8157_v36 = vor.u32 %v12027_v25, %v8156_v23  ;;  %v8341_v40 = vor.u32 %v12073_v29, %v8340_v28 }
  0x48   :  { %2604 = vmatpush.bf16.msra.mxu0 %v8045_v4  ;;  %v8468_v33 = vld [vmem:[#allocation5 + $0x370] sm:$0xf]  ;;  %v12105_v34 = vld [vmem:[#allocation5 + $0x374] sm:$0xf0]  ;;  %v8221_v39 = vor.u32 %v12043_v27, %v8220_v26  ;;  %v8405_v41 = vor.u32 %v12089_v32, %v8404_v30  ;;  %v8332_v43 = vld [vmem:[#allocation5 + $0x260] sm:$0xf] }
  0x49   :  { %2617 = vmatpush.bf16.msra.mxu1 %v8109_v5  ;;  %v8532_v37 = vld [vmem:[#allocation5 + $0x3f0] sm:$0xf]  ;;  %v12121_v38 = vld [vmem:[#allocation5 + $0x3f4] sm:$0xf0]  ;;  %v8469_v42 = vor.u32 %v12105_v34, %v8468_v33  ;;  %v12071_v44 = vld [vmem:[#allocation5 + $0x264] sm:$0xf0] }
  0x4a   :  { %2630 = vmatpush.bf16.msra.mxu2 %v8173_v6  ;;  %v8396_v45 = vld [vmem:[#allocation5 + $0x2e0] sm:$0xf]  ;;  %v8533_v46 = vor.u32 %v12121_v38, %v8532_v37  ;;  %v12087_v47 = vld [vmem:[#allocation5 + $0x2e4] sm:$0xf0]  ;;  %v8333_v52 = vor.u32 %v12071_v44, %v8332_v43  ;;  %v8324_v55 = vld [vmem:[#allocation5 + $0x250] sm:$0xf] }
  0x4b   :  { %2643 = vmatpush.bf16.msra.mxu3 %v8237_v10  ;;  %v8460_v48 = vld [vmem:[#allocation5 + $0x360] sm:$0xf]  ;;  %v12103_v49 = vld [vmem:[#allocation5 + $0x364] sm:$0xf0]  ;;  %v8397_v53 = vor.u32 %v12087_v47, %v8396_v45  ;;  %v12069_v56 = vld [vmem:[#allocation5 + $0x254] sm:$0xf0] }
  0x4c   :  { %2605 = vmatpush.bf16.msra.mxu0 %v8037_v16  ;;  %v8524_v50 = vld [vmem:[#allocation5 + $0x3e0] sm:$0xf]  ;;  %v12119_v51 = vld [vmem:[#allocation5 + $0x3e4] sm:$0xf0]  ;;  %v8461_v54 = vor.u32 %v12103_v49, %v8460_v48  ;;  %v8388_v57 = vld [vmem:[#allocation5 + $0x2d0] sm:$0xf]  ;;  %v8325_v0 = vor.u32 %v12069_v56, %v8324_v55 }
  0x4d   :  { %2618 = vmatpush.bf16.msra.mxu1 %v8101_v19  ;;  %v8525_v58 = vor.u32 %v12119_v51, %v8524_v50  ;;  %v12085_v59 = vld [vmem:[#allocation5 + $0x2d4] sm:$0xf0]  ;;  %v8452_v60 = vld [vmem:[#allocation5 + $0x350] sm:$0xf]  ;;  %v8316_v1 = vld [vmem:[#allocation5 + $0x240] sm:$0xf] }
  0x4e   :  { %2631 = vmatpush.bf16.msra.mxu2 %v8165_v20  ;;  %v12101_v61 = vld [vmem:[#allocation5 + $0x354] sm:$0xf0]  ;;  %v8516_v62 = vld [vmem:[#allocation5 + $0x3d0] sm:$0xf]  ;;  %v8389_v3 = vor.u32 %v12085_v59, %v8388_v57  ;;  %v12067_v5 = vld [vmem:[#allocation5 + $0x244] sm:$0xf0] }
  0x4f   :  { %2644 = vmatpush.bf16.msra.mxu3 %v8229_v24  ;;  %v12117_v63 = vld [vmem:[#allocation5 + $0x3d4] sm:$0xf0]  ;;  %v198_v2 = vld [vmem:[#allocation2] sm:$0xff]  ;;  %v8453_v4 = vor.u32 %v12101_v61, %v8452_v60  ;;  %v8380_v6 = vld [vmem:[#allocation5 + $0x2c0] sm:$0xf]  ;;  %v8317_v13 = vor.u32 %v12067_v5, %v8316_v1  ;;  %s13331_s8 = smov [#allocation20]  }
  0x50   :  { %2606 = vmatpush.bf16.msra.mxu0 %v8029_v31  ;;  %210 = vst [vmem:[#allocation1] ss:$4 sm:$0xff] %v198_v2  ;;  %v8517_v7 = vor.u32 %v12117_v63, %v8516_v62  ;;  %v12083_v8 = vld [vmem:[#allocation5 + $0x2c4] sm:$0xf0]  ;;  %v8444_v9 = vld [vmem:[#allocation5 + $0x340] sm:$0xf] }
  0x51   :  { %2619 = vmatpush.bf16.msra.mxu1 %v8093_v35  ;;  %v12099_v10 = vld [vmem:[#allocation5 + $0x344] sm:$0xf0]  ;;  %v8508_v11 = vld [vmem:[#allocation5 + $0x3c0] sm:$0xf]  ;;  %v8308_v14 = vld [vmem:[#allocation5 + $0x230] sm:$0xf]  ;;  %v8381_v16 = vor.u32 %v12083_v8, %v8380_v6 }
  0x52   :  { %2632 = vmatpush.bf16.msra.mxu2 %v8157_v36  ;;  %v12115_v12 = vld [vmem:[#allocation5 + $0x3c4] sm:$0xf0]  ;;  %v12065_v15 = vld [vmem:[#allocation5 + $0x234] sm:$0xf0]  ;;  %v8445_v17 = vor.u32 %v12099_v10, %v8444_v9  ;;  %v8372_v18 = vld [vmem:[#allocation5 + $0x2b0] sm:$0xf] }
  0x53   :  { %2645 = vmatpush.bf16.msra.mxu3 %v8221_v39  ;;  %v12081_v19 = vld [vmem:[#allocation5 + $0x2b4] sm:$0xf0]  ;;  %v8436_v20 = vld [vmem:[#allocation5 + $0x330] sm:$0xf]  ;;  %v8509_v21 = vor.u32 %v12115_v12, %v8508_v11  ;;  %v8300_v25 = vld [vmem:[#allocation5 + $0x220] sm:$0xf]  ;;  %v8309_v28 = vor.u32 %v12065_v15, %v8308_v14 }
  0x54   :  { %2651 = vmatpush.bf16.msrb.mxu0 %v8341_v40  ;;  %v12097_v22 = vld [vmem:[#allocation5 + $0x334] sm:$0xf0]  ;;  %v8500_v23 = vld [vmem:[#allocation5 + $0x3b0] sm:$0xf]  ;;  %v12063_v26 = vld [vmem:[#allocation5 + $0x224] sm:$0xf0]  ;;  %v8373_v29 = vor.u32 %v12081_v19, %v8372_v18 }
  0x55   :  { %2664 = vmatpush.bf16.msrb.mxu1 %v8405_v41  ;;  %v12113_v24 = vld [vmem:[#allocation5 + $0x3b4] sm:$0xf0]  ;;  %v200_v27 = vld [vmem:[#allocation2 + $0x10] sm:$0xff]  ;;  %v12079_v31 = vld [vmem:[#allocation5 + $0x2a4] sm:$0xf0]  ;;  %v8437_v34 = vor.u32 %v12097_v22, %v8436_v20  ;;  %s8009_s10 = sshll.u32 %s13331_s8, 4  ;;  %s8010_s10 = int_to_ptr.vmem [resolvable:$true] %s8009_s10 }
  0x56   :  { %2677 = vmatpush.bf16.msrb.mxu2 %v8469_v42  ;;  %v8364_v30 = vld [vmem:[#allocation5 + $0x2a0] sm:$0xf]  ;;  %v8501_v39 = vor.u32 %v12113_v24, %v8500_v23  ;;  %v12095_v41 = vld [vmem:[#allocation5 + $0x324] sm:$0xf0]  ;;  %v8292_v47 = vld [vmem:[#allocation5 + $0x210] sm:$0xf] }
  0x57   :  { %2690 = vmatpush.bf16.msrb.mxu3 %v8533_v46  ;;  %v215_v32 = vld.sshfl [vmem:[#allocation1 + $0x10] sm:$0xff pattern:$0x73625140]  ;;  %v213_v33 = vld.sshfl [vmem:[#allocation1] sm:$0xff pattern:$0x73625140]  ;;  %v8301_v46 = vor.u32 %v12063_v26, %v8300_v25  ;;  %v8365_v49 = vor.u32 %v12079_v31, %v8364_v30 }
  0x58   :  { %2652 = vmatpush.bf16.msrb.mxu0 %v8333_v52  ;;  %v13425_v35 = vpack.c.bf16 %v215_v32, %v215_v32  ;;  %v13427_v36 = vpack.c.bf16 %v213_v33, %v213_v33  ;;  %v216_v37 = vld.sshfl [vmem:[#allocation1 + $0x18] sm:$0xff pattern:$0x73625140]  ;;  %v214_v38 = vld.sshfl [vmem:[#allocation1 + $0x8] sm:$0xff pattern:$0x73625140] }
  0x59   :  { %2665 = vmatpush.bf16.msrb.mxu1 %v8397_v53  ;;  %v8428_v40 = vld [vmem:[#allocation5 + $0x320] sm:$0xf]  ;;  %v13429_v42 = vpack.c.bf16 %v216_v37, %v216_v37  ;;  %221 = vst [vmem:[#allocation1] ss:$4 sm:$0xff] %v200_v27  ;;  %v13431_v43 = vpack.c.bf16 %v214_v38, %v214_v38  ;;  %v12111_v45 = vld [vmem:[#allocation5 + $0x3a4] sm:$0xf0] }
  0x5a   :  { %2678 = vmatpush.bf16.msrb.mxu2 %v8461_v54  ;;  %v8492_v44 = vld [vmem:[#allocation5 + $0x3a0] sm:$0xf]  ;;  %2607 = vmatmul.bf16.vlgmr.msra.gmra.mxu0 %v13427_v36  ;;  %v12061_v48 = vld [vmem:[#allocation5 + $0x214] sm:$0xf0]  ;;  %v8429_v50 = vor.u32 %v12095_v41, %v8428_v40  ;;  %v8356_v51 = vld [vmem:[#allocation5 + $0x290] sm:$0xf] }
  0x5b   :  { %2691 = vmatpush.bf16.msrb.mxu3 %v8525_v58  ;;  %2633 = vmatmul.bf16.vlgmr.msra.gmra.mxu2 %v13425_v35  ;;  %v12077_v52 = vld [vmem:[#allocation5 + $0x294] sm:$0xf0]  ;;  %v8420_v53 = vld [vmem:[#allocation5 + $0x310] sm:$0xf]  ;;  %v8493_v54 = vor.u32 %v12111_v45, %v8492_v44  ;;  %v8284_v59 = vld [vmem:[#allocation5 + $0x200] sm:$0xf]  ;;  %v8293_v60 = vor.u32 %v12061_v48, %v8292_v47 }
  0x5c   :  { %2653 = vmatpush.bf16.msrb.mxu0 %v8325_v0  ;;  %2646 = vmatmul.bf16.vlgmr.msra.gmra.mxu3 %v13429_v42  ;;  %v12093_v55 = vld [vmem:[#allocation5 + $0x314] sm:$0xf0]  ;;  %v8484_v56 = vld [vmem:[#allocation5 + $0x390] sm:$0xf]  ;;  %v12059_v61 = vld [vmem:[#allocation5 + $0x204] sm:$0xf0]  ;;  %v8357_v0 = vor.u32 %v12077_v52, %v8356_v51 }
  0x5d   :  { %2666 = vmatpush.bf16.msrb.mxu1 %v8389_v3  ;;  %v199_v57 = vld [vmem:[#allocation2 + $0x8] sm:$0xff]  ;;  %v8348_v62 = vld [vmem:[#allocation5 + $0x280] sm:$0xf]  ;;  %v12075_v63 = vld [vmem:[#allocation5 + $0x284] sm:$0xf0]  ;;  %v8421_v1 = vor.u32 %v12093_v55, %v8420_v53  ;;  %v8285_v12 = vor.u32 %v12059_v61, %v8284_v59  ;;  %s8011_s13 = sshll.u32 %s13825_s11, 4  ;;  %s8012_s13 = int_to_ptr.hbm [resolvable:$true] %s8011_s13 }
  0x5e   :  { %2679 = vmatpush.bf16.msrb.mxu2 %v8453_v4  ;;  %2620 = vmatmul.bf16.vlgmr.msra.gmra.mxu1 %v13431_v43  ;;  %v12109_v58 = vld [vmem:[#allocation5 + $0x394] sm:$0xf0]  ;;  %212 = vst [vmem:[#allocation1 + $0x20] ss:$4 sm:$0xff] %v199_v57  ;;  %v8412_v2 = vld [vmem:[#allocation5 + $0x300] sm:$0xf] }
  0x5f   :  { %2692 = vmatpush.bf16.msrb.mxu3 %v8517_v7  ;;  %v12091_v3 = vld [vmem:[#allocation5 + $0x304] sm:$0xf0]  ;;  %v8476_v4 = vld [vmem:[#allocation5 + $0x380] sm:$0xf]  ;;  %v8485_v5 = vor.u32 %v12109_v58, %v8484_v56  ;;  %v8596_v7 = vld [vmem:[#allocation5 + $0x470] sm:$0xf] }
  0x60   :  { %2654 = vmatpush.bf16.msrb.mxu0 %v8317_v13  ;;  %v12107_v6 = vld [vmem:[#allocation5 + $0x384] sm:$0xf0]  ;;  %v12137_v8 = vld [vmem:[#allocation5 + $0x474] sm:$0xf0]  ;;  %v8660_v9 = vld [vmem:[#allocation5 + $0x4f0] sm:$0xf] }
  0x61   :  { %2667 = vmatpush.bf16.msrb.mxu1 %v8381_v16  ;;  %v12153_v10 = vld [vmem:[#allocation5 + $0x4f4] sm:$0xf0]  ;;  %v8724_v11 = vld [vmem:[#allocation5 + $0x570] sm:$0xf]  ;;  %v8349_v16 = vor.u32 %v12075_v63, %v8348_v62  ;;  %v8588_v18 = vld [vmem:[#allocation5 + $0x460] sm:$0xf]  ;;  %v8597_v22 = vor.u32 %v12137_v8, %v8596_v7 }
  0x62   :  { %2680 = vmatpush.bf16.msrb.mxu2 %v8445_v17  ;;  %v12169_v13 = vld [vmem:[#allocation5 + $0x574] sm:$0xf0]  ;;  %v8788_v14 = vld [vmem:[#allocation5 + $0x5f0] sm:$0xf]  ;;  %v8413_v17 = vor.u32 %v12091_v3, %v8412_v2  ;;  %v12135_v19 = vld [vmem:[#allocation5 + $0x464] sm:$0xf0]  ;;  %v8661_v27 = vor.u32 %v12153_v10, %v8660_v9 }
  0x63   :  { %2693 = vmatpush.bf16.msrb.mxu3 %v8509_v21  ;;  %v12185_v15 = vld [vmem:[#allocation5 + $0x5f4] sm:$0xf0]  ;;  %v201_v20 = vld [vmem:[#allocation2 + $0x18] sm:$0xff]  ;;  %v8477_v21 = vor.u32 %v12107_v6, %v8476_v4  ;;  %v8652_v23 = vld [vmem:[#allocation5 + $0x4e0] sm:$0xf]  ;;  %v8589_v41 = vor.u32 %v12135_v19, %v8588_v18 }
  0x64   :  { %2655 = vmatpush.bf16.msrb.mxu0 %v8309_v28  ;;  %v12151_v24 = vld [vmem:[#allocation5 + $0x4e4] sm:$0xf0]  ;;  %v8725_v28 = vor.u32 %v12169_v13, %v8724_v11  ;;  %v8789_v31 = vor.u32 %v12185_v15, %v8788_v14  ;;  %v8716_v32 = vld [vmem:[#allocation5 + $0x560] sm:$0xf]  ;;  %v8580_v47 = vld [vmem:[#allocation5 + $0x450] sm:$0xf] }
  0x65   :  { %2668 = vmatpush.bf16.msrb.mxu1 %v8373_v29  ;;  %v219_v25 = vld.sshfl [vmem:[#allocation1 + $0x30] sm:$0xff pattern:$0x73625140]  ;;  %v217_v26 = vld.sshfl [vmem:[#allocation1 + $0x20] sm:$0xff pattern:$0x73625140]  ;;  %v8653_v45 = vor.u32 %v12151_v24, %v8652_v23 }
  0x66   :  { %2681 = vmatpush.bf16.msrb.mxu2 %v8437_v34  ;;  %v220_v29 = vld.sshfl [vmem:[#allocation1 + $0x38] sm:$0xff pattern:$0x73625140]  ;;  %v218_v30 = vld.sshfl [vmem:[#allocation1 + $0x28] sm:$0xff pattern:$0x73625140]  ;;  %v13437_v34 = vpack.c.bf16 %v219_v25, %v219_v25 }
  0x67   :  { %2694 = vmatpush.bf16.msrb.mxu3 %v8501_v39  ;;  %v12167_v33 = vld [vmem:[#allocation5 + $0x564] sm:$0xf0]  ;;  %222 = vst [vmem:[#allocation1 + $0x20] ss:$4 sm:$0xff] %v201_v20  ;;  %v8780_v37 = vld [vmem:[#allocation5 + $0x5e0] sm:$0xf]  ;;  %v13439_v39 = vpack.c.bf16 %v217_v26, %v217_v26  ;;  %v13441_v40 = vpack.c.bf16 %v220_v29, %v220_v29  ;;  %v13443_v44 = vpack.c.bf16 %v218_v30, %v218_v30 }
  0x68   :  { %2656 = vmatpush.bf16.msrb.mxu0 %v8301_v46  ;;  %v12183_v38 = vld [vmem:[#allocation5 + $0x5e4] sm:$0xf0]  ;;  %v8717_v46 = vor.u32 %v12167_v33, %v8716_v32  ;;  %v12133_v48 = vld [vmem:[#allocation5 + $0x454] sm:$0xf0]  ;;  %v8708_v52 = vld [vmem:[#allocation5 + $0x550] sm:$0xf] }
  0x69   :  { %2669 = vmatpush.bf16.msrb.mxu1 %v8365_v49  ;;  %v8644_v49 = vld [vmem:[#allocation5 + $0x4d0] sm:$0xf]  ;;  %v12149_v51 = vld [vmem:[#allocation5 + $0x4d4] sm:$0xf0]  ;;  %v8581_v56 = vor.u32 %v12133_v48, %v8580_v47  ;;  %v8572_v59 = vld [vmem:[#allocation5 + $0x440] sm:$0xf] }
  0x6a   :  { %2682 = vmatpush.bf16.msrb.mxu2 %v8429_v50  ;;  %v8781_v50 = vor.u32 %v12183_v38, %v8780_v37  ;;  %v12165_v53 = vld [vmem:[#allocation5 + $0x554] sm:$0xf0]  ;;  %v8645_v57 = vor.u32 %v12149_v51, %v8644_v49  ;;  %v8636_v61 = vld [vmem:[#allocation5 + $0x4c0] sm:$0xf]  ;;  %v12147_v63 = vld [vmem:[#allocation5 + $0x4c4] sm:$0xf0] }
  0x6b   :  { %2695 = vmatpush.bf16.msrb.mxu3 %v8493_v54  ;;  %v8772_v54 = vld [vmem:[#allocation5 + $0x5d0] sm:$0xf]  ;;  %v12181_v55 = vld [vmem:[#allocation5 + $0x5d4] sm:$0xf0]  ;;  %v8709_v58 = vor.u32 %v12165_v53, %v8708_v52  ;;  %v8764_v2 = vld [vmem:[#allocation5 + $0x5c0] sm:$0xf]  ;;  %v8637_v8 = vor.u32 %v12147_v63, %v8636_v61 }
  0x6c   :  { %2657 = vmatpush.bf16.msrb.mxu0 %v8293_v60  ;;  %v12131_v60 = vld [vmem:[#allocation5 + $0x444] sm:$0xf0]  ;;  %v8773_v62 = vor.u32 %v12181_v55, %v8772_v54  ;;  %v12129_v6 = vld [vmem:[#allocation5 + $0x434] sm:$0xf0]  ;;  %v8628_v7 = vld [vmem:[#allocation5 + $0x4b0] sm:$0xf] }
  0x6d   :  { %2670 = vmatpush.bf16.msrb.mxu1 %v8357_v0  ;;  %v8700_v0 = vld [vmem:[#allocation5 + $0x540] sm:$0xf]  ;;  %v12179_v3 = vld [vmem:[#allocation5 + $0x5c4] sm:$0xf0]  ;;  %v8573_v4 = vor.u32 %v12131_v60, %v8572_v59  ;;  %v12145_v10 = vld [vmem:[#allocation5 + $0x4b4] sm:$0xf0] }
  0x6e   :  { %2683 = vmatpush.bf16.msrb.mxu2 %v8421_v1  ;;  %v12163_v1 = vld [vmem:[#allocation5 + $0x544] sm:$0xf0]  ;;  %v8692_v11 = vld [vmem:[#allocation5 + $0x530] sm:$0xf]  ;;  %v8765_v13 = vor.u32 %v12179_v3, %v8764_v2  ;;  %v12177_v15 = vld [vmem:[#allocation5 + $0x5b4] sm:$0xf0]  ;;  %v8629_v23 = vor.u32 %v12145_v10, %v8628_v7 }
  0x6f   :  { %2696 = vmatpush.bf16.msrb.mxu3 %v8485_v5  ;;  %v8564_v5 = vld [vmem:[#allocation5 + $0x430] sm:$0xf]  ;;  %v8701_v9 = vor.u32 %v12163_v1, %v8700_v0  ;;  %v13449_v18 = vld.sshfl [vmem:[#allocation1] sm:$0xff pattern:$0x73625140] }
  0x70   :  { %2658 = vmatpush.bf16.msrb.mxu0 %v8285_v12  ;;  %v12161_v12 = vld [vmem:[#allocation5 + $0x534] sm:$0xf0]  ;;  %v8756_v14 = vld [vmem:[#allocation5 + $0x5b0] sm:$0xf]  ;;  %v8565_v20 = vor.u32 %v12129_v6, %v8564_v5  ;;  %v12127_v25 = vld [vmem:[#allocation5 + $0x424] sm:$0xf0] }
  0x71   :  { %2671 = vmatpush.bf16.msrb.mxu1 %v8349_v16  ;;  %v202_v16 = vld [vmem:[#allocation2 + $0x20] sm:$0xff]  ;;  %v13451_v19 = vld.sshfl [vmem:[#allocation1 + $0x10] sm:$0xff pattern:$0x73625140]  ;;  %v8693_v24 = vor.u32 %v12161_v12, %v8692_v11  ;;  %v8620_v26 = vld [vmem:[#allocation5 + $0x4a0] sm:$0xf] }
  0x72   :  { %2684 = vmatpush.bf16.msrb.mxu2 %v8413_v17  ;;  %v8556_v17 = vld [vmem:[#allocation5 + $0x420] sm:$0xf]  ;;  %v12159_v30 = vld [vmem:[#allocation5 + $0x524] sm:$0xf0]  ;;  %v12141_v48 = vld [vmem:[#allocation5 + $0x494] sm:$0xf0] }
  0x73   :  { %2697 = vmatpush.bf16.msrb.mxu3 %v8477_v21  ;;  %2659 = vmatmul.bf16.vlgmr.msrb.gmra.mxu0 %v13439_v39  ;;  %v13453_v21 = vld.sshfl [vmem:[#allocation1 + $0x8] sm:$0xff pattern:$0x73625140]  ;;  %v8684_v29 = vld [vmem:[#allocation5 + $0x520] sm:$0xf]  ;;  %v8557_v33 = vor.u32 %v12127_v25, %v8556_v17 }
  0x74   :  { %2703 = vmatpush.bf16.msra.mxu0 %v8597_v22  ;;  %2672 = vmatmul.bf16.vlgmr.msrb.gmra.mxu1 %v13443_v44  ;;  %v13455_v22 = vld.sshfl [vmem:[#allocation1 + $0x18] sm:$0xff pattern:$0x73625140]  ;;  %v12175_v32 = vld [vmem:[#allocation5 + $0x5a4] sm:$0xf0]  ;;  %v8685_v38 = vor.u32 %v12159_v30, %v8684_v29  ;;  %v13467_v29 = vpack.c.bf16 %v13453_v21, %v13453_v21 }
  0x75   :  { %2716 = vmatpush.bf16.msra.mxu1 %v8661_v27  ;;  %2685 = vmatmul.bf16.vlgmr.msrb.gmra.mxu2 %v13437_v34  ;;  %231 = vst [vmem:[#allocation1] ss:$4 sm:$0xff] %v202_v16  ;;  %v8757_v27 = vor.u32 %v12177_v15, %v8756_v14  ;;  %v8676_v49 = vld [vmem:[#allocation5 + $0x510] sm:$0xf]  ;;  %v12173_v52 = vld [vmem:[#allocation5 + $0x594] sm:$0xf0] }
  0x76   :  { %2729 = vmatpush.bf16.msra.mxu2 %v8725_v28  ;;  %2698 = vmatmul.bf16.vlgmr.msrb.gmra.mxu3 %v13441_v40  ;;  %v12143_v28 = vld [vmem:[#allocation5 + $0x4a4] sm:$0xf0]  ;;  %v8740_v51 = vld [vmem:[#allocation5 + $0x590] sm:$0xf]  ;;  %v8540_v54 = vld [vmem:[#allocation5 + $0x400] sm:$0xf] }
  0x77   :  { %2742 = vmatpush.bf16.msra.mxu3 %v8789_v31  ;;  %v8748_v31 = vld [vmem:[#allocation5 + $0x5a0] sm:$0xf]  ;;  %v8621_v37 = vor.u32 %v12143_v28, %v8620_v26  ;;  %v12123_v55 = vld [vmem:[#allocation5 + $0x404] sm:$0xf0]  ;;  %v8741_v61 = vor.u32 %v12173_v52, %v8740_v51  ;;  %v8852_v1 = vld [vmem:[#allocation5 + $0x670] sm:$0xf]  ;;  %v13463_v28 = vpack.c.bf16 %v13451_v19, %v13451_v19 }
  0x78   :  { %2704 = vmatpush.bf16.msra.mxu0 %v8589_v41  ;;  %v8548_v41 = vld [vmem:[#allocation5 + $0x410] sm:$0xf]  ;;  %v8749_v47 = vor.u32 %v12175_v32, %v8748_v31  ;;  %v12139_v59 = vld [vmem:[#allocation5 + $0x484] sm:$0xf0]  ;;  %v8668_v60 = vld [vmem:[#allocation5 + $0x500] sm:$0xf] }
  0x79   :  { %2717 = vmatpush.bf16.msra.mxu1 %v8653_v45  ;;  %v12125_v45 = vld [vmem:[#allocation5 + $0x414] sm:$0xf0]  ;;  %v8732_v63 = vld [vmem:[#allocation5 + $0x580] sm:$0xf]  ;;  %v12171_v0 = vld [vmem:[#allocation5 + $0x584] sm:$0xf0] }
  0x7a   :  { %2730 = vmatpush.bf16.msra.mxu2 %v8717_v46  ;;  %v8612_v46 = vld [vmem:[#allocation5 + $0x490] sm:$0xf]  ;;  %v8549_v53 = vor.u32 %v12125_v45, %v8548_v41  ;;  %v12201_v2 = vld [vmem:[#allocation5 + $0x674] sm:$0xf0]  ;;  %v8733_v12 = vor.u32 %v12171_v0, %v8732_v63  ;;  %v8844_v16 = vld [vmem:[#allocation5 + $0x660] sm:$0xf] }
  0x7b   :  { %2743 = vmatpush.bf16.msra.mxu3 %v8781_v50  ;;  %v12157_v50 = vld [vmem:[#allocation5 + $0x514] sm:$0xf0]  ;;  %v8916_v3 = vld [vmem:[#allocation5 + $0x6f0] sm:$0xf]  ;;  %v12199_v17 = vld [vmem:[#allocation5 + $0x664] sm:$0xf0] }
  0x7c   :  { %2705 = vmatpush.bf16.msra.mxu0 %v8581_v56  ;;  %v8613_v56 = vor.u32 %v12141_v48, %v8612_v46  ;;  %v12217_v5 = vld [vmem:[#allocation5 + $0x6f4] sm:$0xf0]  ;;  %v8980_v6 = vld [vmem:[#allocation5 + $0x770] sm:$0xf]  ;;  %v12215_v25 = vld [vmem:[#allocation5 + $0x6e4] sm:$0xf0]  ;;  %v8845_v32 = vor.u32 %v12199_v17, %v8844_v16 }
  0x7d   :  { %2718 = vmatpush.bf16.msra.mxu1 %v8645_v57  ;;  %v8677_v57 = vor.u32 %v12157_v50, %v8676_v49  ;;  %v12233_v7 = vld [vmem:[#allocation5 + $0x774] sm:$0xf0]  ;;  %v9044_v10 = vld [vmem:[#allocation5 + $0x7f0] sm:$0xf]  ;;  %v8917_v14 = vor.u32 %v12217_v5, %v8916_v3  ;;  %v8972_v26 = vld [vmem:[#allocation5 + $0x760] sm:$0xf] }
  0x7e   :  { %2731 = vmatpush.bf16.msra.mxu2 %v8709_v58  ;;  %v8604_v58 = vld [vmem:[#allocation5 + $0x480] sm:$0xf]  ;;  %v12249_v11 = vld [vmem:[#allocation5 + $0x7f4] sm:$0xf0]  ;;  %v8981_v15 = vor.u32 %v12233_v7, %v8980_v6  ;;  %v12247_v31 = vld [vmem:[#allocation5 + $0x7e4] sm:$0xf0] }
  0x7f   :  { %2744 = vmatpush.bf16.msra.mxu3 %v8773_v62  ;;  %v12155_v62 = vld [vmem:[#allocation5 + $0x504] sm:$0xf0]  ;;  %v9036_v30 = vld [vmem:[#allocation5 + $0x7e0] sm:$0xf]  ;;  %v12197_v19 = vld [vmem:[#allocation5 + $0x654] sm:$0xf0] }
  0x80   :  { %2706 = vmatpush.bf16.msra.mxu0 %v8573_v4  ;;  %v8541_v4 = vor.u32 %v12123_v55, %v8540_v54  ;;  %v8900_v41 = vld [vmem:[#allocation5 + $0x6d0] sm:$0xf]  ;;  %v12213_v45 = vld [vmem:[#allocation5 + $0x6d4] sm:$0xf0]  ;;  %v9037_v21 = vor.u32 %v12247_v31, %v9036_v30  ;;  %v8828_v49 = vld [vmem:[#allocation5 + $0x640] sm:$0xf] }
  0x81   :  { %2719 = vmatpush.bf16.msra.mxu1 %v8637_v8  ;;  %v8605_v8 = vor.u32 %v12139_v59, %v8604_v58  ;;  %v8964_v46 = vld [vmem:[#allocation5 + $0x750] sm:$0xf]  ;;  %v12195_v50 = vld [vmem:[#allocation5 + $0x644] sm:$0xf0]  ;;  %v8892_v52 = vld [vmem:[#allocation5 + $0x6c0] sm:$0xf] }
  0x82   :  { %2732 = vmatpush.bf16.msra.mxu2 %v8701_v9  ;;  %v8669_v9 = vor.u32 %v12155_v62, %v8668_v60  ;;  %v9028_v48 = vld [vmem:[#allocation5 + $0x7d0] sm:$0xf]  ;;  %v8956_v54 = vld [vmem:[#allocation5 + $0x740] sm:$0xf]  ;;  %v12227_v55 = vld [vmem:[#allocation5 + $0x744] sm:$0xf0] }
  0x83   :  { %2745 = vmatpush.bf16.msra.mxu3 %v8765_v13  ;;  %v8853_v13 = vor.u32 %v12201_v2, %v8852_v1  ;;  %v13477_v59 = vld.sshfl [vmem:[#allocation1 + $0x20] sm:$0xff pattern:$0x73625140]  ;;  %v13479_v60 = vld.sshfl [vmem:[#allocation1 + $0x30] sm:$0xff pattern:$0x73625140]  ;;  %v8829_v2 = vor.u32 %v12195_v50, %v8828_v49 }
  0x84   :  { %2707 = vmatpush.bf16.msra.mxu0 %v8565_v20  ;;  %v8908_v20 = vld [vmem:[#allocation5 + $0x6e0] sm:$0xf]  ;;  %v13481_v62 = vld.sshfl [vmem:[#allocation1 + $0x28] sm:$0xff pattern:$0x73625140] }
  0x85   :  { %2720 = vmatpush.bf16.msra.mxu1 %v8629_v23  ;;  %v9045_v23 = vor.u32 %v12249_v11, %v9044_v10  ;;  %v13483_v63 = vld.sshfl [vmem:[#allocation1 + $0x38] sm:$0xff pattern:$0x73625140]  ;;  %v12243_v1 = vld [vmem:[#allocation5 + $0x7c4] sm:$0xf0] }
  0x86   :  { %2733 = vmatpush.bf16.msra.mxu2 %v8693_v24  ;;  %v13459_v24 = vpack.c.bf16 %v13449_v18, %v13449_v18  ;;  %v13471_v18 = vpack.c.bf16 %v13455_v22, %v13455_v22  ;;  %v12245_v22 = vld [vmem:[#allocation5 + $0x7d4] sm:$0xf0]  ;;  %v9020_v0 = vld [vmem:[#allocation5 + $0x7c0] sm:$0xf]  ;;  %v8820_v5 = vld [vmem:[#allocation5 + $0x630] sm:$0xf] }
  0x87   :  { %2746 = vmatpush.bf16.msra.mxu3 %v8757_v27  ;;  %v12231_v27 = vld [vmem:[#allocation5 + $0x764] sm:$0xf0]  ;;  %v12193_v6 = vld [vmem:[#allocation5 + $0x634] sm:$0xf0]  ;;  %v8884_v7 = vld [vmem:[#allocation5 + $0x6b0] sm:$0xf] }
  0x88   :  { %2708 = vmatpush.bf16.msra.mxu0 %v8557_v33  ;;  %v8836_v33 = vld [vmem:[#allocation5 + $0x650] sm:$0xf]  ;;  %v12225_v11 = vld [vmem:[#allocation5 + $0x734] sm:$0xf0]  ;;  %v8812_v17 = vld [vmem:[#allocation5 + $0x620] sm:$0xf] }
  0x89   :  { %2721 = vmatpush.bf16.msra.mxu1 %v8621_v37  ;;  %v8909_v37 = vor.u32 %v12215_v25, %v8908_v20  ;;  %v8837_v51 = vor.u32 %v12197_v19, %v8836_v33  ;;  %v8948_v10 = vld [vmem:[#allocation5 + $0x730] sm:$0xf]  ;;  %v12191_v20 = vld [vmem:[#allocation5 + $0x624] sm:$0xf0]  ;;  %v9004_v31 = vld [vmem:[#allocation5 + $0x7a0] sm:$0xf] }
  0x8a   :  { %2734 = vmatpush.bf16.msra.mxu2 %v8685_v38  ;;  %v8973_v38 = vor.u32 %v12231_v27, %v8972_v26  ;;  %v8949_v16 = vor.u32 %v12225_v11, %v8948_v10  ;;  %v12207_v26 = vld [vmem:[#allocation5 + $0x6a4] sm:$0xf0]  ;;  %v8940_v27 = vld [vmem:[#allocation5 + $0x720] sm:$0xf]  ;;  %v8813_v33 = vor.u32 %v12191_v20, %v8812_v17  ;;  %v8804_v19 = vld [vmem:[#allocation5 + $0x610] sm:$0xf] }
  0x8b   :  { %2747 = vmatpush.bf16.msra.mxu3 %v8749_v47  ;;  %v12229_v47 = vld [vmem:[#allocation5 + $0x754] sm:$0xf0]  ;;  %v12223_v30 = vld [vmem:[#allocation5 + $0x724] sm:$0xf0]  ;;  %v9300_v11 = vld [vmem:[#allocation5 + $0x9f0] sm:$0xf] }
  0x8c   :  { %2709 = vmatpush.bf16.msra.mxu0 %v8549_v53  ;;  %v12211_v53 = vld [vmem:[#allocation5 + $0x6c4] sm:$0xf0]  ;;  %v8965_v58 = vor.u32 %v12229_v47, %v8964_v46  ;;  %v12205_v46 = vld [vmem:[#allocation5 + $0x694] sm:$0xf0]  ;;  %v8932_v47 = vld [vmem:[#allocation5 + $0x710] sm:$0xf] }
  0x8d   :  { %2722 = vmatpush.bf16.msra.mxu1 %v8613_v56  ;;  %v203_v56 = vld [vmem:[#allocation2 + $0x28] sm:$0xff]  ;;  %v8893_v3 = vor.u32 %v12211_v53, %v8892_v52  ;;  %v12187_v52 = vld [vmem:[#allocation5 + $0x604] sm:$0xf0]  ;;  %v8860_v53 = vld [vmem:[#allocation5 + $0x680] sm:$0xf] }
  0x8e   :  { %2735 = vmatpush.bf16.msra.mxu2 %v8677_v57  ;;  %v8901_v57 = vor.u32 %v12213_v45, %v8900_v41  ;;  %232 = vst [vmem:[#allocation1 + $0x20] ss:$4 sm:$0xff] %v203_v56  ;;  %v12189_v41 = vld [vmem:[#allocation5 + $0x614] sm:$0xf0]  ;;  %v8868_v45 = vld [vmem:[#allocation5 + $0x690] sm:$0xf] }
  0x8f   :  { %2748 = vmatpush.bf16.msra.mxu3 %v8741_v61  ;;  %v9029_v61 = vor.u32 %v12245_v22, %v9028_v48  ;;  %v12221_v48 = vld [vmem:[#allocation5 + $0x714] sm:$0xf0]  ;;  %v8996_v22 = vld [vmem:[#allocation5 + $0x790] sm:$0xf]  ;;  %v8805_v50 = vor.u32 %v12189_v41, %v8804_v19  ;;  %v12203_v56 = vld [vmem:[#allocation5 + $0x684] sm:$0xf0] }
  0x90   :  { %2710 = vmatpush.bf16.msra.mxu0 %v8541_v4  ;;  %v8957_v4 = vor.u32 %v12227_v55, %v8956_v54  ;;  %v12237_v49 = vld [vmem:[#allocation5 + $0x794] sm:$0xf0]  ;;  %v8869_v54 = vor.u32 %v12205_v46, %v8868_v45  ;;  %v8933_v55 = vor.u32 %v12221_v48, %v8932_v47  ;;  %v9100_v17 = vld [vmem:[#allocation5 + $0x860] sm:$0xf]  ;;  %v12263_v20 = vld [vmem:[#allocation5 + $0x864] sm:$0xf0] }
  0x91   :  { %2723 = vmatpush.bf16.msra.mxu1 %v8605_v8  ;;  %v9021_v8 = vor.u32 %v12243_v1, %v9020_v0  ;;  %v8988_v0 = vld [vmem:[#allocation5 + $0x780] sm:$0xf]  ;;  %v12235_v1 = vld [vmem:[#allocation5 + $0x784] sm:$0xf0]  ;;  %v9101_v19 = vor.u32 %v12263_v20, %v9100_v17  ;;  %v9156_v46 = vld [vmem:[#allocation5 + $0x8d0] sm:$0xf] }
  0x92   :  { %2736 = vmatpush.bf16.msra.mxu2 %v8669_v9  ;;  %v12209_v9 = vld [vmem:[#allocation5 + $0x6b4] sm:$0xf0]  ;;  %v9220_v48 = vld [vmem:[#allocation5 + $0x950] sm:$0xf]  ;;  %v9068_v17 = vld [vmem:[#allocation5 + $0x820] sm:$0xf] }
  0x93   :  { %2749 = vmatpush.bf16.msra.mxu3 %v8733_v12  ;;  %2711 = vmatmul.bf16.vlgmr.msra.gmra.mxu0 %v13459_v24  ;;  %v9012_v12 = vld [vmem:[#allocation5 + $0x7b0] sm:$0xf]  ;;  %v12277_v47 = vld [vmem:[#allocation5 + $0x8d4] sm:$0xf0]  ;;  %v12255_v20 = vld [vmem:[#allocation5 + $0x824] sm:$0xf0] }
  0x94   :  { %2755 = vmatpush.bf16.msrb.mxu0 %v8853_v13  ;;  %2724 = vmatmul.bf16.vlgmr.msra.gmra.mxu1 %v13467_v29  ;;  %v12241_v13 = vld [vmem:[#allocation5 + $0x7b4] sm:$0xf0] }
  0x95   :  { %2768 = vmatpush.bf16.msrb.mxu1 %v8917_v14  ;;  %2737 = vmatmul.bf16.vlgmr.msra.gmra.mxu2 %v13463_v28  ;;  %v8821_v14 = vor.u32 %v12193_v6, %v8820_v5  ;;  %v9013_v25 = vor.u32 %v12241_v13, %v9012_v12  ;;  %v12281_v6 = vld [vmem:[#allocation5 + $0x8f4] sm:$0xf0]  ;;  %v8989_v13 = vor.u32 %v12235_v1, %v8988_v0  ;;  %v9276_v0 = vld [vmem:[#allocation5 + $0x9c0] sm:$0xf]  ;;  %v12307_v1 = vld [vmem:[#allocation5 + $0x9c4] sm:$0xf0] }
  0x96   :  { %2781 = vmatpush.bf16.msrb.mxu2 %v8981_v15  ;;  %2750 = vmatmul.bf16.vlgmr.msra.gmra.mxu3 %v13471_v18  ;;  %v8885_v15 = vor.u32 %v12209_v9, %v8884_v7  ;;  %v9236_v7 = vld [vmem:[#allocation5 + $0x970] sm:$0xf]  ;;  %v8861_v9 = vor.u32 %v12203_v56, %v8860_v53  ;;  %v12313_v12 = vld [vmem:[#allocation5 + $0x9f4] sm:$0xf0]  ;;  %v9084_v53 = vld [vmem:[#allocation5 + $0x840] sm:$0xf] }
  0x97   :  { %2794 = vmatpush.bf16.msrb.mxu3 %v9045_v23  ;;  %v8876_v23 = vld [vmem:[#allocation5 + $0x6a0] sm:$0xf] }
  0x98   :  { %2756 = vmatpush.bf16.msrb.mxu0 %v8845_v32  ;;  %v12239_v32 = vld [vmem:[#allocation5 + $0x7a4] sm:$0xf0] }
  0x99   :  { %2769 = vmatpush.bf16.msrb.mxu1 %v8909_v37  ;;  %v8877_v37 = vor.u32 %v12207_v26, %v8876_v23  ;;  %v9164_v23 = vld [vmem:[#allocation5 + $0x8e0] sm:$0xf]  ;;  %v13487_v26 = vpack.c.bf16 %v13477_v59, %v13477_v59  ;;  %v13499_v59 = vpack.c.bf16 %v13483_v63, %v13483_v63  ;;  %v9284_v63 = vld [vmem:[#allocation5 + $0x9d0] sm:$0xf] }
  0x9a   :  { %2782 = vmatpush.bf16.msrb.mxu2 %v8973_v38  ;;  %v8941_v38 = vor.u32 %v12223_v30, %v8940_v27  ;;  %v12279_v27 = vld [vmem:[#allocation5 + $0x8e4] sm:$0xf0]  ;;  %v9228_v30 = vld [vmem:[#allocation5 + $0x960] sm:$0xf] }
  0x9b   :  { %2795 = vmatpush.bf16.msrb.mxu3 %v9037_v21  ;;  %v9005_v21 = vor.u32 %v12239_v32, %v9004_v31  ;;  %v12295_v31 = vld [vmem:[#allocation5 + $0x964] sm:$0xf0]  ;;  %v13491_v32 = vpack.c.bf16 %v13479_v60, %v13479_v60  ;;  %v9165_v41 = vor.u32 %v12279_v27, %v9164_v23  ;;  %v12261_v60 = vld [vmem:[#allocation5 + $0x854] sm:$0xf0]  ;;  %v9132_v23 = vld [vmem:[#allocation5 + $0x8a0] sm:$0xf] }
  0x9c   :  { %2757 = vmatpush.bf16.msrb.mxu0 %v8837_v51  ;;  %v8796_v51 = vld [vmem:[#allocation5 + $0x600] sm:$0xf]  ;;  %v9229_v45 = vor.u32 %v12295_v31, %v9228_v30  ;;  %v12271_v27 = vld [vmem:[#allocation5 + $0x8a4] sm:$0xf0] }
  0x9d   :  { %2770 = vmatpush.bf16.msrb.mxu1 %v8901_v57  ;;  %v8924_v57 = vld [vmem:[#allocation5 + $0x700] sm:$0xf]  ;;  %v8797_v5 = vor.u32 %v12187_v52, %v8796_v51  ;;  %v9157_v51 = vor.u32 %v12277_v47, %v9156_v46  ;;  %v12287_v31 = vld [vmem:[#allocation5 + $0x924] sm:$0xf0]  ;;  %v9124_v46 = vld [vmem:[#allocation5 + $0x890] sm:$0xf] }
  0x9e   :  { %2783 = vmatpush.bf16.msrb.mxu2 %v8965_v58  ;;  %v12219_v58 = vld [vmem:[#allocation5 + $0x704] sm:$0xf0]  ;;  %v9196_v30 = vld [vmem:[#allocation5 + $0x920] sm:$0xf]  ;;  %v12269_v47 = vld [vmem:[#allocation5 + $0x894] sm:$0xf0] }
  0x9f   :  { %2796 = vmatpush.bf16.msrb.mxu3 %v9029_v61  ;;  %v8997_v61 = vor.u32 %v12237_v49, %v8996_v22  ;;  %v8925_v10 = vor.u32 %v12219_v58, %v8924_v57  ;;  %v12293_v22 = vld [vmem:[#allocation5 + $0x954] sm:$0xf0]  ;;  %v12275_v57 = vld [vmem:[#allocation5 + $0x8c4] sm:$0xf0]  ;;  %v9212_v58 = vld [vmem:[#allocation5 + $0x940] sm:$0xf] }
  0xa0   :  { %2758 = vmatpush.bf16.msrb.mxu0 %v8829_v2  ;;  %v9108_v2 = vld [vmem:[#allocation5 + $0x870] sm:$0xf]  ;;  %v12309_v49 = vld [vmem:[#allocation5 + $0x9d4] sm:$0xf0]  ;;  %v9221_v52 = vor.u32 %v12293_v22, %v9220_v48 }
  0xa1   :  { %2771 = vmatpush.bf16.msrb.mxu1 %v8893_v3  ;;  %v12265_v3 = vld [vmem:[#allocation5 + $0x874] sm:$0xf0]  ;;  %v9285_v56 = vor.u32 %v12309_v49, %v9284_v63  ;;  %v9188_v48 = vld [vmem:[#allocation5 + $0x910] sm:$0xf] }
  0xa2   :  { %2784 = vmatpush.bf16.msrb.mxu2 %v8957_v4  ;;  %v9172_v4 = vld [vmem:[#allocation5 + $0x8f0] sm:$0xf]  ;;  %v12285_v22 = vld [vmem:[#allocation5 + $0x914] sm:$0xf0] }
  0xa3   :  { %2797 = vmatpush.bf16.msrb.mxu3 %v9021_v8  ;;  %v12297_v8 = vld [vmem:[#allocation5 + $0x974] sm:$0xf0]  ;;  %v9252_v63 = vld [vmem:[#allocation5 + $0x990] sm:$0xf] }
  0xa4   :  { %2759 = vmatpush.bf16.msrb.mxu0 %v8821_v14  ;;  %v9109_v14 = vor.u32 %v12265_v3, %v9108_v2  ;;  %v12301_v49 = vld [vmem:[#allocation5 + $0x994] sm:$0xf0] }
  0xa5   :  { %2772 = vmatpush.bf16.msrb.mxu1 %v8885_v15  ;;  %v9173_v15 = vor.u32 %v12281_v6, %v9172_v4  ;;  %v12257_v6 = vld [vmem:[#allocation5 + $0x834] sm:$0xf0] }
  0xa6   :  { %2785 = vmatpush.bf16.msrb.mxu2 %v8949_v16  ;;  %v9237_v16 = vor.u32 %v12297_v8, %v9236_v7  ;;  %v9140_v7 = vld [vmem:[#allocation5 + $0x8b0] sm:$0xf]  ;;  %v9277_v8 = vor.u32 %v12307_v1, %v9276_v0  ;;  %v9253_v0 = vor.u32 %v12301_v49, %v9252_v63  ;;  %v12299_v1 = vld [vmem:[#allocation5 + $0x984] sm:$0xf0] }
  0xa7   :  { %2798 = vmatpush.bf16.msrb.mxu3 %v9013_v25  ;;  %v9301_v25 = vor.u32 %v12313_v12, %v9300_v11  ;;  %v12289_v11 = vld [vmem:[#allocation5 + $0x934] sm:$0xf0]  ;;  %v9268_v12 = vld [vmem:[#allocation5 + $0x9b0] sm:$0xf] }
  0xa8   :  { %2760 = vmatpush.bf16.msrb.mxu0 %v8813_v33  ;;  %v13495_v33 = vpack.c.bf16 %v13481_v62, %v13481_v62  ;;  %v9348_v49 = vld [vmem:[#allocation5 + $0xa50] sm:$0xf] }
  0xa9   :  { %2773 = vmatpush.bf16.msrb.mxu1 %v8877_v37  ;;  %v9292_v37 = vld [vmem:[#allocation5 + $0x9e0] sm:$0xf] }
  0xaa   :  { %2786 = vmatpush.bf16.msrb.mxu2 %v8941_v38  ;;  %v12311_v38 = vld [vmem:[#allocation5 + $0x9e4] sm:$0xf0] }
  0xab   :  { %2799 = vmatpush.bf16.msrb.mxu3 %v9005_v21  ;;  %v9092_v21 = vld [vmem:[#allocation5 + $0x850] sm:$0xf]  ;;  %v9293_v62 = vor.u32 %v12311_v38, %v9292_v37  ;;  %v9260_v37 = vld [vmem:[#allocation5 + $0x9a0] sm:$0xf]  ;;  %v12303_v38 = vld [vmem:[#allocation5 + $0x9a4] sm:$0xf0] }
  0xac   :  { %2761 = vmatpush.bf16.msrb.mxu0 %v8805_v50  ;;  %v9093_v50 = vor.u32 %v12261_v60, %v9092_v21  ;;  %v9060_v21 = vld [vmem:[#allocation5 + $0x810] sm:$0xf]  ;;  %v12253_v60 = vld [vmem:[#allocation5 + $0x814] sm:$0xf0] }
  0xad   :  { %2774 = vmatpush.bf16.msrb.mxu1 %v8869_v54  ;;  %v12259_v54 = vld [vmem:[#allocation5 + $0x844] sm:$0xf0] }
  0xae   :  { %2787 = vmatpush.bf16.msrb.mxu2 %v8933_v55  ;;  %v9148_v55 = vld [vmem:[#allocation5 + $0x8c0] sm:$0xf]  ;;  %v9085_v2 = vor.u32 %v12259_v54, %v9084_v53  ;;  %v12267_v54 = vld [vmem:[#allocation5 + $0x884] sm:$0xf0] }
  0xaf   :  { %2800 = vmatpush.bf16.msrb.mxu3 %v8997_v61  ;;  %v12291_v61 = vld [vmem:[#allocation5 + $0x944] sm:$0xf0]  ;;  %v9149_v3 = vor.u32 %v12275_v57, %v9148_v55  ;;  %v9116_v53 = vld [vmem:[#allocation5 + $0x880] sm:$0xf]  ;;  %v9125_v55 = vor.u32 %v12269_v47, %v9124_v46 }
  0xb0   :  { %2762 = vmatpush.bf16.msrb.mxu0 %v8797_v5  ;;  %v9213_v4 = vor.u32 %v12291_v61, %v9212_v58  ;;  %v9076_v5 = vld [vmem:[#allocation5 + $0x830] sm:$0xf]  ;;  %v9180_v57 = vld [vmem:[#allocation5 + $0x900] sm:$0xf]  ;;  %v12283_v58 = vld [vmem:[#allocation5 + $0x904] sm:$0xf0] }
  0xb1   :  { %2775 = vmatpush.bf16.msrb.mxu1 %v8861_v9  ;;  %v12273_v9 = vld [vmem:[#allocation5 + $0x8b4] sm:$0xf0]  ;;  %v9244_v61 = vld [vmem:[#allocation5 + $0x980] sm:$0xf] }
  0xb2   :  { %2788 = vmatpush.bf16.msrb.mxu2 %v8925_v10  ;;  %v9204_v10 = vld [vmem:[#allocation5 + $0x930] sm:$0xf]  ;;  %v9548_v46 = vld [vmem:[#allocation5 + $0xbe0] sm:$0xf] }
  0xb3   :  { %2801 = vmatpush.bf16.msrb.mxu3 %v8989_v13  ;;  %2763 = vmatmul.bf16.vlgmr.msrb.gmra.mxu0 %v13487_v26  ;;  %v12305_v13 = vld [vmem:[#allocation5 + $0x9b4] sm:$0xf0] }
  0xb4   :  { %2807 = vmatpush.bf16.msra.mxu0 %v9109_v14  ;;  %2776 = vmatmul.bf16.vlgmr.msrb.gmra.mxu1 %v13495_v33  ;;  %v9077_v14 = vor.u32 %v12257_v6, %v9076_v5  ;;  %v12345_v5 = vld [vmem:[#allocation5 + $0xaf4] sm:$0xf0]  ;;  %v9492_v6 = vld [vmem:[#allocation5 + $0xb70] sm:$0xf] }
  0xb5   :  { %2820 = vmatpush.bf16.msra.mxu1 %v9173_v15  ;;  %2789 = vmatmul.bf16.vlgmr.msrb.gmra.mxu2 %v13491_v32  ;;  %v9141_v15 = vor.u32 %v12273_v9, %v9140_v7  ;;  %v9556_v9 = vld [vmem:[#allocation5 + $0xbf0] sm:$0xf] }
  0xb6   :  { %2833 = vmatpush.bf16.msra.mxu2 %v9237_v16  ;;  %2802 = vmatmul.bf16.vlgmr.msrb.gmra.mxu3 %v13499_v59  ;;  %v9205_v16 = vor.u32 %v12289_v11, %v9204_v10  ;;  %v12377_v10 = vld [vmem:[#allocation5 + $0xbf4] sm:$0xf0]  ;;  %v9117_v11 = vor.u32 %v12267_v54, %v9116_v53  ;;  %v9476_v54 = vld [vmem:[#allocation5 + $0xb50] sm:$0xf] }
  0xb7   :  { %2846 = vmatpush.bf16.msra.mxu3 %v9301_v25  ;;  %v9269_v25 = vor.u32 %v12305_v13, %v9268_v12  ;;  %v9181_v12 = vor.u32 %v12283_v58, %v9180_v57  ;;  %v233_v13 = vld.sshfl [vmem:[#allocation1] sm:$0xff pattern:$0x73625140]  ;;  %v12341_v53 = vld [vmem:[#allocation5 + $0xad4] sm:$0xf0] }
  0xb8   :  { %2808 = vmatpush.bf16.msra.mxu0 %v9101_v19  ;;  %v9069_v19 = vor.u32 %v12255_v20, %v9068_v17  ;;  %v234_v17 = vld.sshfl [vmem:[#allocation1 + $0x8] sm:$0xff pattern:$0x73625140]  ;;  %v236_v20 = vld.sshfl [vmem:[#allocation1 + $0x18] sm:$0xff pattern:$0x73625140] }
  0xb9   :  { %2821 = vmatpush.bf16.msra.mxu1 %v9165_v41  ;;  %v9133_v41 = vor.u32 %v12271_v27, %v9132_v23  ;;  %v9356_v27 = vld [vmem:[#allocation5 + $0xa60] sm:$0xf]  ;;  %v13511_v47 = vpack.c.bf16 %v236_v20, %v236_v20  ;;  %v12373_v57 = vld [vmem:[#allocation5 + $0xbd4] sm:$0xf0]  ;;  %v9460_v20 = vld [vmem:[#allocation5 + $0xb30] sm:$0xf] }
  0xba   :  { %2834 = vmatpush.bf16.msra.mxu2 %v9229_v45  ;;  %v9197_v45 = vor.u32 %v12287_v31, %v9196_v30  ;;  %v12327_v30 = vld [vmem:[#allocation5 + $0xa64] sm:$0xf0]  ;;  %v9420_v31 = vld [vmem:[#allocation5 + $0xae0] sm:$0xf] }
  0xbb   :  { %2847 = vmatpush.bf16.msra.mxu3 %v9293_v62  ;;  %v9261_v62 = vor.u32 %v12303_v38, %v9260_v37  ;;  %v9557_v37 = vor.u32 %v12377_v10, %v9556_v9  ;;  %v13505_v38 = vpack.c.bf16 %v233_v13, %v233_v13  ;;  %v12371_v9 = vld [vmem:[#allocation5 + $0xbc4] sm:$0xf0]  ;;  %v9332_v13 = vld [vmem:[#allocation5 + $0xa30] sm:$0xf] }
  0xbc   :  { %2809 = vmatpush.bf16.msra.mxu0 %v9093_v50  ;;  %v9052_v50 = vld [vmem:[#allocation5 + $0x800] sm:$0xf] }
  0xbd   :  { %2822 = vmatpush.bf16.msra.mxu1 %v9157_v51  ;;  %v9061_v51 = vor.u32 %v12253_v60, %v9060_v21  ;;  %v13509_v60 = vpack.c.bf16 %v234_v17, %v234_v17  ;;  %v12337_v17 = vld [vmem:[#allocation5 + $0xab4] sm:$0xf0] }
  0xbe   :  { %2835 = vmatpush.bf16.msra.mxu2 %v9221_v52  ;;  %v12251_v52 = vld [vmem:[#allocation5 + $0x804] sm:$0xf0] }
  0xbf   :  { %2848 = vmatpush.bf16.msra.mxu3 %v9285_v56  ;;  %v9189_v56 = vor.u32 %v12285_v22, %v9188_v48  ;;  %v9053_v7 = vor.u32 %v12251_v52, %v9052_v50  ;;  %v9357_v48 = vor.u32 %v12327_v30, %v9356_v27  ;;  %v12325_v50 = vld [vmem:[#allocation5 + $0xa54] sm:$0xf0] }
  0xc0   :  { %2810 = vmatpush.bf16.msra.mxu0 %v9085_v2  ;;  %v9364_v2 = vld [vmem:[#allocation5 + $0xa70] sm:$0xf]  ;;  %v9349_v58 = vor.u32 %v12325_v50, %v9348_v49  ;;  %v12369_v27 = vld [vmem:[#allocation5 + $0xbb4] sm:$0xf0]  ;;  %v9516_v49 = vld [vmem:[#allocation5 + $0xba0] sm:$0xf] }
  0xc1   :  { %2823 = vmatpush.bf16.msra.mxu1 %v9149_v3  ;;  %v12329_v3 = vld [vmem:[#allocation5 + $0xa74] sm:$0xf0]  ;;  %v12367_v50 = vld [vmem:[#allocation5 + $0xba4] sm:$0xf0] }
  0xc2   :  { %2836 = vmatpush.bf16.msra.mxu2 %v9213_v4  ;;  %v9428_v4 = vld [vmem:[#allocation5 + $0xaf0] sm:$0xf] }
  0xc3   :  { %2849 = vmatpush.bf16.msra.mxu3 %v9277_v8  ;;  %v12361_v8 = vld [vmem:[#allocation5 + $0xb74] sm:$0xf0]  ;;  %v9429_v23 = vor.u32 %v12345_v5, %v9428_v4  ;;  %v12339_v5 = vld [vmem:[#allocation5 + $0xac4] sm:$0xf0] }
  0xc4   :  { %2811 = vmatpush.bf16.msra.mxu0 %v9077_v14  ;;  %v235_v14 = vld.sshfl [vmem:[#allocation1 + $0x10] sm:$0xff pattern:$0x73625140] }
  0xc5   :  { %2824 = vmatpush.bf16.msra.mxu1 %v9141_v15  ;;  %v9245_v15 = vor.u32 %v12299_v1, %v9244_v61  ;;  %v13507_v21 = vpack.c.bf16 %v235_v14, %v235_v14  ;;  %v9340_v1 = vld [vmem:[#allocation5 + $0xa40] sm:$0xf]  ;;  %v12321_v14 = vld [vmem:[#allocation5 + $0xa34] sm:$0xf0] }
  0xc6   :  { %2837 = vmatpush.bf16.msra.mxu2 %v9205_v16  ;;  %v9365_v16 = vor.u32 %v12329_v3, %v9364_v2  ;;  %v12323_v2 = vld [vmem:[#allocation5 + $0xa44] sm:$0xf0]  ;;  %v9404_v3 = vld [vmem:[#allocation5 + $0xac0] sm:$0xf]  ;;  %v9333_v30 = vor.u32 %v12321_v14, %v9332_v13 }
  0xc7   :  { %2850 = vmatpush.bf16.msra.mxu3 %v9269_v25  ;;  %v9493_v25 = vor.u32 %v12361_v8, %v9492_v6  ;;  %v9468_v6 = vld [vmem:[#allocation5 + $0xb40] sm:$0xf]  ;;  %v9341_v10 = vor.u32 %v12323_v2, %v9340_v1  ;;  %v12349_v1 = vld [vmem:[#allocation5 + $0xb14] sm:$0xf0]  ;;  %v9508_v2 = vld [vmem:[#allocation5 + $0xb90] sm:$0xf] }
  0xc8   :  { %2812 = vmatpush.bf16.msra.mxu0 %v9069_v19  ;;  %v12343_v19 = vld [vmem:[#allocation5 + $0xae4] sm:$0xf0]  ;;  %v9532_v8 = vld [vmem:[#allocation5 + $0xbc0] sm:$0xf] }
  0xc9   :  { %2825 = vmatpush.bf16.msra.mxu1 %v9133_v41  ;;  %v9484_v41 = vld [vmem:[#allocation5 + $0xb60] sm:$0xf]  ;;  %v9421_v22 = vor.u32 %v12343_v19, %v9420_v31  ;;  %v12347_v13 = vld [vmem:[#allocation5 + $0xb04] sm:$0xf0] }
  0xca   :  { %2838 = vmatpush.bf16.msra.mxu2 %v9197_v45  ;;  %v12359_v45 = vld [vmem:[#allocation5 + $0xb64] sm:$0xf0]  ;;  %v9324_v31 = vld [vmem:[#allocation5 + $0xa20] sm:$0xf] }
  0xcb   :  { %2851 = vmatpush.bf16.msra.mxu3 %v9261_v62  ;;  %v12375_v62 = vld [vmem:[#allocation5 + $0xbe4] sm:$0xf0]  ;;  %v9485_v63 = vor.u32 %v12359_v45, %v9484_v41  ;;  %v9388_v45 = vld [vmem:[#allocation5 + $0xaa0] sm:$0xf] }
  0xcc   :  { %2813 = vmatpush.bf16.msra.mxu0 %v9061_v51  ;;  %v9412_v51 = vld [vmem:[#allocation5 + $0xad0] sm:$0xf]  ;;  %v9549_v52 = vor.u32 %v12375_v62, %v9548_v46  ;;  %v12319_v41 = vld [vmem:[#allocation5 + $0xa24] sm:$0xf0]  ;;  %v9500_v14 = vld [vmem:[#allocation5 + $0xb80] sm:$0xf] }
  0xcd   :  { %2826 = vmatpush.bf16.msra.mxu1 %v9125_v55  ;;  %v12357_v55 = vld [vmem:[#allocation5 + $0xb54] sm:$0xf0]  ;;  %v9413_v61 = vor.u32 %v12341_v53, %v9412_v51  ;;  %v12335_v46 = vld [vmem:[#allocation5 + $0xaa4] sm:$0xf0]  ;;  %v9325_v51 = vor.u32 %v12319_v41, %v9324_v31  ;;  %v12056_v41 = vld [vmem:[#allocation5 + $0x1f4] sm:$0xf] }
  0xce   :  { %2839 = vmatpush.bf16.msra.mxu2 %v9189_v56  ;;  %v9540_v56 = vld [vmem:[#allocation5 + $0xbd0] sm:$0xf]  ;;  %v9389_v53 = vor.u32 %v12335_v46, %v9388_v45  ;;  %v8278_v45 = vld [vmem:[#allocation5 + $0x1f8] sm:$0xf0] }
  0xcf   :  { %2852 = vmatpush.bf16.msra.mxu3 %v9253_v0  ;;  %v9477_v0 = vor.u32 %v12357_v55, %v9476_v54  ;;  %v9541_v4 = vor.u32 %v12373_v57, %v9540_v56  ;;  %v12317_v55 = vld [vmem:[#allocation5 + $0xa14] sm:$0xf0]  ;;  %v9380_v56 = vld [vmem:[#allocation5 + $0xa90] sm:$0xf] }
  0xd0   :  { %2814 = vmatpush.bf16.msra.mxu0 %v9053_v7  ;;  %v12355_v7 = vld [vmem:[#allocation5 + $0xb44] sm:$0xf0] }
  0xd1   :  { %2827 = vmatpush.bf16.msra.mxu1 %v9117_v11  ;;  %v9405_v11 = vor.u32 %v12339_v5, %v9404_v3  ;;  %v12365_v3 = vld [vmem:[#allocation5 + $0xb94] sm:$0xf0] }
  0xd2   :  { %2840 = vmatpush.bf16.msra.mxu2 %v9181_v12  ;;  %v9469_v12 = vor.u32 %v12355_v7, %v9468_v6  ;;  %v12315_v6 = vld [vmem:[#allocation5 + $0xa04] sm:$0xf0]  ;;  %v9372_v7 = vld [vmem:[#allocation5 + $0xa80] sm:$0xf] }
  0xd3   :  { %2853 = vmatpush.bf16.msra.mxu3 %v9245_v15  ;;  %2815 = vmatmul.bf16.vlgmr.msra.gmra.mxu0 %v13505_v38  ;;  %v9396_v15 = vld [vmem:[#allocation5 + $0xab0] sm:$0xf] }
  0xd4   :  { %2859 = vmatpush.bf16.msrb.mxu0 %v9365_v16  ;;  %2828 = vmatmul.bf16.vlgmr.msra.gmra.mxu1 %v13509_v60  ;;  %v9533_v16 = vor.u32 %v12371_v9, %v9532_v8  ;;  %v12331_v8 = vld [vmem:[#allocation5 + $0xa84] sm:$0xf0] }
  0xd5   :  { %2872 = vmatpush.bf16.msrb.mxu1 %v9429_v23  ;;  %2841 = vmatmul.bf16.vlgmr.msra.gmra.mxu2 %v13507_v21  ;;  %v12353_v23 = vld [vmem:[#allocation5 + $0xb34] sm:$0xf0] }
  0xd6   :  { %2885 = vmatpush.bf16.msrb.mxu2 %v9493_v25  ;;  %2854 = vmatmul.bf16.vlgmr.msra.gmra.mxu3 %v13511_v47  ;;  %v9524_v25 = vld [vmem:[#allocation5 + $0xbb0] sm:$0xf]  ;;  %v9461_v19 = vor.u32 %v12353_v23, %v9460_v20  ;;  %v12008_v20 = vld [vmem:[#allocation5 + $0x74] sm:$0xf]  ;;  %v8086_v23 = vld [vmem:[#allocation5 + $0x78] sm:$0xf0] }
  0xd7   :  { %2898 = vmatpush.bf16.msrb.mxu3 %v9557_v37  ;;  %v9397_v37 = vor.u32 %v12337_v17, %v9396_v15  ;;  %v9525_v62 = vor.u32 %v12369_v27, %v9524_v25  ;;  %v2608_v9 = vpop.f32.mrf.mxu0  ;;  %v12363_v17 = vld [vmem:[#allocation5 + $0xb84] sm:$0xf0]  ;;  %v12024_v25 = vld [vmem:[#allocation5 + $0xf4] sm:$0xf]  ;;  %v8150_v27 = vld [vmem:[#allocation5 + $0xf8] sm:$0xf0] }
  0xd8   :  { %2860 = vmatpush.bf16.msrb.mxu0 %v9357_v48  ;;  %v9452_v48 = vld [vmem:[#allocation5 + $0xb20] sm:$0xf] }
  0xd9   :  { %2873 = vmatpush.bf16.msrb.mxu1 %v9421_v22  ;;  %v12351_v22 = vld [vmem:[#allocation5 + $0xb24] sm:$0xf0] }
  0xda   :  { %2886 = vmatpush.bf16.msrb.mxu2 %v9485_v63  ;;  %v673_v63 = vld [vmem:[#allocation7] sm:$0x3]  ;;  %v9453_v54 = vor.u32 %v12351_v22, %v9452_v48  ;;  %v237_v22 = vld.sshfl [vmem:[#allocation1 + $0x20] sm:$0xff pattern:$0x73625140] }
  0xdb   :  { %2899 = vmatpush.bf16.msrb.mxu3 %v9549_v52  ;;  %v9316_v52 = vld [vmem:[#allocation5 + $0xa10] sm:$0xf]  ;;  %v675_v57 = vperm.slane %v673_v63, 0  ;;  %v2621_v31 = vpop.f32.mrf.mxu1  ;;  %v239_v63 = vld.sshfl [vmem:[#allocation1 + $0x30] sm:$0xff pattern:$0x73625140] }
  0xdc   :  { %2861 = vmatpush.bf16.msrb.mxu0 %v9349_v58  ;;  %v9517_v58 = vor.u32 %v12367_v50, %v9516_v49  ;;  %v9317_v5 = vor.u32 %v12317_v55, %v9316_v52  ;;  %v9501_v49 = vor.u32 %v12363_v17, %v9500_v14  ;;  %v8089_v50 = vor.u32 %v12008_v20, %v8086_v23  ;;  %v240_v52 = vld.sshfl [vmem:[#allocation1 + $0x38] sm:$0xff pattern:$0x73625140]  ;;  %v8070_v17 = vld [vmem:[#allocation5 + $0x58] sm:$0xf0] }
  0xdd   :  { %2874 = vmatpush.bf16.msrb.mxu1 %v9413_v61  ;;  %v12333_v61 = vld [vmem:[#allocation5 + $0xa94] sm:$0xf0]  ;;  %v2609_v15 = vadd.f32 %v2608_v9, %v675_v57  ;;  %v8078_v57 = vld [vmem:[#allocation5 + $0x68] sm:$0xf0]  ;;  %v12054_v9 = vld [vmem:[#allocation5 + $0x1e4] sm:$0xf] }
  0xde   :  { %2887 = vmatpush.bf16.msrb.mxu2 %v9477_v0  ;;  %v9444_v0 = vld [vmem:[#allocation5 + $0xb10] sm:$0xf]  ;;  %v12020_v20 = vld [vmem:[#allocation5 + $0xd4] sm:$0xf] }
  0xdf   :  { %2900 = vmatpush.bf16.msrb.mxu3 %v9541_v4  ;;  %v9308_v4 = vld [vmem:[#allocation5 + $0xa00] sm:$0xf]  ;;  %v2622_v46 = vadd.f32 %v2621_v31, %v2609_v15  ;;  %v8198_v31 = vld [vmem:[#allocation5 + $0x158] sm:$0xf0] }
  0xe0   :  { %2862 = vmatpush.bf16.msrb.mxu0 %v9341_v10  ;;  %v9381_v10 = vor.u32 %v12333_v61, %v9380_v56  ;;  %v12006_v56 = vld [vmem:[#allocation5 + $0x64] sm:$0xf] }
  0xe1   :  { %2875 = vmatpush.bf16.msrb.mxu1 %v9405_v11  ;;  %v9445_v11 = vor.u32 %v12349_v1, %v9444_v0  ;;  %v2647_v0 = vpop.f32.mrf.mxu3  ;;  %v8281_v1 = vor.u32 %v12056_v41, %v8278_v45 }
  0xe2   :  { %2888 = vmatpush.bf16.msrb.mxu2 %v9469_v12  ;;  %v9436_v12 = vld [vmem:[#allocation5 + $0xb00] sm:$0xf] }
  0xe3   :  { %2901 = vmatpush.bf16.msrb.mxu3 %v9533_v16  ;;  %v9509_v16 = vor.u32 %v12365_v3, %v9508_v2  ;;  %v9437_v48 = vor.u32 %v12347_v13, %v9436_v12  ;;  %v13517_v2 = vpack.c.bf16 %v237_v22, %v237_v22  ;;  %v8142_v3 = vld [vmem:[#allocation5 + $0xe8] sm:$0xf0]  ;;  %v13523_v12 = vpack.c.bf16 %v240_v52, %v240_v52  ;;  %v2623_v23 = vpop.f32.mrf.mxu1  ;;  %v12034_v52 = vld [vmem:[#allocation5 + $0x144] sm:$0xf] }
  0xe4   :  { %2863 = vmatpush.bf16.msrb.mxu0 %v9333_v30  ;;  %v12040_v30 = vld [vmem:[#allocation5 + $0x174] sm:$0xf]  ;;  %v8081_v13 = vor.u32 %v12006_v56, %v8078_v57  ;;  %v8062_v22 = vld [vmem:[#allocation5 + $0x48] sm:$0xf0] }
  0xe5   :  { %2876 = vmatpush.bf16.msrb.mxu1 %v9397_v37  ;;  %v9309_v37 = vor.u32 %v12315_v6, %v9308_v4  ;;  %v12038_v4 = vld [vmem:[#allocation5 + $0x164] sm:$0xf]  ;;  %v2610_v6 = vpop.f32.mrf.mxu0 }
  0xe6   :  { %2889 = vmatpush.bf16.msrb.mxu2 %v9461_v19  ;;  %v8214_v19 = vld [vmem:[#allocation5 + $0x178] sm:$0xf0] }
  0xe7   :  { %2902 = vmatpush.bf16.msrb.mxu3 %v9525_v62  ;;  %v9373_v62 = vor.u32 %v12331_v8, %v9372_v7  ;;  %v8217_v55 = vor.u32 %v12040_v30, %v8214_v19  ;;  %v13519_v7 = vpack.c.bf16 %v239_v63, %v239_v63  ;;  %v12036_v30 = vld [vmem:[#allocation5 + $0x154] sm:$0xf]  ;;  %v8262_v19 = vld [vmem:[#allocation5 + $0x1d8] sm:$0xf0]  ;;  %v12018_v63 = vld [vmem:[#allocation5 + $0xc4] sm:$0xf] }
  0xe8   :  { %2864 = vmatpush.bf16.msrb.mxu0 %v9325_v51  ;;  %v238_v51 = vld.sshfl [vmem:[#allocation1 + $0x28] sm:$0xff pattern:$0x73625140] }
  0xe9   :  { %2877 = vmatpush.bf16.msrb.mxu1 %v9389_v53  ;;  %v2634_v53 = vpop.f32.mrf.mxu2  ;;  %v13521_v8 = vpack.c.bf16 %v238_v51, %v238_v51  ;;  %v8126_v51 = vld [vmem:[#allocation5 + $0xc8] sm:$0xf0] }
  0xea   :  { %2890 = vmatpush.bf16.msrb.mxu2 %v9453_v54  ;;  %v8153_v54 = vor.u32 %v12024_v25, %v8150_v27  ;;  %v2635_v61 = vadd.f32 %v2634_v53, %v2622_v46  ;;  %v8134_v27 = vld [vmem:[#allocation5 + $0xd8] sm:$0xf0]  ;;  %v8190_v53 = vld [vmem:[#allocation5 + $0x148] sm:$0xf0] }
  0xeb   :  { %2903 = vmatpush.bf16.msrb.mxu3 %v9517_v58  ;;  %v12022_v58 = vld [vmem:[#allocation5 + $0xe4] sm:$0xf]  ;;  %v8137_v46 = vor.u32 %v12020_v20, %v8134_v27  ;;  %v8046_v27 = vld [vmem:[#allocation5 + $0x28] sm:$0xf0] }
  0xec   :  { %2865 = vmatpush.bf16.msrb.mxu0 %v9317_v5  ;;  %v8206_v5 = vld [vmem:[#allocation5 + $0x168] sm:$0xf0]  ;;  %v8145_v14 = vor.u32 %v12022_v58, %v8142_v3  ;;  %v8129_v58 = vor.u32 %v12018_v63, %v8126_v51  ;;  %v12016_v3 = vld [vmem:[#allocation5 + $0xb4] sm:$0xf] }
  0xed   :  { %2878 = vmatpush.bf16.msrb.mxu1 %v9381_v10  ;;  %v8270_v10 = vld [vmem:[#allocation5 + $0x1e8] sm:$0xf0]  ;;  %v8209_v15 = vor.u32 %v12038_v4, %v8206_v5 }
  0xee   :  { %2891 = vmatpush.bf16.msrb.mxu2 %v9445_v11  ;;  %v2648_v11 = vadd.f32 %v2647_v0, %v2635_v61  ;;  %v8273_v25 = vor.u32 %v12054_v9, %v8270_v10  ;;  %v8193_v61 = vor.u32 %v12034_v52, %v8190_v53  ;;  %v12000_v0 = vld [vmem:[#allocation5 + $0x34] sm:$0xf]  ;;  %v8118_v9 = vld [vmem:[#allocation5 + $0xb8] sm:$0xf0] }
  0xef   :  { %2904 = vmatpush.bf16.msrb.mxu3 %v9509_v16  ;;  %v12004_v16 = vld [vmem:[#allocation5 + $0x54] sm:$0xf]  ;;  %v8121_v20 = vor.u32 %v12016_v3, %v8118_v9  ;;  %v8038_v53 = vld [vmem:[#allocation5 + $0x18] sm:$0xf0] }
  0xf0   :  { %2866 = vmatpush.bf16.msrb.mxu0 %v9309_v37  ;;  %v12052_v37 = vld [vmem:[#allocation5 + $0x1d4] sm:$0xf]  ;;  %v8073_v41 = vor.u32 %v12004_v16, %v8070_v17  ;;  %v2660_v57 = vpop.f32.mrf.mxu0 }
  0xf1   :  { %2879 = vmatpush.bf16.msrb.mxu1 %v9373_v62  ;;  %v2636_v45 = vpop.f32.mrf.mxu2  ;;  %v8201_v62 = vor.u32 %v12036_v30, %v8198_v31  ;;  %v2661_v4 = vadd.f32 %v2660_v57, %v2648_v11  ;;  %v2673_v5 = vpop.f32.mrf.mxu1  ;;  %v12032_v10 = vld [vmem:[#allocation5 + $0x134] sm:$0xf]  ;;  %v12014_v30 = vld [vmem:[#allocation5 + $0xa4] sm:$0xf]  ;;  %v8102_v57 = vld [vmem:[#allocation5 + $0x98] sm:$0xf0] }
  0xf2   :  { %2892 = vmatpush.bf16.msrb.mxu2 %v9437_v48  ;;  %v12002_v48 = vld [vmem:[#allocation5 + $0x44] sm:$0xf]  ;;  %v11996_v52 = vld [vmem:[#allocation5 + $0x14] sm:$0xf] }
  0xf3   :  { %2905 = vmatpush.bf16.msrb.mxu3 %v9501_v49  ;;  %2867 = vmatmul.bf16.vlgmr.msrb.gmra.mxu0 %v13517_v2  ;;  %v2649_v49 = vpop.f32.mrf.mxu3  ;;  %v8065_v56 = vor.u32 %v12002_v48, %v8062_v22  ;;  %v2674_v16 = vadd.f32 %v2673_v5, %v2661_v4  ;;  %v8238_v48 = vld [vmem:[#allocation5 + $0x1a8] sm:$0xf0]  ;;  %v8041_v3 = vor.u32 %v11996_v52, %v8038_v53  ;;  %v11994_v4 = vld [vmem:[#allocation5 + $0x4] sm:$0xf] }
  0xf4   :  { %2911 = vmatpush.bf16.msra.mxu0 %v8089_v50  ;;  %2880 = vmatmul.bf16.vlgmr.msrb.gmra.mxu1 %v13521_v8  ;;  %v8265_v50 = vor.u32 %v12052_v37, %v8262_v19  ;;  %v8110_v37 = vld [vmem:[#allocation5 + $0xa8] sm:$0xf0]  ;;  %v12030_v19 = vld [vmem:[#allocation5 + $0x124] sm:$0xf] }
  0xf5   :  { %2924 = vmatpush.bf16.msra.mxu1 %v8153_v54  ;;  %2893 = vmatmul.bf16.vlgmr.msrb.gmra.mxu2 %v13519_v7  ;;  %v12050_v54 = vld [vmem:[#allocation5 + $0x1c4] sm:$0xf]  ;;  %v8030_v5 = vld [vmem:[#allocation5 + $0x8] sm:$0xf0] }
  0xf6   :  { %2937 = vmatpush.bf16.msra.mxu2 %v8217_v55  ;;  %2906 = vmatmul.bf16.vlgmr.msrb.gmra.mxu3 %v13523_v12  ;;  %v8254_v55 = vld [vmem:[#allocation5 + $0x1c8] sm:$0xf0]  ;;  %v12070_v52 = vld [vmem:[#allocation5 + $0x264] sm:$0xf] }
  0xf7   :  { %2950 = vmatpush.bf16.msra.mxu3 %v8281_v1  ;;  %v8054_v1 = vld [vmem:[#allocation5 + $0x38] sm:$0xf0]  ;;  %v8257_v6 = vor.u32 %v12050_v54, %v8254_v55  ;;  %v12012_v54 = vld [vmem:[#allocation5 + $0x94] sm:$0xf]  ;;  %v8334_v53 = vld [vmem:[#allocation5 + $0x268] sm:$0xf0] }
  0xf8   :  { %2912 = vmatpush.bf16.msra.mxu0 %v8081_v13  ;;  %v8182_v13 = vld [vmem:[#allocation5 + $0x138] sm:$0xf0]  ;;  %v8057_v17 = vor.u32 %v12000_v0, %v8054_v1  ;;  %v2662_v49 = vpop.f32.mrf.mxu0  ;;  %v12044_v0 = vld [vmem:[#allocation5 + $0x194] sm:$0xf] }
  0xf9   :  { %2925 = vmatpush.bf16.msra.mxu1 %v8145_v14  ;;  %v12048_v14 = vld [vmem:[#allocation5 + $0x1b4] sm:$0xf]  ;;  %v8185_v23 = vor.u32 %v12032_v10, %v8182_v13  ;;  %v2686_v31 = vpop.f32.mrf.mxu2  ;;  %v2675_v55 = vpop.f32.mrf.mxu1  ;;  %v8230_v1 = vld [vmem:[#allocation5 + $0x198] sm:$0xf0]  ;;  %v12010_v10 = vld [vmem:[#allocation5 + $0x84] sm:$0xf] }
  0xfa   :  { %2938 = vmatpush.bf16.msra.mxu2 %v8209_v15  ;;  %v8246_v15 = vld [vmem:[#allocation5 + $0x1b8] sm:$0xf0]  ;;  %v2687_v45 = vadd.f32 %v2686_v31, %v2674_v16  ;;  %v8094_v13 = vld [vmem:[#allocation5 + $0x88] sm:$0xf0]  ;;  %v8233_v16 = vor.u32 %v12044_v0, %v8230_v1  ;;  %v12088_v31 = vld [vmem:[#allocation5 + $0x2f4] sm:$0xf]  ;;  %v8337_v1 = vor.u32 %v12070_v52, %v8334_v53 }
  0xfb   :  { %2951 = vmatpush.bf16.msra.mxu3 %v8273_v25  ;;  %v11998_v25 = vld [vmem:[#allocation5 + $0x24] sm:$0xf]  ;;  %v8249_v11 = vor.u32 %v12048_v14, %v8246_v15  ;;  %v8526_v0 = vld [vmem:[#allocation5 + $0x3e8] sm:$0xf0]  ;;  %v8374_v53 = vld [vmem:[#allocation5 + $0x2b8] sm:$0xf0] }
  0xfc   :  { %2913 = vmatpush.bf16.msra.mxu0 %v8073_v41  ;;  %v8174_v41 = vld [vmem:[#allocation5 + $0x128] sm:$0xf0]  ;;  %v8049_v22 = vor.u32 %v11998_v25, %v8046_v27  ;;  %v12026_v14 = vld [vmem:[#allocation5 + $0x104] sm:$0xf]  ;;  %v12072_v27 = vld [vmem:[#allocation5 + $0x274] sm:$0xf] }
  0xfd   :  { %2926 = vmatpush.bf16.msra.mxu1 %v8137_v46  ;;  %v2699_v46 = vpop.f32.mrf.mxu3  ;;  %v8177_v51 = vor.u32 %v12030_v19, %v8174_v41  ;;  %v12104_v19 = vld [vmem:[#allocation5 + $0x374] sm:$0xf]  ;;  %v8470_v41 = vld [vmem:[#allocation5 + $0x378] sm:$0xf0] }
  0xfe   :  { %2939 = vmatpush.bf16.msra.mxu2 %v8201_v62  ;;  %v12046_v62 = vld [vmem:[#allocation5 + $0x1a4] sm:$0xf]  ;;  %v13529_v63 = vadd.f32 %v2699_v46, %v2687_v45  ;;  %v8097_v45 = vor.u32 %v12010_v10, %v8094_v13  ;;  %v8390_v13 = vld [vmem:[#allocation5 + $0x2d8] sm:$0xf0] }
  0xff   :  { %2952 = vmatpush.bf16.msra.mxu3 %v8265_v50  ;;  %v8113_v50 = vor.u32 %v12014_v30, %v8110_v37  ;;  %v8342_v30 = vld [vmem:[#allocation5 + $0x278] sm:$0xf0] }
 0x100   :  { %2914 = vmatpush.bf16.msra.mxu0 %v8065_v56  ;;  %v8241_v56 = vor.u32 %v12046_v62, %v8238_v48  ;;  %v8406_v37 = vld [vmem:[#allocation5 + $0x2f8] sm:$0xf0]  ;;  %v12120_v62 = vld [vmem:[#allocation5 + $0x3f4] sm:$0xf]  ;;  %v8345_v49 = vor.u32 %v12072_v27, %v8342_v30  ;;  %v12066_v27 = vld [vmem:[#allocation5 + $0x244] sm:$0xf] }
 0x101   :  { %2927 = vmatpush.bf16.msra.mxu1 %v8129_v58  ;;  %v12028_v58 = vld [vmem:[#allocation5 + $0x114] sm:$0xf]  ;;  %v2688_v15 = vpop.f32.mrf.mxu2  ;;  %v8534_v48 = vld [vmem:[#allocation5 + $0x3f8] sm:$0xf0]  ;;  %v8318_v30 = vld [vmem:[#allocation5 + $0x248] sm:$0xf0] }
 0x102   :  { %2940 = vmatpush.bf16.msra.mxu2 %v8193_v61  ;;  %v8166_v61 = vld [vmem:[#allocation5 + $0x118] sm:$0xf0]  ;;  %v8537_v55 = vor.u32 %v12120_v62, %v8534_v48 }
 0x103   :  { %2953 = vmatpush.bf16.msra.mxu3 %v8257_v6  ;;  %v8105_v6 = vor.u32 %v12012_v54, %v8102_v57  ;;  %v8169_v9 = vor.u32 %v12028_v58, %v8166_v61  ;;  %v12086_v54 = vld [vmem:[#allocation5 + $0x2e4] sm:$0xf]  ;;  %v8462_v58 = vld [vmem:[#allocation5 + $0x368] sm:$0xf0]  ;;  %v8454_v15 = vld [vmem:[#allocation5 + $0x358] sm:$0xf0] }
 0x104   :  { %2915 = vmatpush.bf16.msra.mxu0 %v8057_v17  ;;  %v8158_v17 = vld [vmem:[#allocation5 + $0x108] sm:$0xf0]  ;;  %v12102_v57 = vld [vmem:[#allocation5 + $0x364] sm:$0xf] }
 0x105   :  { %2928 = vmatpush.bf16.msra.mxu1 %v8121_v20  ;;  %v12042_v20 = vld [vmem:[#allocation5 + $0x184] sm:$0xf]  ;;  %v2701_v25 = vpop.f32.mrf.mxu3  ;;  %v8161_v46 = vor.u32 %v12026_v14, %v8158_v17  ;;  %v12100_v14 = vld [vmem:[#allocation5 + $0x354] sm:$0xf]  ;;  %v8518_v17 = vld [vmem:[#allocation5 + $0x3d8] sm:$0xf0] }
 0x106   :  { %2941 = vmatpush.bf16.msra.mxu2 %v8185_v23  ;;  %v8222_v23 = vld [vmem:[#allocation5 + $0x188] sm:$0xf0]  ;;  %v12118_v61 = vld [vmem:[#allocation5 + $0x3e4] sm:$0xf]  ;;  %v8457_v25 = vor.u32 %v12100_v14, %v8454_v15 }
 0x107   :  { %2954 = vmatpush.bf16.msra.mxu3 %v8249_v11  ;;  %v8033_v11 = vor.u32 %v11994_v4, %v8030_v5  ;;  %v8465_v4 = vor.u32 %v12102_v57, %v8462_v58  ;;  %v12068_v5 = vld [vmem:[#allocation5 + $0x254] sm:$0xf]  ;;  %v8529_v10 = vor.u32 %v12118_v61, %v8526_v0  ;;  %v8502_v57 = vld [vmem:[#allocation5 + $0x3b8] sm:$0xf0]  ;;  %v12062_v0 = vld [vmem:[#allocation5 + $0x224] sm:$0xf] }
 0x108   :  { %2916 = vmatpush.bf16.msra.mxu0 %v8049_v22  ;;  %v8225_v22 = vor.u32 %v12042_v20, %v8222_v23  ;;  %v12110_v15 = vld [vmem:[#allocation5 + $0x3a4] sm:$0xf] }
 0x109   :  { %2929 = vmatpush.bf16.msra.mxu1 %v8113_v50  ;;  %v8409_v50 = vor.u32 %v12088_v31, %v8406_v37  ;;  %v12082_v31 = vld [vmem:[#allocation5 + $0x2c4] sm:$0xf] }
 0x10a   :  { %2942 = vmatpush.bf16.msra.mxu2 %v8177_v51  ;;  %v8473_v51 = vor.u32 %v12104_v19, %v8470_v41  ;;  %v12098_v37 = vld [vmem:[#allocation5 + $0x344] sm:$0xf]  ;;  %v8446_v19 = vld [vmem:[#allocation5 + $0x348] sm:$0xf0] }
 0x10b   :  { %2955 = vmatpush.bf16.msra.mxu3 %v8241_v56  ;;  %v8398_v56 = vld [vmem:[#allocation5 + $0x2e8] sm:$0xf0]  ;;  %v8449_v48 = vor.u32 %v12098_v37, %v8446_v19  ;;  %v8358_v19 = vld [vmem:[#allocation5 + $0x298] sm:$0xf0] }
 0x10c   :  { %2917 = vmatpush.bf16.msra.mxu0 %v8041_v3  ;;  %v8401_v3 = vor.u32 %v12086_v54, %v8398_v56  ;;  %v12096_v54 = vld [vmem:[#allocation5 + $0x334] sm:$0xf] }
 0x10d   :  { %2930 = vmatpush.bf16.msra.mxu1 %v8105_v6  ;;  %v8326_v6 = vld [vmem:[#allocation5 + $0x258] sm:$0xf0]  ;;  %v12112_v56 = vld [vmem:[#allocation5 + $0x3b4] sm:$0xf] }
 0x10e   :  { %2943 = vmatpush.bf16.msra.mxu2 %v8169_v9  ;;  %v12084_v9 = vld [vmem:[#allocation5 + $0x2d4] sm:$0xf]  ;;  %v8329_v20 = vor.u32 %v12068_v5, %v8326_v6  ;;  %v8366_v6 = vld [vmem:[#allocation5 + $0x2a8] sm:$0xf0] }
 0x10f   :  { %2956 = vmatpush.bf16.msra.mxu3 %v8233_v16  ;;  %v12116_v16 = vld [vmem:[#allocation5 + $0x3d4] sm:$0xf]  ;;  %v8393_v23 = vor.u32 %v12084_v9, %v8390_v13  ;;  %v12094_v9 = vld [vmem:[#allocation5 + $0x324] sm:$0xf] }
 0x110   :  { %2918 = vmatpush.bf16.msra.mxu0 %v8033_v11  ;;  %v8521_v11 = vor.u32 %v12116_v16, %v8518_v17  ;;  %v2712_v41 = vpop.f32.mrf.mxu0  ;;  %v8494_v16 = vld [vmem:[#allocation5 + $0x3a8] sm:$0xf0] }
 0x111   :  { %2931 = vmatpush.bf16.msra.mxu1 %v8097_v45  ;;  %v8510_v45 = vld [vmem:[#allocation5 + $0x3c8] sm:$0xf0]  ;;  %v8497_v37 = vor.u32 %v12110_v15, %v8494_v16 }
 0x112   :  { %2944 = vmatpush.bf16.msra.mxu2 %v8161_v46  ;;  %v8321_v46 = vor.u32 %v12066_v27, %v8318_v30 }
 0x113   :  { %2957 = vmatpush.bf16.msra.mxu3 %v8225_v22  ;;  %2919 = vmatmul.bf16.vlgmr.msra.gmra.mxu0 %v13427_v36  ;;  %v12114_v36 = vld [vmem:[#allocation5 + $0x3c4] sm:$0xf]  ;;  %v12064_v22 = vld [vmem:[#allocation5 + $0x234] sm:$0xf] }
 0x114   :  { %2963 = vmatpush.bf16.msrb.mxu0 %v8345_v49  ;;  %2932 = vmatmul.bf16.vlgmr.msra.gmra.mxu1 %v13431_v43  ;;  %v2725_v43 = vpop.f32.mrf.mxu1  ;;  %v8310_v49 = vld [vmem:[#allocation5 + $0x238] sm:$0xf0] }
 0x115   :  { %2976 = vmatpush.bf16.msrb.mxu1 %v8409_v50  ;;  %2945 = vmatmul.bf16.vlgmr.msra.gmra.mxu2 %v13425_v35  ;;  %v8382_v35 = vld [vmem:[#allocation5 + $0x2c8] sm:$0xf0]  ;;  %v12080_v50 = vld [vmem:[#allocation5 + $0x2b4] sm:$0xf]  ;;  %v8313_v58 = vor.u32 %v12064_v22, %v8310_v49  ;;  %v12074_v49 = vld [vmem:[#allocation5 + $0x284] sm:$0xf] }
 0x116   :  { %2989 = vmatpush.bf16.msrb.mxu2 %v8473_v51  ;;  %2958 = vmatmul.bf16.vlgmr.msra.gmra.mxu3 %v13429_v42  ;;  %v2713_v42 = vadd.f32 %v2712_v41, %v13529_v63  ;;  %v8385_v62 = vor.u32 %v12082_v31, %v8382_v35  ;;  %v8513_v51 = vor.u32 %v12114_v36, %v8510_v45  ;;  %v12060_v31 = vld [vmem:[#allocation5 + $0x214] sm:$0xf]  ;;  %v8422_v36 = vld [vmem:[#allocation5 + $0x318] sm:$0xf0] }
 0x117   :  { %3002 = vmatpush.bf16.msrb.mxu3 %v8537_v55  ;;  %v8438_v55 = vld [vmem:[#allocation5 + $0x338] sm:$0xf0]  ;;  %v8377_v63 = vor.u32 %v12080_v50, %v8374_v53  ;;  %v12076_v35 = vld [vmem:[#allocation5 + $0x294] sm:$0xf]  ;;  %v8350_v50 = vld [vmem:[#allocation5 + $0x288] sm:$0xf0] }
 0x118   :  { %2964 = vmatpush.bf16.msrb.mxu0 %v8337_v1  ;;  %v2726_v52 = vadd.f32 %v2725_v43, %v2713_v42  ;;  %v8441_v61 = vor.u32 %v12096_v54, %v8438_v55  ;;  %v8302_v1 = vld [vmem:[#allocation5 + $0x228] sm:$0xf0]  ;;  %v2738_v5 = vpop.f32.mrf.mxu2  ;;  %v2714_v17 = vpop.f32.mrf.mxu0  ;;  %v12092_v41 = vld [vmem:[#allocation5 + $0x314] sm:$0xf]  ;;  %v8486_v42 = vld [vmem:[#allocation5 + $0x398] sm:$0xf0] }
 0x119   :  { %2977 = vmatpush.bf16.msrb.mxu1 %v8401_v3  ;;  %v12078_v3 = vld [vmem:[#allocation5 + $0x2a4] sm:$0xf]  ;;  %v2751_v14 = vpop.f32.mrf.mxu3  ;;  %v12108_v45 = vld [vmem:[#allocation5 + $0x394] sm:$0xf]  ;;  %v8425_v22 = vor.u32 %v12092_v41, %v8422_v36  ;;  %v8414_v53 = vld [vmem:[#allocation5 + $0x308] sm:$0xf0] }
 0x11a   :  { %2990 = vmatpush.bf16.msrb.mxu2 %v8465_v4  ;;  %v8505_v4 = vor.u32 %v12112_v56, %v8502_v57  ;;  %v2739_v13 = vadd.f32 %v2738_v5, %v2726_v52  ;;  %v8369_v27 = vor.u32 %v12078_v3, %v8366_v6  ;;  %v12058_v43 = vld [vmem:[#allocation5 + $0x204] sm:$0xf]  ;;  %v8489_v52 = vor.u32 %v12108_v45, %v8486_v42  ;;  %v8478_v55 = vld [vmem:[#allocation5 + $0x388] sm:$0xf0]  ;;  %v12136_v57 = vld [vmem:[#allocation5 + $0x474] sm:$0xf] }
 0x11b   :  { %3003 = vmatpush.bf16.msrb.mxu3 %v8529_v10  ;;  %v8430_v10 = vld [vmem:[#allocation5 + $0x328] sm:$0xf0]  ;;  %v12106_v54 = vld [vmem:[#allocation5 + $0x384] sm:$0xf]  ;;  %v12168_v3 = vld [vmem:[#allocation5 + $0x574] sm:$0xf]  ;;  %v8353_v5 = vor.u32 %v12074_v49, %v8350_v50 }
 0x11c   :  { %2965 = vmatpush.bf16.msrb.mxu0 %v8329_v20  ;;  %v8305_v20 = vor.u32 %v12062_v0, %v8302_v1  ;;  %v8433_v30 = vor.u32 %v12094_v9, %v8430_v10  ;;  %v8662_v1 = vld [vmem:[#allocation5 + $0x4f8] sm:$0xf0]  ;;  %v12184_v9 = vld [vmem:[#allocation5 + $0x5f4] sm:$0xf]  ;;  %v12134_v17 = vld [vmem:[#allocation5 + $0x464] sm:$0xf] }
 0x11d   :  { %2978 = vmatpush.bf16.msrb.mxu1 %v8393_v23  ;;  %v2727_v23 = vpop.f32.mrf.mxu1  ;;  %v8790_v10 = vld [vmem:[#allocation5 + $0x5f8] sm:$0xf0]  ;;  %v12132_v45 = vld [vmem:[#allocation5 + $0x454] sm:$0xf] }
 0x11e   :  { %2991 = vmatpush.bf16.msrb.mxu2 %v8457_v25  ;;  %v13536_v25 = vadd.f32 %v2751_v14, %v2739_v13  ;;  %v8481_v13 = vor.u32 %v12106_v54, %v8478_v55  ;;  %v12150_v23 = vld [vmem:[#allocation5 + $0x4e4] sm:$0xf]  ;;  %v8582_v42 = vld [vmem:[#allocation5 + $0x458] sm:$0xf0]  ;;  %v12180_v49 = vld [vmem:[#allocation5 + $0x5d4] sm:$0xf] }
 0x11f   :  { %3004 = vmatpush.bf16.msrb.mxu3 %v8521_v11  ;;  %v8294_v11 = vld [vmem:[#allocation5 + $0x218] sm:$0xf0]  ;;  %v12130_v54 = vld [vmem:[#allocation5 + $0x444] sm:$0xf]  ;;  %v8574_v55 = vld [vmem:[#allocation5 + $0x448] sm:$0xf0] }
 0x120   :  { %2966 = vmatpush.bf16.msrb.mxu0 %v8321_v46  ;;  %v8297_v46 = vor.u32 %v12060_v31, %v8294_v11  ;;  %v2740_v56 = vpop.f32.mrf.mxu2  ;;  %v12166_v31 = vld [vmem:[#allocation5 + $0x564] sm:$0xf]  ;;  %v8718_v11 = vld [vmem:[#allocation5 + $0x568] sm:$0xf0]  ;;  %v8774_v50 = vld [vmem:[#allocation5 + $0x5d8] sm:$0xf0] }
 0x121   :  { %2979 = vmatpush.bf16.msrb.mxu1 %v8385_v62  ;;  %v8286_v62 = vld [vmem:[#allocation5 + $0x208] sm:$0xf0]  ;;  %v8721_v36 = vor.u32 %v12166_v31, %v8718_v11  ;;  %v8777_v56 = vor.u32 %v12180_v49, %v8774_v50  ;;  %v12142_v11 = vld [vmem:[#allocation5 + $0x4a4] sm:$0xf] }
 0x122   :  { %2992 = vmatpush.bf16.msrb.mxu2 %v8449_v48  ;;  %v8361_v48 = vor.u32 %v12076_v35, %v8358_v19  ;;  %v8289_v0 = vor.u32 %v12058_v43, %v8286_v62  ;;  %v12182_v35 = vld [vmem:[#allocation5 + $0x5e4] sm:$0xf]  ;;  %v8646_v62 = vld [vmem:[#allocation5 + $0x4d8] sm:$0xf0]  ;;  %v8558_v31 = vld [vmem:[#allocation5 + $0x428] sm:$0xf0] }
 0x123   :  { %3005 = vmatpush.bf16.msrb.mxu3 %v8513_v51  ;;  %v12090_v51 = vld [vmem:[#allocation5 + $0x304] sm:$0xf] }
 0x124   :  { %2967 = vmatpush.bf16.msrb.mxu0 %v8313_v58  ;;  %v8598_v58 = vld [vmem:[#allocation5 + $0x478] sm:$0xf0]  ;;  %v8417_v6 = vor.u32 %v12090_v51, %v8414_v53  ;;  %v8585_v51 = vor.u32 %v12132_v45, %v8582_v42 }
 0x125   :  { %2980 = vmatpush.bf16.msrb.mxu1 %v8377_v63  ;;  %v12152_v63 = vld [vmem:[#allocation5 + $0x4f4] sm:$0xf]  ;;  %v8601_v14 = vor.u32 %v12136_v57, %v8598_v58  ;;  %v8638_v57 = vld [vmem:[#allocation5 + $0x4c8] sm:$0xf0]  ;;  %v12162_v58 = vld [vmem:[#allocation5 + $0x544] sm:$0xf] }
 0x126   :  { %2993 = vmatpush.bf16.msrb.mxu2 %v8441_v61  ;;  %v2753_v61 = vpop.f32.mrf.mxu3  ;;  %v8665_v15 = vor.u32 %v12152_v63, %v8662_v1  ;;  %v8702_v63 = vld [vmem:[#allocation5 + $0x548] sm:$0xf0]  ;;  %v8577_v1 = vor.u32 %v12130_v54, %v8574_v55  ;;  %v12140_v54 = vld [vmem:[#allocation5 + $0x494] sm:$0xf] }
 0x127   :  { %3006 = vmatpush.bf16.msrb.mxu3 %v8505_v4  ;;  %v8726_v4 = vld [vmem:[#allocation5 + $0x578] sm:$0xf0] }
 0x128   :  { %2968 = vmatpush.bf16.msrb.mxu0 %v8305_v20  ;;  %v8729_v16 = vor.u32 %v12168_v3, %v8726_v4  ;;  %v8590_v20 = vld [vmem:[#allocation5 + $0x468] sm:$0xf0]  ;;  %v8705_v4 = vor.u32 %v12162_v58, %v8702_v63  ;;  %v12172_v58 = vld [vmem:[#allocation5 + $0x594] sm:$0xf]  ;;  %v8742_v63 = vld [vmem:[#allocation5 + $0x598] sm:$0xf0] }
 0x129   :  { %2981 = vmatpush.bf16.msrb.mxu1 %v8369_v27  ;;  %v8793_v27 = vor.u32 %v12184_v9, %v8790_v10  ;;  %v8593_v19 = vor.u32 %v12134_v17, %v8590_v20  ;;  %v12144_v9 = vld [vmem:[#allocation5 + $0x4b4] sm:$0xf]  ;;  %v8758_v20 = vld [vmem:[#allocation5 + $0x5b8] sm:$0xf0] }
 0x12a   :  { %2994 = vmatpush.bf16.msrb.mxu2 %v8433_v30  ;;  %v8654_v30 = vld [vmem:[#allocation5 + $0x4e8] sm:$0xf0]  ;;  %v12176_v17 = vld [vmem:[#allocation5 + $0x5b4] sm:$0xf] }
 0x12b   :  { %3007 = vmatpush.bf16.msrb.mxu3 %v8497_v37  ;;  %v8782_v37 = vld [vmem:[#allocation5 + $0x5e8] sm:$0xf0]  ;;  %v8657_v41 = vor.u32 %v12150_v23, %v8654_v30  ;;  %v12126_v30 = vld [vmem:[#allocation5 + $0x424] sm:$0xf] }
 0x12c   :  { %2969 = vmatpush.bf16.msrb.mxu0 %v8297_v46  ;;  %v12148_v46 = vld [vmem:[#allocation5 + $0x4d4] sm:$0xf]  ;;  %v8785_v43 = vor.u32 %v12182_v35, %v8782_v37  ;;  %v8761_v35 = vor.u32 %v12176_v17, %v8758_v20 }
 0x12d   :  { %2982 = vmatpush.bf16.msrb.mxu1 %v8361_v48  ;;  %v12164_v48 = vld [vmem:[#allocation5 + $0x554] sm:$0xf] }
 0x12e   :  { %2995 = vmatpush.bf16.msrb.mxu2 %v8425_v22  ;;  %v8710_v22 = vld [vmem:[#allocation5 + $0x558] sm:$0xf0] }
 0x12f   :  { %3008 = vmatpush.bf16.msrb.mxu3 %v8489_v52  ;;  %v8649_v52 = vor.u32 %v12148_v46, %v8646_v62  ;;  %v8713_v53 = vor.u32 %v12164_v48, %v8710_v22  ;;  %v12174_v46 = vld [vmem:[#allocation5 + $0x5a4] sm:$0xf]  ;;  %v8561_v48 = vor.u32 %v12126_v30, %v8558_v31 }
 0x130   :  { %2970 = vmatpush.bf16.msrb.mxu0 %v8289_v0  ;;  %v2764_v61 = vpop.f32.mrf.mxu0  ;;  %v8766_v0 = vld [vmem:[#allocation5 + $0x5c8] sm:$0xf0] }
 0x131   :  { %2983 = vmatpush.bf16.msrb.mxu1 %v8353_v5  ;;  %v12128_v5 = vld [vmem:[#allocation5 + $0x434] sm:$0xf] }
 0x132   :  { %2996 = vmatpush.bf16.msrb.mxu2 %v8417_v6  ;;  %v8566_v6 = vld [vmem:[#allocation5 + $0x438] sm:$0xf0] }
 0x133   :  { %3009 = vmatpush.bf16.msrb.mxu3 %v8481_v13  ;;  %2971 = vmatmul.bf16.vlgmr.msrb.gmra.mxu0 %v13439_v39  ;;  %v12178_v39 = vld [vmem:[#allocation5 + $0x5c4] sm:$0xf]  ;;  %v8569_v23 = vor.u32 %v12128_v5, %v8566_v6  ;;  %v8745_v5 = vor.u32 %v12172_v58, %v8742_v63  ;;  %v8670_v6 = vld [vmem:[#allocation5 + $0x508] sm:$0xf0]  ;;  %v8902_v58 = vld [vmem:[#allocation5 + $0x6d8] sm:$0xf0] }
 0x134   :  { %3015 = vmatpush.bf16.msra.mxu0 %v8601_v14  ;;  %2984 = vmatmul.bf16.vlgmr.msrb.gmra.mxu1 %v13443_v44  ;;  %v2777_v44 = vpop.f32.mrf.mxu1  ;;  %v8769_v10 = vor.u32 %v12178_v39, %v8766_v0  ;;  %v8630_v14 = vld [vmem:[#allocation5 + $0x4b8] sm:$0xf0]  ;;  %v12122_v39 = vld [vmem:[#allocation5 + $0x404] sm:$0xf]  ;;  %v8542_v0 = vld [vmem:[#allocation5 + $0x408] sm:$0xf0] }
 0x135   :  { %3028 = vmatpush.bf16.msra.mxu1 %v8665_v15  ;;  %2997 = vmatmul.bf16.vlgmr.msrb.gmra.mxu2 %v13437_v34  ;;  %v12146_v34 = vld [vmem:[#allocation5 + $0x4c4] sm:$0xf]  ;;  %v12160_v15 = vld [vmem:[#allocation5 + $0x534] sm:$0xf]  ;;  %v8545_v20 = vor.u32 %v12122_v39, %v8542_v0  ;;  %v9030_v0 = vld [vmem:[#allocation5 + $0x7d8] sm:$0xf0] }
 0x136   :  { %3041 = vmatpush.bf16.msra.mxu2 %v8729_v16  ;;  %3010 = vmatmul.bf16.vlgmr.msrb.gmra.mxu3 %v13441_v40  ;;  %v2765_v40 = vadd.f32 %v2764_v61, %v13536_v25  ;;  %v8641_v3 = vor.u32 %v12146_v34, %v8638_v57  ;;  %v8694_v16 = vld [vmem:[#allocation5 + $0x538] sm:$0xf0]  ;;  %v8633_v25 = vor.u32 %v12144_v9, %v8630_v14  ;;  %v12170_v9 = vld [vmem:[#allocation5 + $0x584] sm:$0xf]  ;;  %v12200_v14 = vld [vmem:[#allocation5 + $0x674] sm:$0xf] }
 0x137   :  { %3054 = vmatpush.bf16.msra.mxu3 %v8793_v27  ;;  %v8697_v27 = vor.u32 %v12160_v15, %v8694_v16  ;;  %v8614_v34 = vld [vmem:[#allocation5 + $0x498] sm:$0xf0]  ;;  %v12216_v16 = vld [vmem:[#allocation5 + $0x6f4] sm:$0xf] }
 0x138   :  { %3016 = vmatpush.bf16.msra.mxu0 %v8593_v19  ;;  %v2778_v13 = vadd.f32 %v2777_v44, %v2765_v40  ;;  %v2790_v37 = vpop.f32.mrf.mxu2  ;;  %v8622_v19 = vld [vmem:[#allocation5 + $0x4a8] sm:$0xf0]  ;;  %v2766_v62 = vpop.f32.mrf.mxu0  ;;  %v8678_v57 = vld [vmem:[#allocation5 + $0x518] sm:$0xf0]  ;;  %v8617_v40 = vor.u32 %v12140_v54, %v8614_v34  ;;  %v12138_v44 = vld [vmem:[#allocation5 + $0x484] sm:$0xf] }
 0x139   :  { %3029 = vmatpush.bf16.msra.mxu1 %v8657_v41  ;;  %v12158_v41 = vld [vmem:[#allocation5 + $0x524] sm:$0xf]  ;;  %v2803_v42 = vpop.f32.mrf.mxu3  ;;  %v8625_v50 = vor.u32 %v12142_v11, %v8622_v19  ;;  %v8854_v15 = vld [vmem:[#allocation5 + $0x678] sm:$0xf0]  ;;  %v12248_v11 = vld [vmem:[#allocation5 + $0x7f4] sm:$0xf] }
 0x13a   :  { %3042 = vmatpush.bf16.msra.mxu2 %v8721_v36  ;;  %v8686_v36 = vld [vmem:[#allocation5 + $0x528] sm:$0xf0]  ;;  %v2791_v45 = vadd.f32 %v2790_v37, %v2778_v13  ;;  %v8857_v19 = vor.u32 %v12200_v14, %v8854_v15  ;;  %v8838_v34 = vld [vmem:[#allocation5 + $0x658] sm:$0xf0]  ;;  %v12228_v63 = vld [vmem:[#allocation5 + $0x754] sm:$0xf] }
 0x13b   :  { %3055 = vmatpush.bf16.msra.mxu3 %v8785_v43  ;;  %v8750_v43 = vld [vmem:[#allocation5 + $0x5a8] sm:$0xf0]  ;;  %v12244_v39 = vld [vmem:[#allocation5 + $0x7d4] sm:$0xf] }
 0x13c   :  { %3017 = vmatpush.bf16.msra.mxu0 %v8585_v51  ;;  %v2779_v22 = vpop.f32.mrf.mxu1  ;;  %v13543_v49 = vadd.f32 %v2803_v42, %v2791_v45  ;;  %v8689_v51 = vor.u32 %v12158_v41, %v8686_v36  ;;  %v8753_v55 = vor.u32 %v12174_v46, %v8750_v43  ;;  %v12198_v45 = vld [vmem:[#allocation5 + $0x664] sm:$0xf]  ;;  %v8846_v42 = vld [vmem:[#allocation5 + $0x668] sm:$0xf0] }
 0x13d   :  { %3030 = vmatpush.bf16.msra.mxu1 %v8649_v52  ;;  %v12124_v52 = vld [vmem:[#allocation5 + $0x414] sm:$0xf]  ;;  %v12214_v46 = vld [vmem:[#allocation5 + $0x6e4] sm:$0xf]  ;;  %v8910_v62 = vld [vmem:[#allocation5 + $0x6e8] sm:$0xf0] }
 0x13e   :  { %3043 = vmatpush.bf16.msra.mxu2 %v8713_v53  ;;  %v8550_v53 = vld [vmem:[#allocation5 + $0x418] sm:$0xf0]  ;;  %v8974_v22 = vld [vmem:[#allocation5 + $0x768] sm:$0xf0] }
 0x13f   :  { %3056 = vmatpush.bf16.msra.mxu3 %v8777_v56  ;;  %v12156_v56 = vld [vmem:[#allocation5 + $0x514] sm:$0xf]  ;;  %v8553_v61 = vor.u32 %v12124_v52, %v8550_v53  ;;  %v8849_v52 = vor.u32 %v12198_v45, %v8846_v42  ;;  %v8913_v53 = vor.u32 %v12214_v46, %v8910_v62  ;;  %v12190_v45 = vld [vmem:[#allocation5 + $0x624] sm:$0xf]  ;;  %v8814_v42 = vld [vmem:[#allocation5 + $0x628] sm:$0xf0] }
 0x140   :  { %3018 = vmatpush.bf16.msra.mxu0 %v8577_v1  ;;  %v8681_v1 = vor.u32 %v12156_v56, %v8678_v57  ;;  %v2792_v13 = vpop.f32.mrf.mxu2  ;;  %v12212_v56 = vld [vmem:[#allocation5 + $0x6d4] sm:$0xf]  ;;  %v12206_v46 = vld [vmem:[#allocation5 + $0x6a4] sm:$0xf] }
 0x141   :  { %3031 = vmatpush.bf16.msra.mxu1 %v8641_v3  ;;  %v8606_v3 = vld [vmem:[#allocation5 + $0x488] sm:$0xf0]  ;;  %v2805_v17 = vpop.f32.mrf.mxu3 }
 0x142   :  { %3044 = vmatpush.bf16.msra.mxu2 %v8705_v4  ;;  %v12154_v4 = vld [vmem:[#allocation5 + $0x504] sm:$0xf]  ;;  %v8609_v30 = vor.u32 %v12138_v44, %v8606_v3  ;;  %v9022_v13 = vld [vmem:[#allocation5 + $0x7c8] sm:$0xf0] }
 0x143   :  { %3057 = vmatpush.bf16.msra.mxu3 %v8769_v10  ;;  %v8734_v10 = vld [vmem:[#allocation5 + $0x588] sm:$0xf0]  ;;  %v8673_v31 = vor.u32 %v12154_v4, %v8670_v6  ;;  %v12194_v3 = vld [vmem:[#allocation5 + $0x644] sm:$0xf] }
 0x144   :  { %3019 = vmatpush.bf16.msra.mxu0 %v8569_v23  ;;  %v8918_v23 = vld [vmem:[#allocation5 + $0x6f8] sm:$0xf0]  ;;  %v8737_v37 = vor.u32 %v12170_v9, %v8734_v10  ;;  %v12210_v4 = vld [vmem:[#allocation5 + $0x6c4] sm:$0xf]  ;;  %v8894_v6 = vld [vmem:[#allocation5 + $0x6c8] sm:$0xf0] }
 0x145   :  { %3032 = vmatpush.bf16.msra.mxu1 %v8633_v25  ;;  %v12232_v25 = vld [vmem:[#allocation5 + $0x774] sm:$0xf]  ;;  %v8921_v41 = vor.u32 %v12216_v16, %v8918_v23  ;;  %v12226_v9 = vld [vmem:[#allocation5 + $0x744] sm:$0xf]  ;;  %v8897_v16 = vor.u32 %v12210_v4, %v8894_v6  ;;  %v8822_v23 = vld [vmem:[#allocation5 + $0x638] sm:$0xf0] }
 0x146   :  { %3045 = vmatpush.bf16.msra.mxu2 %v8697_v27  ;;  %v8982_v27 = vld [vmem:[#allocation5 + $0x778] sm:$0xf0]  ;;  %v12186_v6 = vld [vmem:[#allocation5 + $0x604] sm:$0xf] }
 0x147   :  { %3058 = vmatpush.bf16.msra.mxu3 %v8761_v35  ;;  %v9046_v35 = vld [vmem:[#allocation5 + $0x7f8] sm:$0xf0]  ;;  %v8985_v36 = vor.u32 %v12232_v25, %v8982_v27  ;;  %v12208_v25 = vld [vmem:[#allocation5 + $0x6b4] sm:$0xf] }
 0x148   :  { %3020 = vmatpush.bf16.msra.mxu0 %v8561_v48  ;;  %v9049_v43 = vor.u32 %v12248_v11, %v9046_v35  ;;  %v12230_v48 = vld [vmem:[#allocation5 + $0x764] sm:$0xf]  ;;  %v12224_v11 = vld [vmem:[#allocation5 + $0x734] sm:$0xf]  ;;  %v8950_v35 = vld [vmem:[#allocation5 + $0x738] sm:$0xf0] }
 0x149   :  { %3033 = vmatpush.bf16.msra.mxu1 %v8625_v50  ;;  %v12246_v50 = vld [vmem:[#allocation5 + $0x7e4] sm:$0xf]  ;;  %v8977_v54 = vor.u32 %v12230_v48, %v8974_v22  ;;  %v8878_v48 = vld [vmem:[#allocation5 + $0x6a8] sm:$0xf0]  ;;  %v8998_v4 = vld [vmem:[#allocation5 + $0x798] sm:$0xf0] }
 0x14a   :  { %3046 = vmatpush.bf16.msra.mxu2 %v8689_v51  ;;  %v9038_v51 = vld [vmem:[#allocation5 + $0x7e8] sm:$0xf0]  ;;  %v12222_v22 = vld [vmem:[#allocation5 + $0x724] sm:$0xf] }
 0x14b   :  { %3059 = vmatpush.bf16.msra.mxu3 %v8753_v55  ;;  %v12196_v55 = vld [vmem:[#allocation5 + $0x654] sm:$0xf]  ;;  %v9041_v57 = vor.u32 %v12246_v50, %v9038_v51  ;;  %v8942_v50 = vld [vmem:[#allocation5 + $0x728] sm:$0xf0] }
 0x14c   :  { %3021 = vmatpush.bf16.msra.mxu0 %v8553_v61  ;;  %v8966_v61 = vld [vmem:[#allocation5 + $0x758] sm:$0xf0] }
 0x14d   :  { %3034 = vmatpush.bf16.msra.mxu1 %v8617_v40  ;;  %v8841_v40 = vor.u32 %v12196_v55, %v8838_v34  ;;  %v8969_v44 = vor.u32 %v12228_v63, %v8966_v61  ;;  %v8817_v34 = vor.u32 %v12190_v45, %v8814_v42  ;;  %v8945_v63 = vor.u32 %v12222_v22, %v8942_v50  ;;  %v12188_v61 = vld [vmem:[#allocation5 + $0x614] sm:$0xf]  ;;  %v12278_v22 = vld [vmem:[#allocation5 + $0x8e4] sm:$0xf] }
 0x14e   :  { %3047 = vmatpush.bf16.msra.mxu2 %v8681_v1  ;;  %v8905_v1 = vor.u32 %v12212_v56, %v8902_v58  ;;  %v8881_v58 = vor.u32 %v12206_v46, %v8878_v48  ;;  %v9102_v48 = vld [vmem:[#allocation5 + $0x868] sm:$0xf0] }
 0x14f   :  { %3060 = vmatpush.bf16.msra.mxu3 %v8745_v5  ;;  %v9033_v5 = vor.u32 %v12244_v39, %v9030_v0  ;;  %v8806_v39 = vld [vmem:[#allocation5 + $0x618] sm:$0xf0]  ;;  %v12204_v0 = vld [vmem:[#allocation5 + $0x694] sm:$0xf] }
 0x150   :  { %3022 = vmatpush.bf16.msra.mxu0 %v8545_v20  ;;  %v2816_v10 = vpop.f32.mrf.mxu0  ;;  %v12192_v20 = vld [vmem:[#allocation5 + $0x634] sm:$0xf] }
 0x151   :  { %3035 = vmatpush.bf16.msra.mxu1 %v8609_v30  ;;  %v2829_v15 = vpop.f32.mrf.mxu1 }
 0x152   :  { %3048 = vmatpush.bf16.msra.mxu2 %v8673_v31  ;;  %v8886_v31 = vld [vmem:[#allocation5 + $0x6b8] sm:$0xf0] }
 0x153   :  { %3061 = vmatpush.bf16.msra.mxu3 %v8737_v37  ;;  %3023 = vmatmul.bf16.vlgmr.msra.gmra.mxu0 %v13459_v24  ;;  %v8830_v24 = vld [vmem:[#allocation5 + $0x648] sm:$0xf0]  ;;  %v12240_v37 = vld [vmem:[#allocation5 + $0x7b4] sm:$0xf] }
 0x154   :  { %3067 = vmatpush.bf16.msrb.mxu0 %v8857_v19  ;;  %3036 = vmatmul.bf16.vlgmr.msra.gmra.mxu1 %v13467_v29  ;;  %v12242_v29 = vld [vmem:[#allocation5 + $0x7c4] sm:$0xf]  ;;  %v8833_v14 = vor.u32 %v12194_v3, %v8830_v24  ;;  %v9014_v19 = vld [vmem:[#allocation5 + $0x7b8] sm:$0xf0]  ;;  %v12236_v24 = vld [vmem:[#allocation5 + $0x794] sm:$0xf] }
 0x155   :  { %3080 = vmatpush.bf16.msrb.mxu1 %v8921_v41  ;;  %3049 = vmatmul.bf16.vlgmr.msra.gmra.mxu2 %v13463_v28  ;;  %v8958_v28 = vld [vmem:[#allocation5 + $0x748] sm:$0xf0]  ;;  %v9025_v27 = vor.u32 %v12242_v29, %v9022_v13  ;;  %v8825_v41 = vor.u32 %v12192_v20, %v8822_v23  ;;  %v8934_v3 = vld [vmem:[#allocation5 + $0x718] sm:$0xf0]  ;;  %v12202_v29 = vld [vmem:[#allocation5 + $0x684] sm:$0xf] }
 0x156   :  { %3093 = vmatpush.bf16.msrb.mxu2 %v8985_v36  ;;  %3062 = vmatmul.bf16.vlgmr.msra.gmra.mxu3 %v13471_v18  ;;  %v2817_v18 = vadd.f32 %v2816_v10, %v13543_v49  ;;  %v8961_v17 = vor.u32 %v12226_v9, %v8958_v28  ;;  %v8889_v49 = vor.u32 %v12208_v25, %v8886_v31  ;;  %v8798_v9 = vld [vmem:[#allocation5 + $0x608] sm:$0xf0]  ;;  %v12264_v23 = vld [vmem:[#allocation5 + $0x874] sm:$0xf]  ;;  %v9110_v25 = vld [vmem:[#allocation5 + $0x878] sm:$0xf0] }
 0x157   :  { %3106 = vmatpush.bf16.msrb.mxu3 %v9049_v43  ;;  %v8953_v36 = vor.u32 %v12224_v11, %v8950_v35  ;;  %v9017_v43 = vor.u32 %v12240_v37, %v9014_v19  ;;  %v8862_v13 = vld [vmem:[#allocation5 + $0x688] sm:$0xf0]  ;;  %v8801_v31 = vor.u32 %v12186_v6, %v8798_v9  ;;  %v9174_v11 = vld [vmem:[#allocation5 + $0x8f8] sm:$0xf0]  ;;  %v12296_v35 = vld [vmem:[#allocation5 + $0x974] sm:$0xf]  ;;  %v9113_v42 = vor.u32 %v12264_v23, %v9110_v25 }
 0x158   :  { %3068 = vmatpush.bf16.msrb.mxu0 %v8849_v52  ;;  %v2830_v30 = vadd.f32 %v2829_v15, %v2817_v18  ;;  %v2842_v62 = vpop.f32.mrf.mxu2  ;;  %v2818_v55 = vpop.f32.mrf.mxu0  ;;  %v12218_v18 = vld [vmem:[#allocation5 + $0x704] sm:$0xf]  ;;  %v8926_v15 = vld [vmem:[#allocation5 + $0x708] sm:$0xf0]  ;;  %v9238_v37 = vld [vmem:[#allocation5 + $0x978] sm:$0xf0]  ;;  %v8865_v19 = vor.u32 %v12202_v29, %v8862_v13 }
 0x159   :  { %3081 = vmatpush.bf16.msrb.mxu1 %v8913_v53  ;;  %v2855_v52 = vpop.f32.mrf.mxu3  ;;  %v12238_v53 = vld [vmem:[#allocation5 + $0x7a4] sm:$0xf]  ;;  %v2831_v56 = vpop.f32.mrf.mxu1  ;;  %v9294_v55 = vld [vmem:[#allocation5 + $0x9e8] sm:$0xf0]  ;;  %v12256_v23 = vld [vmem:[#allocation5 + $0x834] sm:$0xf] }
 0x15a   :  { %3094 = vmatpush.bf16.msrb.mxu2 %v8977_v54  ;;  %v2843_v51 = vadd.f32 %v2842_v62, %v2830_v30  ;;  %v9006_v54 = vld [vmem:[#allocation5 + $0x7a8] sm:$0xf0]  ;;  %v12262_v62 = vld [vmem:[#allocation5 + $0x864] sm:$0xf]  ;;  %v9078_v25 = vld [vmem:[#allocation5 + $0x838] sm:$0xf0] }
 0x15b   :  { %3107 = vmatpush.bf16.msrb.mxu3 %v9041_v57  ;;  %v12258_v9 = vld [vmem:[#allocation5 + $0x844] sm:$0xf]  ;;  %v9150_v29 = vld [vmem:[#allocation5 + $0x8c8] sm:$0xf0] }
 0x15c   :  { %3069 = vmatpush.bf16.msrb.mxu0 %v8841_v40  ;;  %v13550_v57 = vadd.f32 %v2855_v52, %v2843_v51  ;;  %v9009_v40 = vor.u32 %v12238_v53, %v9006_v54  ;;  %v9166_v51 = vld [vmem:[#allocation5 + $0x8e8] sm:$0xf0]  ;;  %v12294_v52 = vld [vmem:[#allocation5 + $0x964] sm:$0xf] }
 0x15d   :  { %3082 = vmatpush.bf16.msrb.mxu1 %v8905_v1  ;;  %v8870_v1 = vld [vmem:[#allocation5 + $0x698] sm:$0xf0]  ;;  %v9230_v53 = vld [vmem:[#allocation5 + $0x968] sm:$0xf0]  ;;  %v12310_v54 = vld [vmem:[#allocation5 + $0x9e4] sm:$0xf]  ;;  %v9169_v56 = vor.u32 %v12278_v22, %v9166_v51 }
 0x15e   :  { %3095 = vmatpush.bf16.msrb.mxu2 %v8969_v44  ;;  %v12220_v44 = vld [vmem:[#allocation5 + $0x714] sm:$0xf]  ;;  %v8873_v28 = vor.u32 %v12204_v0, %v8870_v1  ;;  %v9297_v0 = vor.u32 %v12310_v54, %v9294_v55  ;;  %v12290_v13 = vld [vmem:[#allocation5 + $0x944] sm:$0xf]  ;;  %v9262_v54 = vld [vmem:[#allocation5 + $0x9a8] sm:$0xf0] }
 0x15f   :  { %3108 = vmatpush.bf16.msrb.mxu3 %v9033_v5  ;;  %v8809_v5 = vor.u32 %v12188_v61, %v8806_v39  ;;  %v8937_v10 = vor.u32 %v12220_v44, %v8934_v3  ;;  %v9094_v61 = vld [vmem:[#allocation5 + $0x858] sm:$0xf0]  ;;  %v12276_v39 = vld [vmem:[#allocation5 + $0x8d4] sm:$0xf]  ;;  %v12286_v22 = vld [vmem:[#allocation5 + $0x924] sm:$0xf] }
 0x160   :  { %3070 = vmatpush.bf16.msrb.mxu0 %v8833_v14  ;;  %v9001_v14 = vor.u32 %v12236_v24, %v8998_v4  ;;  %v2844_v20 = vpop.f32.mrf.mxu2  ;;  %v12292_v1 = vld [vmem:[#allocation5 + $0x954] sm:$0xf]  ;;  %v9222_v44 = vld [vmem:[#allocation5 + $0x958] sm:$0xf0] }
 0x161   :  { %3083 = vmatpush.bf16.msrb.mxu1 %v8897_v16  ;;  %v12234_v16 = vld [vmem:[#allocation5 + $0x784] sm:$0xf]  ;;  %v2857_v30 = vpop.f32.mrf.mxu3  ;;  %v12308_v3 = vld [vmem:[#allocation5 + $0x9d4] sm:$0xf]  ;;  %v9286_v24 = vld [vmem:[#allocation5 + $0x9d8] sm:$0xf0]  ;;  %v9225_v6 = vor.u32 %v12292_v1, %v9222_v44 }
 0x162   :  { %3096 = vmatpush.bf16.msrb.mxu2 %v8961_v17  ;;  %v8990_v17 = vld [vmem:[#allocation5 + $0x788] sm:$0xf0]  ;;  %v9126_v44 = vld [vmem:[#allocation5 + $0x898] sm:$0xf0] }
 0x163   :  { %3109 = vmatpush.bf16.msrb.mxu3 %v9025_v27  ;;  %v12280_v27 = vld [vmem:[#allocation5 + $0x8f4] sm:$0xf]  ;;  %v8993_v45 = vor.u32 %v12234_v16, %v8990_v17 }
 0x164   :  { %3071 = vmatpush.bf16.msrb.mxu0 %v8825_v41  ;;  %v8929_v41 = vor.u32 %v12218_v18, %v8926_v15  ;;  %v9177_v46 = vor.u32 %v12280_v27, %v9174_v11  ;;  %v12272_v27 = vld [vmem:[#allocation5 + $0x8b4] sm:$0xf]  ;;  %v9142_v11 = vld [vmem:[#allocation5 + $0x8b8] sm:$0xf0] }
 0x165   :  { %3084 = vmatpush.bf16.msrb.mxu1 %v8889_v49  ;;  %v12312_v49 = vld [vmem:[#allocation5 + $0x9f4] sm:$0xf] }
 0x166   :  { %3097 = vmatpush.bf16.msrb.mxu2 %v8953_v36  ;;  %v9302_v36 = vld [vmem:[#allocation5 + $0x9f8] sm:$0xf0] }
 0x167   :  { %3110 = vmatpush.bf16.msrb.mxu3 %v9017_v43  ;;  %v9241_v43 = vor.u32 %v12296_v35, %v9238_v37  ;;  %v9305_v50 = vor.u32 %v12312_v49, %v9302_v36  ;;  %v12288_v35 = vld [vmem:[#allocation5 + $0x934] sm:$0xf]  ;;  %v9206_v37 = vld [vmem:[#allocation5 + $0x938] sm:$0xf0]  ;;  %v9081_v49 = vor.u32 %v12256_v23, %v9078_v25 }
 0x168   :  { %3072 = vmatpush.bf16.msrb.mxu0 %v8817_v34  ;;  %v9105_v34 = vor.u32 %v12262_v62, %v9102_v48  ;;  %v9209_v36 = vor.u32 %v12288_v35, %v9206_v37  ;;  %v9134_v48 = vld [vmem:[#allocation5 + $0x8a8] sm:$0xf0]  ;;  %v12376_v37 = vld [vmem:[#allocation5 + $0xbf4] sm:$0xf] }
 0x169   :  { %3085 = vmatpush.bf16.msrb.mxu1 %v8881_v58  ;;  %v9233_v58 = vor.u32 %v12294_v52, %v9230_v53  ;;  %v12302_v53 = vld [vmem:[#allocation5 + $0x9a4] sm:$0xf] }
 0x16a   :  { %3098 = vmatpush.bf16.msrb.mxu2 %v8945_v63  ;;  %v12260_v63 = vld [vmem:[#allocation5 + $0x854] sm:$0xf]  ;;  %v9265_v1 = vor.u32 %v12302_v53, %v9262_v54 }
 0x16b   :  { %3111 = vmatpush.bf16.msrb.mxu3 %v9009_v40  ;;  %v9158_v40 = vld [vmem:[#allocation5 + $0x8d8] sm:$0xf0]  ;;  %v9097_v4 = vor.u32 %v12260_v63, %v9094_v61 }
 0x16c   :  { %3073 = vmatpush.bf16.msrb.mxu0 %v8809_v5  ;;  %v9161_v5 = vor.u32 %v12276_v39, %v9158_v40  ;;  %v12252_v39 = vld [vmem:[#allocation5 + $0x814] sm:$0xf] }
 0x16d   :  { %3086 = vmatpush.bf16.msrb.mxu1 %v8873_v28  ;;  %v12274_v28 = vld [vmem:[#allocation5 + $0x8c4] sm:$0xf]  ;;  %v12268_v40 = vld [vmem:[#allocation5 + $0x894] sm:$0xf] }
 0x16e   :  { %3099 = vmatpush.bf16.msrb.mxu2 %v8937_v10  ;;  %v9289_v10 = vor.u32 %v12308_v3, %v9286_v24  ;;  %v9153_v17 = vor.u32 %v12274_v28, %v9150_v29  ;;  %v12284_v3 = vld [vmem:[#allocation5 + $0x914] sm:$0xf]  ;;  %v9190_v24 = vld [vmem:[#allocation5 + $0x918] sm:$0xf0]  ;;  %v9129_v28 = vor.u32 %v12268_v40, %v9126_v44  ;;  %v12266_v29 = vld [vmem:[#allocation5 + $0x884] sm:$0xf] }
 0x16f   :  { %3112 = vmatpush.bf16.msrb.mxu3 %v9001_v14  ;;  %v9278_v14 = vld [vmem:[#allocation5 + $0x9c8] sm:$0xf0]  ;;  %v12372_v40 = vld [vmem:[#allocation5 + $0xbd4] sm:$0xf] }
 0x170   :  { %3074 = vmatpush.bf16.msrb.mxu0 %v8801_v31  ;;  %v2868_v18 = vpop.f32.mrf.mxu0 }
 0x171   :  { %3087 = vmatpush.bf16.msrb.mxu1 %v8865_v19  ;;  %v2881_v16 = vpop.f32.mrf.mxu1  ;;  %v12304_v19 = vld [vmem:[#allocation5 + $0x9b4] sm:$0xf] }
 0x172   :  { %3100 = vmatpush.bf16.msrb.mxu2 %v8929_v41  ;;  %v9270_v41 = vld [vmem:[#allocation5 + $0x9b8] sm:$0xf0] }
 0x173   :  { %3113 = vmatpush.bf16.msrb.mxu3 %v8993_v45  ;;  %3075 = vmatmul.bf16.vlgmr.msrb.gmra.mxu0 %v13487_v26  ;;  %v9086_v26 = vld [vmem:[#allocation5 + $0x848] sm:$0xf0]  ;;  %v12254_v45 = vld [vmem:[#allocation5 + $0x824] sm:$0xf] }
 0x174   :  { %3119 = vmatpush.bf16.msra.mxu0 %v9113_v42  ;;  %3088 = vmatmul.bf16.vlgmr.msrb.gmra.mxu1 %v13495_v33  ;;  %v12306_v33 = vld [vmem:[#allocation5 + $0x9c4] sm:$0xf]  ;;  %v9089_v15 = vor.u32 %v12258_v9, %v9086_v26  ;;  %v9070_v42 = vld [vmem:[#allocation5 + $0x828] sm:$0xf0] }
 0x175   :  { %3132 = vmatpush.bf16.msra.mxu1 %v9177_v46  ;;  %3101 = vmatmul.bf16.vlgmr.msrb.gmra.mxu2 %v13491_v32  ;;  %v9214_v32 = vld [vmem:[#allocation5 + $0x948] sm:$0xf0]  ;;  %v9281_v30 = vor.u32 %v12306_v33, %v9278_v14  ;;  %v12270_v46 = vld [vmem:[#allocation5 + $0x8a4] sm:$0xf] }
 0x176   :  { %3145 = vmatpush.bf16.msra.mxu2 %v9241_v43  ;;  %3114 = vmatmul.bf16.vlgmr.msrb.gmra.mxu3 %v13499_v59  ;;  %v2869_v59 = vadd.f32 %v2868_v18, %v13550_v57  ;;  %v9217_v20 = vor.u32 %v12290_v13, %v9214_v32  ;;  %v9145_v57 = vor.u32 %v12272_v27, %v9142_v11  ;;  %v12250_v9 = vld [vmem:[#allocation5 + $0x804] sm:$0xf]  ;;  %v9054_v26 = vld [vmem:[#allocation5 + $0x808] sm:$0xf0]  ;;  %v9430_v27 = vld [vmem:[#allocation5 + $0xaf8] sm:$0xf0] }
 0x177   :  { %3158 = vmatpush.bf16.msra.mxu3 %v9305_v50  ;;  %v9273_v43 = vor.u32 %v12304_v19, %v9270_v41  ;;  %v9198_v50 = vld [vmem:[#allocation5 + $0x928] sm:$0xf0]  ;;  %v9137_v63 = vor.u32 %v12270_v46, %v9134_v48  ;;  %v12282_v32 = vld [vmem:[#allocation5 + $0x904] sm:$0xf]  ;;  %v9057_v25 = vor.u32 %v12250_v9, %v9054_v26  ;;  %v9558_v19 = vld [vmem:[#allocation5 + $0xbf8] sm:$0xf0] }
 0x178   :  { %3120 = vmatpush.bf16.msra.mxu0 %v9105_v34  ;;  %v2882_v31 = vadd.f32 %v2881_v16, %v2869_v59  ;;  %v2894_v62 = vpop.f32.mrf.mxu2  ;;  %v2870_v55 = vpop.f32.mrf.mxu0  ;;  %v9073_v34 = vor.u32 %v12254_v45, %v9070_v42  ;;  %v9201_v61 = vor.u32 %v12286_v22, %v9198_v50  ;;  %v9118_v13 = vld [vmem:[#allocation5 + $0x888] sm:$0xf0]  ;;  %v12298_v14 = vld [vmem:[#allocation5 + $0x984] sm:$0xf]  ;;  %v12328_v16 = vld [vmem:[#allocation5 + $0xa74] sm:$0xf] }
 0x179   :  { %3133 = vmatpush.bf16.msra.mxu1 %v9169_v56  ;;  %v2907_v52 = vpop.f32.mrf.mxu3  ;;  %v2883_v56 = vpop.f32.mrf.mxu1  ;;  %v9182_v33 = vld [vmem:[#allocation5 + $0x908] sm:$0xf0]  ;;  %v9121_v11 = vor.u32 %v12266_v29, %v9118_v13  ;;  %v12326_v45 = vld [vmem:[#allocation5 + $0xa64] sm:$0xf]  ;;  %v12324_v55 = vld [vmem:[#allocation5 + $0xa54] sm:$0xf] }
 0x17a   :  { %3146 = vmatpush.bf16.msra.mxu2 %v9233_v58  ;;  %v2895_v51 = vadd.f32 %v2894_v62, %v2882_v31  ;;  %v9246_v59 = vld [vmem:[#allocation5 + $0x988] sm:$0xf0]  ;;  %v9494_v31 = vld [vmem:[#allocation5 + $0xb78] sm:$0xf0]  ;;  %v9185_v35 = vor.u32 %v12282_v32, %v9182_v33  ;;  %v12342_v46 = vld [vmem:[#allocation5 + $0xae4] sm:$0xf] }
 0x17b   :  { %3159 = vmatpush.bf16.msra.mxu3 %v9297_v0  ;;  %v9062_v0 = vld [vmem:[#allocation5 + $0x818] sm:$0xf0]  ;;  %v9249_v41 = vor.u32 %v12298_v14, %v9246_v59  ;;  %v9358_v42 = vld [vmem:[#allocation5 + $0xa68] sm:$0xf0]  ;;  %v12358_v48 = vld [vmem:[#allocation5 + $0xb64] sm:$0xf] }
 0x17c   :  { %3121 = vmatpush.bf16.msra.mxu0 %v9097_v4  ;;  %v13557_v58 = vadd.f32 %v2907_v52, %v2895_v51  ;;  %v12300_v4 = vld [vmem:[#allocation5 + $0x994] sm:$0xf]  ;;  %v9422_v62 = vld [vmem:[#allocation5 + $0xae8] sm:$0xf0]  ;;  %v12374_v50 = vld [vmem:[#allocation5 + $0xbe4] sm:$0xf]  ;;  %v9361_v52 = vor.u32 %v12326_v45, %v9358_v42 }
 0x17d   :  { %3134 = vmatpush.bf16.msra.mxu1 %v9161_v5  ;;  %v9254_v5 = vld [vmem:[#allocation5 + $0x998] sm:$0xf0]  ;;  %v9486_v22 = vld [vmem:[#allocation5 + $0xb68] sm:$0xf0]  ;;  %v9425_v53 = vor.u32 %v12342_v46, %v9422_v62  ;;  %v12340_v56 = vld [vmem:[#allocation5 + $0xad4] sm:$0xf] }
 0x17e   :  { %3147 = vmatpush.bf16.msra.mxu2 %v9225_v6  ;;  %v9065_v6 = vor.u32 %v12252_v39, %v9062_v0  ;;  %v9257_v18 = vor.u32 %v12300_v4, %v9254_v5  ;;  %v9550_v51 = vld [vmem:[#allocation5 + $0xbe8] sm:$0xf0]  ;;  %v9489_v54 = vor.u32 %v12358_v48, %v9486_v22  ;;  %v12356_v39 = vld [vmem:[#allocation5 + $0xb54] sm:$0xf]  ;;  %v9478_v0 = vld [vmem:[#allocation5 + $0xb58] sm:$0xf0] }
 0x17f   :  { %3160 = vmatpush.bf16.msra.mxu3 %v9289_v10  ;;  %v9193_v10 = vor.u32 %v12284_v3, %v9190_v24  ;;  %v12322_v3 = vld [vmem:[#allocation5 + $0xa44] sm:$0xf]  ;;  %v9481_v4 = vor.u32 %v12356_v39, %v9478_v0  ;;  %v9534_v29 = vld [vmem:[#allocation5 + $0xbc8] sm:$0xf0]  ;;  %v12320_v33 = vld [vmem:[#allocation5 + $0xa34] sm:$0xf] }
 0x180   :  { %3122 = vmatpush.bf16.msra.mxu0 %v9089_v15  ;;  %v2896_v15 = vpop.f32.mrf.mxu2  ;;  %v12338_v5 = vld [vmem:[#allocation5 + $0xac4] sm:$0xf]  ;;  %v9334_v14 = vld [vmem:[#allocation5 + $0xa38] sm:$0xf0]  ;;  %v12336_v59 = vld [vmem:[#allocation5 + $0xab4] sm:$0xf] }
 0x181   :  { %3135 = vmatpush.bf16.msra.mxu1 %v9153_v17  ;;  %v9366_v17 = vld [vmem:[#allocation5 + $0xa78] sm:$0xf0]  ;;  %v2909_v23 = vpop.f32.mrf.mxu3  ;;  %v9390_v45 = vld [vmem:[#allocation5 + $0xaa8] sm:$0xf0]  ;;  %v12350_v42 = vld [vmem:[#allocation5 + $0xb24] sm:$0xf] }
 0x182   :  { %3148 = vmatpush.bf16.msra.mxu2 %v9217_v20  ;;  %v12344_v20 = vld [vmem:[#allocation5 + $0xaf4] sm:$0xf]  ;;  %v9454_v46 = vld [vmem:[#allocation5 + $0xb28] sm:$0xf0]  ;;  %v12366_v48 = vld [vmem:[#allocation5 + $0xba4] sm:$0xf] }
 0x183   :  { %3161 = vmatpush.bf16.msra.mxu3 %v9281_v30  ;;  %v12360_v30 = vld [vmem:[#allocation5 + $0xb74] sm:$0xf]  ;;  %v9518_v22 = vld [vmem:[#allocation5 + $0xba8] sm:$0xf0]  ;;  %v9382_v39 = vld [vmem:[#allocation5 + $0xa98] sm:$0xf0] }
 0x184   :  { %3123 = vmatpush.bf16.msra.mxu0 %v9081_v49  ;;  %v9369_v49 = vor.u32 %v12328_v16, %v9366_v17  ;;  %v12352_v23 = vld [vmem:[#allocation5 + $0xb34] sm:$0xf] }
 0x185   :  { %3136 = vmatpush.bf16.msra.mxu1 %v9145_v57  ;;  %v9433_v57 = vor.u32 %v12344_v20, %v9430_v27  ;;  %v9398_v20 = vld [vmem:[#allocation5 + $0xab8] sm:$0xf0]  ;;  %v12368_v27 = vld [vmem:[#allocation5 + $0xbb4] sm:$0xf] }
 0x186   :  { %3149 = vmatpush.bf16.msra.mxu2 %v9209_v36  ;;  %v9497_v36 = vor.u32 %v12360_v30, %v9494_v31  ;;  %v9526_v30 = vld [vmem:[#allocation5 + $0xbb8] sm:$0xf0]  ;;  %v12348_v0 = vld [vmem:[#allocation5 + $0xb14] sm:$0xf] }
 0x187   :  { %3162 = vmatpush.bf16.msra.mxu3 %v9273_v43  ;;  %v9561_v43 = vor.u32 %v12376_v37, %v9558_v19  ;;  %v12318_v19 = vld [vmem:[#allocation5 + $0xa24] sm:$0xf] }
 0x188   :  { %3124 = vmatpush.bf16.msra.mxu0 %v9073_v34  ;;  %v9350_v34 = vld [vmem:[#allocation5 + $0xa58] sm:$0xf0] }
 0x189   :  { %3137 = vmatpush.bf16.msra.mxu1 %v9137_v63  ;;  %v9553_v63 = vor.u32 %v12374_v50, %v9550_v51  ;;  %v9353_v44 = vor.u32 %v12324_v55, %v9350_v34  ;;  %v12316_v55 = vld [vmem:[#allocation5 + $0xa14] sm:$0xf]  ;;  %v9318_v34 = vld [vmem:[#allocation5 + $0xa18] sm:$0xf0] }
 0x18a   :  { %3150 = vmatpush.bf16.msra.mxu2 %v9201_v61  ;;  %v9414_v61 = vld [vmem:[#allocation5 + $0xad8] sm:$0xf0] }
 0x18b   :  { %3163 = vmatpush.bf16.msra.mxu3 %v9265_v1  ;;  %v9542_v1 = vld [vmem:[#allocation5 + $0xbd8] sm:$0xf0]  ;;  %v9417_v24 = vor.u32 %v12340_v56, %v9414_v61  ;;  %v12332_v56 = vld [vmem:[#allocation5 + $0xa94] sm:$0xf]  ;;  %v9521_v61 = vor.u32 %v12366_v48, %v9518_v22 }
 0x18c   :  { %3125 = vmatpush.bf16.msra.mxu0 %v9065_v6  ;;  %v13007_v6 = vld [vmem:[#allocation7] sm:$0x3]  ;;  %v9545_v26 = vor.u32 %v12372_v40, %v9542_v1  ;;  %v9446_v40 = vld [vmem:[#allocation5 + $0xb18] sm:$0xf0]  ;;  %v12364_v1 = vld [vmem:[#allocation5 + $0xb94] sm:$0xf] }
 0x18d   :  { %3138 = vmatpush.bf16.msra.mxu1 %v9129_v28  ;;  %v676_v9 = vperm.slane %v13007_v6, 1  ;;  %v12354_v28 = vld [vmem:[#allocation5 + $0xb44] sm:$0xf]  ;;  %v12392_v48 = vld [vmem:[#allocation8 + $0x6c] sm:$0xf0] }
 0x18e   :  { %3151 = vmatpush.bf16.msra.mxu2 %v9193_v10  ;;  %v12370_v10 = vld [vmem:[#allocation5 + $0xbc4] sm:$0xf] }
 0x18f   :  { %3164 = vmatpush.bf16.msra.mxu3 %v9257_v18  ;;  %v9537_v17 = vor.u32 %v12370_v10, %v9534_v29  ;;  %v12330_v6 = vld [vmem:[#allocation5 + $0xa84] sm:$0xf] }
 0x190   :  { %3126 = vmatpush.bf16.msra.mxu0 %v9057_v25  ;;  %v2920_v13 = vpop.f32.mrf.mxu0  ;;  %v9462_v25 = vld [vmem:[#allocation5 + $0xb38] sm:$0xf0]  ;;  %v12362_v10 = vld [vmem:[#allocation5 + $0xb84] sm:$0xf] }
 0x191   :  { %3139 = vmatpush.bf16.msra.mxu1 %v9121_v11  ;;  %v2921_v15 = vadd.f32 %v2920_v13, %v676_v9  ;;  %v2933_v16 = vpop.f32.mrf.mxu1  ;;  %v9337_v11 = vor.u32 %v12320_v33, %v9334_v14  ;;  %v9465_v37 = vor.u32 %v12352_v23, %v9462_v25  ;;  %v9374_v9 = vld [vmem:[#allocation5 + $0xa88] sm:$0xf0]  ;;  %v9676_v13 = vld [vmem:[#allocation8 + $0xe0] sm:$0xf]  ;;  %v12406_v33 = vld [vmem:[#allocation8 + $0xe4] sm:$0xf] }
 0x192   :  { %3152 = vmatpush.bf16.msra.mxu2 %v9185_v35  ;;  %v9401_v35 = vor.u32 %v12336_v59, %v9398_v20  ;;  %v9678_v14 = vld [vmem:[#allocation8 + $0xf0] sm:$0xf0]  ;;  %v9377_v59 = vor.u32 %v12330_v6, %v9374_v9  ;;  %v9660_v23 = vld [vmem:[#allocation8 + $0xc0] sm:$0xf]  ;;  %v12404_v25 = vld [vmem:[#allocation8 + $0xcc] sm:$0xf0] }
 0x193   :  { %3165 = vmatpush.bf16.msra.mxu3 %v9249_v41  ;;  %3127 = vmatmul.bf16.vlgmr.msra.gmra.mxu0 %v13505_v38  ;;  %v9342_v38 = vld [vmem:[#allocation5 + $0xa48] sm:$0xf0]  ;;  %v2934_v31 = vadd.f32 %v2933_v16, %v2921_v15  ;;  %v9681_v20 = vor.u32 %v12406_v33, %v9678_v14  ;;  %v3223_v14 = vmax.f32 %v13557_v58, 0.0 }
 0x194   :  { %3171 = vmatpush.bf16.msrb.mxu0 %v9369_v49  ;;  %3140 = vmatmul.bf16.vlgmr.msra.gmra.mxu1 %v13509_v60  ;;  %v9470_v60 = vld [vmem:[#allocation5 + $0xb48] sm:$0xf0]  ;;  %v12334_v49 = vld [vmem:[#allocation5 + $0xaa4] sm:$0xf] }
 0x195   :  { %3184 = vmatpush.bf16.msrb.mxu1 %v9433_v57  ;;  %3153 = vmatmul.bf16.vlgmr.msra.gmra.mxu2 %v13507_v21  ;;  %v9406_v21 = vld [vmem:[#allocation5 + $0xac8] sm:$0xf0]  ;;  %v9473_v18 = vor.u32 %v12354_v28, %v9470_v60  ;;  %v12346_v28 = vld [vmem:[#allocation5 + $0xb04] sm:$0xf] }
 0x196   :  { %3197 = vmatpush.bf16.msrb.mxu2 %v9497_v36  ;;  %3166 = vmatmul.bf16.vlgmr.msra.gmra.mxu3 %v13511_v47  ;;  %v9345_v47 = vor.u32 %v12322_v3, %v9342_v38  ;;  %v9409_v32 = vor.u32 %v12338_v5, %v9406_v21  ;;  %v9326_v41 = vld [vmem:[#allocation5 + $0xa28] sm:$0xf0]  ;;  %v9529_v36 = vor.u32 %v12368_v27, %v9526_v30  ;;  %v12402_v27 = vld [vmem:[#allocation8 + $0xc4] sm:$0xf]  ;;  %v9662_v30 = vld [vmem:[#allocation8 + $0xd0] sm:$0xf0] }
 0x197   :  { %3210 = vmatpush.bf16.msrb.mxu3 %v9561_v43  ;;  %v9329_v50 = vor.u32 %v12318_v19, %v9326_v41  ;;  %v9321_v3 = vor.u32 %v12316_v55, %v9318_v34  ;;  %v9449_v38 = vor.u32 %v12348_v0, %v9446_v40  ;;  %v9310_v5 = vld [vmem:[#allocation5 + $0xa08] sm:$0xf0]  ;;  %v12398_v19 = vld [vmem:[#allocation8 + $0xa4] sm:$0xf]  ;;  %v9646_v41 = vld [vmem:[#allocation8 + $0xb0] sm:$0xf0] }
 0x198   :  { %3172 = vmatpush.bf16.msrb.mxu0 %v9361_v52  ;;  %v2946_v57 = vpop.f32.mrf.mxu2  ;;  %v2922_v52 = vpop.f32.mrf.mxu0  ;;  %v9438_v60 = vld [vmem:[#allocation5 + $0xb08] sm:$0xf0]  ;;  %v9596_v55 = vld [vmem:[#allocation8 + $0x40] sm:$0xf]  ;;  %v12388_v34 = vld [vmem:[#allocation8 + $0x4c] sm:$0xf0] }
 0x199   :  { %3185 = vmatpush.bf16.msrb.mxu1 %v9425_v53  ;;  %v2947_v43 = vadd.f32 %v2946_v57, %v2934_v31  ;;  %v2959_v62 = vpop.f32.mrf.mxu3  ;;  %v9393_v53 = vor.u32 %v12334_v49, %v9390_v45  ;;  %v9441_v15 = vor.u32 %v12346_v28, %v9438_v60  ;;  %v9661_v31 = vor.u32 %v12404_v25, %v9660_v23  ;;  %v12396_v45 = vld [vmem:[#allocation8 + $0x8c] sm:$0xf0]  ;;  %v12378_v28 = vld [vmem:[#allocation8 + $0x4] sm:$0xf]  ;;  %v12403_v23 = vld [vmem:[#allocation8 + $0xcc] sm:$0xf] }
 0x19a   :  { %3198 = vmatpush.bf16.msrb.mxu2 %v9489_v54  ;;  %v9457_v54 = vor.u32 %v12350_v42, %v9454_v46  ;;  %v9649_v57 = vor.u32 %v12398_v19, %v9646_v41  ;;  %v12394_v42 = vld [vmem:[#allocation8 + $0x84] sm:$0xf]  ;;  %v9630_v46 = vld [vmem:[#allocation8 + $0x90] sm:$0xf0]  ;;  %v9597_v40 = vor.u32 %v12388_v34, %v9596_v55  ;;  %v9670_v25 = vld [vmem:[#allocation8 + $0xd8] sm:$0xf0] }
 0x19b   :  { %3211 = vmatpush.bf16.msrb.mxu3 %v9553_v63  ;;  %v13563_v51 = vadd.f32 %v2959_v62, %v2947_v43  ;;  %v2935_v63 = vpop.f32.mrf.mxu1  ;;  %v9633_v62 = vor.u32 %v12394_v42, %v9630_v46  ;;  %v12399_v58 = vld [vmem:[#allocation8 + $0xac] sm:$0xf]  ;;  %v9606_v34 = vld [vmem:[#allocation8 + $0x58] sm:$0xf0] }
 0x19c   :  { %3173 = vmatpush.bf16.msrb.mxu0 %v9353_v44  ;;  %v9510_v44 = vld [vmem:[#allocation5 + $0xb98] sm:$0xf0]  ;;  %v12386_v63 = vld [vmem:[#allocation8 + $0x44] sm:$0xf]  ;;  %v12387_v55 = vld [vmem:[#allocation8 + $0x4c] sm:$0xf] }
 0x19d   :  { %3186 = vmatpush.bf16.msrb.mxu1 %v9417_v24  ;;  %v12314_v24 = vld [vmem:[#allocation5 + $0xa04] sm:$0xf]  ;;  %v9513_v21 = vor.u32 %v12364_v1, %v9510_v44 }
 0x19e   :  { %3199 = vmatpush.bf16.msrb.mxu2 %v9481_v4  ;;  %v9385_v4 = vor.u32 %v12332_v56, %v9382_v39 }
 0x19f   :  { %3212 = vmatpush.bf16.msrb.mxu3 %v9545_v26 }
 0x1a0   :  { %3174 = vmatpush.bf16.msrb.mxu0 %v9345_v47  ;;  %v2948_v26 = vpop.f32.mrf.mxu2  ;;  %v9502_v47 = vld [vmem:[#allocation5 + $0xb88] sm:$0xf0] }
 0x1a1   :  { %3187 = vmatpush.bf16.msrb.mxu1 %v9409_v32  ;;  %v2961_v29 = vpop.f32.mrf.mxu3  ;;  %v12408_v32 = vld [vmem:[#allocation8 + $0xec] sm:$0xf0]  ;;  %v9505_v16 = vor.u32 %v12362_v10, %v9502_v47  ;;  %v9564_v26 = vld [vmem:[#allocation8] sm:$0xf]  ;;  %v9566_v10 = vld [vmem:[#allocation8 + $0x10] sm:$0xf0] }
 0x1a2   :  { %3200 = vmatpush.bf16.msrb.mxu2 %v9473_v18  ;;  %v9313_v18 = vor.u32 %v12314_v24, %v9310_v5  ;;  %v12384_v24 = vld [vmem:[#allocation8 + $0x2c] sm:$0xf0]  ;;  %v9582_v5 = vld [vmem:[#allocation8 + $0x30] sm:$0xf0]  ;;  %v9684_v29 = vld [vmem:[#allocation8 + $0xe8] sm:$0xf] }
 0x1a3   :  { %3213 = vmatpush.bf16.msrb.mxu3 %v9537_v17  ;;  %v9677_v17 = vor.u32 %v12408_v32, %v9676_v13  ;;  %v12409_v47 = vld [vmem:[#allocation8 + $0xf4] sm:$0xf0]  ;;  %v12407_v32 = vld [vmem:[#allocation8 + $0xec] sm:$0xf] }
 0x1a4   :  { %3175 = vmatpush.bf16.msrb.mxu0 %v9337_v11  ;;  %v9665_v11 = vor.u32 %v12402_v27, %v9662_v30  ;;  %v13571_v27 = vpack.c.bf16 %v3223_v14, %v3223_v14 }
 0x1a5   :  { %3188 = vmatpush.bf16.msrb.mxu1 %v9401_v35  ;;  %v9644_v35 = vld [vmem:[#allocation8 + $0xa0] sm:$0xf] }
 0x1a6   :  { %3201 = vmatpush.bf16.msrb.mxu2 %v9465_v37  ;;  %v12400_v37 = vld [vmem:[#allocation8 + $0xac] sm:$0xf0] }
 0x1a7   :  { %3214 = vmatpush.bf16.msrb.mxu3 %v9529_v36  ;;  %v9645_v49 = vor.u32 %v12400_v37, %v9644_v35  ;;  %v9628_v36 = vld [vmem:[#allocation8 + $0x80] sm:$0xf]  ;;  %v12401_v35 = vld [vmem:[#allocation8 + $0xb4] sm:$0xf0]  ;;  %v9654_v37 = vld [vmem:[#allocation8 + $0xb8] sm:$0xf0] }
 0x1a8   :  { %3176 = vmatpush.bf16.msrb.mxu0 %v9329_v50  ;;  %v12390_v50 = vld [vmem:[#allocation8 + $0x64] sm:$0xf]  ;;  %v9657_v41 = vor.u32 %v12399_v58, %v9654_v37  ;;  %v9774_v58 = vld [vmem:[#allocation8 + $0x1b0] sm:$0xf0] }
 0x1a9   :  { %3189 = vmatpush.bf16.msrb.mxu1 %v9393_v53 }
 0x1aa   :  { %3202 = vmatpush.bf16.msrb.mxu2 %v9457_v54 }
 0x1ab   :  { %3215 = vmatpush.bf16.msrb.mxu3 %v9521_v61  ;;  %v9598_v61 = vld [vmem:[#allocation8 + $0x50] sm:$0xf0] }
 0x1ac   :  { %3177 = vmatpush.bf16.msrb.mxu0 %v9321_v3  ;;  %v9580_v3 = vld [vmem:[#allocation8 + $0x20] sm:$0xf] }
 0x1ad   :  { %3190 = vmatpush.bf16.msrb.mxu1 %v9385_v4  ;;  %v9581_v6 = vor.u32 %v12384_v24, %v9580_v3  ;;  %v12383_v24 = vld [vmem:[#allocation8 + $0x2c] sm:$0xf] }
 0x1ae   :  { %3203 = vmatpush.bf16.msrb.mxu2 %v9449_v38  ;;  %v12382_v38 = vld [vmem:[#allocation8 + $0x24] sm:$0xf] }
 0x1af   :  { %3216 = vmatpush.bf16.msrb.mxu3 %v9513_v21  ;;  %v9585_v9 = vor.u32 %v12382_v38, %v9582_v5  ;;  %v12380_v21 = vld [vmem:[#allocation8 + $0xc] sm:$0xf0] }
 0x1b0   :  { %3178 = vmatpush.bf16.msrb.mxu0 %v9313_v18  ;;  %v2972_v43 = vpop.f32.mrf.mxu0  ;;  %v9686_v18 = vld [vmem:[#allocation8 + $0xf8] sm:$0xf0]  ;;  %v9565_v33 = vor.u32 %v12380_v21, %v9564_v26  ;;  %v12379_v26 = vld [vmem:[#allocation8 + $0xc] sm:$0xf] }
 0x1b1   :  { %3191 = vmatpush.bf16.msrb.mxu1 %v9377_v59  ;;  %v2985_v22 = vpop.f32.mrf.mxu1  ;;  %v9569_v59 = vor.u32 %v12378_v28, %v9566_v10  ;;  %v9574_v21 = vld [vmem:[#allocation8 + $0x18] sm:$0xf0] }
 0x1b2   :  { %3204 = vmatpush.bf16.msrb.mxu2 %v9441_v15  ;;  %v9685_v15 = vor.u32 %v12409_v47, %v9684_v29  ;;  %v9577_v29 = vor.u32 %v12379_v26, %v9574_v21  ;;  %v9804_v47 = vld [vmem:[#allocation8 + $0x1e0] sm:$0xf]  ;;  %v12441_v26 = vld [vmem:[#allocation8 + $0x1f4] sm:$0xf0]  ;;  %v12439_v21 = vld [vmem:[#allocation8 + $0x1ec] sm:$0xf] }
 0x1b3   :  { %3217 = vmatpush.bf16.msrb.mxu3 %v9505_v16  ;;  %3179 = vmatmul.bf16.vlgmr.msrb.gmra.mxu0 %v13517_v2  ;;  %v9629_v2 = vor.u32 %v12396_v45, %v9628_v36  ;;  %v9689_v16 = vor.u32 %v12407_v32, %v9686_v18  ;;  %v12395_v36 = vld [vmem:[#allocation8 + $0x8c] sm:$0xf]  ;;  %v9638_v45 = vld [vmem:[#allocation8 + $0x98] sm:$0xf0]  ;;  %v12438_v32 = vld [vmem:[#allocation8 + $0x1e4] sm:$0xf] }
 0x1b4   :  { %3621 = vmatpush.bf16.msra.mxu0 %v9677_v17  ;;  %3192 = vmatmul.bf16.vlgmr.msrb.gmra.mxu1 %v13521_v8  ;;  %v9612_v8 = vld [vmem:[#allocation8 + $0x60] sm:$0xf]  ;;  %v9668_v17 = vld [vmem:[#allocation8 + $0xc8] sm:$0xf] }
 0x1b5   :  { %3205 = vmatmul.bf16.vlgmr.msrb.gmra.mxu2 %v13519_v7  ;;  %v2973_v7 = vadd.f32 %v2972_v43, %v13563_v51  ;;  %v9613_v53 = vor.u32 %v12392_v48, %v9612_v8  ;;  %v9601_v51 = vor.u32 %v12386_v63, %v9598_v61  ;;  %v9641_v43 = vor.u32 %v12395_v36, %v9638_v45  ;;  %v9620_v8 = vld [vmem:[#allocation8 + $0x68] sm:$0xf]  ;;  %v12393_v48 = vld [vmem:[#allocation8 + $0x74] sm:$0xf0]  ;;  %v12428_v36 = vld [vmem:[#allocation8 + $0x18c] sm:$0xf0] }
 0x1b6   :  { %3647 = vmatpush.bf16.msra.mxu2 %v9681_v20  ;;  %3218 = vmatmul.bf16.vlgmr.msrb.gmra.mxu3 %v13523_v12  ;;  %v9614_v12 = vld [vmem:[#allocation8 + $0x70] sm:$0xf0]  ;;  %v12405_v20 = vld [vmem:[#allocation8 + $0xd4] sm:$0xf0]  ;;  %v12426_v45 = vld [vmem:[#allocation8 + $0x184] sm:$0xf] }
 0x1b7   :  { %v2986_v52 = vadd.f32 %v2985_v22, %v2973_v7  ;;  %v9617_v54 = vor.u32 %v12390_v50, %v9614_v12  ;;  %v9669_v30 = vor.u32 %v12405_v20, %v9668_v17  ;;  %v12391_v7 = vld [vmem:[#allocation8 + $0x6c] sm:$0xf]  ;;  %v9622_v22 = vld [vmem:[#allocation8 + $0x78] sm:$0xf0]  ;;  %v9621_v12 = vor.u32 %v12393_v48, %v9620_v8  ;;  %v12436_v17 = vld [vmem:[#allocation8 + $0x1cc] sm:$0xf0] }
 0x1b8   :  { %3622 = vmatpush.bf16.msra.mxu0 %v9661_v31  ;;  %v2998_v56 = vpop.f32.mrf.mxu2  ;;  %v2974_v44 = vpop.f32.mrf.mxu0  ;;  %v9673_v31 = vor.u32 %v12403_v23, %v9670_v25  ;;  %v12434_v20 = vld [vmem:[#allocation8 + $0x1c4] sm:$0xf]  ;;  %v9790_v25 = vld [vmem:[#allocation8 + $0x1d0] sm:$0xf0] }
 0x1b9   :  { %v2999_v39 = vadd.f32 %v2998_v56, %v2986_v52  ;;  %v3011_v0 = vpop.f32.mrf.mxu3  ;;  %v2987_v4 = vpop.f32.mrf.mxu1  ;;  %v9625_v52 = vor.u32 %v12391_v7, %v9622_v22  ;;  %v12385_v44 = vld [vmem:[#allocation8 + $0x34] sm:$0xf0]  ;;  %v12422_v48 = vld [vmem:[#allocation8 + $0x164] sm:$0xf]  ;;  %v9742_v7 = vld [vmem:[#allocation8 + $0x170] sm:$0xf0] }
 0x1ba   :  { %3648 = vmatpush.bf16.msra.mxu2 %v9665_v11  ;;  %v9652_v11 = vld [vmem:[#allocation8 + $0xa8] sm:$0xf]  ;;  %v9590_v4 = vld [vmem:[#allocation8 + $0x38] sm:$0xf0] }
 0x1bb   :  { %v3012_v1 = vadd.f32 %v3011_v0, %v2999_v39  ;;  %v9653_v19 = vor.u32 %v12401_v35, %v9652_v11  ;;  %v9593_v5 = vor.u32 %v12383_v24, %v9590_v4  ;;  %v12430_v11 = vld [vmem:[#allocation8 + $0x1a4] sm:$0xf]  ;;  %v12412_v24 = vld [vmem:[#allocation8 + $0x10c] sm:$0xf0] }
 0x1bc   :  { %3623 = vmatpush.bf16.msra.mxu0 %v9645_v49  ;;  %v9636_v49 = vld [vmem:[#allocation8 + $0x88] sm:$0xf]  ;;  %v12410_v4 = vld [vmem:[#allocation8 + $0x104] sm:$0xf] }
 0x1be   :  { %3649 = vmatpush.bf16.msra.mxu2 %v9649_v57  ;;  %v12397_v57 = vld [vmem:[#allocation8 + $0x94] sm:$0xf0] }
 0x1bf   :  { %v9637_v46 = vor.u32 %v12397_v57, %v9636_v49  ;;  %v9756_v57 = vld [vmem:[#allocation8 + $0x180] sm:$0xf] }
 0x1c0   :  { %3624 = vmatpush.bf16.msra.mxu0 %v9629_v2  ;;  %v3000_v60 = vpop.f32.mrf.mxu2 }
 0x1c1   :  { %v3013_v13 = vpop.f32.mrf.mxu3 }
 0x1c2   :  { %3650 = vmatpush.bf16.msra.mxu2 %v9633_v62  ;;  %v12440_v13 = vld [vmem:[#allocation8 + $0x1ec] sm:$0xf0] }
 0x1c3   :  { %v9805_v18 = vor.u32 %v12440_v13, %v9804_v47  ;;  %v9796_v47 = vld [vmem:[#allocation8 + $0x1c8] sm:$0xf]  ;;  %v12437_v13 = vld [vmem:[#allocation8 + $0x1d4] sm:$0xf0] }
 0x1c4   :  { %3625 = vmatpush.bf16.msra.mxu0 %v9613_v53  ;;  %v9604_v53 = vld [vmem:[#allocation8 + $0x48] sm:$0xf] }
 0x1c5   :  { %3634 = vmatpush.bf16.msra.mxu1 %v9805_v18 }
 0x1c6   :  { %3651 = vmatpush.bf16.msra.mxu2 %v9617_v54  ;;  %v12389_v54 = vld [vmem:[#allocation8 + $0x54] sm:$0xf0] }
 0x1c7   :  { %v9605_v39 = vor.u32 %v12389_v54, %v9604_v53  ;;  %v12418_v53 = vld [vmem:[#allocation8 + $0x144] sm:$0xf]  ;;  %v9726_v54 = vld [vmem:[#allocation8 + $0x150] sm:$0xf0] }
 0x1c8   :  { %3626 = vmatpush.bf16.msra.mxu0 %v9597_v40  ;;  %v9609_v40 = vor.u32 %v12387_v55, %v9606_v34 }
 0x1ca   :  { %3652 = vmatpush.bf16.msra.mxu2 %v9601_v51 }
 0x1cc   :  { %3627 = vmatpush.bf16.msra.mxu0 %v9581_v6  ;;  %v9572_v6 = vld [vmem:[#allocation8 + $0x8] sm:$0xf] }
 0x1ce   :  { %3653 = vmatpush.bf16.msra.mxu2 %v9585_v9  ;;  %v12381_v9 = vld [vmem:[#allocation8 + $0x14] sm:$0xf0] }
 0x1cf   :  { %v9573_v60 = vor.u32 %v12381_v9, %v9572_v6  ;;  %v9812_v9 = vld [vmem:[#allocation8 + $0x1e8] sm:$0xf] }
 0x1d0   :  { %3628 = vmatpush.bf16.msra.mxu0 %v9565_v33  ;;  %v3024_v42 = vpop.f32.mrf.mxu0  ;;  %v9806_v33 = vld [vmem:[#allocation8 + $0x1f0] sm:$0xf0] }
 0x1d1   :  { %v3025_v2 = vadd.f32 %v3024_v42, %v3012_v1  ;;  %v3037_v62 = vpop.f32.mrf.mxu1  ;;  %v9588_v1 = vld [vmem:[#allocation8 + $0x28] sm:$0xf]  ;;  %v9809_v14 = vor.u32 %v12438_v32, %v9806_v33  ;;  %v12435_v32 = vld [vmem:[#allocation8 + $0x1cc] sm:$0xf]  ;;  %v9797_v33 = vor.u32 %v12437_v13, %v9796_v47 }
 0x1d2   :  { %3654 = vmatpush.bf16.msra.mxu2 %v9569_v59  ;;  %v9589_v38 = vor.u32 %v12385_v44, %v9588_v1 }
 0x1d3   :  { %3629 = vmatmul.bf16.vlgmr.msra.gmra.mxu0 %v13571_v27  ;;  %v3038_v50 = vadd.f32 %v3037_v62, %v3025_v2  ;;  %3660 = vmatpush.bf16.msra.mxu3 %v9809_v14  ;;  %v9758_v2 = vld [vmem:[#allocation8 + $0x190] sm:$0xf0]  ;;  %v12424_v62 = vld [vmem:[#allocation8 + $0x16c] sm:$0xf0]  ;;  %v9798_v14 = vld [vmem:[#allocation8 + $0x1d8] sm:$0xf0] }
 0x1d4   :  { %3673 = vmatpush.bf16.msrb.mxu0 %v9685_v15  ;;  %v9761_v8 = vor.u32 %v12426_v45, %v9758_v2 }
 0x1d5   :  { %3655 = vmatmul.bf16.vlgmr.msra.gmra.mxu2 %v13571_v27 }
 0x1d6   :  { %3699 = vmatpush.bf16.msrb.mxu2 %v9689_v16  ;;  %v9788_v16 = vld [vmem:[#allocation8 + $0x1c0] sm:$0xf] }
 0x1d7   :  { %v9789_v23 = vor.u32 %v12436_v17, %v9788_v16  ;;  %v9801_v16 = vor.u32 %v12435_v32, %v9798_v14  ;;  %v9780_v17 = vld [vmem:[#allocation8 + $0x1a8] sm:$0xf] }
 0x1d8   :  { %3674 = vmatpush.bf16.msrb.mxu0 %v9669_v30  ;;  %v3050_v56 = vpop.f32.mrf.mxu2  ;;  %v3026_v0 = vpop.f32.mrf.mxu0  ;;  %v9793_v30 = vor.u32 %v12434_v20, %v9790_v25  ;;  %v12433_v20 = vld [vmem:[#allocation8 + $0x1b4] sm:$0xf0] }
 0x1d9   :  { %v3051_v63 = vadd.f32 %v3050_v56, %v3038_v50  ;;  %v3063_v61 = vpop.f32.mrf.mxu3  ;;  %v3039_v51 = vpop.f32.mrf.mxu1  ;;  %3635 = vmatpush.bf16.msra.mxu1 %v9789_v23  ;;  %v9745_v50 = vor.u32 %v12422_v48, %v9742_v7  ;;  %v12414_v0 = vld [vmem:[#allocation8 + $0x124] sm:$0xf]  ;;  %v12431_v23 = vld [vmem:[#allocation8 + $0x1ac] sm:$0xf]  ;;  %v9781_v25 = vor.u32 %v12433_v20, %v9780_v17  ;;  %v9750_v48 = vld [vmem:[#allocation8 + $0x178] sm:$0xf0] }
 0x1da   :  { %3700 = vmatpush.bf16.msrb.mxu2 %v9673_v31  ;;  %3661 = vmatpush.bf16.msra.mxu3 %v9793_v30  ;;  %v12432_v31 = vld [vmem:[#allocation8 + $0x1ac] sm:$0xf0]  ;;  %v9692_v51 = vld [vmem:[#allocation8 + $0x100] sm:$0xf]  ;;  %v9782_v30 = vld [vmem:[#allocation8 + $0x1b8] sm:$0xf0] }
 0x1db   :  { %v13575_v3 = vadd.f32 %v3063_v61, %v3051_v63  ;;  %v9729_v63 = vor.u32 %v12418_v53, %v9726_v54  ;;  %v9708_v61 = vld [vmem:[#allocation8 + $0x120] sm:$0xf]  ;;  %v9732_v7 = vld [vmem:[#allocation8 + $0x148] sm:$0xf] }
 0x1dc   :  { %3675 = vmatpush.bf16.msrb.mxu0 %v9653_v19  ;;  %v9777_v19 = vor.u32 %v12430_v11, %v9774_v58 }
 0x1de   :  { %3701 = vmatpush.bf16.msrb.mxu2 %v9657_v41  ;;  %3662 = vmatpush.bf16.msra.mxu3 %v9777_v19  ;;  %v9764_v19 = vld [vmem:[#allocation8 + $0x188] sm:$0xf] }
 0x1e0   :  { %3676 = vmatpush.bf16.msrb.mxu0 %v9637_v46  ;;  %v3052_v28 = vpop.f32.mrf.mxu2  ;;  %v9757_v46 = vor.u32 %v12428_v36, %v9756_v57  ;;  %v12427_v57 = vld [vmem:[#allocation8 + $0x18c] sm:$0xf] }
 0x1e1   :  { %v3065_v10 = vpop.f32.mrf.mxu3  ;;  %v9813_v28 = vor.u32 %v12441_v26, %v9812_v9 }
 0x1e2   :  { %3702 = vmatpush.bf16.msrb.mxu2 %v9641_v43  ;;  %v9740_v43 = vld [vmem:[#allocation8 + $0x160] sm:$0xf]  ;;  %3663 = vmatpush.bf16.msra.mxu3 %v9761_v8  ;;  %v12423_v8 = vld [vmem:[#allocation8 + $0x16c] sm:$0xf] }
 0x1e3   :  { %v9741_v22 = vor.u32 %v12424_v62, %v9740_v43  ;;  %v9748_v43 = vld [vmem:[#allocation8 + $0x168] sm:$0xf]  ;;  %v12425_v62 = vld [vmem:[#allocation8 + $0x174] sm:$0xf0] }
 0x1e4   :  { %3677 = vmatpush.bf16.msrb.mxu0 %v9621_v12  ;;  %v9724_v12 = vld [vmem:[#allocation8 + $0x140] sm:$0xf] }
 0x1e6   :  { %3703 = vmatpush.bf16.msrb.mxu2 %v9625_v52  ;;  %v12420_v52 = vld [vmem:[#allocation8 + $0x14c] sm:$0xf0]  ;;  %3664 = vmatpush.bf16.msra.mxu3 %v9745_v50  ;;  %v9753_v50 = vor.u32 %v12423_v8, %v9750_v48  ;;  %v10556_v8 = vld [vmem:[#allocation11 + $0x5c0] sm:$0xf] }
 0x1e7   :  { %v9725_v56 = vor.u32 %v12420_v52, %v9724_v12  ;;  %v12419_v12 = vld [vmem:[#allocation8 + $0x14c] sm:$0xf]  ;;  %v9734_v52 = vld [vmem:[#allocation8 + $0x158] sm:$0xf0] }
 0x1e8   :  { %3678 = vmatpush.bf16.msrb.mxu0 %v9605_v39  ;;  %v12416_v39 = vld [vmem:[#allocation8 + $0x12c] sm:$0xf0] }
 0x1e9   :  { %v9709_v1 = vor.u32 %v12416_v39, %v9708_v61  ;;  %v12415_v61 = vld [vmem:[#allocation8 + $0x12c] sm:$0xf]  ;;  %v9718_v39 = vld [vmem:[#allocation8 + $0x138] sm:$0xf0] }
 0x1ea   :  { %3704 = vmatpush.bf16.msrb.mxu2 %v9609_v40  ;;  %v9710_v40 = vld [vmem:[#allocation8 + $0x130] sm:$0xf0]  ;;  %3665 = vmatpush.bf16.msra.mxu3 %v9729_v63 }
 0x1eb   :  { %v9713_v44 = vor.u32 %v12414_v0, %v9710_v40  ;;  %v9721_v40 = vor.u32 %v12415_v61, %v9718_v39  ;;  %v12614_v61 = vld [vmem:[#allocation11 + $0x55c] sm:$0xf0] }
 0x1ec   :  { %3679 = vmatpush.bf16.msrb.mxu0 %v9589_v38  ;;  %v9694_v38 = vld [vmem:[#allocation8 + $0x110] sm:$0xf0] }
 0x1ed   :  { %v9697_v6 = vor.u32 %v12410_v4, %v9694_v38 }
 0x1ee   :  { %3705 = vmatpush.bf16.msrb.mxu2 %v9593_v5  ;;  %v9693_v5 = vor.u32 %v12412_v24, %v9692_v51  ;;  %3666 = vmatpush.bf16.msra.mxu3 %v9713_v44  ;;  %v12413_v44 = vld [vmem:[#allocation8 + $0x114] sm:$0xf0]  ;;  %v12411_v51 = vld [vmem:[#allocation8 + $0x10c] sm:$0xf]  ;;  %v9702_v24 = vld [vmem:[#allocation8 + $0x118] sm:$0xf0] }
 0x1f0   :  { %3680 = vmatpush.bf16.msrb.mxu0 %v9573_v60  ;;  %v13579_v59 = vpop.f32.mrf.mxu0  ;;  %v9814_v60 = vld [vmem:[#allocation8 + $0x1f8] sm:$0xf0] }
 0x1f1   :  { %v13581_v15 = vpop.f32.mrf.mxu1  ;;  %v9817_v10 = vor.u32 %v12439_v21, %v9814_v60 }
 0x1f2   :  { %3706 = vmatpush.bf16.msrb.mxu2 %v9577_v29  ;;  %3667 = vmatpush.bf16.msra.mxu3 %v9697_v6 }
 0x1f3   :  { %3681 = vmatmul.bf16.vlgmr.msrb.gmra.mxu0 %v13571_v27 }
 0x1f5   :  { %3707 = vmatmul.bf16.vlgmr.msrb.gmra.mxu2 %v13571_v27  ;;  %v9772_v27 = vld [vmem:[#allocation8 + $0x1a0] sm:$0xf] }
 0x1f6   :  { %v9773_v35 = vor.u32 %v12432_v31, %v9772_v27  ;;  %3712 = vmatpush.bf16.msrb.mxu3 %v9817_v10  ;;  %v9785_v27 = vor.u32 %v12431_v23, %v9782_v30  ;;  %v3077_v31 = vadd.f32 %v13579_v59, %v13575_v3  ;;  %v9749_v59 = vor.u32 %v12425_v62, %v9748_v43  ;;  %v12502_v30 = vld [vmem:[#allocation11 + $0x1dc] sm:$0xf0] }
 0x1f7   :  { %v10236_v43 = vld [vmem:[#allocation11 + $0x340] sm:$0xf] }
 0x1f8   :  { %v13583_v37 = vpop.f32.mrf.mxu2  ;;  %v3078_v49 = vpop.f32.mrf.mxu0  ;;  %3636 = vmatpush.bf16.msra.mxu1 %v9773_v35  ;;  %v3090_v2 = vadd.f32 %v13581_v15, %v3077_v31  ;;  %v9737_v15 = vor.u32 %v12419_v12, %v9734_v52  ;;  %v12550_v62 = vld [vmem:[#allocation11 + $0x35c] sm:$0xf0] }
 0x1f9   :  { %v13585_v41 = vpop.f32.mrf.mxu3  ;;  %v3091_v42 = vpop.f32.mrf.mxu1  ;;  %v12429_v49 = vld [vmem:[#allocation8 + $0x194] sm:$0xf0]  ;;  %v12478_v12 = vld [vmem:[#allocation11 + $0x11c] sm:$0xf0]  ;;  %v10237_v52 = vor.u32 %v12550_v62, %v10236_v43  ;;  %v12498_v43 = vld [vmem:[#allocation11 + $0x1c4] sm:$0xf] }
 0x1fa   :  { %3713 = vmatpush.bf16.msrb.mxu3 %v9801_v16  ;;  %v9765_v45 = vor.u32 %v12429_v49, %v9764_v19  ;;  %v9766_v42 = vld [vmem:[#allocation8 + $0x198] sm:$0xf0]  ;;  %v3103_v3 = vadd.f32 %v13583_v37, %v3090_v2  ;;  %v10268_v49 = vld [vmem:[#allocation11 + $0x380] sm:$0xf]  ;;  %v10046_v62 = vld [vmem:[#allocation11 + $0x1e0] sm:$0xf0] }
 0x1fc   :  { %3637 = vmatpush.bf16.msra.mxu1 %v9757_v46  ;;  %v9769_v46 = vor.u32 %v12427_v57, %v9766_v42  ;;  %v3116_v63 = vadd.f32 %v13585_v41, %v3103_v3  ;;  %v9980_v42 = vld [vmem:[#allocation11 + $0x140] sm:$0xf] }
 0x1fd   :  { %v12630_v3 = vld [vmem:[#allocation11 + $0x5dc] sm:$0xf0] }
 0x1fe   :  { %3714 = vmatpush.bf16.msrb.mxu3 %v9785_v27  ;;  %v10012_v27 = vld [vmem:[#allocation11 + $0x180] sm:$0xf] }
 0x200   :  { %v3104_v55 = vpop.f32.mrf.mxu2  ;;  %3638 = vmatpush.bf16.msra.mxu1 %v9741_v22  ;;  %v12421_v22 = vld [vmem:[#allocation8 + $0x154] sm:$0xf0] }
 0x201   :  { %v3117_v34 = vpop.f32.mrf.mxu3  ;;  %v9733_v54 = vor.u32 %v12421_v22, %v9732_v7  ;;  %v10524_v7 = vld [vmem:[#allocation11 + $0x580] sm:$0xf] }
 0x202   :  { %3715 = vmatpush.bf16.msrb.mxu3 %v9769_v46  ;;  %v9716_v34 = vld [vmem:[#allocation8 + $0x128] sm:$0xf]  ;;  %v12486_v46 = vld [vmem:[#allocation11 + $0x15c] sm:$0xf0] }
 0x203   :  { %v9981_v48 = vor.u32 %v12486_v46, %v9980_v42  ;;  %v12622_v22 = vld [vmem:[#allocation11 + $0x59c] sm:$0xf0] }
 0x204   :  { %3639 = vmatpush.bf16.msra.mxu1 %v9725_v56  ;;  %v12417_v56 = vld [vmem:[#allocation8 + $0x134] sm:$0xf0]  ;;  %v9820_v42 = vld [vmem:[#allocation11] sm:$0xf] }
 0x205   :  { %v9717_v0 = vor.u32 %v12417_v56, %v9716_v34  ;;  %v12694_v34 = vld [vmem:[#allocation11 + $0x7dc] sm:$0xf0] }
 0x206   :  { %3716 = vmatpush.bf16.msrb.mxu3 %v9753_v50  ;;  %v9948_v50 = vld [vmem:[#allocation11 + $0x100] sm:$0xf] }
 0x207   :  { %v9949_v39 = vor.u32 %v12478_v12, %v9948_v50  ;;  %v10302_v12 = vld [vmem:[#allocation11 + $0x3e0] sm:$0xf0] }
 0x208   :  { %3640 = vmatpush.bf16.msra.mxu1 %v9709_v1  ;;  %v9700_v1 = vld [vmem:[#allocation8 + $0x108] sm:$0xf] }
 0x209   :  { %v9701_v38 = vor.u32 %v12413_v44, %v9700_v1  ;;  %v12470_v1 = vld [vmem:[#allocation11 + $0xdc] sm:$0xf0] }
 0x20a   :  { %3717 = vmatpush.bf16.msrb.mxu3 %v9737_v15  ;;  %v12542_v15 = vld [vmem:[#allocation11 + $0x31c] sm:$0xf0] }
 0x20c   :  { %3641 = vmatpush.bf16.msra.mxu1 %v9693_v5  ;;  %v9705_v5 = vor.u32 %v12411_v51, %v9702_v24  ;;  %v10172_v51 = vld [vmem:[#allocation11 + $0x2c0] sm:$0xf] }
 0x20e   :  { %3718 = vmatpush.bf16.msrb.mxu3 %v9721_v40  ;;  %v9916_v40 = vld [vmem:[#allocation11 + $0xc0] sm:$0xf] }
 0x210   :  { %3686 = vmatpush.bf16.msrb.mxu1 %v9813_v28  ;;  %v3128_v29 = vpop.f32.mrf.mxu0 }
 0x211   :  { %v3141_v18 = vpop.f32.mrf.mxu1  ;;  %v3129_v37 = vadd.f32 %v3128_v29, %v3116_v63  ;;  %v10492_v63 = vld [vmem:[#allocation11 + $0x540] sm:$0xf] }
 0x212   :  { %3719 = vmatpush.bf16.msrb.mxu3 %v9705_v5  ;;  %v10493_v24 = vor.u32 %v12614_v61, %v10492_v63  ;;  %v10460_v5 = vld [vmem:[#allocation11 + $0x500] sm:$0xf]  ;;  %v10014_v61 = vld [vmem:[#allocation11 + $0x1a0] sm:$0xf0] }
 0x213   :  { %v3142_v4 = vadd.f32 %v3141_v18, %v3129_v37  ;;  %v10780_v37 = vld [vmem:[#allocation11 + $0x780] sm:$0xf] }
 0x214   :  { %3687 = vmatpush.bf16.msrb.mxu1 %v9797_v33 }
 0x218   :  { %v3154_v11 = vpop.f32.mrf.mxu2  ;;  %3688 = vmatpush.bf16.msrb.mxu1 %v9781_v25  ;;  %v3130_v58 = vpop.f32.mrf.mxu0  ;;  %v10044_v25 = vld [vmem:[#allocation11 + $0x1c0] sm:$0xf] }
 0x219   :  { %v3167_v35 = vpop.f32.mrf.mxu3  ;;  %v3143_v36 = vpop.f32.mrf.mxu1  ;;  %v3155_v6 = vadd.f32 %v3154_v11, %v3142_v4  ;;  %v10045_v31 = vor.u32 %v12502_v30, %v10044_v25  ;;  %v12494_v11 = vld [vmem:[#allocation11 + $0x19c] sm:$0xf0] }
 0x21a   :  { %v12566_v58 = vld [vmem:[#allocation11 + $0x3dc] sm:$0xf0]  ;;  %v10013_v36 = vor.u32 %v12494_v11, %v10012_v27 }
 0x21b   :  { %v3168_v41 = vadd.f32 %v3167_v35, %v3155_v6  ;;  %v10300_v35 = vld [vmem:[#allocation11 + $0x3c0] sm:$0xf]  ;;  %5287 = vmatpush.bf16.msra.mxu0 %v10045_v31 }
 0x21c   :  { %3689 = vmatpush.bf16.msrb.mxu1 %v9765_v45  ;;  %v10301_v19 = vor.u32 %v12566_v58, %v10300_v35  ;;  %v12558_v45 = vld [vmem:[#allocation11 + $0x39c] sm:$0xf0] }
 0x21d   :  { %v10269_v2 = vor.u32 %v12558_v45, %v10268_v49  ;;  %v12534_v4 = vld [vmem:[#allocation11 + $0x2dc] sm:$0xf0] }
 0x21e   :  { %v12606_v6 = vld [vmem:[#allocation11 + $0x51c] sm:$0xf0] }
 0x21f   :  { %5288 = vmatpush.bf16.msra.mxu0 %v10013_v36  ;;  %v9852_v25 = vld [vmem:[#allocation11 + $0x40] sm:$0xf] }
 0x220   :  { %v3156_v53 = vpop.f32.mrf.mxu2  ;;  %3690 = vmatpush.bf16.msrb.mxu1 %v9749_v59  ;;  %v10557_v59 = vor.u32 %v12630_v3, %v10556_v8  ;;  %v12454_v30 = vld [vmem:[#allocation11 + $0x5c] sm:$0xf0] }
 0x221   :  { %v3169_v55 = vpop.f32.mrf.mxu3  ;;  %v10525_v53 = vor.u32 %v12622_v22, %v10524_v7  ;;  %v10108_v31 = vld [vmem:[#allocation11 + $0x240] sm:$0xf]  ;;  %v9853_v45 = vor.u32 %v12454_v30, %v9852_v25  ;;  %v12562_v22 = vld [vmem:[#allocation11 + $0x3c4] sm:$0xf] }
 0x222   :  { %5313 = vmatpush.bf16.msra.mxu2 %v10557_v59  ;;  %v10204_v55 = vld [vmem:[#allocation11 + $0x300] sm:$0xf]  ;;  %v9950_v25 = vld [vmem:[#allocation11 + $0x120] sm:$0xf0] }
 0x223   :  { %5289 = vmatpush.bf16.msra.mxu0 %v9981_v48  ;;  %v10205_v44 = vor.u32 %v12542_v15, %v10204_v55  ;;  %v12518_v35 = vld [vmem:[#allocation11 + $0x25c] sm:$0xf0] }
 0x224   :  { %3691 = vmatpush.bf16.msrb.mxu1 %v9733_v54  ;;  %v10812_v54 = vld [vmem:[#allocation11 + $0x7c0] sm:$0xf]  ;;  %v10109_v8 = vor.u32 %v12518_v35, %v10108_v31  ;;  %v10206_v31 = vld [vmem:[#allocation11 + $0x320] sm:$0xf0] }
 0x225   :  { %v10813_v56 = vor.u32 %v12694_v34, %v10812_v54  ;;  %v12590_v49 = vld [vmem:[#allocation11 + $0x49c] sm:$0xf0]  ;;  %v10049_v34 = vor.u32 %v12498_v43, %v10046_v62  ;;  %v12530_v43 = vld [vmem:[#allocation11 + $0x2c4] sm:$0xf] }
 0x226   :  { %5314 = vmatpush.bf16.msra.mxu2 %v10525_v53  ;;  %v12662_v36 = vld [vmem:[#allocation11 + $0x6dc] sm:$0xf0]  ;;  %v10174_v62 = vld [vmem:[#allocation11 + $0x2e0] sm:$0xf0] }
 0x227   :  { %5290 = vmatpush.bf16.msra.mxu0 %v9949_v39  ;;  %v10076_v48 = vld [vmem:[#allocation11 + $0x200] sm:$0xf]  ;;  %v10305_v39 = vor.u32 %v12562_v22, %v10302_v12  ;;  %v9854_v22 = vld [vmem:[#allocation11 + $0x60] sm:$0xf0] }
 0x228   :  { %3692 = vmatpush.bf16.msrb.mxu1 %v9717_v0  ;;  %v12686_v0 = vld [vmem:[#allocation11 + $0x79c] sm:$0xf0] }
 0x229   :  { %v12510_v7 = vld [vmem:[#allocation11 + $0x21c] sm:$0xf0] }
 0x22a   :  { %5315 = vmatpush.bf16.msra.mxu2 %v10493_v24  ;;  %v12582_v53 = vld [vmem:[#allocation11 + $0x45c] sm:$0xf0]  ;;  %v10077_v63 = vor.u32 %v12510_v7, %v10076_v48  ;;  %v12626_v24 = vld [vmem:[#allocation11 + $0x5c4] sm:$0xf] }
 0x22b   :  { %v10652_v55 = vld [vmem:[#allocation11 + $0x680] sm:$0xf]  ;;  %v12450_v7 = vld [vmem:[#allocation11 + $0x44] sm:$0xf] }
 0x22c   :  { %3693 = vmatpush.bf16.msrb.mxu1 %v9701_v38  ;;  %v10781_v38 = vor.u32 %v12686_v0, %v10780_v37  ;;  %v12654_v15 = vld [vmem:[#allocation11 + $0x69c] sm:$0xf0]  ;;  %v12554_v37 = vld [vmem:[#allocation11 + $0x384] sm:$0xf]  ;;  %v9857_v12 = vor.u32 %v12450_v7, %v9854_v22  ;;  %v10052_v7 = vld [vmem:[#allocation11 + $0x1c8] sm:$0xf] }
 0x22d   :  { %v10270_v0 = vld [vmem:[#allocation11 + $0x3a0] sm:$0xf0]  ;;  %v12503_v22 = vld [vmem:[#allocation11 + $0x1e4] sm:$0xf0] }
 0x230   :  { %v3180_v9 = vpop.f32.mrf.mxu0 }
 0x231   :  { %v3193_v26 = vpop.f32.mrf.mxu1  ;;  %v3181_v21 = vadd.f32 %v3180_v9, %v3168_v41  ;;  %v10748_v41 = vld [vmem:[#allocation11 + $0x740] sm:$0xf]  ;;  %v9917_v9 = vor.u32 %v12470_v1, %v9916_v40  ;;  %v10653_v1 = vor.u32 %v12654_v15, %v10652_v55  ;;  %v10142_v55 = vld [vmem:[#allocation11 + $0x2a0] sm:$0xf0] }
 0x232   :  { %v12682_v15 = vld [vmem:[#allocation11 + $0x784] sm:$0xf] }
 0x233   :  { %v3194_v28 = vadd.f32 %v3193_v26, %v3181_v21  ;;  %v12678_v26 = vld [vmem:[#allocation11 + $0x75c] sm:$0xf0]  ;;  %5291 = vmatpush.bf16.msra.mxu0 %v9917_v9  ;;  %v12482_v9 = vld [vmem:[#allocation11 + $0x144] sm:$0xf] }
 0x234   :  { %v9884_v21 = vld [vmem:[#allocation11 + $0x80] sm:$0xf] }
 0x238   :  { %v3206_v60 = vpop.f32.mrf.mxu2  ;;  %v3182_v47 = vpop.f32.mrf.mxu0 }
 0x239   :  { %v3207_v10 = vadd.f32 %v3206_v60, %v3194_v28  ;;  %v3219_v29 = vpop.f32.mrf.mxu3  ;;  %v3195_v13 = vpop.f32.mrf.mxu1  ;;  %v12462_v28 = vld [vmem:[#allocation11 + $0x9c] sm:$0xf0]  ;;  %v10173_v60 = vor.u32 %v12534_v4, %v10172_v51  ;;  %v10558_v4 = vld [vmem:[#allocation11 + $0x5e0] sm:$0xf0] }
 0x23a   :  { %v12526_v13 = vld [vmem:[#allocation11 + $0x29c] sm:$0xf0] }
 0x23b   :  { %v3220_v32 = vadd.f32 %v3219_v29, %v3207_v10  ;;  %v10140_v10 = vld [vmem:[#allocation11 + $0x280] sm:$0xf]  ;;  %v10461_v29 = vor.u32 %v12606_v6, %v10460_v5 }
 0x23c   :  { %v10141_v27 = vor.u32 %v12526_v13, %v10140_v10  ;;  %v12574_v51 = vld [vmem:[#allocation11 + $0x41c] sm:$0xf0]  ;;  %v10238_v10 = vld [vmem:[#allocation11 + $0x360] sm:$0xf0] }
 0x23d   :  { %v3224_v33 = vmax.f32 %v3220_v32, 0.0  ;;  %v10749_v32 = vor.u32 %v12678_v26, %v10748_v41  ;;  %5316 = vmatpush.bf16.msra.mxu2 %v10461_v29  ;;  %v12646_v5 = vld [vmem:[#allocation11 + $0x65c] sm:$0xf0]  ;;  %v9982_v26 = vld [vmem:[#allocation11 + $0x160] sm:$0xf0]  ;;  %v10561_v29 = vor.u32 %v12626_v24, %v10558_v4 }
 0x23e   :  { %v12674_v24 = vld [vmem:[#allocation11 + $0x744] sm:$0xf] }
 0x23f   :  { %v3226_v18 = vpack.c.bf16 %v3224_v33, %v3224_v33  ;;  %v10428_v33 = vld [vmem:[#allocation11 + $0x4c0] sm:$0xf] }
 0x240   :  { %v3208_v14 = vpop.f32.mrf.mxu2 }
 0x241   :  { %v3221_v16 = vpop.f32.mrf.mxu3  ;;  %3642 = vmatmul.bf16.vlgmr.msra.gmra.mxu1 %v3226_v18  ;;  %3668 = vmatmul.bf16.vlgmr.msra.gmra.mxu3 %v3226_v18  ;;  %v10716_v14 = vld [vmem:[#allocation11 + $0x700] sm:$0xf] }
 0x242   :  { %5300 = vmatpush.bf16.msra.mxu1 %v10301_v19  ;;  %5326 = vmatpush.bf16.msra.mxu3 %v10813_v56  ;;  %v12670_v16 = vld [vmem:[#allocation11 + $0x71c] sm:$0xf0]  ;;  %v12490_v56 = vld [vmem:[#allocation11 + $0x184] sm:$0xf] }
 0x243   :  { %v10717_v58 = vor.u32 %v12670_v16, %v10716_v14  ;;  %v10396_v19 = vld [vmem:[#allocation11 + $0x480] sm:$0xf]  ;;  %v10017_v41 = vor.u32 %v12490_v56, %v10014_v61  ;;  %v9985_v16 = vor.u32 %v12482_v9, %v9982_v26  ;;  %v10782_v56 = vld [vmem:[#allocation11 + $0x7a0] sm:$0xf0] }
 0x244   :  { %v10397_v3 = vor.u32 %v12590_v49, %v10396_v19  ;;  %v12638_v14 = vld [vmem:[#allocation11 + $0x61c] sm:$0xf0]  ;;  %v12466_v19 = vld [vmem:[#allocation11 + $0xc4] sm:$0xf] }
 0x245   :  { %v9918_v49 = vld [vmem:[#allocation11 + $0xe0] sm:$0xf0] }
 0x246   :  { %5301 = vmatpush.bf16.msra.mxu1 %v10269_v2  ;;  %5327 = vmatpush.bf16.msra.mxu3 %v10781_v38  ;;  %v12446_v2 = vld [vmem:[#allocation11 + $0x1c] sm:$0xf0]  ;;  %v12442_v61 = vld [vmem:[#allocation11 + $0x4] sm:$0xf] }
 0x247   :  { %v9821_v54 = vor.u32 %v12446_v2, %v9820_v42  ;;  %v10620_v38 = vld [vmem:[#allocation11 + $0x640] sm:$0xf]  ;;  %v9886_v42 = vld [vmem:[#allocation11 + $0xa0] sm:$0xf0] }
 0x248   :  { %v10621_v13 = vor.u32 %v12646_v5, %v10620_v38  ;;  %v10750_v38 = vld [vmem:[#allocation11 + $0x760] sm:$0xf0] }
 0x249   :  { %v10753_v5 = vor.u32 %v12674_v24, %v10750_v38  ;;  %v12506_v26 = vld [vmem:[#allocation11 + $0x204] sm:$0xf]  ;;  %v12479_v38 = vld [vmem:[#allocation11 + $0x124] sm:$0xf0] }
 0x24a   :  { %5302 = vmatpush.bf16.msra.mxu1 %v10237_v52  ;;  %5328 = vmatpush.bf16.msra.mxu3 %v10749_v32  ;;  %v10364_v52 = vld [vmem:[#allocation11 + $0x440] sm:$0xf]  ;;  %v12618_v32 = vld [vmem:[#allocation11 + $0x584] sm:$0xf] }
 0x24b   :  { %v10365_v40 = vor.u32 %v12582_v53, %v10364_v52  ;;  %v10494_v52 = vld [vmem:[#allocation11 + $0x560] sm:$0xf0] }
 0x24e   :  { %5303 = vmatpush.bf16.msra.mxu1 %v10205_v44  ;;  %5329 = vmatpush.bf16.msra.mxu3 %v10717_v58  ;;  %v10332_v44 = vld [vmem:[#allocation11 + $0x400] sm:$0xf] }
 0x250   :  { %v13592_v17 = vpop.f32.mrf.mxu0 }
 0x251   :  { %3694 = vmatmul.bf16.vlgmr.msrb.gmra.mxu1 %v3226_v18  ;;  %3720 = vmatmul.bf16.vlgmr.msrb.gmra.mxu3 %v3226_v18  ;;  %v12598_v18 = vld [vmem:[#allocation11 + $0x4dc] sm:$0xf0] }
 0x252   :  { %5304 = vmatpush.bf16.msra.mxu1 %v10173_v60  ;;  %v10429_v11 = vor.u32 %v12598_v18, %v10428_v33  ;;  %v12546_v60 = vld [vmem:[#allocation11 + $0x344] sm:$0xf]  ;;  %v10588_v18 = vld [vmem:[#allocation11 + $0x600] sm:$0xf] }
 0x253   :  { %v10526_v33 = vld [vmem:[#allocation11 + $0x5a0] sm:$0xf0]  ;;  %v10241_v30 = vor.u32 %v12546_v60, %v10238_v10  ;;  %v10589_v35 = vor.u32 %v12638_v14, %v10588_v18 }
 0x254   :  { %5317 = vmatpush.bf16.msra.mxu2 %v10429_v11  ;;  %v10529_v11 = vor.u32 %v12618_v32, %v10526_v33  ;;  %v10718_v10 = vld [vmem:[#allocation11 + $0x720] sm:$0xf0] }
 0x255   :  { %v10398_v32 = vld [vmem:[#allocation11 + $0x4a0] sm:$0xf0] }
 0x256   :  { %5305 = vmatpush.bf16.msra.mxu1 %v10141_v27  ;;  %v12538_v27 = vld [vmem:[#allocation11 + $0x304] sm:$0xf] }
 0x257   :  { %v12658_v18 = vld [vmem:[#allocation11 + $0x6c4] sm:$0xf] }
 0x258   :  { %v13594_v20 = vpop.f32.mrf.mxu2  ;;  %v3632_v23 = vpop.f32.mrf.mxu0  ;;  %5318 = vmatpush.bf16.msra.mxu2 %v10397_v3  ;;  %v10177_v3 = vor.u32 %v12530_v43, %v10174_v62  ;;  %v10686_v14 = vld [vmem:[#allocation11 + $0x6e0] sm:$0xf0] }
 0x259   :  { %v9885_v23 = vor.u32 %v12462_v28, %v9884_v21  ;;  %v10273_v21 = vor.u32 %v12554_v37, %v10270_v0  ;;  %v10333_v28 = vor.u32 %v12574_v51, %v10332_v44  ;;  %v12602_v37 = vld [vmem:[#allocation11 + $0x504] sm:$0xf] }
 0x25a   :  { %5306 = vmatpush.bf16.msra.mxu1 %v10109_v8  ;;  %v12690_v8 = vld [vmem:[#allocation11 + $0x7c4] sm:$0xf] }
 0x25b   :  { %5292 = vmatpush.bf16.msra.mxu0 %v9885_v23  ;;  %v12474_v23 = vld [vmem:[#allocation11 + $0x104] sm:$0xf] }
 0x25c   :  { %5319 = vmatpush.bf16.msra.mxu2 %v10365_v40  ;;  %v9953_v58 = vor.u32 %v12474_v23, %v9950_v25  ;;  %v10462_v40 = vld [vmem:[#allocation11 + $0x520] sm:$0xf0] }
 0x25d   :  { %v12514_v44 = vld [vmem:[#allocation11 + $0x244] sm:$0xf] }
 0x25e   :  { %5307 = vmatpush.bf16.msra.mxu1 %v10077_v63  ;;  %v10785_v63 = vor.u32 %v12682_v15, %v10782_v56  ;;  %v10110_v51 = vld [vmem:[#allocation11 + $0x260] sm:$0xf0]  ;;  %v10308_v56 = vld [vmem:[#allocation11 + $0x3c8] sm:$0xf] }
 0x25f   :  { %5293 = vmatpush.bf16.msra.mxu0 %v9853_v45  ;;  %v12458_v45 = vld [vmem:[#allocation11 + $0x84] sm:$0xf]  ;;  %v10113_v4 = vor.u32 %v12514_v44, %v10110_v51  ;;  %v10276_v44 = vld [vmem:[#allocation11 + $0x388] sm:$0xf] }
 0x260   :  { %v3658_v57 = vpop.f32.mrf.mxu2  ;;  %5320 = vmatpush.bf16.msra.mxu2 %v10333_v28  ;;  %v9889_v2 = vor.u32 %v12458_v45, %v9886_v42  ;;  %v12666_v28 = vld [vmem:[#allocation11 + $0x704] sm:$0xf]  ;;  %v13600_v45 = vld [vmem:[#allocation10] sm:$0xf]  ;;  %v12559_v51 = vld [vmem:[#allocation11 + $0x3a4] sm:$0xf0] }
 0x261   :  { %v10684_v57 = vld [vmem:[#allocation11 + $0x6c0] sm:$0xf]  ;;  %v12578_v23 = vld [vmem:[#allocation11 + $0x444] sm:$0xf]  ;;  %v3293_v43 = vperm.slane %v13600_v45, 0 }
 0x262   :  { %v10685_v50 = vor.u32 %v12662_v36, %v10684_v57  ;;  %5352 = vmatpush.bf16.msrb.mxu1 %v10305_v39  ;;  %v10209_v57 = vor.u32 %v12538_v27, %v10206_v31  ;;  %v9921_v36 = vor.u32 %v12466_v19, %v9918_v49  ;;  %v9822_v39 = vld [vmem:[#allocation11 + $0x20] sm:$0xf0] }
 0x263   :  { %5294 = vmatpush.bf16.msra.mxu0 %v9821_v54  ;;  %v12522_v54 = vld [vmem:[#allocation11 + $0x284] sm:$0xf]  ;;  %v9825_v0 = vor.u32 %v12442_v61, %v9822_v39 }
 0x264   :  { %5330 = vmatpush.bf16.msra.mxu3 %v10685_v50  ;;  %5365 = vmatpush.bf16.msrb.mxu2 %v10561_v29  ;;  %v12610_v50 = vld [vmem:[#allocation11 + $0x544] sm:$0xf]  ;;  %v10721_v29 = vor.u32 %v12666_v28, %v10718_v10  ;;  %v9924_v10 = vld [vmem:[#allocation11 + $0xc8] sm:$0xf] }
 0x265   :  { %v10497_v53 = vor.u32 %v12610_v50, %v10494_v52  ;;  %v10366_v25 = vld [vmem:[#allocation11 + $0x460] sm:$0xf0] }
 0x266   :  { %5353 = vmatpush.bf16.msrb.mxu1 %v10273_v21  ;;  %v10078_v21 = vld [vmem:[#allocation11 + $0x220] sm:$0xf0] }
 0x267   :  { %5339 = vmatpush.bf16.msrb.mxu0 %v10049_v34  ;;  %v10145_v34 = vor.u32 %v12522_v54, %v10142_v55  ;;  %v10081_v60 = vor.u32 %v12506_v26, %v10078_v21  ;;  %v12650_v27 = vld [vmem:[#allocation11 + $0x684] sm:$0xf]  ;;  %v10020_v54 = vld [vmem:[#allocation11 + $0x188] sm:$0xf]  ;;  %v3296_v21 = vperm.slane %v13600_v45, 3 }
 0x268   :  { %5331 = vmatpush.bf16.msra.mxu3 %v10653_v1  ;;  %5366 = vmatpush.bf16.msrb.mxu2 %v10529_v11  ;;  %v10465_v1 = vor.u32 %v12602_v37, %v10462_v40  ;;  %v10654_v31 = vld [vmem:[#allocation11 + $0x6a0] sm:$0xf0]  ;;  %v12495_v55 = vld [vmem:[#allocation11 + $0x1a4] sm:$0xf0] }
 0x269   :  { %v10657_v11 = vor.u32 %v12650_v27, %v10654_v31  ;;  %v12642_v49 = vld [vmem:[#allocation11 + $0x644] sm:$0xf]  ;;  %v10021_v61 = vor.u32 %v12495_v55, %v10020_v54  ;;  %v9988_v37 = vld [vmem:[#allocation11 + $0x148] sm:$0xf] }
 0x26a   :  { %5354 = vmatpush.bf16.msrb.mxu1 %v10241_v30  ;;  %v10369_v30 = vor.u32 %v12578_v23, %v10366_v25  ;;  %v12634_v42 = vld [vmem:[#allocation11 + $0x604] sm:$0xf]  ;;  %v12551_v26 = vld [vmem:[#allocation11 + $0x364] sm:$0xf0] }
 0x26b   :  { %5340 = vmatpush.bf16.msrb.mxu0 %v10017_v41  ;;  %v10430_v41 = vld [vmem:[#allocation11 + $0x4e0] sm:$0xf0]  ;;  %v12543_v23 = vld [vmem:[#allocation11 + $0x324] sm:$0xf0] }
 0x26c   :  { %5332 = vmatpush.bf16.msra.mxu3 %v10621_v13  ;;  %5367 = vmatpush.bf16.msrb.mxu2 %v10497_v53  ;;  %v12586_v13 = vld [vmem:[#allocation11 + $0x484] sm:$0xf]  ;;  %v12527_v54 = vld [vmem:[#allocation11 + $0x2a4] sm:$0xf0] }
 0x26d   :  { %v10401_v33 = vor.u32 %v12586_v13, %v10398_v32  ;;  %v12471_v13 = vld [vmem:[#allocation11 + $0xe4] sm:$0xf0] }
 0x26e   :  { %5355 = vmatpush.bf16.msrb.mxu1 %v10209_v57  ;;  %v10622_v57 = vld [vmem:[#allocation11 + $0x660] sm:$0xf0]  ;;  %v10564_v32 = vld [vmem:[#allocation11 + $0x5c8] sm:$0xf]  ;;  %v9925_v25 = vor.u32 %v12471_v13, %v9924_v10  ;;  %v10022_v10 = vld [vmem:[#allocation11 + $0x1a8] sm:$0xf0] }
 0x26f   :  { %5341 = vmatpush.bf16.msrb.mxu0 %v9985_v16  ;;  %v10689_v16 = vor.u32 %v12658_v18, %v10686_v14  ;;  %v10788_v55 = vld [vmem:[#allocation11 + $0x788] sm:$0xf] }
 0x270   :  { %v13596_v47 = vpop.f32.mrf.mxu0  ;;  %5333 = vmatpush.bf16.msra.mxu3 %v10589_v35  ;;  %5368 = vmatpush.bf16.msrb.mxu2 %v10465_v1  ;;  %v12570_v35 = vld [vmem:[#allocation11 + $0x404] sm:$0xf]  ;;  %v3295_v1 = vperm.slane %v13600_v45, 2  ;;  %v12511_v13 = vld [vmem:[#allocation11 + $0x224] sm:$0xf0] }
 0x272   :  { %5356 = vmatpush.bf16.msrb.mxu1 %v10177_v3 }
 0x273   :  { %5342 = vmatpush.bf16.msrb.mxu0 %v9953_v58  ;;  %v10334_v58 = vld [vmem:[#allocation11 + $0x420] sm:$0xf0] }
 0x274   :  { %v10337_v19 = vor.u32 %v12570_v35, %v10334_v58  ;;  %v10532_v35 = vld [vmem:[#allocation11 + $0x588] sm:$0xf] }
 0x275   :  { %v12623_v58 = vld [vmem:[#allocation11 + $0x5a4] sm:$0xf0] }
 0x276   :  { %5357 = vmatpush.bf16.msrb.mxu1 %v10145_v34 }
 0x277   :  { %5343 = vmatpush.bf16.msrb.mxu0 %v9921_v36  ;;  %v10625_v36 = vor.u32 %v12642_v49, %v10622_v57  ;;  %v10180_v57 = vld [vmem:[#allocation11 + $0x2c8] sm:$0xf] }
 0x278   :  { %v13598_v46 = vpop.f32.mrf.mxu2  ;;  %v3684_v59 = vpop.f32.mrf.mxu0 }
 0x279   :  { %v10814_v59 = vld [vmem:[#allocation11 + $0x7e0] sm:$0xf0]  ;;  %v3709_v27 = vadd.f32 %v13598_v46, %v3296_v21 }
 0x27a   :  { %v10817_v48 = vor.u32 %v12690_v8, %v10814_v59  ;;  %5358 = vmatpush.bf16.msrb.mxu1 %v10113_v4  ;;  %v3631_v8 = vadd.f32 %v13592_v17, %v3293_v43  ;;  %v3294_v59 = vperm.slane %v13600_v45, 1  ;;  %v12567_v17 = vld [vmem:[#allocation11 + $0x3e4] sm:$0xf0] }
 0x27b   :  { %5344 = vmatpush.bf16.msrb.mxu0 %v9889_v2  ;;  %v10590_v2 = vld [vmem:[#allocation11 + $0x620] sm:$0xf0]  ;;  %v10309_v40 = vor.u32 %v12567_v17, %v10308_v56  ;;  %v9956_v4 = vld [vmem:[#allocation11 + $0x108] sm:$0xf] }
 0x27c   :  { %5378 = vmatpush.bf16.msrb.mxu3 %v10817_v48  ;;  %v10593_v62 = vor.u32 %v12634_v42, %v10590_v2  ;;  %v3657_v52 = vadd.f32 %v13594_v20, %v3294_v59  ;;  %v12535_v45 = vld [vmem:[#allocation11 + $0x2e4] sm:$0xf0] }
 0x27d   :  { %v10820_v42 = vld [vmem:[#allocation11 + $0x7c8] sm:$0xf] }
 0x27e   :  { %5359 = vmatpush.bf16.msrb.mxu1 %v10081_v60  ;;  %v9957_v60 = vor.u32 %v12479_v38, %v9956_v4  ;;  %v12695_v2 = vld [vmem:[#allocation11 + $0x7e4] sm:$0xf0] }
 0x27f   :  { %5345 = vmatpush.bf16.msrb.mxu0 %v9857_v12  ;;  %v10053_v12 = vor.u32 %v12503_v22, %v10052_v7  ;;  %v12615_v7 = vld [vmem:[#allocation11 + $0x564] sm:$0xf0]  ;;  %v10181_v22 = vor.u32 %v12535_v45, %v10180_v57  ;;  %v10278_v45 = vld [vmem:[#allocation11 + $0x3a8] sm:$0xf0] }
 0x280   :  { %v3710_v6 = vpop.f32.mrf.mxu2  ;;  %5379 = vmatpush.bf16.msrb.mxu3 %v10785_v63  ;;  %v9828_v17 = vld [vmem:[#allocation11 + $0x8] sm:$0xf] }
 0x281   :  { %v12594_v6 = vld [vmem:[#allocation11 + $0x4c4] sm:$0xf]  ;;  %v10756_v4 = vld [vmem:[#allocation11 + $0x748] sm:$0xf] }
 0x282   :  { %v10433_v9 = vor.u32 %v12594_v6, %v10430_v41  ;;  %v10277_v6 = vor.u32 %v12559_v51, %v10276_v44  ;;  %v3683_v41 = vadd.f32 %v13596_v47, %v3295_v1  ;;  %v12499_v1 = vld [vmem:[#allocation11 + $0x1cc] sm:$0xf]  ;;  %v10116_v51 = vld [vmem:[#allocation11 + $0x248] sm:$0xf] }
 0x283   :  { %5346 = vmatpush.bf16.msrb.mxu0 %v9825_v0  ;;  %v12487_v0 = vld [vmem:[#allocation11 + $0x164] sm:$0xf0]  ;;  %v10054_v44 = vld [vmem:[#allocation11 + $0x1e8] sm:$0xf0] }
 0x284   :  { %5380 = vmatpush.bf16.msrb.mxu3 %v10753_v5  ;;  %5369 = vmatpush.bf16.msrb.mxu2 %v10433_v9  ;;  %v9989_v24 = vor.u32 %v12487_v0, %v9988_v37  ;;  %v10244_v9 = vld [vmem:[#allocation11 + $0x348] sm:$0xf] }
 0x285   :  { %v10245_v18 = vor.u32 %v12551_v26, %v10244_v9  ;;  %v12679_v38 = vld [vmem:[#allocation11 + $0x764] sm:$0xf0] }
 0x286   :  { %v10436_v9 = vld [vmem:[#allocation11 + $0x4c8] sm:$0xf] }
 0x287   :  { %v12599_v26 = vld [vmem:[#allocation11 + $0x4e4] sm:$0xf0] }
 0x288   :  { %5381 = vmatpush.bf16.msrb.mxu3 %v10721_v29  ;;  %5370 = vmatpush.bf16.msrb.mxu2 %v10401_v33  ;;  %v12631_v33 = vld [vmem:[#allocation11 + $0x5e4] sm:$0xf0] }
 0x289   :  { %v10565_v47 = vor.u32 %v12631_v33, %v10564_v32  ;;  %v10724_v32 = vld [vmem:[#allocation11 + $0x708] sm:$0xf] }
 0x28a   :  { %v12671_v33 = vld [vmem:[#allocation11 + $0x724] sm:$0xf0] }
 0x28c   :  { %5382 = vmatpush.bf16.msrb.mxu3 %v10689_v16  ;;  %5371 = vmatpush.bf16.msrb.mxu2 %v10369_v30  ;;  %v10212_v16 = vld [vmem:[#allocation11 + $0x308] sm:$0xf] }
 0x28d   :  { %v9892_v30 = vld [vmem:[#allocation11 + $0x88] sm:$0xf]  ;;  %v10213_v49 = vor.u32 %v12543_v23, %v10212_v16  ;;  %v10310_v16 = vld [vmem:[#allocation11 + $0x3e8] sm:$0xf0] }
 0x290   :  { %5383 = vmatpush.bf16.msrb.mxu3 %v10657_v11  ;;  %5372 = vmatpush.bf16.msrb.mxu2 %v10337_v19  ;;  %v12463_v11 = vld [vmem:[#allocation11 + $0xa4] sm:$0xf0] }
 0x291   :  { %v9893_v43 = vor.u32 %v12463_v11, %v9892_v30  ;;  %v12483_v11 = vld [vmem:[#allocation11 + $0x14c] sm:$0xf] }
 0x294   :  { %5384 = vmatpush.bf16.msrb.mxu3 %v10625_v36 }
 0x298   :  { %5385 = vmatpush.bf16.msrb.mxu3 %v10593_v62  ;;  %v10533_v62 = vor.u32 %v12623_v58, %v10532_v35  ;;  %v9990_v35 = vld [vmem:[#allocation11 + $0x168] sm:$0xf0] }
 0x2be   :  { %v3643_v3 = vpop.f32.mrf.mxu1 }
 0x2bf   :  { %v3644_v48 = vadd.f32 %v3643_v3, %v3631_v8  ;;  %v9860_v8 = vld [vmem:[#allocation11 + $0x48] sm:$0xf] }
 0x2c0   :  { %v12455_v3 = vld [vmem:[#allocation11 + $0x64] sm:$0xf0] }
 0x2c1   :  { %v3725_v50 = vmax.f32 %v3644_v48, 0.0  ;;  %v10500_v48 = vld [vmem:[#allocation11 + $0x548] sm:$0xf] }
 0x2c2   :  { %v10501_v56 = vor.u32 %v12615_v7, %v10500_v48  ;;  %v12655_v48 = vld [vmem:[#allocation11 + $0x6a4] sm:$0xf0] }
 0x2c3   :  { %v13606_v53 = vpack.c.bf16 %v3725_v50, %v3725_v50  ;;  %v10821_v50 = vor.u32 %v12695_v2, %v10820_v42  ;;  %v9993_v42 = vor.u32 %v12483_v11, %v9990_v35  ;;  %v10372_v2 = vld [vmem:[#allocation11 + $0x448] sm:$0xf]  ;;  %v10790_v11 = vld [vmem:[#allocation11 + $0x7a8] sm:$0xf0] }
 0x2c4   :  { %v3669_v15 = vpop.f32.mrf.mxu3 }
 0x2c5   :  { %v3670_v34 = vadd.f32 %v3669_v15, %v3657_v52  ;;  %5295 = vmatmul.bf16.vlgmr.msra.gmra.mxu0 %v13606_v53  ;;  %v12687_v15 = vld [vmem:[#allocation11 + $0x7a4] sm:$0xf0] }
 0x2c6   :  { %5391 = vmatpush.bf16.msra.mxu0 %v10053_v12  ;;  %v3645_v63 = vpop.f32.mrf.mxu1  ;;  %v10148_v12 = vld [vmem:[#allocation11 + $0x288] sm:$0xf] }
 0x2c7   :  { %v3726_v39 = vmax.f32 %v3670_v34, 0.0  ;;  %v9861_v34 = vor.u32 %v12455_v3, %v9860_v8  ;;  %v12447_v63 = vld [vmem:[#allocation11 + $0x24] sm:$0xf0]  ;;  %v10149_v0 = vor.u32 %v12527_v54, %v10148_v12  ;;  %v9958_v8 = vld [vmem:[#allocation11 + $0x128] sm:$0xf0] }
 0x2c8   :  { %v10340_v54 = vld [vmem:[#allocation11 + $0x408] sm:$0xf] }
 0x2c9   :  { %v13610_v20 = vpack.c.bf16 %v3726_v39, %v3726_v39  ;;  %v12607_v39 = vld [vmem:[#allocation11 + $0x524] sm:$0xf0] }
 0x2ca   :  { %5392 = vmatpush.bf16.msra.mxu0 %v10021_v61  ;;  %v10468_v61 = vld [vmem:[#allocation11 + $0x508] sm:$0xf] }
 0x2cb   :  { %5308 = vmatmul.bf16.vlgmr.msra.gmra.mxu1 %v13610_v20 }
 0x2cc   :  { %5404 = vmatpush.bf16.msra.mxu1 %v10309_v40  ;;  %v3671_v5 = vpop.f32.mrf.mxu3  ;;  %v10789_v40 = vor.u32 %v12687_v15, %v10788_v55  ;;  %v12575_v55 = vld [vmem:[#allocation11 + $0x424] sm:$0xf0]  ;;  %v12467_v15 = vld [vmem:[#allocation11 + $0xcc] sm:$0xf] }
 0x2cd   :  { %v9829_v5 = vor.u32 %v12447_v63, %v9828_v17  ;;  %v12627_v17 = vld [vmem:[#allocation11 + $0x5cc] sm:$0xf] }
 0x2ce   :  { %5393 = vmatpush.bf16.msra.mxu0 %v9989_v24  ;;  %v3695_v28 = vpop.f32.mrf.mxu1  ;;  %v12519_v24 = vld [vmem:[#allocation11 + $0x264] sm:$0xf0]  ;;  %v10566_v63 = vld [vmem:[#allocation11 + $0x5e8] sm:$0xf0] }
 0x2cf   :  { %v3696_v29 = vadd.f32 %v3695_v28, %v3683_v41  ;;  %v10057_v41 = vor.u32 %v12499_v1, %v10054_v44  ;;  %v10117_v21 = vor.u32 %v12519_v24, %v10116_v51  ;;  %v10757_v28 = vor.u32 %v12679_v38, %v10756_v4  ;;  %v10214_v1 = vld [vmem:[#allocation11 + $0x328] sm:$0xf0] }
 0x2d0   :  { %5405 = vmatpush.bf16.msra.mxu1 %v10277_v6  ;;  %v10469_v6 = vor.u32 %v12607_v39, %v10468_v61  ;;  %v10628_v39 = vld [vmem:[#allocation11 + $0x648] sm:$0xf]  ;;  %v10569_v51 = vor.u32 %v12627_v17, %v10566_v63  ;;  %v12459_v24 = vld [vmem:[#allocation11 + $0x8c] sm:$0xf] }
 0x2d1   :  { %v3727_v14 = vmax.f32 %v3696_v29, 0.0  ;;  %v10084_v29 = vld [vmem:[#allocation11 + $0x208] sm:$0xf]  ;;  %v9894_v38 = vld [vmem:[#allocation11 + $0xa8] sm:$0xf0] }
 0x2d2   :  { %5394 = vmatpush.bf16.msra.mxu0 %v9957_v60  ;;  %v12491_v60 = vld [vmem:[#allocation11 + $0x18c] sm:$0xf]  ;;  %v10085_v30 = vor.u32 %v12511_v13, %v10084_v29  ;;  %v9897_v29 = vor.u32 %v12459_v24, %v9894_v38  ;;  %v9996_v24 = vld [vmem:[#allocation11 + $0x150] sm:$0xf] }
 0x2d3   :  { %v13616_v31 = vpack.c.bf16 %v3727_v14, %v3727_v14  ;;  %v12563_v14 = vld [vmem:[#allocation11 + $0x3cc] sm:$0xf]  ;;  %v10025_v23 = vor.u32 %v12491_v60, %v10022_v10 }
 0x2d4   :  { %5406 = vmatpush.bf16.msra.mxu1 %v10245_v18  ;;  %v3721_v19 = vpop.f32.mrf.mxu3  ;;  %v10437_v18 = vor.u32 %v12599_v26, %v10436_v9  ;;  %v10313_v58 = vor.u32 %v12563_v14, %v10310_v16  ;;  %v10596_v9 = vld [vmem:[#allocation11 + $0x608] sm:$0xf]  ;;  %v12691_v60 = vld [vmem:[#allocation11 + $0x7cc] sm:$0xf] }
 0x2d5   :  { %v3722_v36 = vadd.f32 %v3721_v19, %v3709_v27  ;;  %5321 = vmatmul.bf16.vlgmr.msra.gmra.mxu2 %v13616_v31  ;;  %5347 = vmatmul.bf16.vlgmr.msrb.gmra.mxu0 %v13606_v53  ;;  %v10725_v27 = vor.u32 %v12671_v33, %v10724_v32  ;;  %v10692_v19 = vld [vmem:[#allocation11 + $0x6c8] sm:$0xf]  ;;  %v10822_v10 = vld [vmem:[#allocation11 + $0x7e8] sm:$0xf0] }
 0x2d6   :  { %5395 = vmatpush.bf16.msra.mxu0 %v9925_v25  ;;  %5417 = vmatpush.bf16.msra.mxu2 %v10565_v47  ;;  %v3697_v46 = vpop.f32.mrf.mxu1  ;;  %v10404_v25 = vld [vmem:[#allocation11 + $0x488] sm:$0xf]  ;;  %v12451_v32 = vld [vmem:[#allocation11 + $0x4c] sm:$0xf] }
 0x2d7   :  { %v3728_v59 = vmax.f32 %v3722_v36, 0.0  ;;  %v12591_v47 = vld [vmem:[#allocation11 + $0x4a4] sm:$0xf0]  ;;  %v12555_v36 = vld [vmem:[#allocation11 + $0x38c] sm:$0xf] }
 0x2d8   :  { %5407 = vmatpush.bf16.msra.mxu1 %v10213_v49  ;;  %v12663_v49 = vld [vmem:[#allocation11 + $0x6e4] sm:$0xf0]  ;;  %v10405_v57 = vor.u32 %v12591_v47, %v10404_v25  ;;  %v10281_v3 = vor.u32 %v12555_v36, %v10278_v45  ;;  %v12611_v14 = vld [vmem:[#allocation11 + $0x54c] sm:$0xf]  ;;  %v10825_v25 = vor.u32 %v12691_v60, %v10822_v10 }
 0x2d9   :  { %v13620_v52 = vpack.c.bf16 %v3728_v59, %v3728_v59  ;;  %v12583_v46 = vld [vmem:[#allocation11 + $0x464] sm:$0xf0]  ;;  %v10502_v16 = vld [vmem:[#allocation11 + $0x568] sm:$0xf0] }
 0x2da   :  { %5396 = vmatpush.bf16.msra.mxu0 %v9893_v43  ;;  %5418 = vmatpush.bf16.msra.mxu2 %v10533_v62  ;;  %v10693_v43 = vor.u32 %v12663_v49, %v10692_v19  ;;  %v12475_v62 = vld [vmem:[#allocation11 + $0x10c] sm:$0xf]  ;;  %v10660_v59 = vld [vmem:[#allocation11 + $0x688] sm:$0xf]  ;;  %v10373_v7 = vor.u32 %v12583_v46, %v10372_v2  ;;  %v10060_v2 = vld [vmem:[#allocation11 + $0x1d0] sm:$0xf] }
 0x2db   :  { %5334 = vmatmul.bf16.vlgmr.msra.gmra.mxu3 %v13620_v52  ;;  %5360 = vmatmul.bf16.vlgmr.msrb.gmra.mxu1 %v13610_v20  ;;  %v9961_v12 = vor.u32 %v12475_v62, %v9958_v8  ;;  %v12639_v26 = vld [vmem:[#allocation11 + $0x624] sm:$0xf0]  ;;  %v12523_v47 = vld [vmem:[#allocation11 + $0x28c] sm:$0xf]  ;;  %v12504_v46 = vld [vmem:[#allocation11 + $0x1ec] sm:$0xf0] }
 0x2dc   :  { %5408 = vmatpush.bf16.msra.mxu1 %v10181_v22  ;;  %5430 = vmatpush.bf16.msra.mxu3 %v10821_v50  ;;  %v3723_v37 = vpop.f32.mrf.mxu3  ;;  %v12547_v22 = vld [vmem:[#allocation11 + $0x34c] sm:$0xf]  ;;  %v10597_v33 = vor.u32 %v12639_v26, %v10596_v9  ;;  %v10284_v9 = vld [vmem:[#allocation11 + $0x390] sm:$0xf] }
 0x2dd   :  { %v10246_v50 = vld [vmem:[#allocation11 + $0x368] sm:$0xf0]  ;;  %v12647_v37 = vld [vmem:[#allocation11 + $0x664] sm:$0xf0]  ;;  %v12560_v26 = vld [vmem:[#allocation11 + $0x3ac] sm:$0xf0] }
 0x2de   :  { %5397 = vmatpush.bf16.msra.mxu0 %v9861_v34  ;;  %5419 = vmatpush.bf16.msra.mxu2 %v10501_v56  ;;  %v10661_v34 = vor.u32 %v12655_v48, %v10660_v59  ;;  %v9926_v56 = vld [vmem:[#allocation11 + $0xe8] sm:$0xf0]  ;;  %v10249_v61 = vor.u32 %v12547_v22, %v10246_v50  ;;  %v10629_v4 = vor.u32 %v12647_v37, %v10628_v39  ;;  %v10316_v39 = vld [vmem:[#allocation11 + $0x3d0] sm:$0xf] }
 0x2df   :  { %v9929_v44 = vor.u32 %v12467_v15, %v9926_v56  ;;  %v12443_v19 = vld [vmem:[#allocation11 + $0xc] sm:$0xf]  ;;  %v12496_v15 = vld [vmem:[#allocation11 + $0x1ac] sm:$0xf0] }
 0x2e0   :  { %5409 = vmatpush.bf16.msra.mxu1 %v10149_v0  ;;  %5431 = vmatpush.bf16.msra.mxu3 %v10789_v40  ;;  %v10341_v0 = vor.u32 %v12575_v55, %v10340_v54  ;;  %v12539_v40 = vld [vmem:[#allocation11 + $0x30c] sm:$0xf]  ;;  %v10028_v55 = vld [vmem:[#allocation11 + $0x190] sm:$0xf] }
 0x2e1   :  { %v9830_v49 = vld [vmem:[#allocation11 + $0x28] sm:$0xf0]  ;;  %v12568_v37 = vld [vmem:[#allocation11 + $0x3ec] sm:$0xf0] }
 0x2e2   :  { %5398 = vmatpush.bf16.msra.mxu0 %v9829_v5  ;;  %5420 = vmatpush.bf16.msra.mxu2 %v10469_v6  ;;  %v12619_v5 = vld [vmem:[#allocation11 + $0x58c] sm:$0xf]  ;;  %v9833_v59 = vor.u32 %v12443_v19, %v9830_v49  ;;  %v10317_v38 = vor.u32 %v12568_v37, %v10316_v39  ;;  %v12632_v19 = vld [vmem:[#allocation11 + $0x5ec] sm:$0xf0] }
 0x2e3   :  { %v10534_v6 = vld [vmem:[#allocation11 + $0x5a8] sm:$0xf0] }
 0x2e4   :  { %5410 = vmatpush.bf16.msra.mxu1 %v10117_v21  ;;  %5432 = vmatpush.bf16.msra.mxu3 %v10757_v28  ;;  %v12531_v21 = vld [vmem:[#allocation11 + $0x2cc] sm:$0xf]  ;;  %v10537_v13 = vor.u32 %v12619_v5, %v10534_v6 }
 0x2e5   :  { %5373 = vmatmul.bf16.vlgmr.msrb.gmra.mxu2 %v13616_v31  ;;  %5399 = vmatmul.bf16.vlgmr.msra.gmra.mxu0 %v13606_v53  ;;  %v10182_v28 = vld [vmem:[#allocation11 + $0x2e8] sm:$0xf0] }
 0x2e6   :  { %5443 = vmatpush.bf16.msrb.mxu0 %v10057_v41  ;;  %5421 = vmatpush.bf16.msra.mxu2 %v10437_v18  ;;  %v10217_v41 = vor.u32 %v12539_v40, %v10214_v1  ;;  %v9862_v18 = vld [vmem:[#allocation11 + $0x68] sm:$0xf0] }
 0x2e7   :  { %v9865_v35 = vor.u32 %v12451_v32, %v9862_v18  ;;  %v10470_v36 = vld [vmem:[#allocation11 + $0x528] sm:$0xf0]  ;;  %v10285_v32 = vor.u32 %v12560_v26, %v10284_v9  ;;  %v12608_v9 = vld [vmem:[#allocation11 + $0x52c] sm:$0xf0] }
 0x2e8   :  { %5411 = vmatpush.bf16.msra.mxu1 %v10085_v30  ;;  %5433 = vmatpush.bf16.msra.mxu3 %v10725_v27  ;;  %v10150_v30 = vld [vmem:[#allocation11 + $0x2a8] sm:$0xf0] }
 0x2e9   :  { %v12683_v27 = vld [vmem:[#allocation11 + $0x78c] sm:$0xf]  ;;  %v10153_v45 = vor.u32 %v12523_v47, %v10150_v30 }
 0x2ea   :  { %5444 = vmatpush.bf16.msrb.mxu0 %v10025_v23  ;;  %5422 = vmatpush.bf16.msra.mxu2 %v10405_v57  ;;  %v10185_v23 = vor.u32 %v12531_v21, %v10182_v28  ;;  %v12603_v57 = vld [vmem:[#allocation11 + $0x50c] sm:$0xf] }
 0x2eb   :  { %5386 = vmatmul.bf16.vlgmr.msrb.gmra.mxu3 %v13620_v52  ;;  %5412 = vmatmul.bf16.vlgmr.msra.gmra.mxu1 %v13610_v20  ;;  %v10118_v62 = vld [vmem:[#allocation11 + $0x268] sm:$0xf0]  ;;  %v10473_v48 = vor.u32 %v12603_v57, %v10470_v36 }
 0x2ec   :  { %5456 = vmatpush.bf16.msrb.mxu1 %v10313_v58  ;;  %5434 = vmatpush.bf16.msra.mxu3 %v10693_v43  ;;  %v10505_v58 = vor.u32 %v12611_v14, %v10502_v16  ;;  %v12515_v43 = vld [vmem:[#allocation11 + $0x24c] sm:$0xf]  ;;  %v10252_v16 = vld [vmem:[#allocation11 + $0x350] sm:$0xf] }
 0x2ed   :  { %v12675_v8 = vld [vmem:[#allocation11 + $0x74c] sm:$0xf] }
 0x2ee   :  { %5445 = vmatpush.bf16.msrb.mxu0 %v9993_v42  ;;  %5423 = vmatpush.bf16.msra.mxu2 %v10373_v7  ;;  %v10793_v42 = vor.u32 %v12683_v27, %v10790_v11  ;;  %v10061_v7 = vor.u32 %v12504_v46, %v10060_v2  ;;  %v12595_v22 = vld [vmem:[#allocation11 + $0x4cc] sm:$0xf]  ;;  %v9932_v27 = vld [vmem:[#allocation11 + $0xd0] sm:$0xf] }
 0x2ef   :  { %v10438_v50 = vld [vmem:[#allocation11 + $0x4e8] sm:$0xf0]  ;;  %v12544_v2 = vld [vmem:[#allocation11 + $0x32c] sm:$0xf0] }
 0x2f0   :  { %5457 = vmatpush.bf16.msrb.mxu1 %v10281_v3  ;;  %5435 = vmatpush.bf16.msra.mxu3 %v10661_v34  ;;  %v10758_v3 = vld [vmem:[#allocation11 + $0x768] sm:$0xf0] }
 0x2f1   :  { %v10761_v54 = vor.u32 %v12675_v8, %v10758_v3  ;;  %v12507_v34 = vld [vmem:[#allocation11 + $0x20c] sm:$0xf]  ;;  %v12464_v3 = vld [vmem:[#allocation11 + $0xac] sm:$0xf0] }
 0x2f2   :  { %5446 = vmatpush.bf16.msrb.mxu0 %v9961_v12  ;;  %5424 = vmatpush.bf16.msra.mxu2 %v10341_v0  ;;  %v10121_v12 = vor.u32 %v12515_v43, %v10118_v62  ;;  %v10086_v56 = vld [vmem:[#allocation11 + $0x228] sm:$0xf0]  ;;  %v10029_v0 = vor.u32 %v12496_v15, %v10028_v55  ;;  %v9900_v62 = vld [vmem:[#allocation11 + $0x90] sm:$0xf] }
 0x2f3   :  { %v12667_v17 = vld [vmem:[#allocation11 + $0x70c] sm:$0xf]  ;;  %v10828_v55 = vld [vmem:[#allocation11 + $0x7d0] sm:$0xf] }
 0x2f4   :  { %5458 = vmatpush.bf16.msrb.mxu1 %v10249_v61  ;;  %5436 = vmatpush.bf16.msra.mxu3 %v10629_v4  ;;  %v10726_v63 = vld [vmem:[#allocation11 + $0x728] sm:$0xf0]  ;;  %v10441_v61 = vor.u32 %v12595_v22, %v10438_v50  ;;  %v12488_v4 = vld [vmem:[#allocation11 + $0x16c] sm:$0xf0] }
 0x2f5   :  { %5425 = vmatmul.bf16.vlgmr.msra.gmra.mxu2 %v13616_v31  ;;  %v12587_v40 = vld [vmem:[#allocation11 + $0x48c] sm:$0xf]  ;;  %v9997_v21 = vor.u32 %v12488_v4, %v9996_v24  ;;  %v12696_v15 = vld [vmem:[#allocation11 + $0x7ec] sm:$0xf0] }
 0x2f6   :  { %5447 = vmatpush.bf16.msrb.mxu0 %v9929_v44  ;;  %5469 = vmatpush.bf16.msrb.mxu2 %v10569_v51  ;;  %v10406_v1 = vld [vmem:[#allocation11 + $0x4a8] sm:$0xf0]  ;;  %v10089_v44 = vor.u32 %v12507_v34, %v10086_v56  ;;  %v10729_v51 = vor.u32 %v12667_v17, %v10726_v63  ;;  %v9901_v34 = vor.u32 %v12464_v3, %v9900_v62  ;;  %v9868_v63 = vld [vmem:[#allocation11 + $0x50] sm:$0xf]  ;;  %v12484_v62 = vld [vmem:[#allocation11 + $0x154] sm:$0xf] }
 0x2f7   :  { %v12659_v5 = vld [vmem:[#allocation11 + $0x6cc] sm:$0xf]  ;;  %v10829_v37 = vor.u32 %v12696_v15, %v10828_v55  ;;  %v12688_v24 = vld [vmem:[#allocation11 + $0x7ac] sm:$0xf0]  ;;  %v9998_v3 = vld [vmem:[#allocation11 + $0x170] sm:$0xf0] }
 0x2f8   :  { %5459 = vmatpush.bf16.msrb.mxu1 %v10217_v41  ;;  %5437 = vmatpush.bf16.msra.mxu3 %v10597_v33  ;;  %v10694_v6 = vld [vmem:[#allocation11 + $0x6e8] sm:$0xf0]  ;;  %v10409_v41 = vor.u32 %v12587_v40, %v10406_v1  ;;  %v12616_v40 = vld [vmem:[#allocation11 + $0x56c] sm:$0xf0] }
 0x2f9   :  { %v12579_v28 = vld [vmem:[#allocation11 + $0x44c] sm:$0xf]  ;;  %v10697_v10 = vor.u32 %v12659_v5, %v10694_v6  ;;  %v10156_v1 = vld [vmem:[#allocation11 + $0x290] sm:$0xf] }
 0x2fa   :  { %5448 = vmatpush.bf16.msrb.mxu0 %v9897_v29  ;;  %5470 = vmatpush.bf16.msrb.mxu2 %v10537_v13  ;;  %v10374_v60 = vld [vmem:[#allocation11 + $0x468] sm:$0xf0]  ;;  %v9964_v29 = vld [vmem:[#allocation11 + $0x110] sm:$0xf] }
 0x2fb   :  { %5438 = vmatmul.bf16.vlgmr.msra.gmra.mxu3 %v13620_v52  ;;  %v12480_v13 = vld [vmem:[#allocation11 + $0x12c] sm:$0xf0]  ;;  %v12651_v33 = vld [vmem:[#allocation11 + $0x68c] sm:$0xf]  ;;  %v10377_v14 = vor.u32 %v12579_v28, %v10374_v60  ;;  %v12500_v28 = vld [vmem:[#allocation11 + $0x1d4] sm:$0xf] }
 0x2fc   :  { %5460 = vmatpush.bf16.msrb.mxu1 %v10185_v23  ;;  %5482 = vmatpush.bf16.msrb.mxu3 %v10825_v25  ;;  %v10662_v18 = vld [vmem:[#allocation11 + $0x6a8] sm:$0xf0]  ;;  %v12552_v23 = vld [vmem:[#allocation11 + $0x36c] sm:$0xf0]  ;;  %v9965_v25 = vor.u32 %v12480_v13, %v9964_v29  ;;  %v10062_v60 = vld [vmem:[#allocation11 + $0x1f0] sm:$0xf0] }
 0x2fd   :  { %v12571_v47 = vld [vmem:[#allocation11 + $0x40c] sm:$0xf]  ;;  %v10665_v11 = vor.u32 %v12651_v33, %v10662_v18  ;;  %v10253_v49 = vor.u32 %v12552_v23, %v10252_v16  ;;  %v12448_v6 = vld [vmem:[#allocation11 + $0x2c] sm:$0xf0] }
 0x2fe   :  { %5449 = vmatpush.bf16.msrb.mxu0 %v9865_v35  ;;  %5471 = vmatpush.bf16.msrb.mxu2 %v10505_v58  ;;  %v10342_v30 = vld [vmem:[#allocation11 + $0x428] sm:$0xf0]  ;;  %v12472_v35 = vld [vmem:[#allocation11 + $0xec] sm:$0xf0] }
 0x2ff   :  { %v10572_v58 = vld [vmem:[#allocation11 + $0x5d0] sm:$0xf]  ;;  %v12643_v57 = vld [vmem:[#allocation11 + $0x64c] sm:$0xf]  ;;  %v9933_v46 = vor.u32 %v12472_v35, %v9932_v27  ;;  %v10030_v27 = vld [vmem:[#allocation11 + $0x1b0] sm:$0xf0] }
 0x300   :  { %5461 = vmatpush.bf16.msrb.mxu1 %v10153_v45  ;;  %5483 = vmatpush.bf16.msrb.mxu3 %v10793_v42  ;;  %v10630_v36 = vld [vmem:[#allocation11 + $0x668] sm:$0xf0]  ;;  %v10345_v45 = vor.u32 %v12571_v47, %v10342_v30  ;;  %v10220_v42 = vld [vmem:[#allocation11 + $0x310] sm:$0xf]  ;;  %v10573_v43 = vor.u32 %v12632_v19, %v10572_v58  ;;  %v12492_v30 = vld [vmem:[#allocation11 + $0x194] sm:$0xf] }
 0x301   :  { %v10633_v8 = vor.u32 %v12643_v57, %v10630_v36  ;;  %v12635_v22 = vld [vmem:[#allocation11 + $0x60c] sm:$0xf]  ;;  %v12520_v29 = vld [vmem:[#allocation11 + $0x26c] sm:$0xf0]  ;;  %v10318_v57 = vld [vmem:[#allocation11 + $0x3f0] sm:$0xf0] }
 0x302   :  { %5450 = vmatpush.bf16.msrb.mxu0 %v9833_v59  ;;  %5472 = vmatpush.bf16.msrb.mxu2 %v10473_v48  ;;  %v10540_v59 = vld [vmem:[#allocation11 + $0x590] sm:$0xf]  ;;  %v10598_v50 = vld [vmem:[#allocation11 + $0x628] sm:$0xf0] }
 0x303   :  { %v12624_v48 = vld [vmem:[#allocation11 + $0x5ac] sm:$0xf0]  ;;  %v10601_v17 = vor.u32 %v12635_v22, %v10598_v50  ;;  %v10286_v22 = vld [vmem:[#allocation11 + $0x3b0] sm:$0xf0] }
 0x304   :  { %5462 = vmatpush.bf16.msrb.mxu1 %v10121_v12  ;;  %5484 = vmatpush.bf16.msrb.mxu3 %v10761_v54  ;;  %v10188_v12 = vld [vmem:[#allocation11 + $0x2d0] sm:$0xf]  ;;  %v10541_v56 = vor.u32 %v12624_v48, %v10540_v59 }
 0x305   :  { %5451 = vmatmul.bf16.vlgmr.msrb.gmra.mxu0 %v13606_v53  ;;  %v12536_v54 = vld [vmem:[#allocation11 + $0x2ec] sm:$0xf0] }
 0x306   :  { %5495 = vmatpush.bf16.msra.mxu0 %v10061_v7  ;;  %5473 = vmatpush.bf16.msrb.mxu2 %v10441_v61  ;;  %v10221_v7 = vor.u32 %v12544_v2, %v10220_v42  ;;  %v12456_v61 = vld [vmem:[#allocation11 + $0x6c] sm:$0xf0]  ;;  %v10189_v39 = vor.u32 %v12536_v54, %v10188_v12  ;;  %v10001_v12 = vor.u32 %v12484_v62, %v9998_v3  ;;  %v10798_v62 = vld [vmem:[#allocation11 + $0x7b0] sm:$0xf0] }
 0x307   :  { %v9869_v4 = vor.u32 %v12456_v61, %v9868_v63  ;;  %v10764_v13 = vld [vmem:[#allocation11 + $0x750] sm:$0xf]  ;;  %v12444_v3 = vld [vmem:[#allocation11 + $0x14] sm:$0xf] }
 0x308   :  { %5463 = vmatpush.bf16.msrb.mxu1 %v10089_v44  ;;  %5485 = vmatpush.bf16.msrb.mxu3 %v10729_v51  ;;  %v12528_v44 = vld [vmem:[#allocation11 + $0x2ac] sm:$0xf0] }
 0x309   :  { %v10796_v51 = vld [vmem:[#allocation11 + $0x790] sm:$0xf]  ;;  %v10157_v26 = vor.u32 %v12528_v44, %v10156_v1 }
 0x30a   :  { %5496 = vmatpush.bf16.msra.mxu0 %v10029_v0  ;;  %5474 = vmatpush.bf16.msrb.mxu2 %v10409_v41  ;;  %v10508_v0 = vld [vmem:[#allocation11 + $0x550] sm:$0xf] }
 0x30b   :  { %5464 = vmatmul.bf16.vlgmr.msrb.gmra.mxu1 %v13610_v20  ;;  %v10509_v5 = vor.u32 %v12616_v40, %v10508_v0  ;;  %v10476_v41 = vld [vmem:[#allocation11 + $0x510] sm:$0xf] }
 0x30c   :  { %5508 = vmatpush.bf16.msra.mxu1 %v10317_v38  ;;  %5486 = vmatpush.bf16.msrb.mxu3 %v10697_v10  ;;  %v9836_v38 = vld [vmem:[#allocation11 + $0x10] sm:$0xf]  ;;  %v10477_v18 = vor.u32 %v12608_v9, %v10476_v41 }
 0x30d   :  { %v10124_v10 = vld [vmem:[#allocation11 + $0x250] sm:$0xf]  ;;  %v9837_v33 = vor.u32 %v12448_v6, %v9836_v38  ;;  %v10574_v6 = vld [vmem:[#allocation11 + $0x5f0] sm:$0xf0] }
 0x30e   :  { %5497 = vmatpush.bf16.msra.mxu0 %v9997_v21  ;;  %5475 = vmatpush.bf16.msrb.mxu2 %v10377_v14  ;;  %v10797_v21 = vor.u32 %v12688_v24, %v10796_v51  ;;  %v10065_v14 = vor.u32 %v12500_v28, %v10062_v60  ;;  %v10444_v16 = vld [vmem:[#allocation11 + $0x4d0] sm:$0xf]  ;;  %v12468_v24 = vld [vmem:[#allocation11 + $0xd4] sm:$0xf] }
 0x30f   :  { %v12600_v23 = vld [vmem:[#allocation11 + $0x4ec] sm:$0xf0] }
 0x310   :  { %5509 = vmatpush.bf16.msra.mxu1 %v10285_v32  ;;  %5487 = vmatpush.bf16.msrb.mxu3 %v10665_v11  ;;  %v12680_v32 = vld [vmem:[#allocation11 + $0x76c] sm:$0xf0]  ;;  %v10445_v36 = vor.u32 %v12600_v23, %v10444_v16 }
 0x311   :  { %v10765_v47 = vor.u32 %v12680_v32, %v10764_v13  ;;  %v10092_v11 = vld [vmem:[#allocation11 + $0x210] sm:$0xf]  ;;  %v9902_v13 = vld [vmem:[#allocation11 + $0xb0] sm:$0xf0] }
 0x312   :  { %5498 = vmatpush.bf16.msra.mxu0 %v9965_v25  ;;  %5476 = vmatpush.bf16.msrb.mxu2 %v10345_v45  ;;  %v10125_v25 = vor.u32 %v12520_v29, %v10124_v10  ;;  %v12512_v35 = vld [vmem:[#allocation11 + $0x22c] sm:$0xf0]  ;;  %v10033_v45 = vor.u32 %v12492_v30, %v10030_v27  ;;  %v12460_v29 = vld [vmem:[#allocation11 + $0x94] sm:$0xf] }
 0x313   :  { %v10732_v58 = vld [vmem:[#allocation11 + $0x710] sm:$0xf]  ;;  %v10093_v42 = vor.u32 %v12512_v35, %v10092_v11  ;;  %v12692_v30 = vld [vmem:[#allocation11 + $0x7d4] sm:$0xf]  ;;  %v9905_v11 = vor.u32 %v12460_v29, %v9902_v13  ;;  %v10004_v29 = vld [vmem:[#allocation11 + $0x158] sm:$0xf] }
 0x314   :  { %5510 = vmatpush.bf16.msra.mxu1 %v10253_v49  ;;  %5488 = vmatpush.bf16.msrb.mxu3 %v10633_v8  ;;  %v12672_v19 = vld [vmem:[#allocation11 + $0x72c] sm:$0xf0]  ;;  %v12564_v49 = vld [vmem:[#allocation11 + $0x3d4] sm:$0xf] }
 0x315   :  { %5477 = vmatmul.bf16.vlgmr.msrb.gmra.mxu2 %v13616_v31  ;;  %v10733_v2 = vor.u32 %v12672_v19, %v10732_v58  ;;  %v10321_v8 = vor.u32 %v12564_v49, %v10318_v57  ;;  %v10700_v59 = vld [vmem:[#allocation11 + $0x6d0] sm:$0xf]  ;;  %v10830_v27 = vld [vmem:[#allocation11 + $0x7f0] sm:$0xf0] }
 0x316   :  { %5499 = vmatpush.bf16.msra.mxu0 %v9933_v46  ;;  %5521 = vmatpush.bf16.msra.mxu2 %v10573_v43  ;;  %v10412_v46 = vld [vmem:[#allocation11 + $0x490] sm:$0xf]  ;;  %v12452_v49 = vld [vmem:[#allocation11 + $0x54] sm:$0xf] }
 0x317   :  { %v12592_v43 = vld [vmem:[#allocation11 + $0x4ac] sm:$0xf0]  ;;  %v9870_v57 = vld [vmem:[#allocation11 + $0x70] sm:$0xf0] }
 0x318   :  { %5511 = vmatpush.bf16.msra.mxu1 %v10221_v7  ;;  %5489 = vmatpush.bf16.msrb.mxu3 %v10601_v17  ;;  %v12664_v48 = vld [vmem:[#allocation11 + $0x6ec] sm:$0xf0]  ;;  %v12556_v7 = vld [vmem:[#allocation11 + $0x394] sm:$0xf]  ;;  %v10413_v50 = vor.u32 %v12592_v43, %v10412_v46 }
 0x319   :  { %v10701_v54 = vor.u32 %v12664_v48, %v10700_v59  ;;  %v10380_v55 = vld [vmem:[#allocation11 + $0x450] sm:$0xf]  ;;  %v9966_v17 = vld [vmem:[#allocation11 + $0x130] sm:$0xf0] }
 0x31a   :  { %5500 = vmatpush.bf16.msra.mxu0 %v9901_v34  ;;  %5522 = vmatpush.bf16.msra.mxu2 %v10541_v56  ;;  %v12584_v15 = vld [vmem:[#allocation11 + $0x46c] sm:$0xf0]  ;;  %v12476_v34 = vld [vmem:[#allocation11 + $0x114] sm:$0xf]  ;;  %v10289_v56 = vor.u32 %v12556_v7, %v10286_v22 }
 0x31b   :  { %5490 = vmatmul.bf16.vlgmr.msrb.gmra.mxu3 %v13620_v52  ;;  %v10668_v63 = vld [vmem:[#allocation11 + $0x690] sm:$0xf]  ;;  %v10381_v0 = vor.u32 %v12584_v15, %v10380_v55  ;;  %v9969_v1 = vor.u32 %v12476_v34, %v9966_v17  ;;  %v10158_v46 = vld [vmem:[#allocation11 + $0x2b0] sm:$0xf0]  ;;  %v12505_v55 = vld [vmem:[#allocation11 + $0x1f4] sm:$0xf0] }
 0x31c   :  { %5512 = vmatpush.bf16.msra.mxu1 %v10189_v39  ;;  %5534 = vmatpush.bf16.msra.mxu3 %v10829_v37  ;;  %v12656_v61 = vld [vmem:[#allocation11 + $0x6ac] sm:$0xf0]  ;;  %v12548_v39 = vld [vmem:[#allocation11 + $0x354] sm:$0xf] }
 0x31d   :  { %v10254_v37 = vld [vmem:[#allocation11 + $0x370] sm:$0xf0]  ;;  %v10348_v40 = vld [vmem:[#allocation11 + $0x410] sm:$0xf]  ;;  %v10669_v44 = vor.u32 %v12656_v61, %v10668_v63 }
 0x31e   :  { %5501 = vmatpush.bf16.msra.mxu0 %v9869_v4  ;;  %5523 = vmatpush.bf16.msra.mxu2 %v10509_v5  ;;  %v12576_v51 = vld [vmem:[#allocation11 + $0x42c] sm:$0xf0]  ;;  %v9934_v4 = vld [vmem:[#allocation11 + $0xf0] sm:$0xf0]  ;;  %v10257_v38 = vor.u32 %v12548_v39, %v10254_v37 }
 0x31f   :  { %v12628_v5 = vld [vmem:[#allocation11 + $0x5d4] sm:$0xf]  ;;  %v10636_v41 = vld [vmem:[#allocation11 + $0x650] sm:$0xf]  ;;  %v10349_v28 = vor.u32 %v12576_v51, %v10348_v40  ;;  %v9937_v60 = vor.u32 %v12468_v24, %v9934_v4  ;;  %v12497_v51 = vld [vmem:[#allocation11 + $0x1b4] sm:$0xf0] }
 0x320   :  { %5513 = vmatpush.bf16.msra.mxu1 %v10157_v26  ;;  %5535 = vmatpush.bf16.msra.mxu3 %v10797_v21  ;;  %v12648_v9 = vld [vmem:[#allocation11 + $0x66c] sm:$0xf0]  ;;  %v12540_v26 = vld [vmem:[#allocation11 + $0x314] sm:$0xf]  ;;  %v10577_v10 = vor.u32 %v12628_v5, %v10574_v6  ;;  %v10324_v6 = vld [vmem:[#allocation11 + $0x3d8] sm:$0xf] }
 0x321   :  { %v10222_v21 = vld [vmem:[#allocation11 + $0x330] sm:$0xf0]  ;;  %v10637_v32 = vor.u32 %v12648_v9, %v10636_v41  ;;  %v10604_v16 = vld [vmem:[#allocation11 + $0x610] sm:$0xf]  ;;  %v12569_v41 = vld [vmem:[#allocation11 + $0x3f4] sm:$0xf0] }
 0x322   :  { %5502 = vmatpush.bf16.msra.mxu0 %v9837_v33  ;;  %5524 = vmatpush.bf16.msra.mxu2 %v10477_v18  ;;  %v10225_v33 = vor.u32 %v12540_v26, %v10222_v21  ;;  %v12620_v18 = vld [vmem:[#allocation11 + $0x594] sm:$0xf]  ;;  %v12640_v23 = vld [vmem:[#allocation11 + $0x62c] sm:$0xf0]  ;;  %v10325_v13 = vor.u32 %v12569_v41, %v10324_v6  ;;  %v12537_v6 = vld [vmem:[#allocation11 + $0x2f4] sm:$0xf0] }
 0x323   :  { %v10605_v58 = vor.u32 %v12640_v23, %v10604_v16  ;;  %v12684_v43 = vld [vmem:[#allocation11 + $0x794] sm:$0xf]  ;;  %v12561_v16 = vld [vmem:[#allocation11 + $0x3b4] sm:$0xf0] }
 0x324   :  { %5514 = vmatpush.bf16.msra.mxu1 %v10125_v25  ;;  %5536 = vmatpush.bf16.msra.mxu3 %v10765_v47  ;;  %v12532_v25 = vld [vmem:[#allocation11 + $0x2d4] sm:$0xf]  ;;  %v10836_v41 = vld [vmem:[#allocation11 + $0x7d8] sm:$0xf] }
 0x325   :  { %5503 = vmatmul.bf16.vlgmr.msra.gmra.mxu0 %v13606_v53  ;;  %v10190_v47 = vld [vmem:[#allocation11 + $0x2f0] sm:$0xf0] }
 0x326   :  { %5547 = vmatpush.bf16.msrb.mxu0 %v10065_v14  ;;  %5525 = vmatpush.bf16.msra.mxu2 %v10445_v36  ;;  %v10542_v14 = vld [vmem:[#allocation11 + $0x5b0] sm:$0xf0]  ;;  %v10193_v19 = vor.u32 %v12532_v25, %v10190_v47  ;;  %v13639_v25 = vld [vmem:[#allocation13] sm:$0xff] }
 0x327   :  { %v10545_v35 = vor.u32 %v12620_v18, %v10542_v14  ;;  %v12612_v36 = vld [vmem:[#allocation11 + $0x554] sm:$0xf]  ;;  %v10292_v14 = vld [vmem:[#allocation11 + $0x398] sm:$0xf] }
 0x328   :  { %5515 = vmatpush.bf16.msra.mxu1 %v10093_v42  ;;  %5537 = vmatpush.bf16.msra.mxu3 %v10733_v2  ;;  %v10510_v42 = vld [vmem:[#allocation11 + $0x570] sm:$0xf0] }
 0x329   :  { %v12524_v2 = vld [vmem:[#allocation11 + $0x294] sm:$0xf]  ;;  %v10513_v59 = vor.u32 %v12612_v36, %v10510_v42  ;;  %v12553_v42 = vld [vmem:[#allocation11 + $0x374] sm:$0xf0] }
 0x32a   :  { %5548 = vmatpush.bf16.msrb.mxu0 %v10033_v45  ;;  %5526 = vmatpush.bf16.msra.mxu2 %v10413_v50  ;;  %v10833_v45 = vor.u32 %v12692_v30, %v10830_v27  ;;  %v10161_v48 = vor.u32 %v12524_v2, %v10158_v46  ;;  %v9838_v7 = vld [vmem:[#allocation11 + $0x30] sm:$0xf0]  ;;  %v3991_v2 = vperm.slane %v13639_v25, 0 }
 0x32b   :  { %5516 = vmatmul.bf16.vlgmr.msra.gmra.mxu1 %v13610_v20  ;;  %v12604_v22 = vld [vmem:[#allocation11 + $0x514] sm:$0xf]  ;;  %v9841_v63 = vor.u32 %v12444_v3, %v9838_v7 }
 0x32c   :  { %5560 = vmatpush.bf16.msrb.mxu1 %v10321_v8  ;;  %5538 = vmatpush.bf16.msra.mxu3 %v10701_v54  ;;  %v9873_v8 = vor.u32 %v12452_v49, %v9870_v57  ;;  %v10478_v50 = vld [vmem:[#allocation11 + $0x530] sm:$0xf0]  ;;  %v10068_v54 = vld [vmem:[#allocation11 + $0x1d8] sm:$0xf] }
 0x32d   :  { %v12516_v15 = vld [vmem:[#allocation11 + $0x254] sm:$0xf]  ;;  %v10481_v61 = vor.u32 %v12604_v22, %v10478_v50  ;;  %v10069_v39 = vor.u32 %v12505_v55, %v10068_v54  ;;  %v10580_v22 = vld [vmem:[#allocation11 + $0x5d8] sm:$0xf] }
 0x32e   :  { %5549 = vmatpush.bf16.msrb.mxu0 %v10001_v12  ;;  %5527 = vmatpush.bf16.msra.mxu2 %v10381_v0  ;;  %v10801_v12 = vor.u32 %v12684_v43, %v10798_v62  ;;  %v10126_v34 = vld [vmem:[#allocation11 + $0x270] sm:$0xf0]  ;;  %v12633_v50 = vld [vmem:[#allocation11 + $0x5f4] sm:$0xf0] }
 0x32f   :  { %v10766_v17 = vld [vmem:[#allocation11 + $0x770] sm:$0xf0]  ;;  %v10129_v40 = vor.u32 %v12516_v15, %v10126_v34  ;;  %v10228_v55 = vld [vmem:[#allocation11 + $0x318] sm:$0xf] }
 0x330   :  { %5561 = vmatpush.bf16.msrb.mxu1 %v10289_v56  ;;  %5539 = vmatpush.bf16.msra.mxu3 %v10669_v44  ;;  %v12676_v56 = vld [vmem:[#allocation11 + $0x754] sm:$0xf]  ;;  %v10036_v44 = vld [vmem:[#allocation11 + $0x198] sm:$0xf] }
 0x331   :  { %v12596_v37 = vld [vmem:[#allocation11 + $0x4d4] sm:$0xf]  ;;  %v10037_v26 = vor.u32 %v12497_v51, %v10036_v44  ;;  %v12545_v15 = vld [vmem:[#allocation11 + $0x334] sm:$0xf0] }
 0x332   :  { %5550 = vmatpush.bf16.msrb.mxu0 %v9969_v1  ;;  %5528 = vmatpush.bf16.msra.mxu2 %v10349_v28  ;;  %v10446_v0 = vld [vmem:[#allocation11 + $0x4f0] sm:$0xf0]  ;;  %v10769_v1 = vor.u32 %v12676_v56, %v10766_v17  ;;  %v10548_v44 = vld [vmem:[#allocation11 + $0x598] sm:$0xf] }
 0x333   :  { %v12508_v24 = vld [vmem:[#allocation11 + $0x214] sm:$0xf]  ;;  %v10449_v9 = vor.u32 %v12596_v37, %v10446_v0  ;;  %v12465_v37 = vld [vmem:[#allocation11 + $0xb4] sm:$0xf0] }
 0x334   :  { %5562 = vmatpush.bf16.msrb.mxu1 %v10257_v38  ;;  %5540 = vmatpush.bf16.msra.mxu3 %v10637_v32  ;;  %v10094_v4 = vld [vmem:[#allocation11 + $0x230] sm:$0xf0]  ;;  %v12489_v32 = vld [vmem:[#allocation11 + $0x174] sm:$0xf0] }
 0x335   :  { %5529 = vmatmul.bf16.vlgmr.msra.gmra.mxu2 %v13616_v31  ;;  %v12668_v38 = vld [vmem:[#allocation11 + $0x714] sm:$0xf]  ;;  %v10097_v21 = vor.u32 %v12508_v24, %v10094_v4  ;;  %v10005_v47 = vor.u32 %v12489_v32, %v10004_v29  ;;  %v12625_v51 = vld [vmem:[#allocation11 + $0x5b4] sm:$0xf0] }
 0x336   :  { %5551 = vmatpush.bf16.msrb.mxu0 %v9937_v60  ;;  %5573 = vmatpush.bf16.msrb.mxu2 %v10577_v10  ;;  %v10734_v5 = vld [vmem:[#allocation11 + $0x730] sm:$0xf0]  ;;  %v12457_v29 = vld [vmem:[#allocation11 + $0x74] sm:$0xf0] }
 0x337   :  { %v10737_v28 = vor.u32 %v12668_v38, %v10734_v5  ;;  %v12588_v60 = vld [vmem:[#allocation11 + $0x494] sm:$0xf]  ;;  %v10196_v5 = vld [vmem:[#allocation11 + $0x2d8] sm:$0xf] }
 0x338   :  { %5563 = vmatpush.bf16.msrb.mxu1 %v10225_v33  ;;  %5541 = vmatpush.bf16.msra.mxu3 %v10605_v58  ;;  %v10414_v10 = vld [vmem:[#allocation11 + $0x4b0] sm:$0xf0]  ;;  %v10293_v58 = vor.u32 %v12561_v16, %v10292_v14  ;;  %v12529_v14 = vld [vmem:[#allocation11 + $0x2b4] sm:$0xf0] }
 0x339   :  { %v12660_v33 = vld [vmem:[#allocation11 + $0x6d4] sm:$0xf]  ;;  %v10417_v23 = vor.u32 %v12588_v60, %v10414_v10  ;;  %v10197_v60 = vor.u32 %v12537_v6, %v10196_v5  ;;  %v9876_v10 = vld [vmem:[#allocation11 + $0x58] sm:$0xf]  ;;  %v10006_v6 = vld [vmem:[#allocation11 + $0x178] sm:$0xf0] }
 0x33a   :  { %5552 = vmatpush.bf16.msrb.mxu0 %v9905_v11  ;;  %5574 = vmatpush.bf16.msrb.mxu2 %v10545_v35  ;;  %v10702_v18 = vld [vmem:[#allocation11 + $0x6f0] sm:$0xf0]  ;;  %v9972_v35 = vld [vmem:[#allocation11 + $0x118] sm:$0xf] }
 0x33b   :  { %5542 = vmatmul.bf16.vlgmr.msra.gmra.mxu3 %v13620_v52  ;;  %v10705_v30 = vor.u32 %v12660_v33, %v10702_v18  ;;  %v12580_v27 = vld [vmem:[#allocation11 + $0x454] sm:$0xf]  ;;  %v12617_v33 = vld [vmem:[#allocation11 + $0x574] sm:$0xf0] }
 0x33c   :  { %5564 = vmatpush.bf16.msrb.mxu1 %v10193_v19  ;;  %5586 = vmatpush.bf16.msrb.mxu3 %v10833_v45  ;;  %v10382_v11 = vld [vmem:[#allocation11 + $0x470] sm:$0xf0]  ;;  %v12481_v19 = vld [vmem:[#allocation11 + $0x134] sm:$0xf0] }
 0x33d   :  { %v12652_v49 = vld [vmem:[#allocation11 + $0x694] sm:$0xf]  ;;  %v10260_v45 = vld [vmem:[#allocation11 + $0x358] sm:$0xf]  ;;  %v10385_v46 = vor.u32 %v12580_v27, %v10382_v11  ;;  %v9973_v62 = vor.u32 %v12481_v19, %v9972_v35 }
 0x33e   :  { %5553 = vmatpush.bf16.msrb.mxu0 %v9873_v8  ;;  %5575 = vmatpush.bf16.msrb.mxu2 %v10513_v59  ;;  %v10670_v57 = vld [vmem:[#allocation11 + $0x6b0] sm:$0xf0]  ;;  %v9940_v59 = vld [vmem:[#allocation11 + $0xd8] sm:$0xf]  ;;  %v10261_v7 = vor.u32 %v12553_v42, %v10260_v45  ;;  %v12501_v45 = vld [vmem:[#allocation11 + $0x1dc] sm:$0xf] }
 0x33f   :  { %v12572_v43 = vld [vmem:[#allocation11 + $0x414] sm:$0xf]  ;;  %v10673_v8 = vor.u32 %v12652_v49, %v10670_v57  ;;  %v10164_v18 = vld [vmem:[#allocation11 + $0x298] sm:$0xf]  ;;  %v10070_v42 = vld [vmem:[#allocation11 + $0x1f8] sm:$0xf0] }
 0x340   :  { %5565 = vmatpush.bf16.msrb.mxu1 %v10161_v48  ;;  %5587 = vmatpush.bf16.msrb.mxu3 %v10801_v12  ;;  %v10350_v3 = vld [vmem:[#allocation11 + $0x430] sm:$0xf0]  ;;  %v12473_v48 = vld [vmem:[#allocation11 + $0xf4] sm:$0xf0]  ;;  %v10165_v35 = vor.u32 %v12529_v14, %v10164_v18  ;;  %v9974_v14 = vld [vmem:[#allocation11 + $0x138] sm:$0xf0] }
 0x341   :  { %v12644_v12 = vld [vmem:[#allocation11 + $0x654] sm:$0xf]  ;;  %v10353_v56 = vor.u32 %v12572_v43, %v10350_v3  ;;  %v10804_v16 = vld [vmem:[#allocation11 + $0x798] sm:$0xf] }
 0x342   :  { %5554 = vmatpush.bf16.msrb.mxu0 %v9841_v63  ;;  %5576 = vmatpush.bf16.msrb.mxu2 %v10481_v61  ;;  %v5296_v36 = vpop.f32.mrf.mxu0  ;;  %v10638_v54 = vld [vmem:[#allocation11 + $0x670] sm:$0xf0]  ;;  %v9941_v63 = vor.u32 %v12473_v48, %v9940_v59  ;;  %v10581_v61 = vor.u32 %v12633_v50, %v10580_v22  ;;  %v9844_v27 = vld [vmem:[#allocation11 + $0x18] sm:$0xf]  ;;  %v10073_v59 = vor.u32 %v12501_v45, %v10070_v42  ;;  %v12469_v42 = vld [vmem:[#allocation11 + $0xdc] sm:$0xf] }
 0x343   :  { %v5297_v34 = vadd.f32 %v5296_v36, %v3991_v2  ;;  %v12636_v24 = vld [vmem:[#allocation11 + $0x614] sm:$0xf]  ;;  %v10484_v19 = vld [vmem:[#allocation11 + $0x518] sm:$0xf] }
 0x344   :  { %5566 = vmatpush.bf16.msrb.mxu1 %v10129_v40  ;;  %5588 = vmatpush.bf16.msrb.mxu3 %v10769_v1  ;;  %v10641_v40 = vor.u32 %v12644_v12, %v10638_v54  ;;  %v10229_v1 = vor.u32 %v12545_v15, %v10228_v55  ;;  %v10606_v38 = vld [vmem:[#allocation11 + $0x630] sm:$0xf0]  ;;  %v12609_v49 = vld [vmem:[#allocation11 + $0x534] sm:$0xf0]  ;;  %v12493_v12 = vld [vmem:[#allocation11 + $0x19c] sm:$0xf] }
 0x345   :  { %5555 = vmatmul.bf16.vlgmr.msrb.gmra.mxu0 %v13606_v53  ;;  %v10132_v2 = vld [vmem:[#allocation11 + $0x258] sm:$0xf]  ;;  %v10485_v3 = vor.u32 %v12609_v49, %v10484_v19  ;;  %v10038_v54 = vld [vmem:[#allocation11 + $0x1b8] sm:$0xf0] }
 0x346   :  { %5599 = vmatpush.bf16.msra.mxu0 %v10069_v39  ;;  %5577 = vmatpush.bf16.msrb.mxu2 %v10449_v9  ;;  %v9908_v39 = vld [vmem:[#allocation11 + $0x98] sm:$0xf] }
 0x347   :  { %v12697_v9 = vld [vmem:[#allocation11 + $0x7f4] sm:$0xf0] }
 0x348   :  { %5567 = vmatpush.bf16.msrb.mxu1 %v10097_v21  ;;  %5589 = vmatpush.bf16.msrb.mxu3 %v10737_v28  ;;  %v5309_v17 = vpop.f32.mrf.mxu1  ;;  %v10549_v21 = vor.u32 %v12625_v51, %v10548_v44  ;;  %v10609_v28 = vor.u32 %v12636_v24, %v10606_v38  ;;  %v10837_v32 = vor.u32 %v12697_v9, %v10836_v41  ;;  %v10772_v43 = vld [vmem:[#allocation11 + $0x758] sm:$0xf]  ;;  %v12485_v38 = vld [vmem:[#allocation11 + $0x15c] sm:$0xf] }
 0x349   :  { %v13643_v0 = vadd.f32 %v5309_v17, %v5297_v34  ;;  %v10452_v48 = vld [vmem:[#allocation11 + $0x4d8] sm:$0xf] }
 0x34a   :  { %5600 = vmatpush.bf16.msra.mxu0 %v10037_v26  ;;  %5578 = vmatpush.bf16.msrb.mxu2 %v10417_v23  ;;  %v5298_v4 = vpop.f32.mrf.mxu0  ;;  %v9909_v26 = vor.u32 %v12465_v37, %v9908_v39  ;;  %v12689_v23 = vld [vmem:[#allocation11 + $0x7b4] sm:$0xf0]  ;;  %v10326_v39 = vld [vmem:[#allocation11 + $0x3f8] sm:$0xf0] }
 0x34b   :  { %5568 = vmatmul.bf16.vlgmr.msrb.gmra.mxu1 %v13610_v20  ;;  %v10805_v36 = vor.u32 %v12689_v23, %v10804_v16  ;;  %v10100_v55 = vld [vmem:[#allocation11 + $0x218] sm:$0xf] }
 0x34c   :  { %5612 = vmatpush.bf16.msra.mxu1 %v10325_v13  ;;  %5590 = vmatpush.bf16.msrb.mxu3 %v10705_v30  ;;  %v10516_v13 = vld [vmem:[#allocation11 + $0x558] sm:$0xf]  ;;  %v9877_v30 = vor.u32 %v12457_v29, %v9876_v10  ;;  %v10009_v10 = vor.u32 %v12485_v38, %v10006_v6 }
 0x34d   :  { %v10517_v11 = vor.u32 %v12617_v33, %v10516_v13  ;;  %v12513_v15 = vld [vmem:[#allocation11 + $0x234] sm:$0xf0]  ;;  %v12477_v33 = vld [vmem:[#allocation11 + $0x11c] sm:$0xf] }
 0x34e   :  { %5601 = vmatpush.bf16.msra.mxu0 %v10005_v47  ;;  %5579 = vmatpush.bf16.msrb.mxu2 %v10385_v46  ;;  %v12521_v46 = vld [vmem:[#allocation11 + $0x274] sm:$0xf0]  ;;  %v10101_v44 = vor.u32 %v12513_v15, %v10100_v55  ;;  %v9977_v49 = vor.u32 %v12477_v33, %v9974_v14  ;;  %v9910_v55 = vld [vmem:[#allocation11 + $0xb8] sm:$0xf0] }
 0x34f   :  { %v10133_v22 = vor.u32 %v12521_v46, %v10132_v2  ;;  %v10740_v34 = vld [vmem:[#allocation11 + $0x718] sm:$0xf]  ;;  %v9942_v2 = vld [vmem:[#allocation11 + $0xf8] sm:$0xf0] }
 0x350   :  { %5613 = vmatpush.bf16.msra.mxu1 %v10293_v58  ;;  %5591 = vmatpush.bf16.msrb.mxu3 %v10673_v8  ;;  %v5311_v47 = vpop.f32.mrf.mxu1  ;;  %v12449_v58 = vld [vmem:[#allocation11 + $0x34] sm:$0xf0]  ;;  %v12685_v33 = vld [vmem:[#allocation11 + $0x79c] sm:$0xf] }
 0x351   :  { %v9845_v8 = vor.u32 %v12449_v58, %v9844_v27  ;;  %v10420_v24 = vld [vmem:[#allocation11 + $0x498] sm:$0xf]  ;;  %v12549_v27 = vld [vmem:[#allocation11 + $0x35c] sm:$0xf] }
 0x352   :  { %5602 = vmatpush.bf16.msra.mxu0 %v9973_v62  ;;  %5580 = vmatpush.bf16.msrb.mxu2 %v10353_v56  ;;  %v13646_v57 = vpop.f32.mrf.mxu0  ;;  %v12681_v62 = vld [vmem:[#allocation11 + $0x774] sm:$0xf0] }
 0x353   :  { %v10773_v50 = vor.u32 %v12681_v62, %v10772_v43  ;;  %v12673_v56 = vld [vmem:[#allocation11 + $0x734] sm:$0xf0]  ;;  %v12629_v43 = vld [vmem:[#allocation11 + $0x5dc] sm:$0xf] }
 0x354   :  { %5614 = vmatpush.bf16.msra.mxu1 %v10261_v7  ;;  %5592 = vmatpush.bf16.msrb.mxu3 %v10641_v40  ;;  %v12601_v7 = vld [vmem:[#allocation11 + $0x4f4] sm:$0xf0]  ;;  %v10041_v40 = vor.u32 %v12493_v12, %v10038_v54  ;;  %v10741_v51 = vor.u32 %v12673_v56, %v10740_v34  ;;  %v10582_v62 = vld [vmem:[#allocation11 + $0x5f8] sm:$0xf0] }
 0x355   :  { %5581 = vmatmul.bf16.vlgmr.msrb.gmra.mxu2 %v13616_v31  ;;  %v10453_v37 = vor.u32 %v12601_v7, %v10452_v48  ;;  %v12593_v4 = vld [vmem:[#allocation11 + $0x4b4] sm:$0xf0]  ;;  %v10230_v48 = vld [vmem:[#allocation11 + $0x338] sm:$0xf0]  ;;  %v10585_v12 = vor.u32 %v12629_v43, %v10582_v62 }
 0x356   :  { %5603 = vmatpush.bf16.msra.mxu0 %v9941_v63  ;;  %5625 = vmatpush.bf16.msra.mxu2 %v10581_v61  ;;  %v12565_v61 = vld [vmem:[#allocation11 + $0x3dc] sm:$0xf]  ;;  %v10708_v41 = vld [vmem:[#allocation11 + $0x6d8] sm:$0xf] }
 0x357   :  { %v10329_v5 = vor.u32 %v12565_v61, %v10326_v39  ;;  %v12665_v9 = vld [vmem:[#allocation11 + $0x6f4] sm:$0xf0]  ;;  %v12461_v54 = vld [vmem:[#allocation11 + $0x9c] sm:$0xf] }
 0x358   :  { %5615 = vmatpush.bf16.msra.mxu1 %v10229_v1  ;;  %5593 = vmatpush.bf16.msrb.mxu3 %v10609_v28  ;;  %v13649_v17 = vpop.f32.mrf.mxu2  ;;  %v13651_v63 = vpop.f32.mrf.mxu1  ;;  %v10421_v28 = vor.u32 %v12593_v4, %v10420_v24  ;;  %v10709_v29 = vor.u32 %v12665_v9, %v10708_v41  ;;  %v10388_v13 = vld [vmem:[#allocation11 + $0x458] sm:$0xf]  ;;  %v12621_v56 = vld [vmem:[#allocation11 + $0x59c] sm:$0xf] }
 0x359   :  { %v10676_v16 = vld [vmem:[#allocation11 + $0x698] sm:$0xf]  ;;  %v10550_v61 = vld [vmem:[#allocation11 + $0x5b8] sm:$0xf0] }
 0x35a   :  { %5604 = vmatpush.bf16.msra.mxu0 %v9909_v26  ;;  %5626 = vmatpush.bf16.msra.mxu2 %v10549_v21  ;;  %v5350_v1 = vpop.f32.mrf.mxu0  ;;  %v12557_v26 = vld [vmem:[#allocation11 + $0x39c] sm:$0xf]  ;;  %v12657_v23 = vld [vmem:[#allocation11 + $0x6b4] sm:$0xf0]  ;;  %v10553_v6 = vor.u32 %v12621_v56, %v10550_v61 }
 0x35b   :  { %5594 = vmatmul.bf16.vlgmr.msrb.gmra.mxu3 %v13620_v52  ;;  %v10294_v21 = vld [vmem:[#allocation11 + $0x3b8] sm:$0xf0]  ;;  %v10356_v58 = vld [vmem:[#allocation11 + $0x418] sm:$0xf] }
 0x35c   :  { %5616 = vmatpush.bf16.msra.mxu1 %v10197_v60  ;;  %5638 = vmatpush.bf16.msra.mxu3 %v10837_v32  ;;  %v12585_v32 = vld [vmem:[#allocation11 + $0x474] sm:$0xf0]  ;;  %v10297_v18 = vor.u32 %v12557_v26, %v10294_v21  ;;  %v12533_v1 = vld [vmem:[#allocation11 + $0x2dc] sm:$0xf] }
 0x35d   :  { %v12577_v45 = vld [vmem:[#allocation11 + $0x434] sm:$0xf0]  ;;  %v12693_v24 = vld [vmem:[#allocation11 + $0x7dc] sm:$0xf] }
 0x35e   :  { %5605 = vmatpush.bf16.msra.mxu0 %v9877_v30  ;;  %5627 = vmatpush.bf16.msra.mxu2 %v10517_v11  ;;  %v13654_v60 = vpop.f32.mrf.mxu3  ;;  %v10262_v11 = vld [vmem:[#allocation11 + $0x378] sm:$0xf0]  ;;  %v10357_v7 = vor.u32 %v12577_v45, %v10356_v58  ;;  %v10612_v39 = vld [vmem:[#allocation11 + $0x618] sm:$0xf] }
 0x35f   :  { %v10265_v46 = vor.u32 %v12549_v27, %v10262_v11  ;;  %v10838_v4 = vld [vmem:[#allocation11 + $0x7f8] sm:$0xf0]  ;;  %v12728_v45 = vld [vmem:[#allocation14 + $0xec] sm:$0xf0] }
 0x360   :  { %5617 = vmatpush.bf16.msra.mxu1 %v10165_v35  ;;  %5639 = vmatpush.bf16.msra.mxu3 %v10805_v36  ;;  %v5324_v47 = vpop.f32.mrf.mxu2  ;;  %v5363_v30 = vpop.f32.mrf.mxu1  ;;  %v10389_v35 = vor.u32 %v12585_v32, %v10388_v13  ;;  %v10677_v36 = vor.u32 %v12657_v23, %v10676_v16  ;;  %v12453_v26 = vld [vmem:[#allocation11 + $0x5c] sm:$0xf] }
 0x361   :  { %v9878_v21 = vld [vmem:[#allocation11 + $0x78] sm:$0xf0] }
 0x362   :  { %5606 = vmatpush.bf16.msra.mxu0 %v9845_v8  ;;  %5628 = vmatpush.bf16.msra.mxu2 %v10485_v3  ;;  %v13657_v19 = vpop.f32.mrf.mxu0  ;;  %v10644_v8 = vld [vmem:[#allocation11 + $0x658] sm:$0xf]  ;;  %v12525_v13 = vld [vmem:[#allocation11 + $0x29c] sm:$0xf]  ;;  %v9881_v16 = vor.u32 %v12453_v26, %v9878_v21 }
 0x363   :  { %v12649_v3 = vld [vmem:[#allocation11 + $0x674] sm:$0xf0]  ;;  %v10166_v32 = vld [vmem:[#allocation11 + $0x2b8] sm:$0xf0] }
 0x364   :  { %5618 = vmatpush.bf16.msra.mxu1 %v10133_v22  ;;  %5640 = vmatpush.bf16.msra.mxu3 %v10773_v50  ;;  %v9945_v50 = vor.u32 %v12469_v42, %v9942_v2  ;;  %v10645_v15 = vor.u32 %v12649_v3, %v10644_v8  ;;  %v12445_v23 = vld [vmem:[#allocation11 + $0x1c] sm:$0xf]  ;;  %v10169_v30 = vor.u32 %v12525_v13, %v10166_v32  ;;  %v12720_v26 = vld [vmem:[#allocation14 + $0xac] sm:$0xf0] }
 0x365   :  { %5607 = vmatmul.bf16.vlgmr.msra.gmra.mxu0 %v13606_v53  ;;  %v9846_v27 = vld [vmem:[#allocation11 + $0x38] sm:$0xf0] }
 0x366   :  { %5651 = vmatpush.bf16.msrb.mxu0 %v10073_v59  ;;  %5629 = vmatpush.bf16.msra.mxu2 %v10453_v37  ;;  %v12541_v59 = vld [vmem:[#allocation11 + $0x31c] sm:$0xf]  ;;  %v5337_v22 = vpop.f32.mrf.mxu3  ;;  %v9849_v8 = vor.u32 %v12445_v23, %v9846_v27  ;;  %v10908_v23 = vld [vmem:[#allocation14 + $0x80] sm:$0xf] }
 0x367   :  { %v10233_v34 = vor.u32 %v12541_v59, %v10230_v48  ;;  %v12605_v11 = vld [vmem:[#allocation11 + $0x51c] sm:$0xf] }
 0x368   :  { %5619 = vmatpush.bf16.msra.mxu1 %v10101_v44  ;;  %5641 = vmatpush.bf16.msra.mxu3 %v10741_v51  ;;  %v13659_v37 = vpop.f32.mrf.mxu2  ;;  %v10198_v44 = vld [vmem:[#allocation11 + $0x2f8] sm:$0xf0]  ;;  %v13661_v51 = vpop.f32.mrf.mxu1 }
 0x369   :  { %v10201_v9 = vor.u32 %v12533_v1, %v10198_v44  ;;  %v12517_v42 = vld [vmem:[#allocation11 + $0x25c] sm:$0xf] }
 0x36a   :  { %5652 = vmatpush.bf16.msrb.mxu0 %v10041_v40  ;;  %5630 = vmatpush.bf16.msra.mxu2 %v10421_v28  ;;  %v12641_v40 = vld [vmem:[#allocation11 + $0x634] sm:$0xf0]  ;;  %v5402_v38 = vpop.f32.mrf.mxu0  ;;  %v12613_v28 = vld [vmem:[#allocation11 + $0x55c] sm:$0xf] }
 0x36b   :  { %5620 = vmatmul.bf16.vlgmr.msra.gmra.mxu1 %v13610_v20  ;;  %v10613_v41 = vor.u32 %v12641_v40, %v10612_v39  ;;  %v12677_v43 = vld [vmem:[#allocation11 + $0x75c] sm:$0xf]  ;;  %v11084_v39 = vld [vmem:[#allocation14 + $0x1e0] sm:$0xf]  ;;  %v12760_v40 = vld [vmem:[#allocation14 + $0x1ec] sm:$0xf0] }
 0x36c   :  { %5664 = vmatpush.bf16.msrb.mxu1 %v10329_v5  ;;  %5642 = vmatpush.bf16.msra.mxu3 %v10709_v29  ;;  %v9913_v5 = vor.u32 %v12461_v54, %v9910_v55  ;;  %v10518_v29 = vld [vmem:[#allocation11 + $0x578] sm:$0xf0]  ;;  %v12724_v54 = vld [vmem:[#allocation14 + $0xcc] sm:$0xf0] }
 0x36d   :  { %v10521_v47 = vor.u32 %v12613_v28, %v10518_v29  ;;  %v10774_v62 = vld [vmem:[#allocation11 + $0x778] sm:$0xf0]  ;;  %v12756_v29 = vld [vmem:[#allocation14 + $0x1cc] sm:$0xf0] }
 0x36e   :  { %5653 = vmatpush.bf16.msrb.mxu0 %v10009_v10  ;;  %5631 = vmatpush.bf16.msra.mxu2 %v10389_v35  ;;  %v10841_v10 = vor.u32 %v12693_v24, %v10838_v4  ;;  %v13664_v14 = vpop.f32.mrf.mxu3  ;;  %v10486_v35 = vld [vmem:[#allocation11 + $0x538] sm:$0xf0] }
 0x36f   :  { %v10489_v3 = vor.u32 %v12605_v11, %v10486_v35  ;;  %v12597_v48 = vld [vmem:[#allocation11 + $0x4dc] sm:$0xf]  ;;  %v11052_v11 = vld [vmem:[#allocation14 + $0x1a0] sm:$0xf]  ;;  %v12752_v35 = vld [vmem:[#allocation14 + $0x1ac] sm:$0xf0] }
 0x370   :  { %5665 = vmatpush.bf16.msrb.mxu1 %v10297_v18  ;;  %5643 = vmatpush.bf16.msra.mxu3 %v10677_v36  ;;  %v10806_v18 = vld [vmem:[#allocation11 + $0x7b8] sm:$0xf0]  ;;  %v5376_v58 = vpop.f32.mrf.mxu2  ;;  %v10956_v36 = vld [vmem:[#allocation14 + $0xe0] sm:$0xf]  ;;  %v5415_v2 = vpop.f32.mrf.mxu1 }
 0x371   :  { %v10957_v59 = vor.u32 %v12728_v45, %v10956_v36  ;;  %v12509_v55 = vld [vmem:[#allocation11 + $0x21c] sm:$0xf] }
 0x372   :  { %5654 = vmatpush.bf16.msrb.mxu0 %v9977_v49  ;;  %5632 = vmatpush.bf16.msra.mxu2 %v10357_v7  ;;  %v10809_v49 = vor.u32 %v12685_v33, %v10806_v18  ;;  %v10454_v7 = vld [vmem:[#allocation11 + $0x4f8] sm:$0xf0] }
 0x373   :  { %v10742_v56 = vld [vmem:[#allocation11 + $0x738] sm:$0xf0]  ;;  %v10457_v1 = vor.u32 %v12597_v48, %v10454_v7  ;;  %v12792_v48 = vld [vmem:[#allocation14 + $0x2ec] sm:$0xf0] }
 0x374   :  { %5666 = vmatpush.bf16.msrb.mxu1 %v10265_v46  ;;  %5644 = vmatpush.bf16.msra.mxu3 %v10645_v15  ;;  %v10134_v46 = vld [vmem:[#allocation11 + $0x278] sm:$0xf0] }
 0x375   :  { %5633 = vmatmul.bf16.vlgmr.msra.gmra.mxu2 %v13616_v31  ;;  %v10137_v22 = vor.u32 %v12517_v42, %v10134_v46  ;;  %v10102_v15 = vld [vmem:[#allocation11 + $0x238] sm:$0xf0] }
 0x376   :  { %5655 = vmatpush.bf16.msrb.mxu0 %v9945_v50  ;;  %5677 = vmatpush.bf16.msrb.mxu2 %v10585_v12  ;;  %v10777_v50 = vor.u32 %v12677_v43, %v10774_v62  ;;  %v10940_v12 = vld [vmem:[#allocation14 + $0xc0] sm:$0xf]  ;;  %v5389_v61 = vpop.f32.mrf.mxu3  ;;  %v10105_v4 = vor.u32 %v12509_v55, %v10102_v15  ;;  %v12661_v21 = vld [vmem:[#allocation11 + $0x6dc] sm:$0xf] }
 0x377   :  { %v10941_v44 = vor.u32 %v12724_v54, %v10940_v12  ;;  %v10710_v28 = vld [vmem:[#allocation11 + $0x6f8] sm:$0xf0]  ;;  %v10892_v62 = vld [vmem:[#allocation14 + $0x60] sm:$0xf]  ;;  %v3992_v54 = vperm.slane %v13639_v25, 1 }
 0x378   :  { %5667 = vmatpush.bf16.msrb.mxu1 %v10233_v34  ;;  %5645 = vmatpush.bf16.msra.mxu3 %v10613_v41  ;;  %v12669_v34 = vld [vmem:[#allocation11 + $0x71c] sm:$0xf]  ;;  %v13667_v24 = vpop.f32.mrf.mxu2  ;;  %v10924_v41 = vld [vmem:[#allocation14 + $0xa0] sm:$0xf]  ;;  %v10713_v33 = vor.u32 %v12661_v21, %v10710_v28  ;;  %v12824_v21 = vld [vmem:[#allocation14 + $0x3ec] sm:$0xf0] }
 0x379   :  { %v10745_v38 = vor.u32 %v12669_v34, %v10742_v56  ;;  %v10925_v32 = vor.u32 %v12720_v26, %v10924_v41  ;;  %v12581_v18 = vld [vmem:[#allocation11 + $0x45c] sm:$0xf]  ;;  %v10876_v34 = vld [vmem:[#allocation14 + $0x40] sm:$0xf]  ;;  %v12708_v56 = vld [vmem:[#allocation14 + $0x4c] sm:$0xf0] }
 0x37a   :  { %5656 = vmatpush.bf16.msrb.mxu0 %v9913_v5  ;;  %5678 = vmatpush.bf16.msrb.mxu2 %v10553_v6  ;;  %v12589_v5 = vld [vmem:[#allocation11 + $0x49c] sm:$0xf]  ;;  %v11340_v26 = vld [vmem:[#allocation14 + $0x3e0] sm:$0xf]  ;;  %v10877_v28 = vor.u32 %v12708_v56, %v10876_v34 }
 0x37b   :  { %5646 = vmatmul.bf16.vlgmr.msra.gmra.mxu3 %v13620_v52  ;;  %v10422_v6 = vld [vmem:[#allocation11 + $0x4b8] sm:$0xf0] }
 0x37c   :  { %5668 = vmatpush.bf16.msrb.mxu1 %v10201_v9  ;;  %5690 = vmatpush.bf16.msrb.mxu3 %v10841_v10  ;;  %v11085_v9 = vor.u32 %v12760_v40, %v11084_v39  ;;  %v11068_v10 = vld [vmem:[#allocation14 + $0x1c0] sm:$0xf]  ;;  %v10425_v13 = vor.u32 %v12589_v5, %v10422_v6  ;;  %v10678_v27 = vld [vmem:[#allocation11 + $0x6b8] sm:$0xf0]  ;;  %v12744_v6 = vld [vmem:[#allocation14 + $0x16c] sm:$0xf0] }
 0x37d   :  { %v12573_v45 = vld [vmem:[#allocation11 + $0x41c] sm:$0xf]  ;;  %v11020_v5 = vld [vmem:[#allocation14 + $0x160] sm:$0xf] }
 0x37e   :  { %5657 = vmatpush.bf16.msrb.mxu0 %v9881_v16  ;;  %5679 = vmatpush.bf16.msrb.mxu2 %v10521_v47  ;;  %v10390_v16 = vld [vmem:[#allocation11 + $0x478] sm:$0xf0]  ;;  %v11069_v47 = vor.u32 %v12756_v29, %v11068_v10  ;;  %v13671_v58 = vpop.f32.mrf.mxu3 }
 0x37f   :  { %v10393_v36 = vor.u32 %v12581_v18, %v10390_v16  ;;  %v10358_v43 = vld [vmem:[#allocation11 + $0x438] sm:$0xf0]  ;;  %v11180_v18 = vld [vmem:[#allocation14 + $0x2a0] sm:$0xf]  ;;  %v5349_v16 = vadd.f32 %v13646_v57, %v3992_v54 }
 0x380   :  { %5669 = vmatpush.bf16.msrb.mxu1 %v10169_v30  ;;  %5691 = vmatpush.bf16.msrb.mxu3 %v10809_v49  ;;  %v12716_v30 = vld [vmem:[#allocation14 + $0x8c] sm:$0xf0]  ;;  %v5428_v2 = vpop.f32.mrf.mxu2  ;;  %v12645_v7 = vld [vmem:[#allocation11 + $0x65c] sm:$0xf]  ;;  %v10361_v12 = vor.u32 %v12573_v45, %v10358_v43 }
 0x381   :  { %v10909_v42 = vor.u32 %v12716_v30, %v10908_v23  ;;  %v11341_v23 = vor.u32 %v12824_v21, %v11340_v26  ;;  %v11004_v30 = vld [vmem:[#allocation14 + $0x140] sm:$0xf]  ;;  %v12700_v43 = vld [vmem:[#allocation14 + $0xc] sm:$0xf0] }
 0x382   :  { %5658 = vmatpush.bf16.msrb.mxu0 %v9849_v8  ;;  %5680 = vmatpush.bf16.msrb.mxu2 %v10489_v3  ;;  %v13673_v49 = vpop.f32.mrf.mxu0  ;;  %v12712_v8 = vld [vmem:[#allocation14 + $0x6c] sm:$0xf0]  ;;  %v11053_v3 = vor.u32 %v12752_v35, %v11052_v11  ;;  %v11324_v11 = vld [vmem:[#allocation14 + $0x3c0] sm:$0xf] }
 0x383   :  { %v10893_v55 = vor.u32 %v12712_v8, %v10892_v62  ;;  %v12820_v35 = vld [vmem:[#allocation14 + $0x3cc] sm:$0xf0]  ;;  %v11164_v62 = vld [vmem:[#allocation14 + $0x280] sm:$0xf] }
 0x384   :  { %5670 = vmatpush.bf16.msrb.mxu1 %v10137_v22  ;;  %5692 = vmatpush.bf16.msrb.mxu3 %v10777_v50  ;;  %v11036_v22 = vld [vmem:[#allocation14 + $0x180] sm:$0xf]  ;;  %v12748_v50 = vld [vmem:[#allocation14 + $0x18c] sm:$0xf0] }
 0x385   :  { %5659 = vmatmul.bf16.vlgmr.msrb.gmra.mxu0 %v13606_v53  ;;  %v12653_v53 = vld [vmem:[#allocation11 + $0x69c] sm:$0xf]  ;;  %v11037_v40 = vor.u32 %v12748_v50, %v11036_v22  ;;  %v12780_v8 = vld [vmem:[#allocation14 + $0x28c] sm:$0xf0] }
 0x386   :  { %7265 = vmatpush.bf16.msra.mxu0 %v10957_v59  ;;  %5681 = vmatpush.bf16.msrb.mxu2 %v10457_v1  ;;  %v10681_v46 = vor.u32 %v12653_v53, %v10678_v27  ;;  %v11212_v59 = vld [vmem:[#allocation14 + $0x2e0] sm:$0xf]  ;;  %v5441_v41 = vpop.f32.mrf.mxu3  ;;  %v12740_v53 = vld [vmem:[#allocation14 + $0x14c] sm:$0xf0]  ;;  %v5323_v27 = vadd.f32 %v13649_v17, %v13643_v0  ;;  %v11325_v0 = vor.u32 %v12820_v35, %v11324_v11 }
 0x387   :  { %v11213_v15 = vor.u32 %v12792_v48, %v11212_v59  ;;  %v11196_v1 = vld [vmem:[#allocation14 + $0x2c0] sm:$0xf]  ;;  %v12736_v48 = vld [vmem:[#allocation14 + $0x12c] sm:$0xf0] }
 0x388   :  { %5671 = vmatpush.bf16.msrb.mxu1 %v10105_v4  ;;  %5693 = vmatpush.bf16.msrb.mxu3 %v10745_v38  ;;  %v13676_v61 = vpop.f32.mrf.mxu1  ;;  %v12637_v4 = vld [vmem:[#allocation11 + $0x61c] sm:$0xf]  ;;  %v5336_v2 = vadd.f32 %v13654_v60, %v5323_v27  ;;  %v11468_v17 = vld [vmem:[#allocation14 + $0x4e0] sm:$0xf] }
 0x389   :  { %v10614_v38 = vld [vmem:[#allocation11 + $0x638] sm:$0xf0]  ;;  %v10988_v59 = vld [vmem:[#allocation14 + $0x120] sm:$0xf] }
 0x38a   :  { %7266 = vmatpush.bf16.msra.mxu0 %v10941_v44  ;;  %5682 = vmatpush.bf16.msrb.mxu2 %v10425_v13  ;;  %v12788_v44 = vld [vmem:[#allocation14 + $0x2cc] sm:$0xf0]  ;;  %v10617_v29 = vor.u32 %v12637_v4, %v10614_v38  ;;  %v11021_v13 = vor.u32 %v12744_v6, %v11020_v5  ;;  %v5703_v22 = vmax.f32 %v5336_v2, 0.0  ;;  %v10989_v34 = vor.u32 %v12736_v48, %v10988_v59  ;;  %v11596_v38 = vld [vmem:[#allocation14 + $0x5e0] sm:$0xf] }
 0x38b   :  { %5672 = vmatmul.bf16.vlgmr.msrb.gmra.mxu1 %v13610_v20  ;;  %v10646_v20 = vld [vmem:[#allocation11 + $0x678] sm:$0xf0]  ;;  %v11197_v10 = vor.u32 %v12788_v44, %v11196_v1  ;;  %v12732_v1 = vld [vmem:[#allocation14 + $0x10c] sm:$0xf0]  ;;  %v11292_v44 = vld [vmem:[#allocation14 + $0x380] sm:$0xf] }
 0x38c   :  { %7278 = vmatpush.bf16.msra.mxu1 %v11085_v9  ;;  %5694 = vmatpush.bf16.msrb.mxu3 %v10713_v33  ;;  %v10649_v39 = vor.u32 %v12645_v7, %v10646_v20  ;;  %v5454_v9 = vpop.f32.mrf.mxu0  ;;  %v12704_v33 = vld [vmem:[#allocation14 + $0x2c] sm:$0xf0]  ;;  %v11308_v7 = vld [vmem:[#allocation14 + $0x3a0] sm:$0xf]  ;;  %v3993_v4 = vperm.slane %v13639_v25, 2  ;;  %v13688_v5 = vpack.c.bf16 %v5703_v22, %v5703_v22 }
 0x38d   :  { %v12816_v20 = vld [vmem:[#allocation14 + $0x3ac] sm:$0xf0]  ;;  %v11420_v2 = vld [vmem:[#allocation14 + $0x480] sm:$0xf] }
 0x38e   :  { %7267 = vmatpush.bf16.msra.mxu0 %v10925_v32  ;;  %5683 = vmatpush.bf16.msrb.mxu2 %v10393_v36  ;;  %v10860_v32 = vld [vmem:[#allocation14 + $0x20] sm:$0xf]  ;;  %v5362_v36 = vadd.f32 %v13651_v63, %v5349_v16  ;;  %v11309_v56 = vor.u32 %v12816_v20, %v11308_v7 }
 0x38f   :  { %v10861_v45 = vor.u32 %v12704_v33, %v10860_v32  ;;  %v12848_v32 = vld [vmem:[#allocation14 + $0x4ac] sm:$0xf0]  ;;  %v11276_v33 = vld [vmem:[#allocation14 + $0x360] sm:$0xf] }
 0x390   :  { %7279 = vmatpush.bf16.msra.mxu1 %v11069_v47  ;;  %5695 = vmatpush.bf16.msrb.mxu3 %v10681_v46  ;;  %v12784_v47 = vld [vmem:[#allocation14 + $0x2ac] sm:$0xf0]  ;;  %v5467_v57 = vpop.f32.mrf.mxu1  ;;  %v11005_v46 = vor.u32 %v12740_v53, %v11004_v30  ;;  %v5375_v63 = vadd.f32 %v13659_v37, %v5362_v36  ;;  %v11452_v37 = vld [vmem:[#allocation14 + $0x4c0] sm:$0xf]  ;;  %v3994_v53 = vperm.slane %v13639_v25, 3 }
 0x391   :  { %v12884_v30 = vld [vmem:[#allocation14 + $0x5cc] sm:$0xf0]  ;;  %v11100_v20 = vld [vmem:[#allocation14 + $0x200] sm:$0xf] }
 0x392   :  { %7268 = vmatpush.bf16.msra.mxu0 %v10909_v42  ;;  %5684 = vmatpush.bf16.msrb.mxu2 %v10361_v12  ;;  %v10844_v42 = vld [vmem:[#allocation14] sm:$0xf]  ;;  %v5388_v50 = vadd.f32 %v13664_v14, %v5375_v63  ;;  %v11165_v12 = vor.u32 %v12780_v8, %v11164_v62  ;;  %v12888_v14 = vld [vmem:[#allocation14 + $0x5ec] sm:$0xf0] }
 0x393   :  { %v10845_v60 = vor.u32 %v12700_v43, %v10844_v42  ;;  %v11597_v16 = vor.u32 %v12888_v14, %v11596_v38  ;;  %v12768_v42 = vld [vmem:[#allocation14 + $0x22c] sm:$0xf0]  ;;  %v11228_v14 = vld [vmem:[#allocation14 + $0x300] sm:$0xf] }
 0x394   :  { %7280 = vmatpush.bf16.msra.mxu1 %v11053_v3  ;;  %5696 = vmatpush.bf16.msrb.mxu3 %v10649_v39  ;;  %v12856_v3 = vld [vmem:[#allocation14 + $0x4ec] sm:$0xf0]  ;;  %v5704_v6 = vmax.f32 %v5388_v50, 0.0 }
 0x395   :  { %5685 = vmatmul.bf16.vlgmr.msrb.gmra.mxu2 %v13616_v31  ;;  %v11181_v31 = vor.u32 %v12784_v47, %v11180_v18  ;;  %v11469_v54 = vor.u32 %v12856_v3, %v11468_v17  ;;  %v12852_v39 = vld [vmem:[#allocation14 + $0x4cc] sm:$0xf0]  ;;  %v11580_v47 = vld [vmem:[#allocation14 + $0x5c0] sm:$0xf]  ;;  %v5453_v17 = vadd.f32 %v13673_v49, %v3994_v53 }
 0x396   :  { %7269 = vmatpush.bf16.msra.mxu0 %v10893_v55  ;;  %7291 = vmatpush.bf16.msra.mxu2 %v11213_v15  ;;  %v11148_v55 = vld [vmem:[#allocation14 + $0x260] sm:$0xf]  ;;  %v12776_v15 = vld [vmem:[#allocation14 + $0x26c] sm:$0xf0]  ;;  %v11453_v26 = vor.u32 %v12852_v39, %v11452_v37  ;;  %v11581_v25 = vor.u32 %v12884_v30, %v11580_v47 }
 0x397   :  { %v11149_v41 = vor.u32 %v12776_v15, %v11148_v55  ;;  %v12808_v18 = vld [vmem:[#allocation14 + $0x36c] sm:$0xf0]  ;;  %v5466_v22 = vadd.f32 %v13676_v61, %v5453_v17  ;;  %v11548_v55 = vld [vmem:[#allocation14 + $0x580] sm:$0xf] }
 0x398   :  { %7281 = vmatpush.bf16.msra.mxu1 %v11037_v40  ;;  %5697 = vmatpush.bf16.msrb.mxu3 %v10617_v29  ;;  %v10972_v40 = vld [vmem:[#allocation14 + $0x100] sm:$0xf]  ;;  %v5478_v9 = vpop.f32.mrf.mxu2  ;;  %v12772_v29 = vld [vmem:[#allocation14 + $0x24c] sm:$0xf0]  ;;  %v11277_v36 = vor.u32 %v12808_v18, %v11276_v33 }
 0x399   :  { %v10973_v21 = vor.u32 %v12732_v1, %v10972_v40  ;;  %v12804_v43 = vld [vmem:[#allocation14 + $0x34c] sm:$0xf0]  ;;  %v11388_v61 = vld [vmem:[#allocation14 + $0x440] sm:$0xf] }
 0x39a   :  { %7270 = vmatpush.bf16.msra.mxu0 %v10877_v28  ;;  %7292 = vmatpush.bf16.msra.mxu2 %v11197_v10  ;;  %v11132_v10 = vld [vmem:[#allocation14 + $0x240] sm:$0xf]  ;;  %v12840_v50 = vld [vmem:[#allocation14 + $0x46c] sm:$0xf0] }
 0x39b   :  { %5698 = vmatmul.bf16.vlgmr.msrb.gmra.mxu3 %v13620_v52  ;;  %v12812_v52 = vld [vmem:[#allocation14 + $0x38c] sm:$0xf0]  ;;  %v11133_v27 = vor.u32 %v12772_v29, %v11132_v10  ;;  %v11708_v10 = vld [vmem:[#allocation14 + $0x6c0] sm:$0xf] }
 0x39c   :  { %7282 = vmatpush.bf16.msra.mxu1 %v11021_v13  ;;  %7304 = vmatpush.bf16.msra.mxu3 %v11341_v23  ;;  %v11293_v28 = vor.u32 %v12812_v52, %v11292_v44  ;;  %v11436_v13 = vld [vmem:[#allocation14 + $0x4a0] sm:$0xf]  ;;  %v5401_v23 = vadd.f32 %v13657_v19, %v3993_v4  ;;  %v12844_v19 = vld [vmem:[#allocation14 + $0x48c] sm:$0xf0] }
 0x39d   :  { %v11437_v35 = vor.u32 %v12848_v32, %v11436_v13  ;;  %v11421_v48 = vor.u32 %v12844_v19, %v11420_v2  ;;  %v12876_v15 = vld [vmem:[#allocation14 + $0x58c] sm:$0xf0]  ;;  %v11516_v53 = vld [vmem:[#allocation14 + $0x540] sm:$0xf]  ;;  %v12726_v19 = vld [vmem:[#allocation14 + $0xe4] sm:$0xf] }
 0x39e   :  { %7271 = vmatpush.bf16.msra.mxu0 %v10861_v45  ;;  %7293 = vmatpush.bf16.msra.mxu2 %v11181_v31  ;;  %v5414_v11 = vadd.f32 %v13661_v51, %v5401_v23  ;;  %v11116_v45 = vld [vmem:[#allocation14 + $0x220] sm:$0xf]  ;;  %v13694_v31 = vpack.c.bf16 %v5704_v6, %v5704_v6  ;;  %v5491_v57 = vpop.f32.mrf.mxu3  ;;  %v12920_v37 = vld [vmem:[#allocation14 + $0x6ec] sm:$0xf0] }
 0x39f   :  { %v11564_v51 = vld [vmem:[#allocation14 + $0x5a0] sm:$0xf]  ;;  %v11117_v3 = vor.u32 %v12768_v42, %v11116_v45  ;;  %v12836_v38 = vld [vmem:[#allocation14 + $0x44c] sm:$0xf0] }
 0x3a0   :  { %7283 = vmatpush.bf16.msra.mxu1 %v11005_v46  ;;  %7305 = vmatpush.bf16.msra.mxu3 %v11325_v0  ;;  %v11260_v46 = vld [vmem:[#allocation14 + $0x340] sm:$0xf]  ;;  %v5427_v62 = vadd.f32 %v13667_v24, %v5414_v11  ;;  %v12880_v0 = vld [vmem:[#allocation14 + $0x5ac] sm:$0xf0]  ;;  %v5480_v59 = vpop.f32.mrf.mxu2  ;;  %v11389_v32 = vor.u32 %v12836_v38, %v11388_v61 }
 0x3a1   :  { %v11261_v7 = vor.u32 %v12804_v43, %v11260_v46  ;;  %v11404_v24 = vld [vmem:[#allocation14 + $0x460] sm:$0xf]  ;;  %v11565_v49 = vor.u32 %v12880_v0, %v11564_v51  ;;  %v12796_v6 = vld [vmem:[#allocation14 + $0x30c] sm:$0xf0]  ;;  %v13711_v59 = vld [vmem:[#allocation13] sm:$0xff] }
 0x3a2   :  { %7272 = vmatpush.bf16.msra.mxu0 %v10845_v60  ;;  %7294 = vmatpush.bf16.msra.mxu2 %v11165_v12  ;;  %v13697_v8 = vpop.f32.mrf.mxu0  ;;  %v5440_v63 = vadd.f32 %v13671_v58, %v5427_v62  ;;  %v12764_v60 = vld [vmem:[#allocation14 + $0x20c] sm:$0xf0]  ;;  %v11244_v12 = vld [vmem:[#allocation14 + $0x320] sm:$0xf]  ;;  %v11405_v40 = vor.u32 %v12840_v50, %v11404_v24  ;;  %v11229_v33 = vor.u32 %v12796_v6, %v11228_v14  ;;  %v12758_v50 = vld [vmem:[#allocation14 + $0x1e4] sm:$0xf] }
 0x3a3   :  { %v11724_v58 = vld [vmem:[#allocation14 + $0x6e0] sm:$0xf]  ;;  %v12916_v29 = vld [vmem:[#allocation14 + $0x6cc] sm:$0xf0] }
 0x3a4   :  { %7284 = vmatpush.bf16.msra.mxu1 %v10989_v34  ;;  %7306 = vmatpush.bf16.msra.mxu3 %v11309_v56  ;;  %v5479_v34 = vadd.f32 %v5478_v9, %v5466_v22  ;;  %v11101_v56 = vor.u32 %v12764_v60, %v11100_v20  ;;  %v5705_v39 = vmax.f32 %v5440_v63, 0.0  ;;  %v11725_v9 = vor.u32 %v12920_v37, %v11724_v58  ;;  %v12832_v23 = vld [vmem:[#allocation14 + $0x42c] sm:$0xf0]  ;;  %v11692_v11 = vld [vmem:[#allocation14 + $0x6a0] sm:$0xf] }
 0x3a5   :  { %7273 = vmatmul.bf16.vlgmr.msra.gmra.mxu0 %v13688_v5  ;;  %v11709_v30 = vor.u32 %v12916_v29, %v11708_v10  ;;  %v11356_v2 = vld [vmem:[#allocation14 + $0x400] sm:$0xf]  ;;  %v12864_v51 = vld [vmem:[#allocation14 + $0x52c] sm:$0xf0]  ;;  %v3995_v63 = vperm.slane %v13711_v59, 4 }
 0x3a6   :  { %7317 = vmatpush.bf16.msrb.mxu0 %v11469_v54  ;;  %7295 = vmatpush.bf16.msra.mxu2 %v11149_v41  ;;  %v12800_v54 = vld [vmem:[#allocation14 + $0x32c] sm:$0xf0]  ;;  %v5492_v52 = vadd.f32 %v5491_v57, %v5479_v34  ;;  %v5493_v4 = vpop.f32.mrf.mxu3  ;;  %v11549_v41 = vor.u32 %v12876_v15, %v11548_v55  ;;  %v13705_v13 = vpack.c.bf16 %v5705_v39, %v5705_v39  ;;  %v11500_v62 = vld [vmem:[#allocation14 + $0x520] sm:$0xf]  ;;  %v10942_v20 = vld [vmem:[#allocation14 + $0xd0] sm:$0xf0] }
 0x3a7   :  { %v11245_v44 = vor.u32 %v12800_v54, %v11244_v12  ;;  %v12828_v57 = vld [vmem:[#allocation14 + $0x40c] sm:$0xf0]  ;;  %v11676_v0 = vld [vmem:[#allocation14 + $0x680] sm:$0xf]  ;;  %v11501_v60 = vor.u32 %v12864_v51, %v11500_v62  ;;  %v11086_v54 = vld [vmem:[#allocation14 + $0x1f0] sm:$0xf0]  ;;  %v5505_v58 = vadd.f32 %v13697_v8, %v3995_v63 }
 0x3a8   :  { %7285 = vmatpush.bf16.msra.mxu1 %v10973_v21  ;;  %7307 = vmatpush.bf16.msra.mxu3 %v11293_v28  ;;  %v13703_v1 = vpop.f32.mrf.mxu1  ;;  %v11532_v21 = vld [vmem:[#allocation14 + $0x560] sm:$0xf]  ;;  %v12872_v28 = vld [vmem:[#allocation14 + $0x56c] sm:$0xf0]  ;;  %v5706_v18 = vmax.f32 %v5492_v52, 0.0 }
 0x3a9   :  { %v11533_v47 = vor.u32 %v12872_v28, %v11532_v21  ;;  %v12908_v17 = vld [vmem:[#allocation14 + $0x68c] sm:$0xf0]  ;;  %v11484_v24 = vld [vmem:[#allocation14 + $0x500] sm:$0xf]  ;;  %v12718_v37 = vld [vmem:[#allocation14 + $0xa4] sm:$0xf]  ;;  %v5518_v14 = vadd.f32 %v13703_v1, %v5505_v58 }
 0x3aa   :  { %7318 = vmatpush.bf16.msrb.mxu0 %v11453_v26  ;;  %7296 = vmatpush.bf16.msra.mxu2 %v11133_v27  ;;  %v5506_v26 = vpop.f32.mrf.mxu0  ;;  %v12868_v27 = vld [vmem:[#allocation14 + $0x54c] sm:$0xf0]  ;;  %v13708_v42 = vpack.c.bf16 %v5706_v18, %v5706_v18  ;;  %v11677_v12 = vor.u32 %v12908_v17, %v11676_v0  ;;  %v10926_v39 = vld [vmem:[#allocation14 + $0xb0] sm:$0xf0]  ;;  %v11644_v4 = vld [vmem:[#allocation14 + $0x640] sm:$0xf] }
 0x3ab   :  { %7286 = vmatmul.bf16.vlgmr.msra.gmra.mxu1 %v13694_v31  ;;  %v11517_v46 = vor.u32 %v12868_v27, %v11516_v53  ;;  %v12860_v22 = vld [vmem:[#allocation14 + $0x50c] sm:$0xf0]  ;;  %v11070_v52 = vld [vmem:[#allocation14 + $0x1d0] sm:$0xf0]  ;;  %v10929_v6 = vor.u32 %v12718_v37, %v10926_v39  ;;  %v12750_v10 = vld [vmem:[#allocation14 + $0x1a4] sm:$0xf] }
 0x3ac   :  { %7330 = vmatpush.bf16.msrb.mxu1 %v11597_v16  ;;  %7308 = vmatpush.bf16.msra.mxu3 %v11277_v36  ;;  %v11372_v16 = vld [vmem:[#allocation14 + $0x420] sm:$0xf]  ;;  %v12904_v55 = vld [vmem:[#allocation14 + $0x66c] sm:$0xf0]  ;;  %v10910_v26 = vld [vmem:[#allocation14 + $0x90] sm:$0xf0] }
 0x3ad   :  { %v11373_v36 = vor.u32 %v12832_v23, %v11372_v16  ;;  %v12900_v38 = vld [vmem:[#allocation14 + $0x64c] sm:$0xf0]  ;;  %v11054_v29 = vld [vmem:[#allocation14 + $0x1b0] sm:$0xf0]  ;;  %v11628_v18 = vld [vmem:[#allocation14 + $0x620] sm:$0xf] }
 0x3ae   :  { %7319 = vmatpush.bf16.msrb.mxu0 %v11437_v35  ;;  %7297 = vmatpush.bf16.msra.mxu2 %v11117_v3  ;;  %v12912_v35 = vld [vmem:[#allocation14 + $0x6ac] sm:$0xf0]  ;;  %v11357_v3 = vor.u32 %v12828_v57, %v11356_v2  ;;  %v11645_v8 = vor.u32 %v12900_v38, %v11644_v4  ;;  %v10894_v53 = vld [vmem:[#allocation14 + $0x70] sm:$0xf0]  ;;  %v11057_v27 = vor.u32 %v12750_v10, %v11054_v29  ;;  %v12790_v62 = vld [vmem:[#allocation14 + $0x2e4] sm:$0xf] }
 0x3af   :  { %v11693_v43 = vor.u32 %v12912_v35, %v11692_v11  ;;  %v12896_v16 = vld [vmem:[#allocation14 + $0x62c] sm:$0xf0]  ;;  %v12746_v11 = vld [vmem:[#allocation14 + $0x184] sm:$0xf]  ;;  %v11038_v35 = vld [vmem:[#allocation14 + $0x190] sm:$0xf0] }
 0x3b0   :  { %7331 = vmatpush.bf16.msrb.mxu1 %v11581_v25  ;;  %7309 = vmatpush.bf16.msra.mxu3 %v11261_v7  ;;  %v5519_v45 = vpop.f32.mrf.mxu1  ;;  %v10958_v25 = vld [vmem:[#allocation14 + $0xf0] sm:$0xf0]  ;;  %v12722_v7 = vld [vmem:[#allocation14 + $0xc4] sm:$0xf]  ;;  %v12892_v57 = vld [vmem:[#allocation14 + $0x60c] sm:$0xf0]  ;;  %v11041_v63 = vor.u32 %v12746_v11, %v11038_v35 }
 0x3b1   :  { %v10945_v34 = vor.u32 %v12722_v7, %v10942_v20  ;;  %v11612_v45 = vld [vmem:[#allocation14 + $0x600] sm:$0xf]  ;;  %v11214_v51 = vld [vmem:[#allocation14 + $0x2f0] sm:$0xf0]  ;;  %v12706_v17 = vld [vmem:[#allocation14 + $0x44] sm:$0xf] }
 0x3b2   :  { %7320 = vmatpush.bf16.msrb.mxu0 %v11421_v48  ;;  %7298 = vmatpush.bf16.msra.mxu2 %v11101_v56  ;;  %v10961_v48 = vor.u32 %v12726_v19, %v10958_v25  ;;  %v11485_v56 = vor.u32 %v12860_v22, %v11484_v24  ;;  %v11852_v19 = vld [vmem:[#allocation14 + $0x7e0] sm:$0xf]  ;;  %v12742_v7 = vld [vmem:[#allocation14 + $0x164] sm:$0xf]  ;;  %v11022_v20 = vld [vmem:[#allocation14 + $0x170] sm:$0xf0]  ;;  %v11217_v22 = vor.u32 %v12790_v62, %v11214_v51 }
 0x3b3   :  { %v11025_v58 = vor.u32 %v12742_v7, %v11022_v20  ;;  %v12738_v37 = vld [vmem:[#allocation14 + $0x144] sm:$0xf]  ;;  %v11006_v39 = vld [vmem:[#allocation14 + $0x150] sm:$0xf0]  ;;  %v11772_v7 = vld [vmem:[#allocation14 + $0x740] sm:$0xf] }
 0x3b4   :  { %7332 = vmatpush.bf16.msrb.mxu1 %v11565_v49  ;;  %7310 = vmatpush.bf16.msra.mxu3 %v11245_v44  ;;  %v11660_v49 = vld [vmem:[#allocation14 + $0x660] sm:$0xf]  ;;  %v12754_v44 = vld [vmem:[#allocation14 + $0x1c4] sm:$0xf]  ;;  %v10990_v10 = vld [vmem:[#allocation14 + $0x130] sm:$0xf0] }
 0x3b5   :  { %7299 = vmatmul.bf16.vlgmr.msra.gmra.mxu2 %v13705_v13  ;;  %v11661_v61 = vor.u32 %v12904_v55, %v11660_v49  ;;  %v11073_v21 = vor.u32 %v12754_v44, %v11070_v52  ;;  %v12786_v55 = vld [vmem:[#allocation14 + $0x2c4] sm:$0xf]  ;;  %v11820_v44 = vld [vmem:[#allocation14 + $0x7a0] sm:$0xf]  ;;  %v11454_v11 = vld [vmem:[#allocation14 + $0x4d0] sm:$0xf0] }
 0x3b6   :  { %7321 = vmatpush.bf16.msrb.mxu0 %v11405_v40  ;;  %7343 = vmatpush.bf16.msrb.mxu2 %v11725_v9  ;;  %v11089_v40 = vor.u32 %v12758_v50, %v11086_v54  ;;  %v12714_v9 = vld [vmem:[#allocation14 + $0x84] sm:$0xf]  ;;  %v11836_v50 = vld [vmem:[#allocation14 + $0x7c0] sm:$0xf]  ;;  %v11150_v62 = vld [vmem:[#allocation14 + $0x270] sm:$0xf0] }
 0x3b7   :  { %v10913_v23 = vor.u32 %v12714_v9, %v10910_v26  ;;  %v12782_v38 = vld [vmem:[#allocation14 + $0x2a4] sm:$0xf]  ;;  %v10846_v9 = vld [vmem:[#allocation14 + $0x10] sm:$0xf0]  ;;  %v12932_v20 = vld [vmem:[#allocation14 + $0x74c] sm:$0xf0] }
 0x3b8   :  { %7333 = vmatpush.bf16.msrb.mxu1 %v11549_v41  ;;  %7311 = vmatpush.bf16.msra.mxu3 %v11229_v33  ;;  %v5530_v15 = vpop.f32.mrf.mxu2  ;;  %v12854_v26 = vld [vmem:[#allocation14 + $0x4e4] sm:$0xf] }
 0x3b9   :  { %v5531_v41 = vadd.f32 %v5530_v15, %v5518_v14  ;;  %v11198_v15 = vld [vmem:[#allocation14 + $0x2d0] sm:$0xf0]  ;;  %v12730_v35 = vld [vmem:[#allocation14 + $0x104] sm:$0xf] }
 0x3ba   :  { %7322 = vmatpush.bf16.msrb.mxu0 %v11389_v32  ;;  %7344 = vmatpush.bf16.msrb.mxu2 %v11709_v30  ;;  %v12710_v30 = vld [vmem:[#allocation14 + $0x64] sm:$0xf]  ;;  %v11182_v14 = vld [vmem:[#allocation14 + $0x2b0] sm:$0xf0] }
 0x3bb   :  { %7312 = vmatmul.bf16.vlgmr.msra.gmra.mxu3 %v13708_v42  ;;  %v11185_v29 = vor.u32 %v12782_v38, %v11182_v14  ;;  %v11598_v38 = vld [vmem:[#allocation14 + $0x5f0] sm:$0xf0] }
 0x3bc   :  { %7334 = vmatpush.bf16.msrb.mxu1 %v11533_v47 }
 0x3be   :  { %7323 = vmatpush.bf16.msrb.mxu0 %v11373_v36  ;;  %7345 = vmatpush.bf16.msrb.mxu2 %v11693_v43  ;;  %v5543_v28 = vpop.f32.mrf.mxu3  ;;  %v11629_v36 = vor.u32 %v12896_v16, %v11628_v18  ;;  %v10897_v43 = vor.u32 %v12710_v30, %v10894_v53  ;;  %v12940_v18 = vld [vmem:[#allocation14 + $0x78c] sm:$0xf0]  ;;  %v12850_v53 = vld [vmem:[#allocation14 + $0x4c4] sm:$0xf] }
 0x3bf   :  { %v5544_v32 = vadd.f32 %v5543_v28, %v5531_v41  ;;  %v12698_v41 = vld [vmem:[#allocation14 + $0x4] sm:$0xf]  ;;  %v11457_v51 = vor.u32 %v12850_v53, %v11454_v11 }
 0x3c0   :  { %7335 = vmatpush.bf16.msrb.mxu1 %v11517_v46  ;;  %v5532_v1 = vpop.f32.mrf.mxu2  ;;  %v12952_v46 = vld [vmem:[#allocation14 + $0x7ec] sm:$0xf0]  ;;  %v12734_v28 = vld [vmem:[#allocation14 + $0x124] sm:$0xf]  ;;  %v10849_v16 = vor.u32 %v12698_v41, %v10846_v9  ;;  %v11406_v41 = vld [vmem:[#allocation14 + $0x470] sm:$0xf0] }
 0x3c1   :  { %v5707_v47 = vmax.f32 %v5544_v32, 0.0  ;;  %v11853_v25 = vor.u32 %v12952_v46, %v11852_v19  ;;  %v11804_v32 = vld [vmem:[#allocation14 + $0x780] sm:$0xf]  ;;  %v12936_v46 = vld [vmem:[#allocation14 + $0x76c] sm:$0xf0] }
 0x3c2   :  { %7324 = vmatpush.bf16.msrb.mxu0 %v11357_v3  ;;  %7346 = vmatpush.bf16.msrb.mxu2 %v11677_v12  ;;  %v13716_v33 = vpop.f32.mrf.mxu0  ;;  %v10878_v3 = vld [vmem:[#allocation14 + $0x50] sm:$0xf0]  ;;  %v12948_v12 = vld [vmem:[#allocation14 + $0x7cc] sm:$0xf0]  ;;  %v11805_v1 = vor.u32 %v12940_v18, %v11804_v32  ;;  %v11788_v19 = vld [vmem:[#allocation14 + $0x760] sm:$0xf] }
 0x3c3   :  { %v13718_v2 = vpack.c.bf16 %v5707_v47, %v5707_v47  ;;  %7356 = vmatpush.bf16.msrb.mxu3 %v11853_v25  ;;  %v10881_v54 = vor.u32 %v12706_v17, %v10878_v3  ;;  %v11837_v49 = vor.u32 %v12948_v12, %v11836_v50  ;;  %v11166_v47 = vld [vmem:[#allocation14 + $0x290] sm:$0xf0]  ;;  %v12774_v25 = vld [vmem:[#allocation14 + $0x264] sm:$0xf] }
 0x3c4   :  { %7336 = vmatpush.bf16.msrb.mxu1 %v11501_v60  ;;  %v11613_v60 = vor.u32 %v12892_v57, %v11612_v45  ;;  %v3996_v45 = vperm.slane %v13711_v59, 5  ;;  %v12846_v17 = vld [vmem:[#allocation14 + $0x4a4] sm:$0xf]  ;;  %v11134_v12 = vld [vmem:[#allocation14 + $0x250] sm:$0xf0] }
 0x3c5   :  { %7325 = vmatmul.bf16.vlgmr.msrb.gmra.mxu0 %v13718_v2  ;;  %v12770_v50 = vld [vmem:[#allocation14 + $0x244] sm:$0xf]  ;;  %v11102_v32 = vld [vmem:[#allocation14 + $0x210] sm:$0xf0] }
 0x3c6   :  { %7369 = vmatpush.bf16.msra.mxu0 %v10961_v48  ;;  %7347 = vmatpush.bf16.msrb.mxu2 %v11661_v61  ;;  %v5545_v48 = vpop.f32.mrf.mxu3  ;;  %v12944_v61 = vld [vmem:[#allocation14 + $0x7ac] sm:$0xf0]  ;;  %v12822_v53 = vld [vmem:[#allocation14 + $0x3e4] sm:$0xf] }
 0x3c7   :  { %7357 = vmatpush.bf16.msrb.mxu3 %v11837_v49  ;;  %v11821_v4 = vor.u32 %v12944_v61, %v11820_v44  ;;  %v11438_v48 = vld [vmem:[#allocation14 + $0x4b0] sm:$0xf0] }
 0x3c8   :  { %7337 = vmatpush.bf16.msrb.mxu1 %v11485_v56  ;;  %v13720_v0 = vpop.f32.mrf.mxu1  ;;  %v10862_v56 = vld [vmem:[#allocation14 + $0x30] sm:$0xf0]  ;;  %v11441_v49 = vor.u32 %v12846_v17, %v11438_v48  ;;  %v12830_v17 = vld [vmem:[#allocation14 + $0x424] sm:$0xf] }
 0x3c9   :  { %v11118_v44 = vld [vmem:[#allocation14 + $0x230] sm:$0xf0] }
 0x3ca   :  { %7370 = vmatpush.bf16.msra.mxu0 %v10945_v34  ;;  %7348 = vmatpush.bf16.msrb.mxu2 %v11645_v8  ;;  %v5558_v24 = vpop.f32.mrf.mxu0  ;;  %v12702_v34 = vld [vmem:[#allocation14 + $0x24] sm:$0xf]  ;;  %v11470_v8 = vld [vmem:[#allocation14 + $0x4f0] sm:$0xf0] }
 0x3cb   :  { %v10865_v52 = vor.u32 %v12702_v34, %v10862_v56  ;;  %7358 = vmatpush.bf16.msrb.mxu3 %v11821_v4  ;;  %v11473_v30 = vor.u32 %v12854_v26, %v11470_v8  ;;  %v11153_v24 = vor.u32 %v12774_v25, %v11150_v62  ;;  %v11137_v56 = vor.u32 %v12770_v50, %v11134_v12  ;;  %v12886_v4 = vld [vmem:[#allocation14 + $0x5e4] sm:$0xf]  ;;  %v12924_v8 = vld [vmem:[#allocation14 + $0x70c] sm:$0xf0]  ;;  %v11566_v62 = vld [vmem:[#allocation14 + $0x5b0] sm:$0xf0] }
 0x3cc   :  { %7382 = vmatpush.bf16.msra.mxu1 %v11089_v40  ;;  %v11201_v40 = vor.u32 %v12786_v55, %v11198_v15  ;;  %v12842_v55 = vld [vmem:[#allocation14 + $0x484] sm:$0xf]  ;;  %v11422_v15 = vld [vmem:[#allocation14 + $0x490] sm:$0xf0] }
 0x3cd   :  { %v12878_v25 = vld [vmem:[#allocation14 + $0x5a4] sm:$0xf] }
 0x3ce   :  { %7371 = vmatpush.bf16.msra.mxu0 %v10929_v6  ;;  %7349 = vmatpush.bf16.msrb.mxu2 %v11629_v36  ;;  %v10974_v36 = vld [vmem:[#allocation14 + $0x110] sm:$0xf0]  ;;  %v11569_v48 = vor.u32 %v12878_v25, %v11566_v62  ;;  %v12826_v12 = vld [vmem:[#allocation14 + $0x404] sm:$0xf] }
 0x3cf   :  { %7359 = vmatpush.bf16.msrb.mxu3 %v11805_v1  ;;  %v10977_v3 = vor.u32 %v12730_v35, %v10974_v36  ;;  %v12834_v1 = vld [vmem:[#allocation14 + $0x444] sm:$0xf]  ;;  %v11486_v25 = vld [vmem:[#allocation14 + $0x510] sm:$0xf0] }
 0x3d0   :  { %7383 = vmatpush.bf16.msra.mxu1 %v11073_v21  ;;  %v5571_v6 = vpop.f32.mrf.mxu1  ;;  %v11009_v21 = vor.u32 %v12738_v37, %v11006_v39 }
 0x3d1   :  { %v12838_v6 = vld [vmem:[#allocation14 + $0x464] sm:$0xf] }
 0x3d2   :  { %7372 = vmatpush.bf16.msra.mxu0 %v10913_v23  ;;  %7350 = vmatpush.bf16.msrb.mxu2 %v11613_v60  ;;  %v12778_v23 = vld [vmem:[#allocation14 + $0x284] sm:$0xf]  ;;  %v5557_v60 = vadd.f32 %v13716_v33, %v3996_v45  ;;  %v12928_v33 = vld [vmem:[#allocation14 + $0x72c] sm:$0xf0] }
 0x3d3   :  { %v11169_v57 = vor.u32 %v12778_v23, %v11166_v47  ;;  %v12882_v23 = vld [vmem:[#allocation14 + $0x5c4] sm:$0xf]  ;;  %v11582_v47 = vld [vmem:[#allocation14 + $0x5d0] sm:$0xf0] }
 0x3d4   :  { %7384 = vmatpush.bf16.msra.mxu1 %v11057_v27  ;;  %v10993_v27 = vor.u32 %v12734_v28, %v10990_v10  ;;  %v11601_v28 = vor.u32 %v12886_v4, %v11598_v38  ;;  %v12806_v38 = vld [vmem:[#allocation14 + $0x364] sm:$0xf] }
 0x3d6   :  { %7373 = vmatpush.bf16.msra.mxu0 %v10897_v43  ;;  %7395 = vmatpush.bf16.msra.mxu2 %v11217_v22  ;;  %v11789_v43 = vor.u32 %v12936_v46, %v11788_v19  ;;  %v11773_v22 = vor.u32 %v12932_v20, %v11772_v7  ;;  %v12818_v19 = vld [vmem:[#allocation14 + $0x3c4] sm:$0xf]  ;;  %v11310_v20 = vld [vmem:[#allocation14 + $0x3b0] sm:$0xf0] }
 0x3d7   :  { %v12814_v7 = vld [vmem:[#allocation14 + $0x3a4] sm:$0xf] }
 0x3d8   :  { %7385 = vmatpush.bf16.msra.mxu1 %v11041_v63  ;;  %v5582_v63 = vpop.f32.mrf.mxu2  ;;  %7360 = vmatpush.bf16.msrb.mxu3 %v11789_v43  ;;  %v11313_v50 = vor.u32 %v12814_v7, %v11310_v20  ;;  %v12918_v20 = vld [vmem:[#allocation14 + $0x6e4] sm:$0xf] }
 0x3da   :  { %7374 = vmatpush.bf16.msra.mxu0 %v10881_v54  ;;  %7396 = vmatpush.bf16.msra.mxu2 %v11201_v40  ;;  %v5570_v54 = vadd.f32 %v13720_v0, %v5557_v60  ;;  %v12766_v40 = vld [vmem:[#allocation14 + $0x224] sm:$0xf]  ;;  %v11425_v0 = vor.u32 %v12842_v55, %v11422_v15  ;;  %v10964_v55 = vld [vmem:[#allocation14 + $0xe8] sm:$0xf]  ;;  %v12729_v15 = vld [vmem:[#allocation14 + $0xf4] sm:$0xf0] }
 0x3db   :  { %v11121_v26 = vor.u32 %v12766_v40, %v11118_v44  ;;  %v10965_v44 = vor.u32 %v12729_v15, %v10964_v55 }
 0x3dc   :  { %7386 = vmatpush.bf16.msra.mxu1 %v11025_v58  ;;  %7361 = vmatpush.bf16.msrb.mxu3 %v11773_v22  ;;  %v5583_v34 = vadd.f32 %v5582_v63, %v5570_v54  ;;  %v11756_v58 = vld [vmem:[#allocation14 + $0x720] sm:$0xf]  ;;  %v11550_v22 = vld [vmem:[#allocation14 + $0x590] sm:$0xf0] }
 0x3dd   :  { %v11757_v39 = vor.u32 %v12928_v33, %v11756_v58  ;;  %v11358_v54 = vld [vmem:[#allocation14 + $0x410] sm:$0xf0] }
 0x3de   :  { %7375 = vmatpush.bf16.msra.mxu0 %v10865_v52  ;;  %7397 = vmatpush.bf16.msra.mxu2 %v11185_v29  ;;  %v5595_v37 = vpop.f32.mrf.mxu3  ;;  %v12762_v29 = vld [vmem:[#allocation14 + $0x204] sm:$0xf]  ;;  %v11294_v58 = vld [vmem:[#allocation14 + $0x390] sm:$0xf0]  ;;  %v11361_v33 = vor.u32 %v12826_v12, %v11358_v54 }
 0x3df   :  { %v5596_v61 = vadd.f32 %v5595_v37, %v5583_v34  ;;  %v11105_v35 = vor.u32 %v12762_v29, %v11102_v32  ;;  %v12870_v37 = vld [vmem:[#allocation14 + $0x564] sm:$0xf]  ;;  %v11262_v29 = vld [vmem:[#allocation14 + $0x350] sm:$0xf0] }
 0x3e0   :  { %7387 = vmatpush.bf16.msra.mxu1 %v11009_v21  ;;  %v5584_v14 = vpop.f32.mrf.mxu2  ;;  %7362 = vmatpush.bf16.msrb.mxu3 %v11757_v39  ;;  %v11740_v21 = vld [vmem:[#allocation14 + $0x700] sm:$0xf]  ;;  %v11534_v39 = vld [vmem:[#allocation14 + $0x570] sm:$0xf0] }
 0x3e1   :  { %v5708_v9 = vmax.f32 %v5596_v61, 0.0  ;;  %v11741_v10 = vor.u32 %v12924_v8, %v11740_v21  ;;  %v10948_v61 = vld [vmem:[#allocation14 + $0xc8] sm:$0xf]  ;;  %v11537_v4 = vor.u32 %v12870_v37, %v11534_v39  ;;  %v11278_v14 = vld [vmem:[#allocation14 + $0x370] sm:$0xf0] }
 0x3e2   :  { %7376 = vmatpush.bf16.msra.mxu0 %v10849_v16  ;;  %7398 = vmatpush.bf16.msra.mxu2 %v11169_v57  ;;  %v13727_v52 = vpop.f32.mrf.mxu0  ;;  %v11409_v16 = vor.u32 %v12838_v6, %v11406_v41  ;;  %v11585_v57 = vor.u32 %v12882_v23, %v11582_v47  ;;  %v3997_v6 = vperm.slane %v13711_v59, 6  ;;  %v12866_v41 = vld [vmem:[#allocation14 + $0x544] sm:$0xf]  ;;  %v10932_v8 = vld [vmem:[#allocation14 + $0xa8] sm:$0xf] }
 0x3e3   :  { %v13729_v18 = vpack.c.bf16 %v5708_v9, %v5708_v9  ;;  %v11518_v9 = vld [vmem:[#allocation14 + $0x550] sm:$0xf0]  ;;  %v12862_v23 = vld [vmem:[#allocation14 + $0x524] sm:$0xf]  ;;  %v12709_v37 = vld [vmem:[#allocation14 + $0x54] sm:$0xf0] }
 0x3e4   :  { %7388 = vmatpush.bf16.msra.mxu1 %v10993_v27  ;;  %7363 = vmatpush.bf16.msrb.mxu3 %v11741_v10  ;;  %v11342_v27 = vld [vmem:[#allocation14 + $0x3f0] sm:$0xf0]  ;;  %v12802_v10 = vld [vmem:[#allocation14 + $0x344] sm:$0xf] }
 0x3e5   :  { %7377 = vmatmul.bf16.vlgmr.msra.gmra.mxu0 %v13688_v5  ;;  %7338 = vmatmul.bf16.vlgmr.msrb.gmra.mxu1 %v13729_v18  ;;  %v11345_v36 = vor.u32 %v12822_v53, %v11342_v27  ;;  %v11502_v47 = vld [vmem:[#allocation14 + $0x530] sm:$0xf0]  ;;  %v12914_v39 = vld [vmem:[#allocation14 + $0x6c4] sm:$0xf] }
 0x3e6   :  { %7421 = vmatpush.bf16.msrb.mxu0 %v11473_v30  ;;  %7399 = vmatpush.bf16.msra.mxu2 %v11153_v24  ;;  %v11390_v30 = vld [vmem:[#allocation14 + $0x450] sm:$0xf0]  ;;  %v5597_v45 = vpop.f32.mrf.mxu3  ;;  %v12874_v24 = vld [vmem:[#allocation14 + $0x584] sm:$0xf] }
 0x3e7   :  { %v11393_v43 = vor.u32 %v12834_v1, %v11390_v30  ;;  %v11553_v34 = vor.u32 %v12874_v24, %v11550_v22  ;;  %v5609_v1 = vadd.f32 %v13727_v52, %v3997_v6  ;;  %v11265_v30 = vor.u32 %v12802_v10, %v11262_v29  ;;  %v11230_v12 = vld [vmem:[#allocation14 + $0x310] sm:$0xf0]  ;;  %v10868_v6 = vld [vmem:[#allocation14 + $0x28] sm:$0xf] }
 0x3e8   :  { %7389 = vmatpush.bf16.msra.mxu1 %v10977_v3  ;;  %v13731_v11 = vpop.f32.mrf.mxu1  ;;  %7408 = vmatpush.bf16.msra.mxu3 %v11345_v36  ;;  %v11374_v3 = vld [vmem:[#allocation14 + $0x430] sm:$0xf0]  ;;  %v12717_v36 = vld [vmem:[#allocation14 + $0x94] sm:$0xf0]  ;;  %v11505_v45 = vor.u32 %v12862_v23, %v11502_v47 }
 0x3e9   :  { %v11377_v60 = vor.u32 %v12830_v17, %v11374_v3  ;;  %v5622_v27 = vadd.f32 %v13731_v11, %v5609_v1  ;;  %v10900_v17 = vld [vmem:[#allocation14 + $0x68] sm:$0xf]  ;;  %v12713_v11 = vld [vmem:[#allocation14 + $0x74] sm:$0xf0] }
 0x3ea   :  { %7422 = vmatpush.bf16.msrb.mxu0 %v11457_v51  ;;  %7400 = vmatpush.bf16.msra.mxu2 %v11137_v56  ;;  %v5610_v46 = vpop.f32.mrf.mxu0  ;;  %v11326_v51 = vld [vmem:[#allocation14 + $0x3d0] sm:$0xf0]  ;;  %v12810_v56 = vld [vmem:[#allocation14 + $0x384] sm:$0xf]  ;;  %v11092_v3 = vld [vmem:[#allocation14 + $0x1e8] sm:$0xf]  ;;  %v10901_v55 = vor.u32 %v12713_v11, %v10900_v17 }
 0x3eb   :  { %v11329_v63 = vor.u32 %v12818_v19, %v11326_v51  ;;  %v11297_v40 = vor.u32 %v12810_v56, %v11294_v58  ;;  %v11246_v19 = vld [vmem:[#allocation14 + $0x330] sm:$0xf0]  ;;  %v11076_v56 = vld [vmem:[#allocation14 + $0x1c8] sm:$0xf]  ;;  %v12757_v58 = vld [vmem:[#allocation14 + $0x1d4] sm:$0xf0] }
 0x3ec   :  { %7434 = vmatpush.bf16.msrb.mxu1 %v11601_v28  ;;  %v12721_v28 = vld [vmem:[#allocation14 + $0xb4] sm:$0xf0]  ;;  %v11044_v1 = vld [vmem:[#allocation14 + $0x188] sm:$0xf]  ;;  %v12898_v11 = vld [vmem:[#allocation14 + $0x644] sm:$0xf] }
 0x3ed   :  { %7409 = vmatpush.bf16.msra.mxu3 %v11329_v63  ;;  %v10933_v53 = vor.u32 %v12721_v28, %v10932_v8  ;;  %v12761_v63 = vld [vmem:[#allocation14 + $0x1f4] sm:$0xf0]  ;;  %v12910_v8 = vld [vmem:[#allocation14 + $0x6a4] sm:$0xf]  ;;  %v11694_v28 = vld [vmem:[#allocation14 + $0x6b0] sm:$0xf0] }
 0x3ee   :  { %7423 = vmatpush.bf16.msrb.mxu0 %v11441_v49  ;;  %7401 = vmatpush.bf16.msra.mxu2 %v11121_v26  ;;  %v11281_v26 = vor.u32 %v12806_v38, %v11278_v14  ;;  %v12749_v23 = vld [vmem:[#allocation14 + $0x194] sm:$0xf0] }
 0x3ef   :  { %v12701_v47 = vld [vmem:[#allocation14 + $0x14] sm:$0xf0] }
 0x3f0   :  { %7435 = vmatpush.bf16.msrb.mxu1 %v11585_v57  ;;  %v5623_v49 = vpop.f32.mrf.mxu1  ;;  %v12798_v57 = vld [vmem:[#allocation14 + $0x324] sm:$0xf]  ;;  %v12853_v17 = vld [vmem:[#allocation14 + $0x4d4] sm:$0xf0] }
 0x3f1   :  { %7410 = vmatpush.bf16.msra.mxu3 %v11313_v50  ;;  %v11249_v62 = vor.u32 %v12798_v57, %v11246_v19  ;;  %v12794_v50 = vld [vmem:[#allocation14 + $0x304] sm:$0xf]  ;;  %v11093_v49 = vor.u32 %v12761_v63, %v11092_v3  ;;  %v3998_v3 = vperm.slane %v13711_v59, 7 }
 0x3f2   :  { %7424 = vmatpush.bf16.msrb.mxu0 %v11425_v0  ;;  %7402 = vmatpush.bf16.msra.mxu2 %v11105_v35  ;;  %v12725_v0 = vld [vmem:[#allocation14 + $0xd4] sm:$0xf0]  ;;  %v10916_v35 = vld [vmem:[#allocation14 + $0x88] sm:$0xf] }
 0x3f3   :  { %v10949_v21 = vor.u32 %v12725_v0, %v10948_v61  ;;  %v10917_v51 = vor.u32 %v12717_v36, %v10916_v35  ;;  %v11077_v0 = vor.u32 %v12757_v58, %v11076_v56  ;;  %v12857_v35 = vld [vmem:[#allocation14 + $0x4f4] sm:$0xf0]  ;;  %v11630_v56 = vld [vmem:[#allocation14 + $0x630] sm:$0xf0]  ;;  %v10996_v58 = vld [vmem:[#allocation14 + $0x128] sm:$0xf] }
 0x3f4   :  { %7436 = vmatpush.bf16.msrb.mxu1 %v11569_v48 }
 0x3f5   :  { %7411 = vmatpush.bf16.msra.mxu3 %v11297_v40  ;;  %7390 = vmatmul.bf16.vlgmr.msra.gmra.mxu1 %v13694_v31  ;;  %v11710_v40 = vld [vmem:[#allocation14 + $0x6d0] sm:$0xf0] }
 0x3f6   :  { %7425 = vmatpush.bf16.msrb.mxu0 %v11409_v16  ;;  %v11521_v16 = vor.u32 %v12866_v41, %v11518_v9  ;;  %v11713_v14 = vor.u32 %v12914_v39, %v11710_v40  ;;  %v11060_v41 = vld [vmem:[#allocation14 + $0x1a8] sm:$0xf]  ;;  %v12753_v9 = vld [vmem:[#allocation14 + $0x1b4] sm:$0xf0] }
 0x3f7   :  { %v11061_v10 = vor.u32 %v12753_v9, %v11060_v41  ;;  %v11428_v39 = vld [vmem:[#allocation14 + $0x488] sm:$0xf]  ;;  %v12845_v40 = vld [vmem:[#allocation14 + $0x494] sm:$0xf0] }
 0x3f8   :  { %7437 = vmatpush.bf16.msrb.mxu1 %v11553_v34  ;;  %v5634_v32 = vpop.f32.mrf.mxu2  ;;  %v10884_v34 = vld [vmem:[#allocation14 + $0x48] sm:$0xf]  ;;  %v11429_v41 = vor.u32 %v12845_v40, %v11428_v39  ;;  %v12881_v39 = vld [vmem:[#allocation14 + $0x5b4] sm:$0xf0] }
 0x3f9   :  { %7412 = vmatpush.bf16.msra.mxu3 %v11281_v26  ;;  %v5635_v46 = vadd.f32 %v5634_v32, %v5622_v27  ;;  %v10885_v38 = vor.u32 %v12709_v37, %v10884_v34  ;;  %v11697_v32 = vor.u32 %v12910_v8, %v11694_v28  ;;  %v11476_v27 = vld [vmem:[#allocation14 + $0x4e8] sm:$0xf]  ;;  %v12737_v37 = vld [vmem:[#allocation14 + $0x134] sm:$0xf0] }
 0x3fa   :  { %7426 = vmatpush.bf16.msrb.mxu0 %v11393_v43  ;;  %v12858_v43 = vld [vmem:[#allocation14 + $0x504] sm:$0xf]  ;;  %v10980_v9 = vld [vmem:[#allocation14 + $0x108] sm:$0xf]  ;;  %v12841_v28 = vld [vmem:[#allocation14 + $0x474] sm:$0xf0] }
 0x3fb   :  { %v11489_v22 = vor.u32 %v12858_v43, %v11486_v25  ;;  %v11477_v43 = vor.u32 %v12857_v35, %v11476_v27  ;;  %v11662_v25 = vld [vmem:[#allocation14 + $0x670] sm:$0xf0]  ;;  %v11412_v8 = vld [vmem:[#allocation14 + $0x468] sm:$0xf]  ;;  %v12889_v35 = vld [vmem:[#allocation14 + $0x5f4] sm:$0xf0] }
 0x3fc   :  { %7438 = vmatpush.bf16.msrb.mxu1 %v11537_v4  ;;  %v11604_v27 = vld [vmem:[#allocation14 + $0x5e8] sm:$0xf] }
 0x3fd   :  { %7413 = vmatpush.bf16.msra.mxu3 %v11265_v30  ;;  %v12906_v30 = vld [vmem:[#allocation14 + $0x684] sm:$0xf] }
 0x3fe   :  { %7427 = vmatpush.bf16.msrb.mxu0 %v11377_v60  ;;  %v5647_v52 = vpop.f32.mrf.mxu3  ;;  %v11726_v60 = vld [vmem:[#allocation14 + $0x6f0] sm:$0xf0] }
 0x3ff   :  { %v5648_v48 = vadd.f32 %v5647_v52, %v5635_v46  ;;  %v11729_v15 = vor.u32 %v12918_v20, %v11726_v60  ;;  %v12902_v46 = vld [vmem:[#allocation14 + $0x664] sm:$0xf]  ;;  %v12745_v52 = vld [vmem:[#allocation14 + $0x174] sm:$0xf0]  ;;  %v11646_v60 = vld [vmem:[#allocation14 + $0x650] sm:$0xf0] }
 0x400   :  { %7439 = vmatpush.bf16.msrb.mxu1 %v11521_v16  ;;  %v5636_v24 = vpop.f32.mrf.mxu2  ;;  %v10852_v16 = vld [vmem:[#allocation14 + $0x8] sm:$0xf]  ;;  %v11665_v63 = vor.u32 %v12902_v46, %v11662_v25  ;;  %v11649_v59 = vor.u32 %v12898_v11, %v11646_v60  ;;  %v12946_v25 = vld [vmem:[#allocation14 + $0x7c4] sm:$0xf]  ;;  %v12885_v11 = vld [vmem:[#allocation14 + $0x5d4] sm:$0xf0] }
 0x401   :  { %v5709_v54 = vmax.f32 %v5648_v48, 0.0  ;;  %7414 = vmatpush.bf16.msra.mxu3 %v11249_v62  ;;  %v10853_v57 = vor.u32 %v12701_v47, %v10852_v16  ;;  %v11028_v62 = vld [vmem:[#allocation14 + $0x168] sm:$0xf] }
 0x402   :  { %7428 = vmatpush.bf16.msrb.mxu0 %v11361_v33  ;;  %v13739_v7 = vpop.f32.mrf.mxu0  ;;  %v11029_v48 = vor.u32 %v12745_v52, %v11028_v62  ;;  %v11012_v24 = vld [vmem:[#allocation14 + $0x148] sm:$0xf]  ;;  %v11605_v52 = vor.u32 %v12889_v35, %v11604_v27  ;;  %v12777_v27 = vld [vmem:[#allocation14 + $0x274] sm:$0xf0] }
 0x403   :  { %v13741_v33 = vpack.c.bf16 %v5709_v54, %v5709_v54  ;;  %v11220_v16 = vld [vmem:[#allocation14 + $0x2e8] sm:$0xf] }
 0x404   :  { %7440 = vmatpush.bf16.msrb.mxu1 %v11505_v45  ;;  %v11045_v45 = vor.u32 %v12749_v23, %v11044_v1  ;;  %v12793_v1 = vld [vmem:[#allocation14 + $0x2f4] sm:$0xf0]  ;;  %v11396_v46 = vld [vmem:[#allocation14 + $0x448] sm:$0xf] }
 0x405   :  { %7429 = vmatmul.bf16.vlgmr.msrb.gmra.mxu0 %v13718_v2  ;;  %7351 = vmatmul.bf16.vlgmr.msrb.gmra.mxu2 %v13741_v33  ;;  %v11540_v35 = vld [vmem:[#allocation14 + $0x568] sm:$0xf] }
 0x406   :  { %7473 = vmatpush.bf16.msra.mxu0 %v10965_v44  ;;  %v11233_v44 = vor.u32 %v12794_v50, %v11230_v12  ;;  %7447 = vmatpush.bf16.msrb.mxu2 %v11729_v15  ;;  %v5649_v4 = vpop.f32.mrf.mxu3  ;;  %v11444_v50 = vld [vmem:[#allocation14 + $0x4a8] sm:$0xf]  ;;  %v12849_v12 = vld [vmem:[#allocation14 + $0x4b4] sm:$0xf0]  ;;  %v5661_v15 = vadd.f32 %v13739_v7, %v3998_v3  ;;  %v11614_v7 = vld [vmem:[#allocation14 + $0x610] sm:$0xf0] }
 0x407   :  { %v11445_v34 = vor.u32 %v12849_v12, %v11444_v50  ;;  %v12789_v3 = vld [vmem:[#allocation14 + $0x2d4] sm:$0xf0] }
 0x408   :  { %7441 = vmatpush.bf16.msrb.mxu1 %v11489_v22  ;;  %v13743_v61 = vpop.f32.mrf.mxu1  ;;  %7415 = vmatpush.bf16.msra.mxu3 %v11233_v44  ;;  %v12741_v22 = vld [vmem:[#allocation14 + $0x154] sm:$0xf0] }
 0x409   :  { %v5674_v44 = vadd.f32 %v13743_v61, %v5661_v15  ;;  %v11854_v61 = vld [vmem:[#allocation14 + $0x7f0] sm:$0xf0] }
 0x40a   :  { %7474 = vmatpush.bf16.msra.mxu0 %v10949_v21  ;;  %v5662_v26 = vpop.f32.mrf.mxu0  ;;  %v12705_v21 = vld [vmem:[#allocation14 + $0x34] sm:$0xf0]  ;;  %7448 = vmatpush.bf16.msrb.mxu2 %v11713_v14  ;;  %v12890_v14 = vld [vmem:[#allocation14 + $0x604] sm:$0xf] }
 0x40b   :  { %7442 = vmatmul.bf16.vlgmr.msrb.gmra.mxu1 %v13729_v18  ;;  %v10869_v29 = vor.u32 %v12705_v21, %v10868_v6  ;;  %v12733_v26 = vld [vmem:[#allocation14 + $0x114] sm:$0xf0] }
 0x40c   :  { %7486 = vmatpush.bf16.msra.mxu1 %v11093_v49  ;;  %v11013_v49 = vor.u32 %v12741_v22, %v11012_v24 }
 0x40e   :  { %7475 = vmatpush.bf16.msra.mxu0 %v10933_v53  ;;  %v11678_v53 = vld [vmem:[#allocation14 + $0x690] sm:$0xf0]  ;;  %7449 = vmatpush.bf16.msrb.mxu2 %v11697_v32 }
 0x40f   :  { %v11681_v19 = vor.u32 %v12906_v30, %v11678_v53  ;;  %v11617_v30 = vor.u32 %v12890_v14, %v11614_v7  ;;  %v10981_v53 = vor.u32 %v12733_v26, %v10980_v9  ;;  %v12829_v14 = vld [vmem:[#allocation14 + $0x414] sm:$0xf0]  ;;  %v11172_v9 = vld [vmem:[#allocation14 + $0x288] sm:$0xf] }
 0x410   :  { %7487 = vmatpush.bf16.msra.mxu1 %v11077_v0  ;;  %v5675_v36 = vpop.f32.mrf.mxu1  ;;  %v13752_v0 = vld [vmem:[#allocation16] sm:$0xf]  ;;  %v12781_v26 = vld [vmem:[#allocation14 + $0x294] sm:$0xf0] }
 0x411   :  { %v5977_v23 = vperm.slane %v13752_v0, 0 }
 0x412   :  { %7476 = vmatpush.bf16.msra.mxu0 %v10917_v51  ;;  %v11460_v51 = vld [vmem:[#allocation14 + $0x4c8] sm:$0xf]  ;;  %7450 = vmatpush.bf16.msrb.mxu2 %v11681_v19  ;;  %v11221_v19 = vor.u32 %v12793_v1, %v11220_v16  ;;  %v11173_v16 = vor.u32 %v12781_v26, %v11172_v9  ;;  %v12934_v1 = vld [vmem:[#allocation14 + $0x764] sm:$0xf]  ;;  %v12861_v26 = vld [vmem:[#allocation14 + $0x514] sm:$0xf0] }
 0x413   :  { %v11461_v20 = vor.u32 %v12853_v17, %v11460_v51  ;;  %v11838_v51 = vld [vmem:[#allocation14 + $0x7d0] sm:$0xf0]  ;;  %v11204_v17 = vld [vmem:[#allocation14 + $0x2c8] sm:$0xf] }
 0x414   :  { %7488 = vmatpush.bf16.msra.mxu1 %v11061_v10  ;;  %v12950_v10 = vld [vmem:[#allocation14 + $0x7e4] sm:$0xf]  ;;  %v11841_v50 = vor.u32 %v12946_v25, %v11838_v51  ;;  %v11205_v12 = vor.u32 %v12789_v3, %v11204_v17  ;;  %v11774_v25 = vld [vmem:[#allocation14 + $0x750] sm:$0xf0]  ;;  %v11140_v17 = vld [vmem:[#allocation14 + $0x248] sm:$0xf] }
 0x415   :  { %7403 = vmatmul.bf16.vlgmr.msra.gmra.mxu2 %v13705_v13  ;;  %v12773_v3 = vld [vmem:[#allocation14 + $0x254] sm:$0xf0]  ;;  %v11492_v9 = vld [vmem:[#allocation14 + $0x508] sm:$0xf] }
 0x416   :  { %7477 = vmatpush.bf16.msra.mxu0 %v10901_v55  ;;  %7451 = vmatpush.bf16.msrb.mxu2 %v11665_v63  ;;  %v12894_v55 = vld [vmem:[#allocation14 + $0x624] sm:$0xf] }
 0x417   :  { %v11633_v4 = vor.u32 %v12894_v55, %v11630_v56  ;;  %v11188_v56 = vld [vmem:[#allocation14 + $0x2a8] sm:$0xf] }
 0x418   :  { %7489 = vmatpush.bf16.msra.mxu1 %v11045_v45  ;;  %v5686_v54 = vpop.f32.mrf.mxu2  ;;  %v11413_v45 = vor.u32 %v12841_v28, %v11412_v8  ;;  %v12877_v8 = vld [vmem:[#allocation14 + $0x594] sm:$0xf0]  ;;  %v12727_v28 = vld [vmem:[#allocation14 + $0xec] sm:$0xf] }
 0x419   :  { %v5687_v6 = vadd.f32 %v5686_v54, %v5674_v44  ;;  %v11380_v54 = vld [vmem:[#allocation14 + $0x428] sm:$0xf] }
 0x41a   :  { %7478 = vmatpush.bf16.msra.mxu0 %v10885_v38  ;;  %7452 = vmatpush.bf16.msrb.mxu2 %v11649_v59  ;;  %v10997_v38 = vor.u32 %v12737_v37, %v10996_v58  ;;  %v12833_v59 = vld [vmem:[#allocation14 + $0x434] sm:$0xf0]  ;;  %v11572_v37 = vld [vmem:[#allocation14 + $0x5a8] sm:$0xf] }
 0x41b   :  { %v12785_v58 = vld [vmem:[#allocation14 + $0x2b4] sm:$0xf0]  ;;  %v11381_v40 = vor.u32 %v12833_v59, %v11380_v54  ;;  %v11364_v44 = vld [vmem:[#allocation14 + $0x408] sm:$0xf]  ;;  %v11573_v7 = vor.u32 %v12881_v39, %v11572_v37  ;;  %v11758_v54 = vld [vmem:[#allocation14 + $0x730] sm:$0xf0] }
 0x41c   :  { %7490 = vmatpush.bf16.msra.mxu1 %v11029_v48  ;;  %v11588_v48 = vld [vmem:[#allocation14 + $0x5c8] sm:$0xf]  ;;  %v12715_v37 = vld [vmem:[#allocation14 + $0x8c] sm:$0xf]  ;;  %v10918_v39 = vld [vmem:[#allocation14 + $0x98] sm:$0xf0] }
 0x41d   :  { %v11589_v15 = vor.u32 %v12885_v11, %v11588_v48  ;;  %v12869_v48 = vld [vmem:[#allocation14 + $0x554] sm:$0xf0]  ;;  %v12719_v11 = vld [vmem:[#allocation14 + $0xac] sm:$0xf] }
 0x41e   :  { %7479 = vmatpush.bf16.msra.mxu0 %v10869_v29  ;;  %v5699_v21 = vpop.f32.mrf.mxu3  ;;  %7453 = vmatpush.bf16.msrb.mxu2 %v11633_v4 }
 0x41f   :  { %v5700_v29 = vadd.f32 %v5699_v21, %v5687_v6  ;;  %v12938_v6 = vld [vmem:[#allocation14 + $0x784] sm:$0xf]  ;;  %v11556_v21 = vld [vmem:[#allocation14 + $0x588] sm:$0xf] }
 0x420   :  { %7491 = vmatpush.bf16.msra.mxu1 %v11013_v49  ;;  %v5688_v47 = vpop.f32.mrf.mxu2  ;;  %v12942_v49 = vld [vmem:[#allocation14 + $0x7a4] sm:$0xf] }
 0x421   :  { %v5710_v36 = vmax.f32 %v5700_v29, 0.0  ;;  %v11557_v47 = vor.u32 %v12877_v8, %v11556_v21  ;;  %v12711_v8 = vld [vmem:[#allocation14 + $0x6c] sm:$0xf] }
 0x422   :  { %7480 = vmatpush.bf16.msra.mxu0 %v10853_v57  ;;  %v7274_v32 = vpop.f32.mrf.mxu0  ;;  %v11857_v57 = vor.u32 %v12950_v10, %v11854_v61  ;;  %7454 = vmatpush.bf16.msrb.mxu2 %v11617_v30  ;;  %v10966_v10 = vld [vmem:[#allocation14 + $0xf8] sm:$0xf0] }
 0x423   :  { %v13755_v62 = vpack.c.bf16 %v5710_v36, %v5710_v36  ;;  %v7275_v63 = vadd.f32 %v7274_v32, %v5977_v23  ;;  %v11365_v32 = vor.u32 %v12829_v14, %v11364_v44  ;;  %v11790_v23 = vld [vmem:[#allocation14 + $0x770] sm:$0xf0]  ;;  %v10969_v30 = vor.u32 %v12727_v28, %v10966_v10  ;;  %v12873_v36 = vld [vmem:[#allocation14 + $0x574] sm:$0xf0]  ;;  %v11108_v14 = vld [vmem:[#allocation14 + $0x208] sm:$0xf] }
 0x424   :  { %7492 = vmatpush.bf16.msra.mxu1 %v10997_v38  ;;  %v11189_v38 = vor.u32 %v12785_v58, %v11188_v56  ;;  %v11508_v56 = vld [vmem:[#allocation14 + $0x528] sm:$0xf]  ;;  %v12865_v58 = vld [vmem:[#allocation14 + $0x534] sm:$0xf0]  ;;  %v10902_v28 = vld [vmem:[#allocation14 + $0x78] sm:$0xf0] }
 0x425   :  { %7481 = vmatmul.bf16.vlgmr.msra.gmra.mxu0 %v13688_v5  ;;  %7364 = vmatmul.bf16.vlgmr.msrb.gmra.mxu3 %v13755_v62  ;;  %v11348_v10 = vld [vmem:[#allocation14 + $0x3e8] sm:$0xf] }
 0x426   :  { %7525 = vmatpush.bf16.msrb.mxu0 %v11477_v43  ;;  %v12837_v43 = vld [vmem:[#allocation14 + $0x454] sm:$0xf0]  ;;  %7460 = vmatpush.bf16.msrb.mxu3 %v11857_v57  ;;  %v5701_v22 = vpop.f32.mrf.mxu3  ;;  %v10950_v57 = vld [vmem:[#allocation14 + $0xd8] sm:$0xf0] }
 0x427   :  { %v11397_v60 = vor.u32 %v12837_v43, %v11396_v46  ;;  %7499 = vmatpush.bf16.msra.mxu2 %v11221_v19  ;;  %v11793_v19 = vor.u32 %v12934_v1, %v11790_v23  ;;  %v12930_v43 = vld [vmem:[#allocation14 + $0x744] sm:$0xf] }
 0x428   :  { %7493 = vmatpush.bf16.msra.mxu1 %v10981_v53  ;;  %7455 = vmatmul.bf16.vlgmr.msrb.gmra.mxu2 %v13741_v33  ;;  %v11156_v53 = vld [vmem:[#allocation14 + $0x268] sm:$0xf]  ;;  %v11777_v22 = vor.u32 %v12930_v43, %v11774_v25  ;;  %v12821_v43 = vld [vmem:[#allocation14 + $0x3d4] sm:$0xf0] }
 0x429   :  { %v11157_v46 = vor.u32 %v12777_v27, %v11156_v53  ;;  %v11493_v53 = vor.u32 %v12861_v26, %v11492_v9  ;;  %v10905_v27 = vor.u32 %v12711_v8, %v10902_v28  ;;  %v11716_v25 = vld [vmem:[#allocation14 + $0x6c8] sm:$0xf]  ;;  %v11478_v9 = vld [vmem:[#allocation14 + $0x4f8] sm:$0xf0] }
 0x42a   :  { %7526 = vmatpush.bf16.msrb.mxu0 %v11461_v20  ;;  %v7287_v20 = vpop.f32.mrf.mxu1  ;;  %v7276_v55 = vpop.f32.mrf.mxu0  ;;  %7461 = vmatpush.bf16.msrb.mxu3 %v11841_v50  ;;  %v11141_v50 = vor.u32 %v12773_v3, %v11140_v17  ;;  %v11078_v17 = vld [vmem:[#allocation14 + $0x1d8] sm:$0xf0] }
 0x42b   :  { %v13758_v24 = vadd.f32 %v7287_v20, %v7275_v63  ;;  %7494 = vmatmul.bf16.vlgmr.msra.gmra.mxu1 %v13694_v31  ;;  %7500 = vmatpush.bf16.msra.mxu2 %v11205_v12  ;;  %v11524_v63 = vld [vmem:[#allocation14 + $0x548] sm:$0xf]  ;;  %v10934_v20 = vld [vmem:[#allocation14 + $0xb8] sm:$0xf0]  ;;  %v12926_v12 = vld [vmem:[#allocation14 + $0x724] sm:$0xf] }
 0x42c   :  { %7538 = vmatpush.bf16.msrb.mxu1 %v11605_v52  ;;  %v11541_v52 = vor.u32 %v12873_v36, %v11540_v35  ;;  %v10937_v55 = vor.u32 %v12719_v11, %v10934_v20  ;;  %v12703_v20 = vld [vmem:[#allocation14 + $0x2c] sm:$0xf] }
 0x42e   :  { %7527 = vmatpush.bf16.msrb.mxu0 %v11445_v34  ;;  %v11822_v34 = vld [vmem:[#allocation14 + $0x7b0] sm:$0xf0] }
 0x42f   :  { %v11825_v4 = vor.u32 %v12942_v49, %v11822_v34  ;;  %7501 = vmatpush.bf16.msra.mxu2 %v11189_v38  ;;  %v11525_v49 = vor.u32 %v12869_v48, %v11524_v63  ;;  %v12769_v34 = vld [vmem:[#allocation14 + $0x234] sm:$0xf0]  ;;  %v11742_v38 = vld [vmem:[#allocation14 + $0x710] sm:$0xf0] }
 0x430   :  { %7539 = vmatpush.bf16.msrb.mxu1 %v11589_v15  ;;  %v11124_v15 = vld [vmem:[#allocation14 + $0x228] sm:$0xf] }
 0x431   :  { %7462 = vmatpush.bf16.msrb.mxu3 %v11825_v4  ;;  %v11125_v44 = vor.u32 %v12769_v34, %v11124_v15  ;;  %v12922_v4 = vld [vmem:[#allocation14 + $0x704] sm:$0xf]  ;;  %v12699_v34 = vld [vmem:[#allocation14 + $0xc] sm:$0xf] }
 0x432   :  { %7528 = vmatpush.bf16.msrb.mxu0 %v11429_v41  ;;  %v11806_v41 = vld [vmem:[#allocation14 + $0x790] sm:$0xf0]  ;;  %v7289_v29 = vpop.f32.mrf.mxu1  ;;  %v11745_v1 = vor.u32 %v12922_v4, %v11742_v38 }
 0x433   :  { %v11809_v61 = vor.u32 %v12938_v6, %v11806_v41  ;;  %7502 = vmatpush.bf16.msra.mxu2 %v11173_v16  ;;  %v11509_v6 = vor.u32 %v12865_v58, %v11508_v56  ;;  %v10921_v41 = vor.u32 %v12715_v37, %v10918_v39  ;;  %v12825_v29 = vld [vmem:[#allocation14 + $0x3f4] sm:$0xf0]  ;;  %v10854_v39 = vld [vmem:[#allocation14 + $0x18] sm:$0xf0] }
 0x434   :  { %7540 = vmatpush.bf16.msrb.mxu1 %v11573_v7  ;;  %v12765_v7 = vld [vmem:[#allocation14 + $0x214] sm:$0xf0]  ;;  %v11349_v35 = vor.u32 %v12825_v29, %v11348_v10  ;;  %v10857_v26 = vor.u32 %v12699_v34, %v10854_v39  ;;  %v11284_v10 = vld [vmem:[#allocation14 + $0x368] sm:$0xf] }
 0x435   :  { %7463 = vmatpush.bf16.msrb.mxu3 %v11809_v61  ;;  %v12921_v61 = vld [vmem:[#allocation14 + $0x6f4] sm:$0xf0]  ;;  %v11109_v23 = vor.u32 %v12765_v7, %v11108_v14  ;;  %v11684_v14 = vld [vmem:[#allocation14 + $0x688] sm:$0xf]  ;;  %v12855_v7 = vld [vmem:[#allocation14 + $0x4ec] sm:$0xf] }
 0x436   :  { %7529 = vmatpush.bf16.msrb.mxu0 %v11413_v45  ;;  %v12723_v45 = vld [vmem:[#allocation14 + $0xcc] sm:$0xf]  ;;  %7416 = vmatmul.bf16.vlgmr.msra.gmra.mxu3 %v13708_v42  ;;  %v12809_v29 = vld [vmem:[#allocation14 + $0x374] sm:$0xf0] }
 0x437   :  { %v10953_v51 = vor.u32 %v12723_v45, %v10950_v57  ;;  %7503 = vmatpush.bf16.msra.mxu2 %v11157_v46  ;;  %v12707_v45 = vld [vmem:[#allocation14 + $0x4c] sm:$0xf]  ;;  %v10886_v57 = vld [vmem:[#allocation14 + $0x58] sm:$0xf0]  ;;  %v12797_v34 = vld [vmem:[#allocation14 + $0x314] sm:$0xf0] }
 0x438   :  { %7541 = vmatpush.bf16.msrb.mxu1 %v11557_v47  ;;  %v12759_v47 = vld [vmem:[#allocation14 + $0x1ec] sm:$0xf]  ;;  %v10889_v63 = vor.u32 %v12707_v45, %v10886_v57  ;;  %v12805_v45 = vld [vmem:[#allocation14 + $0x354] sm:$0xf0] }
 0x439   :  { %7464 = vmatpush.bf16.msrb.mxu3 %v11793_v19  ;;  %v11332_v19 = vld [vmem:[#allocation14 + $0x3c8] sm:$0xf]  ;;  %v12893_v39 = vld [vmem:[#allocation14 + $0x614] sm:$0xf0] }
 0x43a   :  { %7530 = vmatpush.bf16.msrb.mxu0 %v11397_v60  ;;  %v7300_v60 = vpop.f32.mrf.mxu2  ;;  %v11333_v48 = vor.u32 %v12821_v43, %v11332_v19  ;;  %v12901_v43 = vld [vmem:[#allocation14 + $0x654] sm:$0xf0] }
 0x43b   :  { %v7301_v59 = vadd.f32 %v7300_v60, %v13758_v24  ;;  %7504 = vmatpush.bf16.msra.mxu2 %v11141_v50  ;;  %v10870_v60 = vld [vmem:[#allocation14 + $0x38] sm:$0xf0] }
 0x43c   :  { %7542 = vmatpush.bf16.msrb.mxu1 %v11541_v52  ;;  %v12917_v52 = vld [vmem:[#allocation14 + $0x6d4] sm:$0xf0]  ;;  %v10873_v15 = vor.u32 %v12703_v20, %v10870_v60 }
 0x43d   :  { %7465 = vmatpush.bf16.msrb.mxu3 %v11777_v22  ;;  %v11717_v11 = vor.u32 %v12917_v52, %v11716_v25  ;;  %v11316_v22 = vld [vmem:[#allocation14 + $0x3a8] sm:$0xf]  ;;  %v12739_v25 = vld [vmem:[#allocation14 + $0x14c] sm:$0xf]  ;;  %v11014_v52 = vld [vmem:[#allocation14 + $0x158] sm:$0xf0] }
 0x43e   :  { %7531 = vmatpush.bf16.msrb.mxu0 %v11381_v40  ;;  %v11761_v40 = vor.u32 %v12926_v12, %v11758_v54  ;;  %v7313_v24 = vpop.f32.mrf.mxu3  ;;  %v12817_v12 = vld [vmem:[#allocation14 + $0x3b4] sm:$0xf0]  ;;  %v11700_v54 = vld [vmem:[#allocation14 + $0x6a8] sm:$0xf]  ;;  %v11017_v20 = vor.u32 %v12739_v25, %v11014_v52  ;;  %v11382_v25 = vld [vmem:[#allocation14 + $0x438] sm:$0xf0] }
 0x43f   :  { %v13765_v21 = vadd.f32 %v7313_v24, %v7301_v59  ;;  %7505 = vmatpush.bf16.msra.mxu2 %v11125_v44  ;;  %v12913_v59 = vld [vmem:[#allocation14 + $0x6b4] sm:$0xf0]  ;;  %v11317_v56 = vor.u32 %v12817_v12, %v11316_v22  ;;  %v11636_v22 = vld [vmem:[#allocation14 + $0x628] sm:$0xf]  ;;  %v12735_v12 = vld [vmem:[#allocation14 + $0x12c] sm:$0xf] }
 0x440   :  { %7543 = vmatpush.bf16.msrb.mxu1 %v11525_v49  ;;  %v12751_v49 = vld [vmem:[#allocation14 + $0x1ac] sm:$0xf]  ;;  %v11701_v58 = vor.u32 %v12913_v59, %v11700_v54  ;;  %v12813_v44 = vld [vmem:[#allocation14 + $0x394] sm:$0xf0]  ;;  %v10998_v54 = vld [vmem:[#allocation14 + $0x138] sm:$0xf0] }
 0x441   :  { %7466 = vmatpush.bf16.msrb.mxu3 %v11761_v40  ;;  %v11300_v40 = vld [vmem:[#allocation14 + $0x388] sm:$0xf]  ;;  %v12909_v24 = vld [vmem:[#allocation14 + $0x694] sm:$0xf0]  ;;  %v12843_v59 = vld [vmem:[#allocation14 + $0x48c] sm:$0xf] }
 0x442   :  { %7532 = vmatpush.bf16.msrb.mxu0 %v11365_v32  ;;  %v11732_v32 = vld [vmem:[#allocation14 + $0x6e8] sm:$0xf]  ;;  %v7302_v16 = vpop.f32.mrf.mxu2  ;;  %v7326_v37 = vpop.f32.mrf.mxu0  ;;  %v11301_v8 = vor.u32 %v12813_v44, %v11300_v40  ;;  %v11685_v28 = vor.u32 %v12909_v24, %v11684_v14  ;;  %v12731_v40 = vld [vmem:[#allocation14 + $0x10c] sm:$0xf]  ;;  %v10982_v44 = vld [vmem:[#allocation14 + $0x118] sm:$0xf0] }
 0x443   :  { %v11733_v36 = vor.u32 %v12921_v61, %v11732_v32  ;;  %7506 = vmatpush.bf16.msra.mxu2 %v11109_v23  ;;  %v13771_v38 = vadd.f32 %v7326_v37, %v13765_v21  ;;  %v11481_v61 = vor.u32 %v12855_v7, %v11478_v9  ;;  %v11668_v16 = vld [vmem:[#allocation14 + $0x668] sm:$0xf]  ;;  %v12905_v21 = vld [vmem:[#allocation14 + $0x674] sm:$0xf0]  ;;  %v11030_v23 = vld [vmem:[#allocation14 + $0x178] sm:$0xf0] }
 0x444   :  { %7544 = vmatpush.bf16.msrb.mxu1 %v11509_v6  ;;  %v12747_v6 = vld [vmem:[#allocation14 + $0x18c] sm:$0xf]  ;;  %v11414_v24 = vld [vmem:[#allocation14 + $0x478] sm:$0xf0]  ;;  %v11828_v52 = vld [vmem:[#allocation14 + $0x7a8] sm:$0xf] }
 0x445   :  { %7533 = vmatmul.bf16.vlgmr.msrb.gmra.mxu0 %v13718_v2  ;;  %7467 = vmatpush.bf16.msrb.mxu3 %v11745_v1  ;;  %v12743_v1 = vld [vmem:[#allocation14 + $0x16c] sm:$0xf]  ;;  %v11222_v9 = vld [vmem:[#allocation14 + $0x2f8] sm:$0xf0] }
 0x446   :  { %7577 = vmatpush.bf16.msra.mxu0 %v10969_v30  ;;  %v11094_v30 = vld [vmem:[#allocation14 + $0x1f8] sm:$0xf0]  ;;  %v7315_v3 = vpop.f32.mrf.mxu3  ;;  %7507 = vmatmul.bf16.vlgmr.msra.gmra.mxu2 %v13705_v13  ;;  %v11033_v57 = vor.u32 %v12743_v1, %v11030_v23  ;;  %v12839_v14 = vld [vmem:[#allocation14 + $0x46c] sm:$0xf]  ;;  %v11844_v23 = vld [vmem:[#allocation14 + $0x7c8] sm:$0xf] }
 0x447   :  { %v11097_v46 = vor.u32 %v12759_v47, %v11094_v30  ;;  %7551 = vmatpush.bf16.msrb.mxu2 %v11733_v36  ;;  %v12851_v47 = vld [vmem:[#allocation14 + $0x4cc] sm:$0xf]  ;;  %v11462_v30 = vld [vmem:[#allocation14 + $0x4d8] sm:$0xf0]  ;;  %v11268_v36 = vld [vmem:[#allocation14 + $0x348] sm:$0xf] }
 0x448   :  { %7545 = vmatpush.bf16.msrb.mxu1 %v11493_v53  ;;  %7468 = vmatmul.bf16.vlgmr.msrb.gmra.mxu3 %v13755_v62  ;;  %v11285_v53 = vor.u32 %v12809_v29, %v11284_v10  ;;  %v11465_v19 = vor.u32 %v12851_v47, %v11462_v30  ;;  %v11269_v3 = vor.u32 %v12805_v45, %v11268_v36  ;;  %v12791_v7 = vld [vmem:[#allocation14 + $0x2ec] sm:$0xf]  ;;  %v11606_v10 = vld [vmem:[#allocation14 + $0x5f8] sm:$0xf0]  ;;  %v12949_v30 = vld [vmem:[#allocation14 + $0x7d4] sm:$0xf0] }
 0x449   :  { %7512 = vmatpush.bf16.msra.mxu3 %v11349_v35  ;;  %v10985_v29 = vor.u32 %v12731_v40, %v10982_v44  ;;  %v11398_v1 = vld [vmem:[#allocation14 + $0x458] sm:$0xf0]  ;;  %v12937_v44 = vld [vmem:[#allocation14 + $0x774] sm:$0xf0] }
 0x44a   :  { %7578 = vmatpush.bf16.msra.mxu0 %v10953_v51  ;;  %v12755_v51 = vld [vmem:[#allocation14 + $0x1cc] sm:$0xf]  ;;  %v7328_v35 = vpop.f32.mrf.mxu0  ;;  %v11590_v36 = vld [vmem:[#allocation14 + $0x5d8] sm:$0xf0] }
 0x44b   :  { %v11081_v50 = vor.u32 %v12755_v51, %v11078_v17  ;;  %7546 = vmatmul.bf16.vlgmr.msrb.gmra.mxu1 %v13729_v18  ;;  %7552 = vmatpush.bf16.msrb.mxu2 %v11717_v11  ;;  %v12847_v51 = vld [vmem:[#allocation14 + $0x4ac] sm:$0xf]  ;;  %v11446_v17 = vld [vmem:[#allocation14 + $0x4b8] sm:$0xf0]  ;;  %v12801_v11 = vld [vmem:[#allocation14 + $0x334] sm:$0xf0] }
 0x44c   :  { %7590 = vmatpush.bf16.msra.mxu1 %v11097_v46  ;;  %v11652_v46 = vld [vmem:[#allocation14 + $0x648] sm:$0xf]  ;;  %v11449_v60 = vor.u32 %v12847_v51, %v11446_v17  ;;  %v12883_v35 = vld [vmem:[#allocation14 + $0x5cc] sm:$0xf]  ;;  %v12945_v17 = vld [vmem:[#allocation14 + $0x7b4] sm:$0xf0] }
 0x44d   :  { %7513 = vmatpush.bf16.msra.mxu3 %v11333_v48  ;;  %v11252_v48 = vld [vmem:[#allocation14 + $0x328] sm:$0xf]  ;;  %v11593_v51 = vor.u32 %v12883_v35, %v11590_v36  ;;  %v12767_v35 = vld [vmem:[#allocation14 + $0x22c] sm:$0xf]  ;;  %v11126_v36 = vld [vmem:[#allocation14 + $0x238] sm:$0xf0] }
 0x44e   :  { %7579 = vmatpush.bf16.msra.mxu0 %v10937_v55  ;;  %v11062_v55 = vld [vmem:[#allocation14 + $0x1b8] sm:$0xf0] }
 0x44f   :  { %v11065_v4 = vor.u32 %v12751_v49, %v11062_v55  ;;  %7553 = vmatpush.bf16.msrb.mxu2 %v11701_v58  ;;  %v11430_v49 = vld [vmem:[#allocation14 + $0x498] sm:$0xf0]  ;;  %v11001_v58 = vor.u32 %v12735_v12, %v10998_v54  ;;  %v12827_v12 = vld [vmem:[#allocation14 + $0x40c] sm:$0xf] }
 0x450   :  { %7591 = vmatpush.bf16.msra.mxu1 %v11081_v50  ;;  %v12897_v50 = vld [vmem:[#allocation14 + $0x634] sm:$0xf0]  ;;  %v11433_v37 = vor.u32 %v12843_v59, %v11430_v49  ;;  %v11366_v54 = vld [vmem:[#allocation14 + $0x418] sm:$0xf0]  ;;  %v11812_v59 = vld [vmem:[#allocation14 + $0x788] sm:$0xf] }
 0x451   :  { %7514 = vmatpush.bf16.msra.mxu3 %v11317_v56  ;;  %v11637_v55 = vor.u32 %v12897_v50, %v11636_v22  ;;  %v11620_v56 = vld [vmem:[#allocation14 + $0x608] sm:$0xf] }
 0x452   :  { %7580 = vmatpush.bf16.msra.mxu0 %v10921_v41  ;;  %v11046_v41 = vld [vmem:[#allocation14 + $0x198] sm:$0xf0] }
 0x453   :  { %v11049_v32 = vor.u32 %v12747_v6, %v11046_v41  ;;  %7554 = vmatpush.bf16.msrb.mxu2 %v11685_v28  ;;  %v11860_v6 = vld [vmem:[#allocation14 + $0x7e8] sm:$0xf]  ;;  %v12953_v41 = vld [vmem:[#allocation14 + $0x7f4] sm:$0xf0]  ;;  %v12887_v28 = vld [vmem:[#allocation14 + $0x5ec] sm:$0xf] }
 0x454   :  { %7592 = vmatpush.bf16.msra.mxu1 %v11065_v4  ;;  %v11609_v47 = vor.u32 %v12887_v28, %v11606_v10  ;;  %v12933_v10 = vld [vmem:[#allocation14 + $0x754] sm:$0xf0] }
 0x455   :  { %7515 = vmatpush.bf16.msra.mxu3 %v11301_v8  ;;  %v11621_v8 = vor.u32 %v12893_v39, %v11620_v56  ;;  %v11369_v56 = vor.u32 %v12827_v12, %v11366_v54  ;;  %v11796_v39 = vld [vmem:[#allocation14 + $0x768] sm:$0xf]  ;;  %v11734_v12 = vld [vmem:[#allocation14 + $0x6f8] sm:$0xf0] }
 0x456   :  { %7581 = vmatpush.bf16.msra.mxu0 %v10905_v27  ;;  %v11669_v27 = vor.u32 %v12905_v21, %v11668_v16  ;;  %v11225_v16 = vor.u32 %v12791_v7, %v11222_v9  ;;  %v12835_v21 = vld [vmem:[#allocation14 + $0x44c] sm:$0xf]  ;;  %v11797_v7 = vor.u32 %v12937_v44, %v11796_v39  ;;  %v12958_v39 = vld [vmem:[#allocation17 + $0x20] sm:$0xff] }
 0x457   :  { %v11401_v45 = vor.u32 %v12835_v21, %v11398_v1  ;;  %v5978_v21 = vperm.slane %v13752_v0, 1  ;;  %v11129_v0 = vor.u32 %v12767_v35, %v11126_v36  ;;  %v12803_v36 = vld [vmem:[#allocation14 + $0x34c] sm:$0xf] }
 0x458   :  { %7593 = vmatpush.bf16.msra.mxu1 %v11049_v32  ;;  %7555 = vmatpush.bf16.msrb.mxu2 %v11669_v27  ;;  %v11417_v32 = vor.u32 %v12839_v14, %v11414_v24  ;;  %v11206_v27 = vld [vmem:[#allocation14 + $0x2d8] sm:$0xf0]  ;;  %v12775_v14 = vld [vmem:[#allocation14 + $0x26c] sm:$0xf] }
 0x459   :  { %7516 = vmatpush.bf16.msra.mxu3 %v11285_v53  ;;  %v12787_v53 = vld [vmem:[#allocation14 + $0x2cc] sm:$0xf]  ;;  %v11158_v24 = vld [vmem:[#allocation14 + $0x278] sm:$0xf0] }
 0x45a   :  { %7582 = vmatpush.bf16.msra.mxu0 %v10889_v63  ;;  %v11653_v63 = vor.u32 %v12901_v43, %v11652_v46  ;;  %v11209_v46 = vor.u32 %v12787_v53, %v11206_v27  ;;  %v12831_v43 = vld [vmem:[#allocation14 + $0x42c] sm:$0xf]  ;;  %v11161_v9 = vor.u32 %v12775_v14, %v11158_v24  ;;  %v12929_v27 = vld [vmem:[#allocation14 + $0x734] sm:$0xf0] }
 0x45b   :  { %v12815_v24 = vld [vmem:[#allocation14 + $0x3ac] sm:$0xf] }
 0x45c   :  { %7594 = vmatpush.bf16.msra.mxu1 %v11033_v57  ;;  %7556 = vmatpush.bf16.msrb.mxu2 %v11653_v63  ;;  %v11190_v63 = vld [vmem:[#allocation14 + $0x2b8] sm:$0xf0] }
 0x45d   :  { %7517 = vmatpush.bf16.msra.mxu3 %v11269_v3  ;;  %v12783_v3 = vld [vmem:[#allocation14 + $0x2ac] sm:$0xf] }
 0x45e   :  { %7583 = vmatpush.bf16.msra.mxu0 %v10873_v15  ;;  %v11236_v15 = vld [vmem:[#allocation14 + $0x308] sm:$0xf]  ;;  %v11193_v22 = vor.u32 %v12783_v3, %v11190_v63  ;;  %v12763_v63 = vld [vmem:[#allocation14 + $0x20c] sm:$0xf] }
 0x460   :  { %7595 = vmatpush.bf16.msra.mxu1 %v11017_v20  ;;  %7557 = vmatpush.bf16.msrb.mxu2 %v11637_v55  ;;  %v11385_v20 = vor.u32 %v12831_v43, %v11382_v25  ;;  %v12779_v55 = vld [vmem:[#allocation14 + $0x28c] sm:$0xf]  ;;  %v11748_v43 = vld [vmem:[#allocation14 + $0x708] sm:$0xf]  ;;  %v12925_v25 = vld [vmem:[#allocation14 + $0x714] sm:$0xf0] }
 0x461   :  { %v11749_v54 = vor.u32 %v12925_v25, %v11748_v43  ;;  %v12799_v25 = vld [vmem:[#allocation14 + $0x32c] sm:$0xf] }
 0x462   :  { %7584 = vmatpush.bf16.msra.mxu0 %v10857_v26  ;;  %v13774_v4 = vpop.f32.mrf.mxu0  ;;  %v11237_v26 = vor.u32 %v12797_v34, %v11236_v15  ;;  %v13779_v50 = vpop.f32.mrf.mxu1  ;;  %v11174_v15 = vld [vmem:[#allocation14 + $0x298] sm:$0xf0]  ;;  %v12875_v34 = vld [vmem:[#allocation14 + $0x58c] sm:$0xf] }
 0x464   :  { %7596 = vmatpush.bf16.msra.mxu1 %v11001_v58  ;;  %7558 = vmatpush.bf16.msrb.mxu2 %v11621_v8  ;;  %v11780_v8 = vld [vmem:[#allocation14 + $0x748] sm:$0xf] }
 0x465   :  { %7585 = vmatmul.bf16.vlgmr.msra.gmra.mxu0 %v13688_v5  ;;  %v11253_v5 = vor.u32 %v12801_v11, %v11252_v48  ;;  %v12879_v48 = vld [vmem:[#allocation14 + $0x5ac] sm:$0xf]  ;;  %v11574_v11 = vld [vmem:[#allocation14 + $0x5b8] sm:$0xf0]  ;;  %v11781_v1 = vor.u32 %v12933_v10, %v11780_v8 }
 0x466   :  { %7629 = vmatpush.bf16.msrb.mxu0 %v11481_v61  ;;  %v11861_v61 = vor.u32 %v12953_v41, %v11860_v6  ;;  %v11577_v49 = vor.u32 %v12879_v48, %v11574_v11  ;;  %v12871_v6 = vld [vmem:[#allocation14 + $0x56c] sm:$0xf]  ;;  %v11542_v41 = vld [vmem:[#allocation14 + $0x578] sm:$0xf0] }
 0x467   :  { %7518 = vmatpush.bf16.msra.mxu3 %v11253_v5  ;;  %7559 = vmatmul.bf16.vlgmr.msrb.gmra.mxu2 %v13741_v33  ;;  %v12941_v5 = vld [vmem:[#allocation14 + $0x794] sm:$0xf0]  ;;  %v11545_v28 = vor.u32 %v12871_v6, %v11542_v41  ;;  %v11110_v48 = vld [vmem:[#allocation14 + $0x218] sm:$0xf0]  ;;  %v12859_v11 = vld [vmem:[#allocation14 + $0x50c] sm:$0xf] }
 0x468   :  { %7597 = vmatpush.bf16.msra.mxu1 %v10985_v29  ;;  %7603 = vmatpush.bf16.msra.mxu2 %v11225_v16  ;;  %v11813_v58 = vor.u32 %v12941_v5, %v11812_v59  ;;  %v12771_v29 = vld [vmem:[#allocation14 + $0x24c] sm:$0xf]  ;;  %v11526_v16 = vld [vmem:[#allocation14 + $0x558] sm:$0xf0]  ;;  %v11113_v59 = vor.u32 %v12763_v63, %v11110_v48 }
 0x469   :  { %v11318_v6 = vld [vmem:[#allocation14 + $0x3b8] sm:$0xf0] }
 0x46a   :  { %7630 = vmatpush.bf16.msrb.mxu0 %v11465_v19  ;;  %v7380_v57 = vpop.f32.mrf.mxu0  ;;  %v11845_v19 = vor.u32 %v12949_v30, %v11844_v23  ;;  %v12961_v30 = vld [vmem:[#allocation17 + $0x38] sm:$0xff] }
 0x46b   :  { %7519 = vmatpush.bf16.msra.mxu3 %v11237_v26  ;;  %7598 = vmatmul.bf16.vlgmr.msra.gmra.mxu1 %v13694_v31  ;;  %v11558_v31 = vld [vmem:[#allocation14 + $0x598] sm:$0xf0]  ;;  %v7341_v26 = vpop.f32.mrf.mxu1 }
 0x46c   :  { %7642 = vmatpush.bf16.msrb.mxu1 %v11609_v47  ;;  %7604 = vmatpush.bf16.msra.mxu2 %v11209_v46  ;;  %v11561_v40 = vor.u32 %v12875_v34, %v11558_v31  ;;  %v11764_v47 = vld [vmem:[#allocation14 + $0x728] sm:$0xf]  ;;  %v11510_v57 = vld [vmem:[#allocation14 + $0x538] sm:$0xf0]  ;;  %v12819_v34 = vld [vmem:[#allocation14 + $0x3cc] sm:$0xf]  ;;  %v11321_v26 = vor.u32 %v12815_v24, %v11318_v6 }
 0x46d   :  { %v11334_v31 = vld [vmem:[#allocation14 + $0x3d8] sm:$0xf0]  ;;  %v12966_v6 = vld [vmem:[#allocation17 + $0x60] sm:$0xff] }
 0x46e   :  { %7631 = vmatpush.bf16.msrb.mxu0 %v11449_v60  ;;  %7520 = vmatmul.bf16.vlgmr.msra.gmra.mxu3 %v13708_v42  ;;  %v11829_v60 = vor.u32 %v12945_v17, %v11828_v52  ;;  %v12960_v52 = vld [vmem:[#allocation17 + $0x30] sm:$0xff]  ;;  %v11337_v44 = vor.u32 %v12819_v34, %v11334_v31  ;;  %v12957_v41 = vld [vmem:[#allocation17 + $0x18] sm:$0xff] }
 0x46f   :  { %7564 = vmatpush.bf16.msrb.mxu3 %v11861_v61  ;;  %v12867_v61 = vld [vmem:[#allocation14 + $0x54c] sm:$0xf]  ;;  %v11302_v10 = vld [vmem:[#allocation14 + $0x398] sm:$0xf0] }
 0x470   :  { %7643 = vmatpush.bf16.msrb.mxu1 %v11593_v51  ;;  %7605 = vmatpush.bf16.msra.mxu2 %v11193_v22  ;;  %v11529_v53 = vor.u32 %v12867_v61, %v11526_v16  ;;  %v12919_v22 = vld [vmem:[#allocation14 + $0x6ec] sm:$0xf]  ;;  %v12956_v16 = vld [vmem:[#allocation17 + $0x10] sm:$0xff]  ;;  %v11638_v63 = vld [vmem:[#allocation14 + $0x638] sm:$0xf0] }
 0x471   :  { %v12969_v48 = vld [vmem:[#allocation17 + $0x78] sm:$0xff] }
 0x472   :  { %7632 = vmatpush.bf16.msrb.mxu0 %v11433_v37  ;;  %v11177_v37 = vor.u32 %v12779_v55, %v11174_v15  ;;  %v11737_v15 = vor.u32 %v12919_v22, %v11734_v12  ;;  %v11238_v12 = vld [vmem:[#allocation14 + $0x318] sm:$0xf0] }
 0x473   :  { %7565 = vmatpush.bf16.msrb.mxu3 %v11845_v19  ;;  %v11765_v19 = vor.u32 %v12929_v27, %v11764_v47  ;;  %v7391_v46 = vpop.f32.mrf.mxu1  ;;  %v11670_v47 = vld [vmem:[#allocation14 + $0x678] sm:$0xf0] }
 0x474   :  { %7644 = vmatpush.bf16.msrb.mxu1 %v11577_v49  ;;  %7606 = vmatpush.bf16.msra.mxu2 %v11177_v37  ;;  %v12959_v49 = vld [vmem:[#allocation17 + $0x28] sm:$0xff]  ;;  %v11830_v24 = vld [vmem:[#allocation14 + $0x7b8] sm:$0xf0] }
 0x476   :  { %7633 = vmatpush.bf16.msrb.mxu0 %v11417_v32  ;;  %v11142_v32 = vld [vmem:[#allocation14 + $0x258] sm:$0xf0] }
 0x477   :  { %7566 = vmatpush.bf16.msrb.mxu3 %v11829_v60  ;;  %v11145_v23 = vor.u32 %v12771_v29, %v11142_v32  ;;  %v12823_v60 = vld [vmem:[#allocation14 + $0x3ec] sm:$0xf]  ;;  %v11686_v32 = vld [vmem:[#allocation14 + $0x698] sm:$0xf0] }
 0x478   :  { %7645 = vmatpush.bf16.msrb.mxu1 %v11561_v40  ;;  %7607 = vmatpush.bf16.msra.mxu2 %v11161_v9  ;;  %v11702_v9 = vld [vmem:[#allocation14 + $0x6b8] sm:$0xf0]  ;;  %v12907_v29 = vld [vmem:[#allocation14 + $0x68c] sm:$0xf] }
 0x47a   :  { %7634 = vmatpush.bf16.msrb.mxu0 %v11401_v45  ;;  %v12863_v45 = vld [vmem:[#allocation14 + $0x52c] sm:$0xf] }
 0x47b   :  { %7567 = vmatpush.bf16.msrb.mxu3 %v11813_v58  ;;  %v11513_v17 = vor.u32 %v12863_v45, %v11510_v57  ;;  %v11718_v58 = vld [vmem:[#allocation14 + $0x6d8] sm:$0xf0]  ;;  %v7393_v37 = vpop.f32.mrf.mxu1  ;;  %v12899_v57 = vld [vmem:[#allocation14 + $0x64c] sm:$0xf] }
 0x47c   :  { %7646 = vmatpush.bf16.msrb.mxu1 %v11545_v28  ;;  %7608 = vmatpush.bf16.msra.mxu2 %v11145_v23  ;;  %v12811_v28 = vld [vmem:[#allocation14 + $0x38c] sm:$0xf]  ;;  %v11286_v23 = vld [vmem:[#allocation14 + $0x378] sm:$0xf0] }
 0x47d   :  { %v11270_v45 = vld [vmem:[#allocation14 + $0x358] sm:$0xf0] }
 0x47e   :  { %7635 = vmatpush.bf16.msrb.mxu0 %v11385_v20  ;;  %v11494_v20 = vld [vmem:[#allocation14 + $0x518] sm:$0xf0] }
 0x47f   :  { %7568 = vmatpush.bf16.msrb.mxu3 %v11797_v7  ;;  %v11497_v5 = vor.u32 %v12859_v11, %v11494_v20  ;;  %v12911_v7 = vld [vmem:[#allocation14 + $0x6ac] sm:$0xf] }
 0x480   :  { %7647 = vmatpush.bf16.msrb.mxu1 %v11529_v53  ;;  %7609 = vmatpush.bf16.msra.mxu2 %v11129_v0  ;;  %v11705_v8 = vor.u32 %v12911_v7, %v11702_v9  ;;  %v12955_v53 = vld [vmem:[#allocation17 + $0x8] sm:$0xff] }
 0x482   :  { %7636 = vmatpush.bf16.msrb.mxu0 %v11369_v56  ;;  %v13784_v51 = vpop.f32.mrf.mxu0  ;;  %v12915_v56 = vld [vmem:[#allocation14 + $0x6cc] sm:$0xf] }
 0x483   :  { %7569 = vmatpush.bf16.msrb.mxu3 %v11781_v1  ;;  %v11721_v14 = vor.u32 %v12915_v56, %v11718_v58  ;;  %v12807_v1 = vld [vmem:[#allocation14 + $0x36c] sm:$0xf]  ;;  %v11846_v58 = vld [vmem:[#allocation14 + $0x7d8] sm:$0xf0] }
 0x484   :  { %7648 = vmatpush.bf16.msrb.mxu1 %v11513_v17  ;;  %7610 = vmatpush.bf16.msra.mxu2 %v11113_v59  ;;  %v11289_v27 = vor.u32 %v12807_v1, %v11286_v23  ;;  %v12895_v17 = vld [vmem:[#allocation14 + $0x62c] sm:$0xf]  ;;  %v12968_v59 = vld [vmem:[#allocation17 + $0x70] sm:$0xff] }
 0x485   :  { %7637 = vmatmul.bf16.vlgmr.msrb.gmra.mxu0 %v13718_v2  ;;  %v7379_v2 = vadd.f32 %v13774_v4, %v5978_v21  ;;  %v11350_v4 = vld [vmem:[#allocation14 + $0x3f8] sm:$0xf0]  ;;  %v11305_v21 = vor.u32 %v12811_v28, %v11302_v10  ;;  %v11641_v22 = vor.u32 %v12895_v17, %v11638_v63  ;;  %v12947_v56 = vld [vmem:[#allocation14 + $0x7cc] sm:$0xf] }
 0x486   :  { %7949 = vmatpush.bf16.msra.mxu0 %v12961_v30  ;;  %v11353_v55 = vor.u32 %v12823_v60, %v11350_v4  ;;  %v12795_v60 = vld [vmem:[#allocation14 + $0x30c] sm:$0xf]  ;;  %v12965_v28 = vld [vmem:[#allocation17 + $0x58] sm:$0xff] }
 0x487   :  { %v13786_v3 = vadd.f32 %v7391_v46, %v7379_v2  ;;  %7570 = vmatpush.bf16.msrb.mxu3 %v11765_v19  ;;  %7611 = vmatmul.bf16.vlgmr.msra.gmra.mxu2 %v13705_v13  ;;  %v11689_v13 = vor.u32 %v12907_v29, %v11686_v32  ;;  %v11654_v2 = vld [vmem:[#allocation14 + $0x658] sm:$0xf0]  ;;  %v12954_v19 = vld [vmem:[#allocation17] sm:$0xff]  ;;  %v11273_v46 = vor.u32 %v12803_v36, %v11270_v45  ;;  %v12963_v45 = vld [vmem:[#allocation17 + $0x48] sm:$0xff] }
 0x488   :  { %7649 = vmatpush.bf16.msrb.mxu1 %v11497_v5  ;;  %7655 = vmatpush.bf16.msrb.mxu2 %v11737_v15  ;;  %v13791_v61 = vpop.f32.mrf.mxu1  ;;  %v13793_v30 = vpop.f32.mrf.mxu2  ;;  %v11657_v43 = vor.u32 %v12899_v57, %v11654_v2  ;;  %v12951_v5 = vld [vmem:[#allocation14 + $0x7ec] sm:$0xf]  ;;  %v11241_v15 = vor.u32 %v12795_v60, %v11238_v12  ;;  %v11750_v17 = vld [vmem:[#allocation14 + $0x718] sm:$0xf0] }
 0x48a   :  { %7950 = vmatpush.bf16.msra.mxu0 %v12960_v52  ;;  %v7432_v40 = vpop.f32.mrf.mxu0  ;;  %v11254_v52 = vld [vmem:[#allocation14 + $0x338] sm:$0xf0] }
 0x48b   :  { %7571 = vmatpush.bf16.msrb.mxu3 %v11749_v54  ;;  %7650 = vmatmul.bf16.vlgmr.msrb.gmra.mxu1 %v13729_v18  ;;  %v12903_v18 = vld [vmem:[#allocation14 + $0x66c] sm:$0xf]  ;;  %v11257_v20 = vor.u32 %v12799_v25, %v11254_v52 }
 0x48c   :  { %7656 = vmatpush.bf16.msrb.mxu2 %v11721_v14  ;;  %v11673_v35 = vor.u32 %v12903_v18, %v11670_v47  ;;  %7962 = vmatpush.bf16.msra.mxu1 %v12969_v48  ;;  %v12891_v54 = vld [vmem:[#allocation14 + $0x60c] sm:$0xf] }
 0x48d   :  { %v12943_v14 = vld [vmem:[#allocation14 + $0x7ac] sm:$0xf] }
 0x48e   :  { %7951 = vmatpush.bf16.msra.mxu0 %v12959_v49  ;;  %7572 = vmatmul.bf16.vlgmr.msrb.gmra.mxu3 %v13755_v62  ;;  %v11622_v49 = vld [vmem:[#allocation14 + $0x618] sm:$0xf0]  ;;  %v11833_v9 = vor.u32 %v12943_v14, %v11830_v24  ;;  %v12923_v52 = vld [vmem:[#allocation14 + $0x70c] sm:$0xf]  ;;  %v12972_v24 = vld [vmem:[#allocation17 + $0x90] sm:$0xff] }
 0x48f   :  { %7616 = vmatpush.bf16.msra.mxu3 %v11353_v55  ;;  %v11862_v55 = vld [vmem:[#allocation14 + $0x7f8] sm:$0xf0]  ;;  %v11625_v34 = vor.u32 %v12891_v54, %v11622_v49  ;;  %v11753_v48 = vor.u32 %v12923_v52, %v11750_v17  ;;  %v12978_v17 = vld [vmem:[#allocation17 + $0xc0] sm:$0xff] }
 0x490   :  { %7657 = vmatpush.bf16.msrb.mxu2 %v11705_v8  ;;  %v7445_v0 = vpop.f32.mrf.mxu1  ;;  %v7354_v11 = vpop.f32.mrf.mxu2  ;;  %7963 = vmatpush.bf16.msra.mxu1 %v12968_v59  ;;  %v11865_v31 = vor.u32 %v12951_v5, %v11862_v55  ;;  %v11814_v8 = vld [vmem:[#allocation14 + $0x798] sm:$0xf0] }
 0x491   :  { %v11766_v0 = vld [vmem:[#allocation14 + $0x738] sm:$0xf0] }
 0x492   :  { %7952 = vmatpush.bf16.msra.mxu0 %v12958_v39  ;;  %v12967_v39 = vld [vmem:[#allocation17 + $0x68] sm:$0xff] }
 0x493   :  { %7617 = vmatpush.bf16.msra.mxu3 %v11337_v44  ;;  %v11849_v44 = vor.u32 %v12947_v56, %v11846_v58 }
 0x494   :  { %7658 = vmatpush.bf16.msrb.mxu2 %v11689_v13  ;;  %7964 = vmatpush.bf16.msra.mxu1 %v12967_v39  ;;  %v12964_v13 = vld [vmem:[#allocation17 + $0x50] sm:$0xff] }
 0x496   :  { %7953 = vmatpush.bf16.msra.mxu0 %v12957_v41  ;;  %v13797_v41 = vld [vmem:[#allocation16] sm:$0xf] }
 0x497   :  { %7618 = vmatpush.bf16.msra.mxu3 %v11321_v26  ;;  %v5979_v7 = vperm.slane %v13797_v41, 2  ;;  %v12939_v26 = vld [vmem:[#allocation14 + $0x78c] sm:$0xf]  ;;  %v5980_v14 = vperm.slane %v13797_v41, 3 }
 0x498   :  { %7659 = vmatpush.bf16.msrb.mxu2 %v11673_v35  ;;  %v7404_v37 = vpop.f32.mrf.mxu2  ;;  %7965 = vmatpush.bf16.msra.mxu1 %v12966_v6  ;;  %v11817_v32 = vor.u32 %v12939_v26, %v11814_v8  ;;  %v11782_v35 = vld [vmem:[#allocation14 + $0x758] sm:$0xf0]  ;;  %v12971_v26 = vld [vmem:[#allocation17 + $0x88] sm:$0xff] }
 0x499   :  { %v7405_v11 = vadd.f32 %v7404_v37, %v13786_v3  ;;  %v12976_v37 = vld [vmem:[#allocation17 + $0xb0] sm:$0xff] }
 0x49a   :  { %7954 = vmatpush.bf16.msra.mxu0 %v12956_v16  ;;  %v7340_v16 = vadd.f32 %v13779_v50, %v13771_v38 }
 0x49b   :  { %7619 = vmatpush.bf16.msra.mxu3 %v11305_v21  ;;  %v12935_v21 = vld [vmem:[#allocation14 + $0x76c] sm:$0xf] }
 0x49c   :  { %7660 = vmatpush.bf16.msrb.mxu2 %v11657_v43  ;;  %7966 = vmatpush.bf16.msra.mxu1 %v12965_v28  ;;  %v7353_v23 = vadd.f32 %v13793_v30, %v7340_v16 }
 0x49e   :  { %7955 = vmatpush.bf16.msra.mxu0 %v12955_v53 }
 0x49f   :  { %7620 = vmatpush.bf16.msra.mxu3 %v11289_v27  ;;  %v12931_v27 = vld [vmem:[#allocation14 + $0x74c] sm:$0xf] }
 0x4a0   :  { %7661 = vmatpush.bf16.msrb.mxu2 %v11641_v22  ;;  %v7406_v10 = vpop.f32.mrf.mxu2  ;;  %7967 = vmatpush.bf16.msra.mxu1 %v12964_v13  ;;  %v11785_v38 = vor.u32 %v12931_v27, %v11782_v35 }
 0x4a2   :  { %7956 = vmatpush.bf16.msra.mxu0 %v12954_v19  ;;  %v7482_v4 = vpop.f32.mrf.mxu0  ;;  %v12927_v19 = vld [vmem:[#allocation14 + $0x72c] sm:$0xf] }
 0x4a3   :  { %7621 = vmatpush.bf16.msra.mxu3 %v11273_v46  ;;  %v7483_v29 = vadd.f32 %v7482_v4, %v5979_v7  ;;  %v12962_v46 = vld [vmem:[#allocation17 + $0x40] sm:$0xff]  ;;  %v11769_v43 = vor.u32 %v12927_v19, %v11766_v0 }
 0x4a4   :  { %7662 = vmatpush.bf16.msrb.mxu2 %v11625_v34  ;;  %7968 = vmatpush.bf16.msra.mxu1 %v12963_v45  ;;  %v12982_v0 = vld [vmem:[#allocation17 + $0xe0] sm:$0xff] }
 0x4a7   :  { %7622 = vmatpush.bf16.msra.mxu3 %v11257_v20  ;;  %7663 = vmatmul.bf16.vlgmr.msrb.gmra.mxu2 %v13741_v33  ;;  %v11798_v33 = vld [vmem:[#allocation14 + $0x778] sm:$0xf0] }
 0x4a8   :  { %v7365_v18 = vpop.f32.mrf.mxu3  ;;  %v11801_v47 = vor.u32 %v12935_v21, %v11798_v33  ;;  %7969 = vmatpush.bf16.msra.mxu1 %v12962_v46  ;;  %v12981_v46 = vld [vmem:[#allocation17 + $0xd8] sm:$0xff] }
 0x4a9   :  { %v7366_v53 = vadd.f32 %v7365_v18, %v7353_v23 }
 0x4aa   :  { %v7484_v40 = vpop.f32.mrf.mxu0 }
 0x4ab   :  { %7623 = vmatpush.bf16.msra.mxu3 %v11241_v15  ;;  %v7456_v36 = vpop.f32.mrf.mxu2  ;;  %v7681_v57 = vmax.f32 %v7366_v53, 0.0  ;;  %v12974_v40 = vld [vmem:[#allocation17 + $0xa0] sm:$0xff] }
 0x4ad   :  { %v7685_v50 = vpack.c.bf16 %v7681_v57, %v7681_v57 }
 0x4ae   :  { %7624 = vmatmul.bf16.vlgmr.msra.gmra.mxu3 %v13708_v42  ;;  %v7495_v42 = vpop.f32.mrf.mxu1 }
 0x4af   :  { %7668 = vmatpush.bf16.msrb.mxu3 %v11865_v31  ;;  %v13802_v1 = vadd.f32 %v7495_v42, %v7483_v29  ;;  %7957 = vmatmul.bf16.vlgmr.msra.gmra.mxu0 %v7685_v50  ;;  %v12977_v31 = vld [vmem:[#allocation17 + $0xb8] sm:$0xff]  ;;  %v12983_v50 = vld [vmem:[#allocation17 + $0xe8] sm:$0xff] }
 0x4b0   :  { %v7367_v30 = vpop.f32.mrf.mxu3  ;;  %7975 = vmatpush.bf16.msra.mxu2 %v12977_v31 }
 0x4b1   :  { %v12980_v30 = vld [vmem:[#allocation17 + $0xd0] sm:$0xff] }
 0x4b3   :  { %7669 = vmatpush.bf16.msrb.mxu3 %v11849_v44  ;;  %v7458_v63 = vpop.f32.mrf.mxu2 }
 0x4b4   :  { %7976 = vmatpush.bf16.msra.mxu2 %v12976_v37 }
 0x4b6   :  { %v7497_v2 = vpop.f32.mrf.mxu1 }
 0x4b7   :  { %7670 = vmatpush.bf16.msrb.mxu3 %v11833_v9 }
 0x4b9   :  { %v7417_v20 = vpop.f32.mrf.mxu3 }
 0x4ba   :  { %v7418_v60 = vadd.f32 %v7417_v20, %v7405_v11 }
 0x4bb   :  { %7671 = vmatpush.bf16.msrb.mxu3 %v11817_v32  ;;  %v12970_v32 = vld [vmem:[#allocation17 + $0x80] sm:$0xff] }
 0x4bc   :  { %v7431_v22 = vadd.f32 %v13784_v51, %v7418_v60 }
 0x4be   :  { %v7444_v59 = vadd.f32 %v13791_v61, %v7431_v22  ;;  %v12973_v61 = vld [vmem:[#allocation17 + $0x98] sm:$0xff] }
 0x4bf   :  { %7672 = vmatpush.bf16.msrb.mxu3 %v11801_v47 }
 0x4c0   :  { %v7457_v5 = vadd.f32 %v7456_v36, %v7444_v59  ;;  %v12985_v36 = vld [vmem:[#allocation17 + $0xf8] sm:$0xff] }
 0x4c1   :  { %v7419_v12 = vpop.f32.mrf.mxu3 }
 0x4c2   :  { %v7534_v25 = vpop.f32.mrf.mxu0 }
 0x4c3   :  { %7673 = vmatpush.bf16.msrb.mxu3 %v11785_v38  ;;  %v12984_v38 = vld [vmem:[#allocation17 + $0xf0] sm:$0xff] }
 0x4c7   :  { %7674 = vmatpush.bf16.msrb.mxu3 %v11769_v43  ;;  %v12979_v43 = vld [vmem:[#allocation17 + $0xc8] sm:$0xff] }
 0x4c8   :  { %v7547_v54 = vpop.f32.mrf.mxu1 }
 0x4c9   :  { %v7508_v49 = vpop.f32.mrf.mxu2 }
 0x4ca   :  { %v7536_v4 = vpop.f32.mrf.mxu0  ;;  %v7509_v8 = vadd.f32 %v7508_v49, %v13802_v1 }
 0x4cb   :  { %7675 = vmatpush.bf16.msrb.mxu3 %v11753_v48  ;;  %v7469_v55 = vpop.f32.mrf.mxu3 }
 0x4cc   :  { %v7470_v15 = vadd.f32 %v7469_v55, %v7457_v5 }
 0x4ce   :  { %7676 = vmatmul.bf16.vlgmr.msrb.gmra.mxu3 %v13755_v62  ;;  %v7682_v56 = vmax.f32 %v7470_v15, 0.0  ;;  %v12975_v62 = vld [vmem:[#allocation17 + $0xa8] sm:$0xff] }
 0x4cf   :  { %7977 = vmatpush.bf16.msra.mxu2 %v12975_v62  ;;  %7988 = vmatpush.bf16.msra.mxu3 %v12985_v36 }
 0x4d0   :  { %v7549_v34 = vpop.f32.mrf.mxu1  ;;  %v7686_v3 = vpack.c.bf16 %v7682_v56, %v7682_v56 }
 0x4d1   :  { %v7510_v39 = vpop.f32.mrf.mxu2  ;;  %v13006_v34 = vld [vmem:[#allocation19] ss:$0 sm:$0xff] }
 0x4d2   :  { %7970 = vmatmul.bf16.vlgmr.msra.gmra.mxu1 %v7686_v3 }
 0x4d3   :  { %v7471_v51 = vpop.f32.mrf.mxu3  ;;  %7978 = vmatpush.bf16.msra.mxu2 %v12974_v40  ;;  %7989 = vmatpush.bf16.msra.mxu3 %v12984_v38 }
 0x4d7   :  { %7979 = vmatpush.bf16.msra.mxu2 %v12973_v61  ;;  %7990 = vmatpush.bf16.msra.mxu3 %v12983_v50 }
 0x4db   :  { %7980 = vmatpush.bf16.msra.mxu2 %v12972_v24  ;;  %7991 = vmatpush.bf16.msra.mxu3 %v12982_v0 }
 0x4df   :  { %7981 = vmatpush.bf16.msra.mxu2 %v12971_v26  ;;  %7992 = vmatpush.bf16.msra.mxu3 %v12981_v46 }
 0x4e2   :  { %v7586_v58 = vpop.f32.mrf.mxu0 }
 0x4e3   :  { %v7587_v6 = vadd.f32 %v7586_v58, %v5980_v14  ;;  %7982 = vmatpush.bf16.msra.mxu2 %v12970_v32  ;;  %7993 = vmatpush.bf16.msra.mxu3 %v12980_v30 }
 0x4e7   :  { %7994 = vmatpush.bf16.msra.mxu3 %v12979_v43 }
 0x4e8   :  { %v7599_v7 = vpop.f32.mrf.mxu1 }
 0x4e9   :  { %v7600_v9 = vadd.f32 %v7599_v7, %v7587_v6 }
 0x4ea   :  { %v7588_v44 = vpop.f32.mrf.mxu0  ;;  %v7560_v29 = vpop.f32.mrf.mxu2 }
 0x4eb   :  { %7995 = vmatpush.bf16.msra.mxu3 %v12978_v17 }
 0x4f0   :  { %v7601_v42 = vpop.f32.mrf.mxu1 }
 0x4f1   :  { %v7521_v28 = vpop.f32.mrf.mxu3 }
 0x4f2   :  { %v7522_v10 = vadd.f32 %v7521_v28, %v7509_v8  ;;  %v7562_v41 = vpop.f32.mrf.mxu2 }
 0x4f4   :  { %v7535_v16 = vadd.f32 %v7534_v25, %v7522_v10 }
 0x4f6   :  { %v7548_v23 = vadd.f32 %v7547_v54, %v7535_v16 }
 0x4f8   :  { %v7561_v47 = vadd.f32 %v7560_v29, %v7548_v23 }
 0x4f9   :  { %v7523_v33 = vpop.f32.mrf.mxu3 }
 0x502   :  { %v7638_v21 = vpop.f32.mrf.mxu0 }
 0x508   :  { %v7651_v18 = vpop.f32.mrf.mxu1 }
 0x50a   :  { %v7640_v13 = vpop.f32.mrf.mxu0  ;;  %v7612_v27 = vpop.f32.mrf.mxu2 }
 0x50b   :  { %v7613_v25 = vadd.f32 %v7612_v27, %v7600_v9 }
 0x510   :  { %v7653_v45 = vpop.f32.mrf.mxu1 }
 0x511   :  { %v7573_v53 = vpop.f32.mrf.mxu3 }
 0x512   :  { %v7574_v35 = vadd.f32 %v7573_v53, %v7561_v47  ;;  %v7614_v19 = vpop.f32.mrf.mxu2 }
 0x514   :  { %v7683_v1 = vmax.f32 %v7574_v35, 0.0 }
 0x516   :  { %v7687_v57 = vpack.c.bf16 %v7683_v1, %v7683_v1 }
 0x518   :  { %7983 = vmatmul.bf16.vlgmr.msra.gmra.mxu2 %v7687_v57 }
 0x519   :  { %v7575_v2 = vpop.f32.mrf.mxu3 }
 0x52a   :  { %v7664_v48 = vpop.f32.mrf.mxu2 }
 0x52c   :  { %v7958_v4 = vpop.f32.mrf.mxu0 }
 0x52d   :  { %v7959_v31 = vadd.f32 %v13006_v34, %v7958_v4 }
 0x531   :  { %v7625_v52 = vpop.f32.mrf.mxu3 }
 0x532   :  { %v7626_v63 = vadd.f32 %v7625_v52, %v7613_v25  ;;  %v7666_v60 = vpop.f32.mrf.mxu2 }
 0x534   :  { %v7639_v11 = vadd.f32 %v7638_v21, %v7626_v63  ;;  %v7960_v22 = vpop.f32.mrf.mxu0 }
 0x536   :  { %v7652_v12 = vadd.f32 %v7651_v18, %v7639_v11 }
 0x538   :  { %v7665_v54 = vadd.f32 %v7664_v48, %v7652_v12 }
 0x539   :  { %v7627_v20 = vpop.f32.mrf.mxu3 }
 0x54f   :  { %v7971_v56 = vpop.f32.mrf.mxu1 }
 0x550   :  { %v7972_v3 = vadd.f32 %v7971_v56, %v7959_v31 }
 0x551   :  { %v7677_v59 = vpop.f32.mrf.mxu3 }
 0x552   :  { %v7678_v49 = vadd.f32 %v7677_v59, %v7665_v54 }
 0x554   :  { %v7684_v5 = vmax.f32 %v7678_v49, 0.0 }
 0x556   :  { %v7688_v55 = vpack.c.bf16 %v7684_v5, %v7684_v5 }
 0x557   :  { %v7973_v58 = vpop.f32.mrf.mxu1 }
 0x558   :  { %7996 = vmatmul.bf16.vlgmr.msra.gmra.mxu3 %v7688_v55 }
 0x559   :  { %v7679_v15 = vpop.f32.mrf.mxu3 }
 0x59b   :  { %v7984_v37 = vpop.f32.mrf.mxu2 }
 0x59c   :  { %v7985_v51 = vadd.f32 %v7984_v37, %v7972_v3 }
 0x5a3   :  { %v7986_v39 = vpop.f32.mrf.mxu2 }
 0x5db   :  { %v7997_v62 = vpop.f32.mrf.mxu3 }
 0x5dc   :  { %v7998_v40 = vadd.f32 %v7997_v62, %v7985_v51 }
 0x5de   :  { %v8001_v44 = vmax.f32 %v7998_v40, 0.0 }
 0x5e0   :  { %v8002_v61 = vpack.c.bf16 %v8001_v44, %v8001_v44 }
 0x5e2   :  { %8003 = vst [vmem:[#allocation20] sm:$0x1] %v8002_v61 }
 0x5e3   :  { %v7999_v14 = vpop.f32.mrf.mxu3  ;;  %8014 = dma.vmem_to_hbm [thread:$0]  %s8010_s10, 16, %s8012_s13, [#allocation4]  }
 0x5e4   :  { %13310 = dma.done.wait [#allocation4], 16  }
 0x5e5   :  { %13311 = vsyncadd [#allocation4], 4294967280 }
 0x5e6   :  { %8019 = vsyncpa [#allocation3], 1 }
 0x5e7   :  { %8020 = vsyncpa [#allocation6], 1 }
 0x5e8   :  { %8021 = vsyncpa [#allocation9], 1 }
 0x5e9   :  { %8022 = vsyncpa [#allocation12], 1 }
 0x5ea   :  { %8023 = vsyncpa [#allocation15], 1 }
 0x5eb   :  { %8024 = vsyncpa [#allocation18], 1 }
 0x5ec   :  { %8025 = vsyncpa [#allocation4], 1 }

</bundles_post_ra>
